<compile_context>
chip_gen: v7x
topology: tpu7x:2x2x1
jax: 0.10.0
libtpu: 0.0.40
codegen_flags: <defaults>
</compile_context>

<pallas_src>
import functools

import jax
import jax.numpy as jnp
from jax.experimental import pallas as pl
from jax.experimental.pallas import tpu as pltpu


# ----------------------------------------------------------------------------
# Kernel
# ----------------------------------------------------------------------------
def _updating_q_kernel(ni_ref, w_ref, b_ref, r_ref, g_ref, u_ref,
                       q_ref, a_ref, *, mxu_dtype):
    """Grid = (M tiles, N tiles).

    NOTE: N must remain the innermost, "arbitrary", non-megacore grid axis —
    the A output block (mi, 0) is written at nj == 0 and re-read as the matmul
    LHS for every later nj of the same M tile.
    """
    nj = pl.program_id(1)

    # A = W * R + B, computed once per M tile, reused across the inner N loop.
    @pl.when(nj == 0)
    def _():
        a_ref[...] = (w_ref[...] * r_ref[...] + b_ref[...]).astype(a_ref.dtype)

    # Bmat = ni[i] * G + U   (scalar from SMEM, broadcast on the VPU).
    bmat = ni_ref[0] * g_ref[...] + u_ref[...]

    lhs = a_ref[...]
    if mxu_dtype is not None:            # optional bf16 MXU path (f32 accum)
        lhs = lhs.astype(mxu_dtype)
        bmat = bmat.astype(mxu_dtype)

    q_ref[...] = jnp.dot(
        lhs, bmat, preferred_element_type=jnp.float32
    ).astype(q_ref.dtype)


# ----------------------------------------------------------------------------
# Tiling policy
# ----------------------------------------------------------------------------
def _round_up(x, a):
    return ((x + a - 1) // a) * a


def _round_down(x, a):
    return max(a, (x // a) * a)


def _tpu_memory_params():
    """(block_budget_bytes, vmem_limit_bytes, n_tensorcores) for this chip."""
    vmem_bytes = 64 * 1024 * 1024          # conservative default (v7x per-TC)
    n_cores = 1
    try:
        vmem_bytes = int(pltpu.get_tpu_info().vmem_capacity_bytes)
    except Exception:
        pass
    try:
        kind = jax.devices()[0].device_kind.lower()
        # Chips where one Pallas grid is sharded over 2 TensorCores.
        if ("v4" in kind) or ("v7" in kind) or ("7x" in kind):
            n_cores = 2
    except Exception:
        pass
    block_budget = int(vmem_bytes * 0.65)   # pipelined block footprint budget
    vmem_limit = int(vmem_bytes * 0.85)     # scoped-VMEM limit (headroom left)
    return block_budget, vmem_limit, n_cores


def _pick_tiles(M, K, N, itemsize, budget_bytes, n_cores, single_buffer_resident):
    """Largest (tm, tn) whose pipelined block footprint fits the VMEM budget.

    tm grows first (each extra M tile re-streams G and U from HBM) but is
    split across TensorCores so none sit idle; tn stays lane-dense (multiple
    of 128, or the full N).
    """
    MIN_TM = 8
    MXU_TM = 256                           # don't starve the MXU when shrinking
    rb = 1 if single_buffer_resident else 2   # W/B/R buffering factor

    def footprint(tm, tn):
        # W,B,R: rb buffers each; A out: 2; G,U in: 2 each; Q out: 2.
        return itemsize * (3 * rb * tm * K + 2 * tm * K
                           + 4 * K * tn + 2 * tm * tn)

    # -- tm: one TensorCore's share of M (maximal => minimal G/U re-reads). --
    if n_cores > 1 and M > MIN_TM:
        tm = min(M, _round_up(-(-M // n_cores), MIN_TM))
    else:
        tm = M

    # -- tn: full N when it fits, else the largest lane-dense 128 multiple. --
    tn = N
    if footprint(tm, tn) > budget_bytes and N > 128:
        tn = _round_down(N, 128)
        while tn > 128 and footprint(tm, tn) > budget_bytes:
            tn = _round_down(tn - 128, 128)

    # -- still over budget: shrink tm, keeping it MXU-friendly while we can. --
    floor_tm = min(M, MXU_TM)
    while footprint(tm, tn) > budget_bytes and tm > floor_tm:
        tm = _round_down(max(floor_tm, tm // 2), MIN_TM)
    while footprint(tm, tn) > budget_bytes and tm > MIN_TM:
        # TODO(synk): for huge K, add a K grid axis with an f32 VMEM accumulator
        # (pl.when init/finalize) instead of starving the MXU with tiny tm.
        tm = _round_down(tm // 2, MIN_TM)
    return tm, tn


# ----------------------------------------------------------------------------
# Wrapper
# ----------------------------------------------------------------------------
def updating_q_layer_0(W, B, ni, G_m_i, U_m_i, R_m_i, i, *,
                       use_bf16_matmul=False,
                       single_buffer_resident=True,
                       tile_override=None):
    """Pallas equivalent of Updating_Q_Layer_0.forward.

    W, B, R_m_i : (M, K);  G_m_i, U_m_i : (K, N);  ni : (L,);  i : int index.
    Returns (Q_m_i (M, N), new R_m_i == A (M, K)).
    """
    M, K = W.shape
    K2, N = G_m_i.shape
    assert K == K2, (K, K2)

    a_dtype = jnp.result_type(W.dtype, R_m_i.dtype, B.dtype)
    bmat_dtype = jnp.result_type(jnp.asarray(ni).dtype, G_m_i.dtype, U_m_i.dtype)
    q_dtype = jnp.result_type(a_dtype, bmat_dtype)
    itemsize = max(jnp.dtype(a_dtype).itemsize, jnp.dtype(q_dtype).itemsize)

    block_budget, vmem_limit, n_cores = _tpu_memory_params()
    if tile_override is not None:
        tm, tn = tile_override
    else:
        tm, tn = _pick_tiles(M, K, N, itemsize, block_budget, n_cores,
                             single_buffer_resident)
    grid_m, grid_n = pl.cdiv(M, tm), pl.cdiv(N, tn)

    # ni[i] gathered once here: ship a single (1,) scalar into SMEM instead of
    # the whole ni vector + a per-step dynamic SMEM index inside the kernel.
    ni_i = (jnp.asarray(ni)[jnp.asarray(i, jnp.int32)]
            .astype(bmat_dtype).reshape((1,)))

    # W/B/R block index only changes once per M tile: single-buffer them.
    resident_kwargs = (
        dict(pipeline_mode=pl.Buffered(1)) if single_buffer_resident else {})

    def m_resident_spec():
        return pl.BlockSpec((tm, K), lambda mi, nj: (mi, 0), **resident_kwargs)

    smem_spec = pl.BlockSpec(memory_space=pltpu.MemorySpace.SMEM)

    cost = pl.CostEstimate(
        flops=2 * M * N * K + 2 * M * K + 2 * K * N * grid_m,
        transcendentals=0,
        bytes_accessed=itemsize * (4 * M * K + 2 * K * N * grid_m + M * N),
    )

    # A is the new R: alias R_m_i (input 3) with the A output (output 1).
    # Safe: each R block is fully resident in VMEM before its A block is
    # written back, and megacore-sharded mi blocks touch disjoint HBM regions.
    io_aliases = {3: 1} if R_m_i.dtype == a_dtype else {}

    kernel = functools.partial(
        _updating_q_kernel,
        mxu_dtype=jnp.bfloat16 if use_bf16_matmul else None)

    q, a = pl.pallas_call(
        kernel,
        out_shape=(
            jax.ShapeDtypeStruct((M, N), q_dtype),
            jax.ShapeDtypeStruct((M, K), a_dtype),
        ),
        grid=(grid_m, grid_n),
        in_specs=[
            smem_spec,                                      # ni[i]  (1,) SMEM
            m_resident_spec(),                              # W
            m_resident_spec(),                              # B
            m_resident_spec(),                              # R_m_i
            pl.BlockSpec((K, tn), lambda mi, nj: (0, nj)),  # G_m_i
            pl.BlockSpec((K, tn), lambda mi, nj: (0, nj)),  # U_m_i
        ],
        out_specs=(
            pl.BlockSpec((tm, tn), lambda mi, nj: (mi, nj)),  # Q_m_i
            pl.BlockSpec((tm, K), lambda mi, nj: (mi, 0)),    # A (new R_m_i)
        ),
        input_output_aliases=io_aliases,
        cost_estimate=cost,
        compiler_params=pltpu.CompilerParams(
            # M tiles are independent -> megacore-shardable; the N axis
            # revisits the A output block, so it MUST stay innermost and
            # "arbitrary" (see kernel docstring).
            dimension_semantics=("parallel", "arbitrary"),
            vmem_limit_bytes=vmem_limit,
        ),
    )(ni_i, W, B, R_m_i, G_m_i, U_m_i)
    return q, a


# ----------------------------------------------------------------------------
# Reference + self-test
# ----------------------------------------------------------------------------
def _reference(W, B, ni, G_m_i, U_m_i, R_m_i, i):
    A = W * R_m_i + B
    Bmat = ni[i] * G_m_i + U_m_i
    Q = jnp.dot(A, Bmat, precision=jax.lax.Precision.HIGHEST)
    return Q, A


if __name__ == "__main__":
    key = jax.random.PRNGKey(0)
    # (8,128)-friendly shapes, big enough to exercise tiling / the MXU.
    M, K, N, L = 512, 256, 512, 8
    k1, k2, k3, k4, k5, k6 = jax.random.split(key, 6)

    # "Parameters" from __init__ (W, B, ni) — synthetic deterministic init.
    W = jax.random.normal(k1, (M, K), dtype=jnp.float32)
    Bp = jax.random.normal(k2, (M, K), dtype=jnp.float32)
    ni = jax.random.uniform(k3, (L,), dtype=jnp.float32)

    # Forward inputs.
    G_m_i = jax.random.normal(k4, (K, N), dtype=jnp.float32)
    U_m_i = jax.random.normal(k5, (K, N), dtype=jnp.float32)
    R_m_i = jax.random.normal(k6, (M, K), dtype=jnp.float32)
    i = 3

    Q_ref, R_ref = _reference(W, Bp, ni, G_m_i, U_m_i, R_m_i, i)

    def run(**kw):
        fn = jax.jit(functools.partial(updating_q_layer_0, **kw))
        out = fn(W, Bp, ni, G_m_i, U_m_i, R_m_i, i)
        jax.block_until_ready(out)
        return out

    # f32 path with auto-picked tiles; fall back to default double-buffering
    # if this JAX build rejects pl.Buffered(1) on the resident operands.
    single_buffer = True
    try:
        Q, R_new = run(single_buffer_resident=True)
    except Exception:
        single_buffer = False
        Q, R_new = run(single_buffer_resident=False)

    assert Q.shape == (M, N) and R_new.shape == (M, K)
    assert jnp.allclose(R_new, R_ref, atol=1e-5, rtol=1e-5), "A / new R mismatch"
    assert jnp.allclose(Q, Q_ref, atol=1e-2, rtol=5e-3), "Q mismatch"

    # Forced multi-tile grid: exercises A reuse across nj (grid_n > 1),
    # grid_m > 1, and the R<->A alias with partial residency.
    Q2, R2 = run(single_buffer_resident=single_buffer, tile_override=(128, 128))
    assert jnp.allclose(R2, R_ref, atol=1e-5, rtol=1e-5), "tiled A mismatch"
    assert jnp.allclose(Q2, Q_ref, atol=1e-2, rtol=5e-3), "tiled Q mismatch"

    # Optional bf16 MXU path (f32 accumulation): looser tolerance by design.
    Q3, R3 = run(single_buffer_resident=single_buffer, use_bf16_matmul=True)
    assert jnp.allclose(R3, R_ref, atol=1e-5, rtol=1e-5), "bf16-path A mismatch"
    assert jnp.allclose(Q3, Q_ref, atol=1.0, rtol=1e-1), "bf16-path Q mismatch"

    # TODO(synk): if the layer is applied over all L indices as a recurrence
    # (R <- A each step), fuse the L steps into one grid axis with R carried
    # in VMEM scratch to amortize launch overhead.
    print("KERNEL_OK")
</pallas_src>

<mosaic_0001>
module attributes {stable_mosaic.version = 11 : i64} {
  func.func @_updating_q_kernel(%arg0: i32, %arg1: i32, %arg2: memref<1xf32, #tpu.memory_space<smem>>, %arg3: memref<512x256xf32, #tpu.memory_space<vmem>>, %arg4: memref<512x256xf32, #tpu.memory_space<vmem>>, %arg5: memref<512x256xf32, #tpu.memory_space<vmem>>, %arg6: memref<256x512xf32, #tpu.memory_space<vmem>>, %arg7: memref<256x512xf32, #tpu.memory_space<vmem>>, %arg8: memref<512x512xf32, #tpu.memory_space<vmem>>, %arg9: memref<512x256xf32, #tpu.memory_space<vmem>>) attributes {dimension_semantics = [#tpu.dimension_semantics<parallel>, #tpu.dimension_semantics<arbitrary>], iteration_bounds = array<i64: 1, 1>, scalar_prefetch = 0 : i64, scratch_operands = 0 : i64, tpu.core_type = #tpu.core_type<tc>, window_params = [{transform_indices = @transform_0, window_bounds = array<i64: 1>}, {pipeline_mode = #tpu.pipeline_mode<synchronous>, transform_indices = @transform_1, window_bounds = array<i64: 512, 256>}, {pipeline_mode = #tpu.pipeline_mode<synchronous>, transform_indices = @transform_2, window_bounds = array<i64: 512, 256>}, {pipeline_mode = #tpu.pipeline_mode<synchronous>, transform_indices = @transform_3, window_bounds = array<i64: 512, 256>}, {transform_indices = @transform_4, window_bounds = array<i64: 256, 512>}, {transform_indices = @transform_5, window_bounds = array<i64: 256, 512>}, {transform_indices = @transform_6, window_bounds = array<i64: 512, 512>}, {transform_indices = @transform_7, window_bounds = array<i64: 512, 256>}]} {
    %c0_i32 = arith.constant 0 : i32
    %0 = arith.cmpi eq, %arg1, %c0_i32 : i32
    %1 = arith.extui %0 : i1 to i32
    %c0_i32_0 = arith.constant 0 : i32
    %2 = arith.cmpi ne, %1, %c0_i32_0 : i32
    scf.if %2 {
      %c0_9 = arith.constant 0 : index
      %c0_10 = arith.constant 0 : index
      %12 = vector.load %arg3[%c0_9, %c0_10] : memref<512x256xf32, #tpu.memory_space<vmem>>, vector<512x256xf32>
      %c0_11 = arith.constant 0 : index
      %c0_12 = arith.constant 0 : index
      %13 = vector.load %arg5[%c0_11, %c0_12] : memref<512x256xf32, #tpu.memory_space<vmem>>, vector<512x256xf32>
      %14 = arith.mulf %12, %13 : vector<512x256xf32>
      %c0_13 = arith.constant 0 : index
      %c0_14 = arith.constant 0 : index
      %15 = vector.load %arg4[%c0_13, %c0_14] : memref<512x256xf32, #tpu.memory_space<vmem>>, vector<512x256xf32>
      %16 = arith.addf %14, %15 : vector<512x256xf32>
      %c0_15 = arith.constant 0 : index
      %c0_16 = arith.constant 0 : index
      %17 = vector.load %arg9[%c0_15, %c0_16] : memref<512x256xf32, #tpu.memory_space<vmem>>, vector<512x256xf32>
      tpu.vector_store %arg9[%c0_15, %c0_16], %16 {strides = array<i32>} : memref<512x256xf32, #tpu.memory_space<vmem>>, vector<512x256xf32>,
    } else {
    }
    %c0 = arith.constant 0 : index
    %3 = memref.load %arg2[%c0] : memref<1xf32, #tpu.memory_space<smem>>
    %c0_1 = arith.constant 0 : index
    %c0_2 = arith.constant 0 : index
    %4 = vector.load %arg6[%c0_1, %c0_2] : memref<256x512xf32, #tpu.memory_space<vmem>>, vector<256x512xf32>
    %5 = vector.broadcast %3 : f32 to vector<256x512xf32>
    %6 = arith.mulf %5, %4 : vector<256x512xf32>
    %c0_3 = arith.constant 0 : index
    %c0_4 = arith.constant 0 : index
    %7 = vector.load %arg7[%c0_3, %c0_4] : memref<256x512xf32, #tpu.memory_space<vmem>>, vector<256x512xf32>
    %8 = arith.addf %6, %7 : vector<256x512xf32>
    %c0_5 = arith.constant 0 : index
    %c0_6 = arith.constant 0 : index
    %9 = vector.load %arg9[%c0_5, %c0_6] : memref<512x256xf32, #tpu.memory_space<vmem>>, vector<512x256xf32>
    %cst = arith.constant dense<0.000000e+00> : vector<512x512xf32>
    %10 = tpu.matmul %9, %8, %cst {dimension_numbers = #tpu.dot_dimension_numbers<[1], [0], [0], [1], [0, 0, 1, 1], [], []>} : vector<512x256xf32>, vector<256x512xf32>, vector<512x512xf32> -> vector<512x512xf32>
    %c0_7 = arith.constant 0 : index
    %c0_8 = arith.constant 0 : index
    %11 = vector.load %arg8[%c0_7, %c0_8] : memref<512x512xf32, #tpu.memory_space<vmem>>, vector<512x512xf32>
    tpu.vector_store %arg8[%c0_7, %c0_8], %10 {strides = array<i32>} : memref<512x512xf32, #tpu.memory_space<vmem>>, vector<512x512xf32>,
    return
  }
  func.func @transform_0(%arg0: i32, %arg1: i32) -> i32 {
    %c0_i32 = arith.constant 0 : i32
    %c0_i32_0 = arith.constant 0 : i32
    return %c0_i32 : i32
  }
  func.func @transform_1(%arg0: i32, %arg1: i32) -> (i32, i32) {
    %c0_i32 = arith.constant 0 : i32
    %c0_i32_0 = arith.constant 0 : i32
    return %arg0, %c0_i32 : i32, i32
  }
  func.func @transform_2(%arg0: i32, %arg1: i32) -> (i32, i32) {
    %c0_i32 = arith.constant 0 : i32
    %c0_i32_0 = arith.constant 0 : i32
    return %arg0, %c0_i32 : i32, i32
  }
  func.func @transform_3(%arg0: i32, %arg1: i32) -> (i32, i32) {
    %c0_i32 = arith.constant 0 : i32
    %c0_i32_0 = arith.constant 0 : i32
    return %arg0, %c0_i32 : i32, i32
  }
  func.func @transform_4(%arg0: i32, %arg1: i32) -> (i32, i32) {
    %c0_i32 = arith.constant 0 : i32
    %c0_i32_0 = arith.constant 0 : i32
    return %c0_i32, %arg1 : i32, i32
  }
  func.func @transform_5(%arg0: i32, %arg1: i32) -> (i32, i32) {
    %c0_i32 = arith.constant 0 : i32
    %c0_i32_0 = arith.constant 0 : i32
    return %c0_i32, %arg1 : i32, i32
  }
  func.func @transform_6(%arg0: i32, %arg1: i32) -> (i32, i32) {
    %c0_i32 = arith.constant 0 : i32
    return %arg0, %arg1 : i32, i32
  }
  func.func @transform_7(%arg0: i32, %arg1: i32) -> (i32, i32) {
    %c0_i32 = arith.constant 0 : i32
    %c0_i32_0 = arith.constant 0 : i32
    return %arg0, %c0_i32 : i32, i32
  }
}

module attributes {stable_mosaic.version = 11 : i64} {
  func.func @_updating_q_kernel(%arg0: i32, %arg1: i32, %arg2: memref<1xf32, #tpu.memory_space<smem>>, %arg3: memref<512x256xf32, #tpu.memory_space<vmem>>, %arg4: memref<512x256xf32, #tpu.memory_space<vmem>>, %arg5: memref<512x256xf32, #tpu.memory_space<vmem>>, %arg6: memref<256x512xf32, #tpu.memory_space<vmem>>, %arg7: memref<256x512xf32, #tpu.memory_space<vmem>>, %arg8: memref<512x512xf32, #tpu.memory_space<vmem>>, %arg9: memref<512x256xf32, #tpu.memory_space<vmem>>) attributes {dimension_semantics = [#tpu.dimension_semantics<parallel>, #tpu.dimension_semantics<arbitrary>], iteration_bounds = array<i64: 1, 1>, scalar_prefetch = 0 : i64, scratch_operands = 0 : i64, tpu.core_type = #tpu.core_type<tc>, window_params = [{transform_indices = @transform_0, window_bounds = array<i64: 1>}, {transform_indices = @transform_1, window_bounds = array<i64: 512, 256>}, {transform_indices = @transform_2, window_bounds = array<i64: 512, 256>}, {transform_indices = @transform_3, window_bounds = array<i64: 512, 256>}, {transform_indices = @transform_4, window_bounds = array<i64: 256, 512>}, {transform_indices = @transform_5, window_bounds = array<i64: 256, 512>}, {transform_indices = @transform_6, window_bounds = array<i64: 512, 512>}, {transform_indices = @transform_7, window_bounds = array<i64: 512, 256>}]} {
    %c0_i32 = arith.constant 0 : i32
    %0 = arith.cmpi eq, %arg1, %c0_i32 : i32
    %1 = arith.extui %0 : i1 to i32
    %c0_i32_0 = arith.constant 0 : i32
    %2 = arith.cmpi ne, %1, %c0_i32_0 : i32
    scf.if %2 {
      %c0_9 = arith.constant 0 : index
      %c0_10 = arith.constant 0 : index
      %12 = vector.load %arg3[%c0_9, %c0_10] : memref<512x256xf32, #tpu.memory_space<vmem>>, vector<512x256xf32>
      %c0_11 = arith.constant 0 : index
      %c0_12 = arith.constant 0 : index
      %13 = vector.load %arg5[%c0_11, %c0_12] : memref<512x256xf32, #tpu.memory_space<vmem>>, vector<512x256xf32>
      %14 = arith.mulf %12, %13 : vector<512x256xf32>
      %c0_13 = arith.constant 0 : index
      %c0_14 = arith.constant 0 : index
      %15 = vector.load %arg4[%c0_13, %c0_14] : memref<512x256xf32, #tpu.memory_space<vmem>>, vector<512x256xf32>
      %16 = arith.addf %14, %15 : vector<512x256xf32>
      %c0_15 = arith.constant 0 : index
      %c0_16 = arith.constant 0 : index
      %17 = vector.load %arg9[%c0_15, %c0_16] : memref<512x256xf32, #tpu.memory_space<vmem>>, vector<512x256xf32>
      tpu.vector_store %arg9[%c0_15, %c0_16], %16 {strides = array<i32>} : memref<512x256xf32, #tpu.memory_space<vmem>>, vector<512x256xf32>,
    } else {
    }
    %c0 = arith.constant 0 : index
    %3 = memref.load %arg2[%c0] : memref<1xf32, #tpu.memory_space<smem>>
    %c0_1 = arith.constant 0 : index
    %c0_2 = arith.constant 0 : index
    %4 = vector.load %arg6[%c0_1, %c0_2] : memref<256x512xf32, #tpu.memory_space<vmem>>, vector<256x512xf32>
    %5 = vector.broadcast %3 : f32 to vector<256x512xf32>
    %6 = arith.mulf %5, %4 : vector<256x512xf32>
    %c0_3 = arith.constant 0 : index
    %c0_4 = arith.constant 0 : index
    %7 = vector.load %arg7[%c0_3, %c0_4] : memref<256x512xf32, #tpu.memory_space<vmem>>, vector<256x512xf32>
    %8 = arith.addf %6, %7 : vector<256x512xf32>
    %c0_5 = arith.constant 0 : index
    %c0_6 = arith.constant 0 : index
    %9 = vector.load %arg9[%c0_5, %c0_6] : memref<512x256xf32, #tpu.memory_space<vmem>>, vector<512x256xf32>
    %cst = arith.constant dense<0.000000e+00> : vector<512x512xf32>
    %10 = tpu.matmul %9, %8, %cst {dimension_numbers = #tpu.dot_dimension_numbers<[1], [0], [0], [1], [0, 0, 1, 1], [], []>} : vector<512x256xf32>, vector<256x512xf32>, vector<512x512xf32> -> vector<512x512xf32>
    %c0_7 = arith.constant 0 : index
    %c0_8 = arith.constant 0 : index
    %11 = vector.load %arg8[%c0_7, %c0_8] : memref<512x512xf32, #tpu.memory_space<vmem>>, vector<512x512xf32>
    tpu.vector_store %arg8[%c0_7, %c0_8], %10 {strides = array<i32>} : memref<512x512xf32, #tpu.memory_space<vmem>>, vector<512x512xf32>,
    return
  }
  func.func @transform_0(%arg0: i32, %arg1: i32) -> i32 {
    %c0_i32 = arith.constant 0 : i32
    %c0_i32_0 = arith.constant 0 : i32
    return %c0_i32 : i32
  }
  func.func @transform_1(%arg0: i32, %arg1: i32) -> (i32, i32) {
    %c0_i32 = arith.constant 0 : i32
    %c0_i32_0 = arith.constant 0 : i32
    return %arg0, %c0_i32 : i32, i32
  }
  func.func @transform_2(%arg0: i32, %arg1: i32) -> (i32, i32) {
    %c0_i32 = arith.constant 0 : i32
    %c0_i32_0 = arith.constant 0 : i32
    return %arg0, %c0_i32 : i32, i32
  }
  func.func @transform_3(%arg0: i32, %arg1: i32) -> (i32, i32) {
    %c0_i32 = arith.constant 0 : i32
    %c0_i32_0 = arith.constant 0 : i32
    return %arg0, %c0_i32 : i32, i32
  }
  func.func @transform_4(%arg0: i32, %arg1: i32) -> (i32, i32) {
    %c0_i32 = arith.constant 0 : i32
    %c0_i32_0 = arith.constant 0 : i32
    return %c0_i32, %arg1 : i32, i32
  }
  func.func @transform_5(%arg0: i32, %arg1: i32) -> (i32, i32) {
    %c0_i32 = arith.constant 0 : i32
    %c0_i32_0 = arith.constant 0 : i32
    return %c0_i32, %arg1 : i32, i32
  }
  func.func @transform_6(%arg0: i32, %arg1: i32) -> (i32, i32) {
    %c0_i32 = arith.constant 0 : i32
    return %arg0, %arg1 : i32, i32
  }
  func.func @transform_7(%arg0: i32, %arg1: i32) -> (i32, i32) {
    %c0_i32 = arith.constant 0 : i32
    %c0_i32_0 = arith.constant 0 : i32
    return %arg0, %c0_i32 : i32, i32
  }
}

</mosaic_0001>

<bundles_post_ra>
// kernel: updating_q_layer_0.1
= control target key start
LH: loop header
LB: loop body
LE: loop exit
PB: predicated region body
PF: predicated region fallthrough
CT: control target
= control target key end

     0   :  { %14 = vsyncpa [#allocation4], 0  ;;  %s4556_s0 = inlined_call_operand.<no memory space> [shape: f32[1], index: 0, kind: input, shape index: {}]   ;;  %s4557_s1 = inlined_call_operand.vmem [shape: f32[512,256], index: 1, kind: input, shape index: {}]   ;;  %s4558_s2 = inlined_call_operand.vmem [shape: f32[512,256], index: 2, kind: input, shape index: {}]   ;;  %s4559_s3 = inlined_call_operand.hbm [shape: f32[512,256], index: 3, kind: input, shape index: {}, may-alias: {3,7}]   ;;  %s4560_s4 = inlined_call_operand.hbm [shape: f32[256,512], index: 4, kind: input, shape index: {}]   ;;  %s4561_s5 = inlined_call_operand.hbm [shape: f32[256,512], index: 5, kind: input, shape index: {}]   ;;  %s4562_s6 = inlined_call_operand.hbm [shape: f32[512,512], index: 6, kind: output, shape index: {0}]   ;;  %s4563_s7 = inlined_call_operand.hbm [shape: f32[512,256], index: 7, kind: output, shape index: {1}, may-alias: {3,7}]  }
   0x1   :  { %15 = vsyncpa [#allocation7], 0 }
   0x2   :  { %16 = vsyncpa [#allocation5], 0 }
   0x3   :  { %17 = vsyncpa [#allocation11], 0  ;;  %s2926_s24 = smov [#allocation6]   ;;  %s2808_s28 = scalar_lea.hbm %s4560_s4, 16384 }
   0x4   :  { %s41_s25 = sshll.u32 %s2926_s24, 4  ;;  %p2809_p0 = scmp.ne.s32.totalorder %s4560_s4, %s2808_s28  ;;  %s42_s25 = int_to_ptr.vmem [resolvable:$true] %s41_s25 }
   0x5   :  { %p2812_p1 = scmp.lt.u32.totalorder %s2808_s28, %s4560_s4 }
   0x7   :  { %p2814_p2 = pnand %p2812_p1, %p2809_p0 }
   0x9   :  { %2817 = shalt.err (!%p2814_p2)
}
   0xa   :  { %s2818_s10 = scalar_lea.vmem %s42_s25, 16384  ;;  %p2823_p4 = scmp.lt.s32.totalorder %s42_s25, %s42_s25 }
   0xb   :  { %p2819_p3 = scmp.ne.s32.totalorder %s42_s25, %s2818_s10  ;;  %p2824_p5 = scmp.lt.s32.totalorder %s2818_s10, %s2818_s10 }
   0xd   :  { %p2825_p6 = por %p2824_p5, %p2823_p4 }
   0xf   :  { %p2826_p7 = pnand %p2825_p6, %p2819_p3 }
  0x11   :  { %2829 = shalt.err (!%p2826_p7)
}
  0x12   :  { %s2927_s11 = smov 512   ;;  %s2928_s12 = smov 32  }
  0x13   :  { %47 = dma.hbm_to_vmem [thread:$0]  %s4560_s4, 16384, %s42_s25, [#allocation7], %s2927_s11, %s2927_s11, %s2928_s12  }
  0x14   :  { %s2929_s15 = smov [#allocation3]   ;;  %s2830_s19 = scalar_lea.hbm %s4559_s3, 16384 }
  0x15   :  { %s29_s16 = sshll.u32 %s2929_s15, 4  ;;  %p2831_p8 = scmp.ne.s32.totalorder %s4559_s3, %s2830_s19  ;;  %s30_s16 = int_to_ptr.vmem [resolvable:$true] %s29_s16 }
  0x16   :  { %p2834_p9 = scmp.lt.u32.totalorder %s2830_s19, %s4559_s3 }
  0x18   :  { %p2836_p10 = pnand %p2834_p9, %p2831_p8 }
  0x1a   :  { %2839 = shalt.err (!%p2836_p10)
}
  0x1b   :  { %s2840_s24 = scalar_lea.vmem %s30_s16, 16384  ;;  %p2845_p12 = scmp.lt.s32.totalorder %s30_s16, %s30_s16 }
  0x1c   :  { %p2841_p11 = scmp.ne.s32.totalorder %s30_s16, %s2840_s24  ;;  %p2846_p13 = scmp.lt.s32.totalorder %s2840_s24, %s2840_s24 }
  0x1e   :  { %p2847_p0 = por %p2846_p13, %p2845_p12 }
  0x20   :  { %p2848_p1 = pnand %p2847_p0, %p2841_p11 }
  0x22   :  { %2851 = shalt.err (!%p2848_p1)
}
  0x23   :  { %s2930_s4 = smov 256   ;;  %s2931_s25 = smov 16  }
  0x24   :  { %35 = dma.hbm_to_vmem [thread:$0]  %s4559_s3, 16384, %s30_s16, [#allocation4], %s2930_s4, %s2930_s4, %s2931_s25  }
  0x25   :  { %s2932_s28 = smov [#allocation8]   ;;  %s2852_s9 = scalar_lea.hbm %s4561_s5, 16384 }
  0x26   :  { %s53_s29 = sshll.u32 %s2932_s28, 4  ;;  %p2853_p2 = scmp.ne.s32.totalorder %s4561_s5, %s2852_s9  ;;  %s54_s29 = int_to_ptr.vmem [resolvable:$true] %s53_s29 }
  0x27   :  { %p2856_p3 = scmp.lt.u32.totalorder %s2852_s9, %s4561_s5 }
  0x29   :  { %p2858_p4 = pnand %p2856_p3, %p2853_p2 }
  0x2b   :  { %2861 = shalt.err (!%p2858_p4)
}
  0x2c   :  { %s2862_s17 = scalar_lea.vmem %s54_s29, 16384  ;;  %p2867_p6 = scmp.lt.s32.totalorder %s54_s29, %s54_s29 }
  0x2d   :  { %p2863_p5 = scmp.ne.s32.totalorder %s54_s29, %s2862_s17  ;;  %p2868_p7 = scmp.lt.s32.totalorder %s2862_s17, %s2862_s17 }
  0x2f   :  { %p2869_p8 = por %p2868_p7, %p2867_p6 }
  0x31   :  { %p2870_p9 = pnand %p2869_p8, %p2863_p5 }
  0x33   :  { %2873 = shalt.err (!%p2870_p9)
}
  0x34   :  { %59 = dma.hbm_to_vmem [thread:$0]  %s4561_s5, 16384, %s54_s29, [#allocation7], %s2927_s11, %s2927_s11, %s2928_s12  }
  0x35   :  { %2918 = dma.done.wait [#allocation4], 16384  }
  0x36   :  { %2919 = vsyncadd [#allocation4], 4294950912 }
  0x37   :  { %2920 = dma.done.wait [#allocation7], 32768  }
  0x38   :  { %2921 = vsyncadd [#allocation7], 4294934528  ;;  %v3023_v0 = vstv %s4556_s0  ;;  %v843_v1 = vld [vmem:[#allocation6 + $0x8] sm:$0xff]  ;;  %v845_v7 = vld [vmem:[#allocation6 + $0x18] sm:$0xff] }
  0x39   :  { %v847_v2 = vld [vmem:[#allocation6 + $0x28] sm:$0xff]  ;;  %v972_v4 = vmul.f32 %v3023_v0, %v843_v1  ;;  %v849_v8 = vld [vmem:[#allocation6 + $0x38] sm:$0xff]  ;;  %v974_v9 = vmul.f32 %v3023_v0, %v845_v7  ;;  %v842_v13 = vld [vmem:[#allocation6] sm:$0xff] }
  0x3a   :  { %v1100_v3 = vld [vmem:[#allocation8 + $0x8] sm:$0xff]  ;;  %v976_v5 = vmul.f32 %v3023_v0, %v847_v2  ;;  %v978_v10 = vmul.f32 %v3023_v0, %v849_v8  ;;  %v1102_v11 = vld [vmem:[#allocation8 + $0x18] sm:$0xff]  ;;  %v846_v16 = vld [vmem:[#allocation6 + $0x20] sm:$0xff]  ;;  %v971_v17 = vmul.f32 %v3023_v0, %v842_v13 }
  0x3b   :  { %v1104_v6 = vld [vmem:[#allocation8 + $0x28] sm:$0xff]  ;;  %v1106_v12 = vld [vmem:[#allocation8 + $0x38] sm:$0xff]  ;;  %v1228_v14 = vadd.f32 %v1100_v3, %v972_v4  ;;  %v1099_v18 = vld [vmem:[#allocation8] sm:$0xff]  ;;  %v1230_v20 = vadd.f32 %v1102_v11, %v974_v9  ;;  %v975_v22 = vmul.f32 %v3023_v0, %v846_v16 }
  0x3c   :  { %v1232_v15 = vadd.f32 %v1104_v6, %v976_v5  ;;  %v1103_v19 = vld [vmem:[#allocation8 + $0x20] sm:$0xff]  ;;  %v1234_v21 = vadd.f32 %v1106_v12, %v978_v10  ;;  %v844_v23 = vld [vmem:[#allocation6 + $0x10] sm:$0xff]  ;;  %v1227_v27 = vadd.f32 %v1099_v18, %v971_v17  ;;  %v851_v31 = vld [vmem:[#allocation6 + $0x48] sm:$0xff] }
  0x3d   :  { %v848_v24 = vld [vmem:[#allocation6 + $0x30] sm:$0xff]  ;;  %v973_v28 = vmul.f32 %v3023_v0, %v844_v23  ;;  %v855_v32 = vld [vmem:[#allocation6 + $0x68] sm:$0xff]  ;;  %v1231_v34 = vadd.f32 %v1103_v19, %v975_v22  ;;  %v980_v35 = vmul.f32 %v3023_v0, %v851_v31  ;;  %v853_v39 = vld [vmem:[#allocation6 + $0x58] sm:$0xff] }
  0x3e   :  { %v1101_v25 = vld [vmem:[#allocation8 + $0x10] sm:$0xff]  ;;  %v2671_v26 = vpack.c.bf16 %v1232_v15, %v1228_v14  ;;  %v977_v29 = vmul.f32 %v3023_v0, %v848_v24  ;;  %v2735_v33 = vpack.c.bf16 %v1234_v21, %v1230_v20  ;;  %v984_v36 = vmul.f32 %v3023_v0, %v855_v32  ;;  %v1108_v37 = vld [vmem:[#allocation8 + $0x48] sm:$0xff]  ;;  %v857_v42 = vld [vmem:[#allocation6 + $0x78] sm:$0xff] }
  0x3f   :  { %v1105_v30 = vld [vmem:[#allocation8 + $0x30] sm:$0xff]  ;;  %v1112_v38 = vld [vmem:[#allocation8 + $0x68] sm:$0xff]  ;;  %v1229_v40 = vadd.f32 %v1101_v25, %v973_v28  ;;  %v982_v43 = vmul.f32 %v3023_v0, %v853_v39  ;;  %v1110_v44 = vld [vmem:[#allocation8 + $0x58] sm:$0xff]  ;;  %v2673_v46 = vpack.c.bf16 %v1231_v34, %v1227_v27  ;;  %v1236_v47 = vadd.f32 %v1108_v37, %v980_v35 }
  0x40   :  { %2672 = vmatprep.subr.bf16.mxu0 %v2671_v26  ;;  %v1233_v41 = vadd.f32 %v1105_v30, %v977_v29  ;;  %v1114_v45 = vld [vmem:[#allocation8 + $0x78] sm:$0xff]  ;;  %2736 = vmatprep.subr.bf16.mxu1 %v2735_v33  ;;  %v1240_v48 = vadd.f32 %v1112_v38, %v984_v36  ;;  %v986_v49 = vmul.f32 %v3023_v0, %v857_v42  ;;  %v850_v50 = vld [vmem:[#allocation6 + $0x40] sm:$0xff]  ;;  %v852_v58 = vld [vmem:[#allocation6 + $0x50] sm:$0xff] }
  0x41   :  { %v854_v51 = vld [vmem:[#allocation6 + $0x60] sm:$0xff]  ;;  %v1238_v54 = vadd.f32 %v1110_v44, %v982_v43  ;;  %v979_v55 = vmul.f32 %v3023_v0, %v850_v50  ;;  %v856_v59 = vld [vmem:[#allocation6 + $0x70] sm:$0xff]  ;;  %2674 = vmatpush1.bf16.msra.mxu0 %v2673_v46  ;;  %v981_v62 = vmul.f32 %v3023_v0, %v852_v58  ;;  %v859_v3 = vld [vmem:[#allocation6 + $0x88] sm:$0xff] }
  0x42   :  { %v1107_v52 = vld [vmem:[#allocation8 + $0x40] sm:$0xff]  ;;  %v2737_v53 = vpack.c.bf16 %v1233_v41, %v1229_v40  ;;  %v983_v56 = vmul.f32 %v3023_v0, %v854_v51  ;;  %v2675_v60 = vpack.c.bf16 %v1240_v48, %v1236_v47  ;;  %v1242_v61 = vadd.f32 %v1114_v45, %v986_v49  ;;  %v1109_v1 = vld [vmem:[#allocation8 + $0x50] sm:$0xff]  ;;  %v863_v6 = vld [vmem:[#allocation6 + $0xa8] sm:$0xff] }
  0x43   :  { %v1111_v57 = vld [vmem:[#allocation8 + $0x60] sm:$0xff]  ;;  %v985_v63 = vmul.f32 %v3023_v0, %v856_v59  ;;  %v1113_v2 = vld [vmem:[#allocation8 + $0x70] sm:$0xff]  ;;  %v1235_v4 = vadd.f32 %v1107_v52, %v979_v55  ;;  %v988_v7 = vmul.f32 %v3023_v0, %v859_v3  ;;  %v1116_v8 = vld [vmem:[#allocation8 + $0x88] sm:$0xff]  ;;  %v1237_v11 = vadd.f32 %v1109_v1, %v981_v62 }
  0x44   :  { %2738 = vmatpush1.bf16.msra.mxu1 %v2737_v53  ;;  %v1239_v5 = vadd.f32 %v1111_v57, %v983_v56  ;;  %v1120_v9 = vld [vmem:[#allocation8 + $0xa8] sm:$0xff]  ;;  %2676 = vmatprep.subr.bf16.mxu0 %v2675_v60  ;;  %v2739_v10 = vpack.c.bf16 %v1242_v61, %v1238_v54  ;;  %v992_v13 = vmul.f32 %v3023_v0, %v863_v6  ;;  %v861_v14 = vld [vmem:[#allocation6 + $0x98] sm:$0xff]  ;;  %v858_v22 = vld [vmem:[#allocation6 + $0x80] sm:$0xff] }
  0x45   :  { %v1241_v12 = vadd.f32 %v1113_v2, %v985_v63  ;;  %v865_v15 = vld [vmem:[#allocation6 + $0xb8] sm:$0xff]  ;;  %v1244_v18 = vadd.f32 %v1116_v8, %v988_v7  ;;  %v990_v19 = vmul.f32 %v3023_v0, %v861_v14  ;;  %v862_v23 = vld [vmem:[#allocation6 + $0xa0] sm:$0xff]  ;;  %v987_v26 = vmul.f32 %v3023_v0, %v858_v22  ;;  %v860_v30 = vld [vmem:[#allocation6 + $0x90] sm:$0xff] }
  0x46   :  { %v1118_v16 = vld [vmem:[#allocation8 + $0x98] sm:$0xff]  ;;  %v2677_v17 = vpack.c.bf16 %v1239_v5, %v1235_v4  ;;  %v994_v20 = vmul.f32 %v3023_v0, %v865_v15  ;;  %2740 = vmatprep.subr.bf16.mxu1 %v2739_v10  ;;  %v1248_v25 = vadd.f32 %v1120_v9, %v992_v13  ;;  %v991_v27 = vmul.f32 %v3023_v0, %v862_v23  ;;  %v1115_v28 = vld [vmem:[#allocation8 + $0x80] sm:$0xff]  ;;  %v864_v33 = vld [vmem:[#allocation6 + $0xb0] sm:$0xff] }
  0x47   :  { %v1122_v21 = vld [vmem:[#allocation8 + $0xb8] sm:$0xff]  ;;  %v2741_v24 = vpack.c.bf16 %v1241_v12, %v1237_v11  ;;  %v1119_v29 = vld [vmem:[#allocation8 + $0xa0] sm:$0xff]  ;;  %v1246_v31 = vadd.f32 %v1118_v16, %v990_v19  ;;  %v989_v34 = vmul.f32 %v3023_v0, %v860_v30  ;;  %v1117_v35 = vld [vmem:[#allocation8 + $0x90] sm:$0xff]  ;;  %v1243_v38 = vadd.f32 %v1115_v28, %v987_v26 }
  0x48   :  { %2678 = vmatpush1.bf16.msra.mxu0 %v2677_v17  ;;  %v1250_v32 = vadd.f32 %v1122_v21, %v994_v20  ;;  %v1121_v36 = vld [vmem:[#allocation8 + $0xb0] sm:$0xff]  ;;  %v2679_v37 = vpack.c.bf16 %v1248_v25, %v1244_v18  ;;  %v1247_v39 = vadd.f32 %v1119_v29, %v991_v27  ;;  %v993_v40 = vmul.f32 %v3023_v0, %v864_v33  ;;  %v867_v41 = vld [vmem:[#allocation6 + $0xc8] sm:$0xff]  ;;  %v869_v49 = vld [vmem:[#allocation6 + $0xd8] sm:$0xff] }
  0x49   :  { %2742 = vmatpush1.bf16.msra.mxu1 %v2741_v24  ;;  %v871_v42 = vld [vmem:[#allocation6 + $0xe8] sm:$0xff]  ;;  %v1245_v45 = vadd.f32 %v1117_v35, %v989_v34  ;;  %v996_v46 = vmul.f32 %v3023_v0, %v867_v41  ;;  %v873_v50 = vld [vmem:[#allocation6 + $0xf8] sm:$0xff]  ;;  %v998_v53 = vmul.f32 %v3023_v0, %v869_v49  ;;  %v866_v57 = vld [vmem:[#allocation6 + $0xc0] sm:$0xff] }
  0x4a   :  { %v1124_v43 = vld [vmem:[#allocation8 + $0xc8] sm:$0xff]  ;;  %v2743_v44 = vpack.c.bf16 %v1250_v32, %v1246_v31  ;;  %v1000_v47 = vmul.f32 %v3023_v0, %v871_v42  ;;  %2680 = vmatprep.subr.bf16.mxu0 %v2679_v37  ;;  %v2681_v51 = vpack.c.bf16 %v1247_v39, %v1243_v38  ;;  %v1249_v52 = vadd.f32 %v1121_v36, %v993_v40  ;;  %v1126_v55 = vld [vmem:[#allocation8 + $0xd8] sm:$0xff]  ;;  %v870_v60 = vld [vmem:[#allocation6 + $0xe0] sm:$0xff] }
  0x4b   :  { %v1128_v48 = vld [vmem:[#allocation8 + $0xe8] sm:$0xff]  ;;  %v1002_v54 = vmul.f32 %v3023_v0, %v873_v50  ;;  %v1130_v56 = vld [vmem:[#allocation8 + $0xf8] sm:$0xff]  ;;  %v1252_v58 = vadd.f32 %v1124_v43, %v996_v46  ;;  %v995_v61 = vmul.f32 %v3023_v0, %v866_v57  ;;  %v1123_v62 = vld [vmem:[#allocation8 + $0xc0] sm:$0xff]  ;;  %v1254_v2 = vadd.f32 %v1126_v55, %v998_v53 }
  0x4c   :  { %2744 = vmatprep.subr.bf16.mxu1 %v2743_v44  ;;  %v1256_v59 = vadd.f32 %v1128_v48, %v1000_v47  ;;  %v1127_v63 = vld [vmem:[#allocation8 + $0xe0] sm:$0xff]  ;;  %2682 = vmatpush1.bf16.msra.mxu0 %v2681_v51  ;;  %v2745_v1 = vpack.c.bf16 %v1249_v52, %v1245_v45  ;;  %v999_v4 = vmul.f32 %v3023_v0, %v870_v60  ;;  %v868_v5 = vld [vmem:[#allocation6 + $0xd0] sm:$0xff]  ;;  %v875_v13 = vld [vmem:[#allocation6 + $0x108] sm:$0xff] }
  0x4d   :  { %v1258_v3 = vadd.f32 %v1130_v56, %v1002_v54  ;;  %v872_v6 = vld [vmem:[#allocation6 + $0xf0] sm:$0xff]  ;;  %v1251_v9 = vadd.f32 %v1123_v62, %v995_v61  ;;  %v997_v10 = vmul.f32 %v3023_v0, %v868_v5  ;;  %v879_v14 = vld [vmem:[#allocation6 + $0x128] sm:$0xff]  ;;  %v1004_v17 = vmul.f32 %v3023_v0, %v875_v13  ;;  %v877_v21 = vld [vmem:[#allocation6 + $0x118] sm:$0xff] }
  0x4e   :  { %v1125_v7 = vld [vmem:[#allocation8 + $0xd0] sm:$0xff]  ;;  %v2683_v8 = vpack.c.bf16 %v1256_v59, %v1252_v58  ;;  %v1001_v11 = vmul.f32 %v3023_v0, %v872_v6  ;;  %2746 = vmatpush1.bf16.msra.mxu1 %v2745_v1  ;;  %v1255_v16 = vadd.f32 %v1127_v63, %v999_v4  ;;  %v1008_v18 = vmul.f32 %v3023_v0, %v879_v14  ;;  %v1132_v19 = vld [vmem:[#allocation8 + $0x108] sm:$0xff]  ;;  %v881_v24 = vld [vmem:[#allocation6 + $0x138] sm:$0xff] }
  0x4f   :  { %v1129_v12 = vld [vmem:[#allocation8 + $0xf0] sm:$0xff]  ;;  %v2747_v15 = vpack.c.bf16 %v1258_v3, %v1254_v2  ;;  %v1136_v20 = vld [vmem:[#allocation8 + $0x128] sm:$0xff]  ;;  %v1253_v22 = vadd.f32 %v1125_v7, %v997_v10  ;;  %v1006_v25 = vmul.f32 %v3023_v0, %v877_v21  ;;  %v1134_v26 = vld [vmem:[#allocation8 + $0x118] sm:$0xff]  ;;  %v1260_v29 = vadd.f32 %v1132_v19, %v1004_v17 }
  0x50   :  { %2684 = vmatprep.subr.bf16.mxu0 %v2683_v8  ;;  %v1257_v23 = vadd.f32 %v1129_v12, %v1001_v11  ;;  %v1138_v27 = vld [vmem:[#allocation8 + $0x138] sm:$0xff]  ;;  %v2685_v28 = vpack.c.bf16 %v1255_v16, %v1251_v9  ;;  %v1264_v30 = vadd.f32 %v1136_v20, %v1008_v18  ;;  %v1010_v31 = vmul.f32 %v3023_v0, %v881_v24  ;;  %v874_v32 = vld [vmem:[#allocation6 + $0x100] sm:$0xff]  ;;  %v876_v40 = vld [vmem:[#allocation6 + $0x110] sm:$0xff] }
  0x51   :  { %2748 = vmatprep.subr.bf16.mxu1 %v2747_v15  ;;  %v878_v33 = vld [vmem:[#allocation6 + $0x120] sm:$0xff]  ;;  %v1262_v36 = vadd.f32 %v1134_v26, %v1006_v25  ;;  %v1003_v37 = vmul.f32 %v3023_v0, %v874_v32  ;;  %v880_v41 = vld [vmem:[#allocation6 + $0x130] sm:$0xff]  ;;  %v1005_v44 = vmul.f32 %v3023_v0, %v876_v40  ;;  %v883_v48 = vld [vmem:[#allocation6 + $0x148] sm:$0xff] }
  0x52   :  { %v1131_v34 = vld [vmem:[#allocation8 + $0x100] sm:$0xff]  ;;  %v2749_v35 = vpack.c.bf16 %v1257_v23, %v1253_v22  ;;  %v1007_v38 = vmul.f32 %v3023_v0, %v878_v33  ;;  %2686 = vmatpush1.bf16.msra.mxu0 %v2685_v28  ;;  %v2687_v42 = vpack.c.bf16 %v1264_v30, %v1260_v29  ;;  %v1266_v43 = vadd.f32 %v1138_v27, %v1010_v31  ;;  %v1133_v46 = vld [vmem:[#allocation8 + $0x110] sm:$0xff]  ;;  %v887_v51 = vld [vmem:[#allocation6 + $0x168] sm:$0xff] }
  0x53   :  { %v1135_v39 = vld [vmem:[#allocation8 + $0x120] sm:$0xff]  ;;  %v1009_v45 = vmul.f32 %v3023_v0, %v880_v41  ;;  %v1137_v47 = vld [vmem:[#allocation8 + $0x130] sm:$0xff]  ;;  %v1259_v49 = vadd.f32 %v1131_v34, %v1003_v37  ;;  %v1012_v52 = vmul.f32 %v3023_v0, %v883_v48  ;;  %v1140_v53 = vld [vmem:[#allocation8 + $0x148] sm:$0xff]  ;;  %v1261_v56 = vadd.f32 %v1133_v46, %v1005_v44 }
  0x54   :  { %2750 = vmatpush1.bf16.msra.mxu1 %v2749_v35  ;;  %v1263_v50 = vadd.f32 %v1135_v39, %v1007_v38  ;;  %v1144_v54 = vld [vmem:[#allocation8 + $0x168] sm:$0xff]  ;;  %2688 = vmatprep.subr.bf16.mxu0 %v2687_v42  ;;  %v2751_v55 = vpack.c.bf16 %v1266_v43, %v1262_v36  ;;  %v1016_v58 = vmul.f32 %v3023_v0, %v887_v51  ;;  %v885_v59 = vld [vmem:[#allocation6 + $0x158] sm:$0xff]  ;;  %v882_v4 = vld [vmem:[#allocation6 + $0x140] sm:$0xff] }
  0x55   :  { %v1265_v57 = vadd.f32 %v1137_v47, %v1009_v45  ;;  %v889_v60 = vld [vmem:[#allocation6 + $0x178] sm:$0xff]  ;;  %v1268_v63 = vadd.f32 %v1140_v53, %v1012_v52  ;;  %v1014_v1 = vmul.f32 %v3023_v0, %v885_v59  ;;  %v886_v5 = vld [vmem:[#allocation6 + $0x160] sm:$0xff]  ;;  %v1011_v8 = vmul.f32 %v3023_v0, %v882_v4  ;;  %v884_v12 = vld [vmem:[#allocation6 + $0x150] sm:$0xff] }
  0x56   :  { %v1142_v61 = vld [vmem:[#allocation8 + $0x158] sm:$0xff]  ;;  %v2689_v62 = vpack.c.bf16 %v1263_v50, %v1259_v49  ;;  %v1018_v2 = vmul.f32 %v3023_v0, %v889_v60  ;;  %2752 = vmatprep.subr.bf16.mxu1 %v2751_v55  ;;  %v1272_v7 = vadd.f32 %v1144_v54, %v1016_v58  ;;  %v1015_v9 = vmul.f32 %v3023_v0, %v886_v5  ;;  %v1139_v10 = vld [vmem:[#allocation8 + $0x140] sm:$0xff]  ;;  %v888_v15 = vld [vmem:[#allocation6 + $0x170] sm:$0xff] }
  0x57   :  { %v1146_v3 = vld [vmem:[#allocation8 + $0x178] sm:$0xff]  ;;  %v2753_v6 = vpack.c.bf16 %v1265_v57, %v1261_v56  ;;  %v1143_v11 = vld [vmem:[#allocation8 + $0x160] sm:$0xff]  ;;  %v1270_v13 = vadd.f32 %v1142_v61, %v1014_v1  ;;  %v1013_v16 = vmul.f32 %v3023_v0, %v884_v12  ;;  %v1141_v17 = vld [vmem:[#allocation8 + $0x150] sm:$0xff]  ;;  %v1267_v20 = vadd.f32 %v1139_v10, %v1011_v8 }
  0x58   :  { %2690 = vmatpush1.bf16.msra.mxu0 %v2689_v62  ;;  %v1274_v14 = vadd.f32 %v1146_v3, %v1018_v2  ;;  %v1145_v18 = vld [vmem:[#allocation8 + $0x170] sm:$0xff]  ;;  %v2691_v19 = vpack.c.bf16 %v1272_v7, %v1268_v63  ;;  %v1271_v21 = vadd.f32 %v1143_v11, %v1015_v9  ;;  %v1017_v22 = vmul.f32 %v3023_v0, %v888_v15  ;;  %v891_v23 = vld [vmem:[#allocation6 + $0x188] sm:$0xff]  ;;  %v893_v31 = vld [vmem:[#allocation6 + $0x198] sm:$0xff] }
  0x59   :  { %2754 = vmatpush1.bf16.msra.mxu1 %v2753_v6  ;;  %v895_v24 = vld [vmem:[#allocation6 + $0x1a8] sm:$0xff]  ;;  %v1269_v27 = vadd.f32 %v1141_v17, %v1013_v16  ;;  %v1020_v28 = vmul.f32 %v3023_v0, %v891_v23  ;;  %v897_v32 = vld [vmem:[#allocation6 + $0x1b8] sm:$0xff]  ;;  %v1022_v35 = vmul.f32 %v3023_v0, %v893_v31  ;;  %v890_v39 = vld [vmem:[#allocation6 + $0x180] sm:$0xff] }
  0x5a   :  { %v1148_v25 = vld [vmem:[#allocation8 + $0x188] sm:$0xff]  ;;  %v2755_v26 = vpack.c.bf16 %v1274_v14, %v1270_v13  ;;  %v1024_v29 = vmul.f32 %v3023_v0, %v895_v24  ;;  %2692 = vmatprep.subr.bf16.mxu0 %v2691_v19  ;;  %v2693_v33 = vpack.c.bf16 %v1271_v21, %v1267_v20  ;;  %v1273_v34 = vadd.f32 %v1145_v18, %v1017_v22  ;;  %v1150_v37 = vld [vmem:[#allocation8 + $0x198] sm:$0xff]  ;;  %v894_v42 = vld [vmem:[#allocation6 + $0x1a0] sm:$0xff] }
  0x5b   :  { %v1152_v30 = vld [vmem:[#allocation8 + $0x1a8] sm:$0xff]  ;;  %v1026_v36 = vmul.f32 %v3023_v0, %v897_v32  ;;  %v1154_v38 = vld [vmem:[#allocation8 + $0x1b8] sm:$0xff]  ;;  %v1276_v40 = vadd.f32 %v1148_v25, %v1020_v28  ;;  %v1019_v43 = vmul.f32 %v3023_v0, %v890_v39  ;;  %v1147_v44 = vld [vmem:[#allocation8 + $0x180] sm:$0xff]  ;;  %v1278_v47 = vadd.f32 %v1150_v37, %v1022_v35 }
  0x5c   :  { %2756 = vmatprep.subr.bf16.mxu1 %v2755_v26  ;;  %v1280_v41 = vadd.f32 %v1152_v30, %v1024_v29  ;;  %v1151_v45 = vld [vmem:[#allocation8 + $0x1a0] sm:$0xff]  ;;  %2694 = vmatpush1.bf16.msra.mxu0 %v2693_v33  ;;  %v2757_v46 = vpack.c.bf16 %v1273_v34, %v1269_v27  ;;  %v1023_v49 = vmul.f32 %v3023_v0, %v894_v42  ;;  %v892_v50 = vld [vmem:[#allocation6 + $0x190] sm:$0xff]  ;;  %v899_v58 = vld [vmem:[#allocation6 + $0x1c8] sm:$0xff] }
  0x5d   :  { %v1282_v48 = vadd.f32 %v1154_v38, %v1026_v36  ;;  %v896_v51 = vld [vmem:[#allocation6 + $0x1b0] sm:$0xff]  ;;  %v1275_v54 = vadd.f32 %v1147_v44, %v1019_v43  ;;  %v1021_v55 = vmul.f32 %v3023_v0, %v892_v50  ;;  %v903_v59 = vld [vmem:[#allocation6 + $0x1e8] sm:$0xff]  ;;  %v1028_v62 = vmul.f32 %v3023_v0, %v899_v58  ;;  %v901_v3 = vld [vmem:[#allocation6 + $0x1d8] sm:$0xff] }
  0x5e   :  { %v1149_v52 = vld [vmem:[#allocation8 + $0x190] sm:$0xff]  ;;  %v2695_v53 = vpack.c.bf16 %v1280_v41, %v1276_v40  ;;  %v1025_v56 = vmul.f32 %v3023_v0, %v896_v51  ;;  %2758 = vmatpush1.bf16.msra.mxu1 %v2757_v46  ;;  %v1279_v61 = vadd.f32 %v1151_v45, %v1023_v49  ;;  %v1032_v63 = vmul.f32 %v3023_v0, %v903_v59  ;;  %v1156_v1 = vld [vmem:[#allocation8 + $0x1c8] sm:$0xff]  ;;  %v905_v6 = vld [vmem:[#allocation6 + $0x1f8] sm:$0xff] }
  0x5f   :  { %v1153_v57 = vld [vmem:[#allocation8 + $0x1b0] sm:$0xff]  ;;  %v2759_v60 = vpack.c.bf16 %v1282_v48, %v1278_v47  ;;  %v1160_v2 = vld [vmem:[#allocation8 + $0x1e8] sm:$0xff]  ;;  %v1277_v4 = vadd.f32 %v1149_v52, %v1021_v55  ;;  %v1030_v7 = vmul.f32 %v3023_v0, %v901_v3  ;;  %v1158_v8 = vld [vmem:[#allocation8 + $0x1d8] sm:$0xff]  ;;  %v1284_v11 = vadd.f32 %v1156_v1, %v1028_v62 }
  0x60   :  { %2696 = vmatprep.subr.bf16.mxu0 %v2695_v53  ;;  %v1281_v5 = vadd.f32 %v1153_v57, %v1025_v56  ;;  %v1162_v9 = vld [vmem:[#allocation8 + $0x1f8] sm:$0xff]  ;;  %v2697_v10 = vpack.c.bf16 %v1279_v61, %v1275_v54  ;;  %v1288_v12 = vadd.f32 %v1160_v2, %v1032_v63  ;;  %v1034_v13 = vmul.f32 %v3023_v0, %v905_v6  ;;  %v898_v14 = vld [vmem:[#allocation6 + $0x1c0] sm:$0xff]  ;;  %v900_v22 = vld [vmem:[#allocation6 + $0x1d0] sm:$0xff] }
  0x61   :  { %2760 = vmatprep.subr.bf16.mxu1 %v2759_v60  ;;  %v902_v15 = vld [vmem:[#allocation6 + $0x1e0] sm:$0xff]  ;;  %v1286_v18 = vadd.f32 %v1158_v8, %v1030_v7  ;;  %v1027_v19 = vmul.f32 %v3023_v0, %v898_v14  ;;  %v904_v23 = vld [vmem:[#allocation6 + $0x1f0] sm:$0xff]  ;;  %v1029_v26 = vmul.f32 %v3023_v0, %v900_v22  ;;  %v907_v30 = vld [vmem:[#allocation6 + $0x208] sm:$0xff] }
  0x62   :  { %v1155_v16 = vld [vmem:[#allocation8 + $0x1c0] sm:$0xff]  ;;  %v2761_v17 = vpack.c.bf16 %v1281_v5, %v1277_v4  ;;  %v1031_v20 = vmul.f32 %v3023_v0, %v902_v15  ;;  %2698 = vmatpush1.bf16.msra.mxu0 %v2697_v10  ;;  %v2699_v24 = vpack.c.bf16 %v1288_v12, %v1284_v11  ;;  %v1290_v25 = vadd.f32 %v1162_v9, %v1034_v13  ;;  %v1157_v28 = vld [vmem:[#allocation8 + $0x1d0] sm:$0xff]  ;;  %v911_v33 = vld [vmem:[#allocation6 + $0x228] sm:$0xff] }
  0x63   :  { %v1159_v21 = vld [vmem:[#allocation8 + $0x1e0] sm:$0xff]  ;;  %v1033_v27 = vmul.f32 %v3023_v0, %v904_v23  ;;  %v1161_v29 = vld [vmem:[#allocation8 + $0x1f0] sm:$0xff]  ;;  %v1283_v31 = vadd.f32 %v1155_v16, %v1027_v19  ;;  %v1036_v34 = vmul.f32 %v3023_v0, %v907_v30  ;;  %v1164_v35 = vld [vmem:[#allocation8 + $0x208] sm:$0xff]  ;;  %v1285_v38 = vadd.f32 %v1157_v28, %v1029_v26 }
  0x64   :  { %2762 = vmatpush1.bf16.msra.mxu1 %v2761_v17  ;;  %v1287_v32 = vadd.f32 %v1159_v21, %v1031_v20  ;;  %v1168_v36 = vld [vmem:[#allocation8 + $0x228] sm:$0xff]  ;;  %2700 = vmatprep.subr.bf16.mxu0 %v2699_v24  ;;  %v2763_v37 = vpack.c.bf16 %v1290_v25, %v1286_v18  ;;  %v1040_v40 = vmul.f32 %v3023_v0, %v911_v33  ;;  %v909_v41 = vld [vmem:[#allocation6 + $0x218] sm:$0xff]  ;;  %v906_v49 = vld [vmem:[#allocation6 + $0x200] sm:$0xff] }
  0x65   :  { %v1289_v39 = vadd.f32 %v1161_v29, %v1033_v27  ;;  %v913_v42 = vld [vmem:[#allocation6 + $0x238] sm:$0xff]  ;;  %v1292_v45 = vadd.f32 %v1164_v35, %v1036_v34  ;;  %v1038_v46 = vmul.f32 %v3023_v0, %v909_v41  ;;  %v910_v50 = vld [vmem:[#allocation6 + $0x220] sm:$0xff]  ;;  %v1035_v53 = vmul.f32 %v3023_v0, %v906_v49  ;;  %v908_v57 = vld [vmem:[#allocation6 + $0x210] sm:$0xff] }
  0x66   :  { %v1166_v43 = vld [vmem:[#allocation8 + $0x218] sm:$0xff]  ;;  %v2701_v44 = vpack.c.bf16 %v1287_v32, %v1283_v31  ;;  %v1042_v47 = vmul.f32 %v3023_v0, %v913_v42  ;;  %2764 = vmatprep.subr.bf16.mxu1 %v2763_v37  ;;  %v1296_v52 = vadd.f32 %v1168_v36, %v1040_v40  ;;  %v1039_v54 = vmul.f32 %v3023_v0, %v910_v50  ;;  %v1163_v55 = vld [vmem:[#allocation8 + $0x200] sm:$0xff]  ;;  %v912_v60 = vld [vmem:[#allocation6 + $0x230] sm:$0xff] }
  0x67   :  { %v1170_v48 = vld [vmem:[#allocation8 + $0x238] sm:$0xff]  ;;  %v2765_v51 = vpack.c.bf16 %v1289_v39, %v1285_v38  ;;  %v1167_v56 = vld [vmem:[#allocation8 + $0x220] sm:$0xff]  ;;  %v1294_v58 = vadd.f32 %v1166_v43, %v1038_v46  ;;  %v1037_v61 = vmul.f32 %v3023_v0, %v908_v57  ;;  %v1165_v62 = vld [vmem:[#allocation8 + $0x210] sm:$0xff]  ;;  %v1291_v2 = vadd.f32 %v1163_v55, %v1035_v53 }
  0x68   :  { %2702 = vmatpush1.bf16.msra.mxu0 %v2701_v44  ;;  %v1298_v59 = vadd.f32 %v1170_v48, %v1042_v47  ;;  %v1169_v63 = vld [vmem:[#allocation8 + $0x230] sm:$0xff]  ;;  %v2703_v1 = vpack.c.bf16 %v1296_v52, %v1292_v45  ;;  %v1295_v3 = vadd.f32 %v1167_v56, %v1039_v54  ;;  %v1041_v4 = vmul.f32 %v3023_v0, %v912_v60  ;;  %v915_v5 = vld [vmem:[#allocation6 + $0x248] sm:$0xff]  ;;  %v917_v13 = vld [vmem:[#allocation6 + $0x258] sm:$0xff] }
  0x69   :  { %2766 = vmatpush1.bf16.msra.mxu1 %v2765_v51  ;;  %v919_v6 = vld [vmem:[#allocation6 + $0x268] sm:$0xff]  ;;  %v1293_v9 = vadd.f32 %v1165_v62, %v1037_v61  ;;  %v1044_v10 = vmul.f32 %v3023_v0, %v915_v5  ;;  %v921_v14 = vld [vmem:[#allocation6 + $0x278] sm:$0xff]  ;;  %v1046_v17 = vmul.f32 %v3023_v0, %v917_v13  ;;  %v914_v21 = vld [vmem:[#allocation6 + $0x240] sm:$0xff] }
  0x6a   :  { %v1172_v7 = vld [vmem:[#allocation8 + $0x248] sm:$0xff]  ;;  %v2767_v8 = vpack.c.bf16 %v1298_v59, %v1294_v58  ;;  %v1048_v11 = vmul.f32 %v3023_v0, %v919_v6  ;;  %2704 = vmatprep.subr.bf16.mxu0 %v2703_v1  ;;  %v2705_v15 = vpack.c.bf16 %v1295_v3, %v1291_v2  ;;  %v1297_v16 = vadd.f32 %v1169_v63, %v1041_v4  ;;  %v1174_v19 = vld [vmem:[#allocation8 + $0x258] sm:$0xff]  ;;  %v918_v24 = vld [vmem:[#allocation6 + $0x260] sm:$0xff] }
  0x6b   :  { %v1176_v12 = vld [vmem:[#allocation8 + $0x268] sm:$0xff]  ;;  %v1050_v18 = vmul.f32 %v3023_v0, %v921_v14  ;;  %v1178_v20 = vld [vmem:[#allocation8 + $0x278] sm:$0xff]  ;;  %v1300_v22 = vadd.f32 %v1172_v7, %v1044_v10  ;;  %v1043_v25 = vmul.f32 %v3023_v0, %v914_v21  ;;  %v1171_v26 = vld [vmem:[#allocation8 + $0x240] sm:$0xff]  ;;  %v1302_v29 = vadd.f32 %v1174_v19, %v1046_v17 }
  0x6c   :  { %2768 = vmatprep.subr.bf16.mxu1 %v2767_v8  ;;  %v1304_v23 = vadd.f32 %v1176_v12, %v1048_v11  ;;  %v1175_v27 = vld [vmem:[#allocation8 + $0x260] sm:$0xff]  ;;  %2706 = vmatpush1.bf16.msra.mxu0 %v2705_v15  ;;  %v2769_v28 = vpack.c.bf16 %v1297_v16, %v1293_v9  ;;  %v1047_v31 = vmul.f32 %v3023_v0, %v918_v24  ;;  %v916_v32 = vld [vmem:[#allocation6 + $0x250] sm:$0xff]  ;;  %v923_v40 = vld [vmem:[#allocation6 + $0x288] sm:$0xff] }
  0x6d   :  { %v1306_v30 = vadd.f32 %v1178_v20, %v1050_v18  ;;  %v920_v33 = vld [vmem:[#allocation6 + $0x270] sm:$0xff]  ;;  %v1299_v36 = vadd.f32 %v1171_v26, %v1043_v25  ;;  %v1045_v37 = vmul.f32 %v3023_v0, %v916_v32  ;;  %v927_v41 = vld [vmem:[#allocation6 + $0x2a8] sm:$0xff]  ;;  %v1052_v44 = vmul.f32 %v3023_v0, %v923_v40  ;;  %v925_v48 = vld [vmem:[#allocation6 + $0x298] sm:$0xff] }
  0x6e   :  { %v1173_v34 = vld [vmem:[#allocation8 + $0x250] sm:$0xff]  ;;  %v2707_v35 = vpack.c.bf16 %v1304_v23, %v1300_v22  ;;  %v1049_v38 = vmul.f32 %v3023_v0, %v920_v33  ;;  %2770 = vmatpush1.bf16.msra.mxu1 %v2769_v28  ;;  %v1303_v43 = vadd.f32 %v1175_v27, %v1047_v31  ;;  %v1056_v45 = vmul.f32 %v3023_v0, %v927_v41  ;;  %v1180_v46 = vld [vmem:[#allocation8 + $0x288] sm:$0xff]  ;;  %v929_v51 = vld [vmem:[#allocation6 + $0x2b8] sm:$0xff] }
  0x6f   :  { %v1177_v39 = vld [vmem:[#allocation8 + $0x270] sm:$0xff]  ;;  %v2771_v42 = vpack.c.bf16 %v1306_v30, %v1302_v29  ;;  %v1184_v47 = vld [vmem:[#allocation8 + $0x2a8] sm:$0xff]  ;;  %v1301_v49 = vadd.f32 %v1173_v34, %v1045_v37  ;;  %v1054_v52 = vmul.f32 %v3023_v0, %v925_v48  ;;  %v1182_v53 = vld [vmem:[#allocation8 + $0x298] sm:$0xff]  ;;  %v1308_v56 = vadd.f32 %v1180_v46, %v1052_v44 }
  0x70   :  { %2708 = vmatprep.subr.bf16.mxu0 %v2707_v35  ;;  %v1305_v50 = vadd.f32 %v1177_v39, %v1049_v38  ;;  %v1186_v54 = vld [vmem:[#allocation8 + $0x2b8] sm:$0xff]  ;;  %v2709_v55 = vpack.c.bf16 %v1303_v43, %v1299_v36  ;;  %v1312_v57 = vadd.f32 %v1184_v47, %v1056_v45  ;;  %v1058_v58 = vmul.f32 %v3023_v0, %v929_v51  ;;  %v922_v59 = vld [vmem:[#allocation6 + $0x280] sm:$0xff]  ;;  %v924_v4 = vld [vmem:[#allocation6 + $0x290] sm:$0xff] }
  0x71   :  { %2772 = vmatprep.subr.bf16.mxu1 %v2771_v42  ;;  %v926_v60 = vld [vmem:[#allocation6 + $0x2a0] sm:$0xff]  ;;  %v1310_v63 = vadd.f32 %v1182_v53, %v1054_v52  ;;  %v1051_v1 = vmul.f32 %v3023_v0, %v922_v59  ;;  %v928_v5 = vld [vmem:[#allocation6 + $0x2b0] sm:$0xff]  ;;  %v1053_v8 = vmul.f32 %v3023_v0, %v924_v4  ;;  %v931_v12 = vld [vmem:[#allocation6 + $0x2c8] sm:$0xff] }
  0x72   :  { %v1179_v61 = vld [vmem:[#allocation8 + $0x280] sm:$0xff]  ;;  %v2773_v62 = vpack.c.bf16 %v1305_v50, %v1301_v49  ;;  %v1055_v2 = vmul.f32 %v3023_v0, %v926_v60  ;;  %2710 = vmatpush1.bf16.msra.mxu0 %v2709_v55  ;;  %v2711_v6 = vpack.c.bf16 %v1312_v57, %v1308_v56  ;;  %v1314_v7 = vadd.f32 %v1186_v54, %v1058_v58  ;;  %v1181_v10 = vld [vmem:[#allocation8 + $0x290] sm:$0xff]  ;;  %v935_v15 = vld [vmem:[#allocation6 + $0x2e8] sm:$0xff] }
  0x73   :  { %v1183_v3 = vld [vmem:[#allocation8 + $0x2a0] sm:$0xff]  ;;  %v1057_v9 = vmul.f32 %v3023_v0, %v928_v5  ;;  %v1185_v11 = vld [vmem:[#allocation8 + $0x2b0] sm:$0xff]  ;;  %v1307_v13 = vadd.f32 %v1179_v61, %v1051_v1  ;;  %v1060_v16 = vmul.f32 %v3023_v0, %v931_v12  ;;  %v1188_v17 = vld [vmem:[#allocation8 + $0x2c8] sm:$0xff]  ;;  %v1309_v20 = vadd.f32 %v1181_v10, %v1053_v8 }
  0x74   :  { %2774 = vmatpush1.bf16.msra.mxu1 %v2773_v62  ;;  %v1311_v14 = vadd.f32 %v1183_v3, %v1055_v2  ;;  %v1192_v18 = vld [vmem:[#allocation8 + $0x2e8] sm:$0xff]  ;;  %2712 = vmatprep.subr.bf16.mxu0 %v2711_v6  ;;  %v2775_v19 = vpack.c.bf16 %v1314_v7, %v1310_v63  ;;  %v1064_v22 = vmul.f32 %v3023_v0, %v935_v15  ;;  %v933_v23 = vld [vmem:[#allocation6 + $0x2d8] sm:$0xff]  ;;  %v930_v31 = vld [vmem:[#allocation6 + $0x2c0] sm:$0xff] }
  0x75   :  { %v1313_v21 = vadd.f32 %v1185_v11, %v1057_v9  ;;  %v937_v24 = vld [vmem:[#allocation6 + $0x2f8] sm:$0xff]  ;;  %v1316_v27 = vadd.f32 %v1188_v17, %v1060_v16  ;;  %v1062_v28 = vmul.f32 %v3023_v0, %v933_v23  ;;  %v934_v32 = vld [vmem:[#allocation6 + $0x2e0] sm:$0xff]  ;;  %v1059_v35 = vmul.f32 %v3023_v0, %v930_v31  ;;  %v932_v39 = vld [vmem:[#allocation6 + $0x2d0] sm:$0xff] }
  0x76   :  { %v1190_v25 = vld [vmem:[#allocation8 + $0x2d8] sm:$0xff]  ;;  %v2713_v26 = vpack.c.bf16 %v1311_v14, %v1307_v13  ;;  %v1066_v29 = vmul.f32 %v3023_v0, %v937_v24  ;;  %2776 = vmatprep.subr.bf16.mxu1 %v2775_v19  ;;  %v1320_v34 = vadd.f32 %v1192_v18, %v1064_v22  ;;  %v1063_v36 = vmul.f32 %v3023_v0, %v934_v32  ;;  %v1187_v37 = vld [vmem:[#allocation8 + $0x2c0] sm:$0xff]  ;;  %v936_v42 = vld [vmem:[#allocation6 + $0x2f0] sm:$0xff] }
  0x77   :  { %v1194_v30 = vld [vmem:[#allocation8 + $0x2f8] sm:$0xff]  ;;  %v2777_v33 = vpack.c.bf16 %v1313_v21, %v1309_v20  ;;  %v1191_v38 = vld [vmem:[#allocation8 + $0x2e0] sm:$0xff]  ;;  %v1318_v40 = vadd.f32 %v1190_v25, %v1062_v28  ;;  %v1061_v43 = vmul.f32 %v3023_v0, %v932_v39  ;;  %v1189_v44 = vld [vmem:[#allocation8 + $0x2d0] sm:$0xff]  ;;  %v1315_v47 = vadd.f32 %v1187_v37, %v1059_v35 }
  0x78   :  { %2714 = vmatpush1.bf16.msra.mxu0 %v2713_v26  ;;  %v1322_v41 = vadd.f32 %v1194_v30, %v1066_v29  ;;  %v1193_v45 = vld [vmem:[#allocation8 + $0x2f0] sm:$0xff]  ;;  %v2715_v46 = vpack.c.bf16 %v1320_v34, %v1316_v27  ;;  %v1319_v48 = vadd.f32 %v1191_v38, %v1063_v36  ;;  %v1065_v49 = vmul.f32 %v3023_v0, %v936_v42  ;;  %v939_v50 = vld [vmem:[#allocation6 + $0x308] sm:$0xff]  ;;  %v941_v58 = vld [vmem:[#allocation6 + $0x318] sm:$0xff] }
  0x79   :  { %2778 = vmatpush1.bf16.msra.mxu1 %v2777_v33  ;;  %v943_v51 = vld [vmem:[#allocation6 + $0x328] sm:$0xff]  ;;  %v1317_v54 = vadd.f32 %v1189_v44, %v1061_v43  ;;  %v1068_v55 = vmul.f32 %v3023_v0, %v939_v50  ;;  %v945_v59 = vld [vmem:[#allocation6 + $0x338] sm:$0xff]  ;;  %v1070_v62 = vmul.f32 %v3023_v0, %v941_v58  ;;  %v938_v3 = vld [vmem:[#allocation6 + $0x300] sm:$0xff] }
  0x7a   :  { %v1196_v52 = vld [vmem:[#allocation8 + $0x308] sm:$0xff]  ;;  %v2779_v53 = vpack.c.bf16 %v1322_v41, %v1318_v40  ;;  %v1072_v56 = vmul.f32 %v3023_v0, %v943_v51  ;;  %2716 = vmatprep.subr.bf16.mxu0 %v2715_v46  ;;  %v2717_v60 = vpack.c.bf16 %v1319_v48, %v1315_v47  ;;  %v1321_v61 = vadd.f32 %v1193_v45, %v1065_v49  ;;  %v1198_v1 = vld [vmem:[#allocation8 + $0x318] sm:$0xff]  ;;  %v942_v6 = vld [vmem:[#allocation6 + $0x320] sm:$0xff] }
  0x7b   :  { %v1200_v57 = vld [vmem:[#allocation8 + $0x328] sm:$0xff]  ;;  %v1074_v63 = vmul.f32 %v3023_v0, %v945_v59  ;;  %v1202_v2 = vld [vmem:[#allocation8 + $0x338] sm:$0xff]  ;;  %v1324_v4 = vadd.f32 %v1196_v52, %v1068_v55  ;;  %v1067_v7 = vmul.f32 %v3023_v0, %v938_v3  ;;  %v1195_v8 = vld [vmem:[#allocation8 + $0x300] sm:$0xff]  ;;  %v1326_v11 = vadd.f32 %v1198_v1, %v1070_v62 }
  0x7c   :  { %2780 = vmatprep.subr.bf16.mxu1 %v2779_v53  ;;  %v1328_v5 = vadd.f32 %v1200_v57, %v1072_v56  ;;  %v1199_v9 = vld [vmem:[#allocation8 + $0x320] sm:$0xff]  ;;  %2718 = vmatpush1.bf16.msra.mxu0 %v2717_v60  ;;  %v2781_v10 = vpack.c.bf16 %v1321_v61, %v1317_v54  ;;  %v1071_v13 = vmul.f32 %v3023_v0, %v942_v6  ;;  %v940_v14 = vld [vmem:[#allocation6 + $0x310] sm:$0xff]  ;;  %v947_v22 = vld [vmem:[#allocation6 + $0x348] sm:$0xff] }
  0x7d   :  { %v1330_v12 = vadd.f32 %v1202_v2, %v1074_v63  ;;  %v944_v15 = vld [vmem:[#allocation6 + $0x330] sm:$0xff]  ;;  %v1323_v18 = vadd.f32 %v1195_v8, %v1067_v7  ;;  %v1069_v19 = vmul.f32 %v3023_v0, %v940_v14  ;;  %v951_v23 = vld [vmem:[#allocation6 + $0x368] sm:$0xff]  ;;  %v1076_v26 = vmul.f32 %v3023_v0, %v947_v22  ;;  %v949_v30 = vld [vmem:[#allocation6 + $0x358] sm:$0xff] }
  0x7e   :  { %v1197_v16 = vld [vmem:[#allocation8 + $0x310] sm:$0xff]  ;;  %v2719_v17 = vpack.c.bf16 %v1328_v5, %v1324_v4  ;;  %v1073_v20 = vmul.f32 %v3023_v0, %v944_v15  ;;  %2782 = vmatpush1.bf16.msra.mxu1 %v2781_v10  ;;  %v1327_v25 = vadd.f32 %v1199_v9, %v1071_v13  ;;  %v1080_v27 = vmul.f32 %v3023_v0, %v951_v23  ;;  %v1204_v28 = vld [vmem:[#allocation8 + $0x348] sm:$0xff]  ;;  %v953_v33 = vld [vmem:[#allocation6 + $0x378] sm:$0xff] }
  0x7f   :  { %v1201_v21 = vld [vmem:[#allocation8 + $0x330] sm:$0xff]  ;;  %v2783_v24 = vpack.c.bf16 %v1330_v12, %v1326_v11  ;;  %v1208_v29 = vld [vmem:[#allocation8 + $0x368] sm:$0xff]  ;;  %v1325_v31 = vadd.f32 %v1197_v16, %v1069_v19  ;;  %v1078_v34 = vmul.f32 %v3023_v0, %v949_v30  ;;  %v1206_v35 = vld [vmem:[#allocation8 + $0x358] sm:$0xff]  ;;  %v1332_v38 = vadd.f32 %v1204_v28, %v1076_v26 }
  0x80   :  { %2720 = vmatprep.subr.bf16.mxu0 %v2719_v17  ;;  %v1329_v32 = vadd.f32 %v1201_v21, %v1073_v20  ;;  %v1210_v36 = vld [vmem:[#allocation8 + $0x378] sm:$0xff]  ;;  %v2721_v37 = vpack.c.bf16 %v1327_v25, %v1323_v18  ;;  %v1336_v39 = vadd.f32 %v1208_v29, %v1080_v27  ;;  %v1082_v40 = vmul.f32 %v3023_v0, %v953_v33  ;;  %v946_v41 = vld [vmem:[#allocation6 + $0x340] sm:$0xff]  ;;  %v948_v49 = vld [vmem:[#allocation6 + $0x350] sm:$0xff] }
  0x81   :  { %2784 = vmatprep.subr.bf16.mxu1 %v2783_v24  ;;  %v950_v42 = vld [vmem:[#allocation6 + $0x360] sm:$0xff]  ;;  %v1334_v45 = vadd.f32 %v1206_v35, %v1078_v34  ;;  %v1075_v46 = vmul.f32 %v3023_v0, %v946_v41  ;;  %v952_v50 = vld [vmem:[#allocation6 + $0x370] sm:$0xff]  ;;  %v1077_v53 = vmul.f32 %v3023_v0, %v948_v49  ;;  %v955_v57 = vld [vmem:[#allocation6 + $0x388] sm:$0xff] }
  0x82   :  { %v1203_v43 = vld [vmem:[#allocation8 + $0x340] sm:$0xff]  ;;  %v2785_v44 = vpack.c.bf16 %v1329_v32, %v1325_v31  ;;  %v1079_v47 = vmul.f32 %v3023_v0, %v950_v42  ;;  %2722 = vmatpush1.bf16.msra.mxu0 %v2721_v37  ;;  %v2723_v51 = vpack.c.bf16 %v1336_v39, %v1332_v38  ;;  %v1338_v52 = vadd.f32 %v1210_v36, %v1082_v40  ;;  %v1205_v55 = vld [vmem:[#allocation8 + $0x350] sm:$0xff]  ;;  %v959_v60 = vld [vmem:[#allocation6 + $0x3a8] sm:$0xff] }
  0x83   :  { %v1207_v48 = vld [vmem:[#allocation8 + $0x360] sm:$0xff]  ;;  %v1081_v54 = vmul.f32 %v3023_v0, %v952_v50  ;;  %v1209_v56 = vld [vmem:[#allocation8 + $0x370] sm:$0xff]  ;;  %v1331_v58 = vadd.f32 %v1203_v43, %v1075_v46  ;;  %v1084_v61 = vmul.f32 %v3023_v0, %v955_v57  ;;  %v1212_v62 = vld [vmem:[#allocation8 + $0x388] sm:$0xff]  ;;  %v1333_v2 = vadd.f32 %v1205_v55, %v1077_v53 }
  0x84   :  { %2786 = vmatpush1.bf16.msra.mxu1 %v2785_v44  ;;  %v1335_v59 = vadd.f32 %v1207_v48, %v1079_v47  ;;  %v1216_v63 = vld [vmem:[#allocation8 + $0x3a8] sm:$0xff]  ;;  %2724 = vmatprep.subr.bf16.mxu0 %v2723_v51  ;;  %v2787_v1 = vpack.c.bf16 %v1338_v52, %v1334_v45  ;;  %v1088_v4 = vmul.f32 %v3023_v0, %v959_v60  ;;  %v957_v5 = vld [vmem:[#allocation6 + $0x398] sm:$0xff]  ;;  %v954_v13 = vld [vmem:[#allocation6 + $0x380] sm:$0xff] }
  0x85   :  { %v1337_v3 = vadd.f32 %v1209_v56, %v1081_v54  ;;  %v961_v6 = vld [vmem:[#allocation6 + $0x3b8] sm:$0xff]  ;;  %v1340_v9 = vadd.f32 %v1212_v62, %v1084_v61  ;;  %v1086_v10 = vmul.f32 %v3023_v0, %v957_v5  ;;  %v958_v14 = vld [vmem:[#allocation6 + $0x3a0] sm:$0xff]  ;;  %v1083_v17 = vmul.f32 %v3023_v0, %v954_v13  ;;  %v956_v21 = vld [vmem:[#allocation6 + $0x390] sm:$0xff] }
  0x86   :  { %v1214_v7 = vld [vmem:[#allocation8 + $0x398] sm:$0xff]  ;;  %v2725_v8 = vpack.c.bf16 %v1335_v59, %v1331_v58  ;;  %v1090_v11 = vmul.f32 %v3023_v0, %v961_v6  ;;  %2788 = vmatprep.subr.bf16.mxu1 %v2787_v1  ;;  %v1344_v16 = vadd.f32 %v1216_v63, %v1088_v4  ;;  %v1087_v18 = vmul.f32 %v3023_v0, %v958_v14  ;;  %v1211_v19 = vld [vmem:[#allocation8 + $0x380] sm:$0xff]  ;;  %v960_v24 = vld [vmem:[#allocation6 + $0x3b0] sm:$0xff] }
  0x87   :  { %v1218_v12 = vld [vmem:[#allocation8 + $0x3b8] sm:$0xff]  ;;  %v2789_v15 = vpack.c.bf16 %v1337_v3, %v1333_v2  ;;  %v1215_v20 = vld [vmem:[#allocation8 + $0x3a0] sm:$0xff]  ;;  %v1342_v22 = vadd.f32 %v1214_v7, %v1086_v10  ;;  %v1085_v25 = vmul.f32 %v3023_v0, %v956_v21  ;;  %v1213_v26 = vld [vmem:[#allocation8 + $0x390] sm:$0xff]  ;;  %v1339_v29 = vadd.f32 %v1211_v19, %v1083_v17 }
  0x88   :  { %2726 = vmatpush1.bf16.msra.mxu0 %v2725_v8  ;;  %v1346_v23 = vadd.f32 %v1218_v12, %v1090_v11  ;;  %v1217_v27 = vld [vmem:[#allocation8 + $0x3b0] sm:$0xff]  ;;  %v2727_v28 = vpack.c.bf16 %v1344_v16, %v1340_v9  ;;  %v1343_v30 = vadd.f32 %v1215_v20, %v1087_v18  ;;  %v1089_v31 = vmul.f32 %v3023_v0, %v960_v24  ;;  %v963_v32 = vld [vmem:[#allocation6 + $0x3c8] sm:$0xff]  ;;  %v965_v40 = vld [vmem:[#allocation6 + $0x3d8] sm:$0xff] }
  0x89   :  { %2790 = vmatpush1.bf16.msra.mxu1 %v2789_v15  ;;  %v967_v33 = vld [vmem:[#allocation6 + $0x3e8] sm:$0xff]  ;;  %v1341_v36 = vadd.f32 %v1213_v26, %v1085_v25  ;;  %v1092_v37 = vmul.f32 %v3023_v0, %v963_v32  ;;  %v969_v41 = vld [vmem:[#allocation6 + $0x3f8] sm:$0xff]  ;;  %v1094_v44 = vmul.f32 %v3023_v0, %v965_v40  ;;  %v962_v48 = vld [vmem:[#allocation6 + $0x3c0] sm:$0xff] }
  0x8a   :  { %v1220_v34 = vld [vmem:[#allocation8 + $0x3c8] sm:$0xff]  ;;  %v2791_v35 = vpack.c.bf16 %v1346_v23, %v1342_v22  ;;  %v1096_v38 = vmul.f32 %v3023_v0, %v967_v33  ;;  %2728 = vmatprep.subr.bf16.mxu0 %v2727_v28  ;;  %v2729_v42 = vpack.c.bf16 %v1343_v30, %v1339_v29  ;;  %v1345_v43 = vadd.f32 %v1217_v27, %v1089_v31  ;;  %v1222_v46 = vld [vmem:[#allocation8 + $0x3d8] sm:$0xff]  ;;  %v966_v51 = vld [vmem:[#allocation6 + $0x3e0] sm:$0xff] }
  0x8b   :  { %v1224_v39 = vld [vmem:[#allocation8 + $0x3e8] sm:$0xff]  ;;  %v1098_v45 = vmul.f32 %v3023_v0, %v969_v41  ;;  %v1226_v47 = vld [vmem:[#allocation8 + $0x3f8] sm:$0xff]  ;;  %v1348_v49 = vadd.f32 %v1220_v34, %v1092_v37  ;;  %v1091_v52 = vmul.f32 %v3023_v0, %v962_v48  ;;  %v1219_v53 = vld [vmem:[#allocation8 + $0x3c0] sm:$0xff]  ;;  %v1350_v56 = vadd.f32 %v1222_v46, %v1094_v44 }
  0x8c   :  { %2792 = vmatprep.subr.bf16.mxu1 %v2791_v35  ;;  %v1352_v50 = vadd.f32 %v1224_v39, %v1096_v38  ;;  %v1223_v54 = vld [vmem:[#allocation8 + $0x3e0] sm:$0xff]  ;;  %2730 = vmatpush1.bf16.msra.mxu0 %v2729_v42  ;;  %v2793_v55 = vpack.c.bf16 %v1345_v43, %v1341_v36  ;;  %v1095_v58 = vmul.f32 %v3023_v0, %v966_v51  ;;  %v964_v59 = vld [vmem:[#allocation6 + $0x3d0] sm:$0xff]  ;;  %v74_v4 = vld [vmem:[%s4557_s1 + $0x8] sm:$0xff] }
  0x8d   :  { %v1354_v57 = vadd.f32 %v1226_v47, %v1098_v45  ;;  %v968_v60 = vld [vmem:[#allocation6 + $0x3f0] sm:$0xff]  ;;  %v1347_v63 = vadd.f32 %v1219_v53, %v1091_v52  ;;  %v1093_v1 = vmul.f32 %v3023_v0, %v964_v59  ;;  %v202_v5 = vld [vmem:[#allocation3 + $0x8] sm:$0xff]  ;;  %v73_v10 = vld [vmem:[%s4557_s1] sm:$0xff] }
  0x8e   :  { %v1221_v61 = vld [vmem:[#allocation8 + $0x3d0] sm:$0xff]  ;;  %v2731_v62 = vpack.c.bf16 %v1352_v50, %v1348_v49  ;;  %v1097_v2 = vmul.f32 %v3023_v0, %v968_v60  ;;  %2794 = vmatpush1.bf16.msra.mxu1 %v2793_v55  ;;  %v1351_v7 = vadd.f32 %v1223_v54, %v1095_v58  ;;  %v330_v8 = vmul.f32 %v202_v5, %v74_v4  ;;  %v458_v9 = vld [vmem:[%s4558_s2 + $0x8] sm:$0xff]  ;;  %v201_v11 = vld [vmem:[#allocation3] sm:$0xff] }
  0x8f   :  { %v1225_v3 = vld [vmem:[#allocation8 + $0x3f0] sm:$0xff]  ;;  %v2795_v6 = vpack.c.bf16 %v1354_v57, %v1350_v56  ;;  %v1349_v0 = vadd.f32 %v1221_v61, %v1093_v1  ;;  %v329_v13 = vmul.f32 %v201_v11, %v73_v10  ;;  %v457_v14 = vld [vmem:[%s4558_s2] sm:$0xff]  ;;  %v76_v15 = vld [vmem:[%s4557_s1 + $0x18] sm:$0xff] }
  0x90   :  { %2732 = vmatprep.subr.bf16.mxu0 %v2731_v62  ;;  %v1353_v12 = vadd.f32 %v1225_v3, %v1097_v2  ;;  %v204_v16 = vld [vmem:[#allocation3 + $0x18] sm:$0xff]  ;;  %v2733_v17 = vpack.c.bf16 %v1351_v7, %v1347_v63  ;;  %v586_v18 = vadd.f32 %v458_v9, %v330_v8  ;;  %v75_v21 = vld [vmem:[%s4557_s1 + $0x10] sm:$0xff]  ;;  %v78_v27 = vld [vmem:[%s4557_s1 + $0x28] sm:$0xff] }
  0x91   :  { %2796 = vmatprep.subr.bf16.mxu1 %v2795_v6  ;;  %v332_v19 = vmul.f32 %v204_v16, %v76_v15  ;;  %v460_v20 = vld [vmem:[%s4558_s2 + $0x18] sm:$0xff]  ;;  %v203_v22 = vld [vmem:[#allocation3 + $0x10] sm:$0xff]  ;;  %v585_v24 = vadd.f32 %v457_v14, %v329_v13  ;;  %v206_v28 = vld [vmem:[#allocation3 + $0x28] sm:$0xff] }
  0x92   :  { %v2797_v23 = vpack.c.bf16 %v1353_v12, %v1349_v0  ;;  %v331_v25 = vmul.f32 %v203_v22, %v75_v21  ;;  %v459_v26 = vld [vmem:[%s4558_s2 + $0x10] sm:$0xff]  ;;  %2734 = vmatpush1.bf16.msra.mxu0 %v2733_v17  ;;  %714 = vst [vmem:[#allocation10 + $0x8] sm:$0xff] %v586_v18  ;;  %1547 = vmatprep.mubr.f32.mxu0 %v586_v18  ;;  %v462_v31 = vld [vmem:[%s4558_s2 + $0x28] sm:$0xff]  ;;  %v77_v32 = vld [vmem:[%s4557_s1 + $0x20] sm:$0xff] }
  0x93   :  { %v588_v29 = vadd.f32 %v460_v20, %v332_v19  ;;  %v334_v30 = vmul.f32 %v206_v28, %v78_v27  ;;  %v205_v33 = vld [vmem:[#allocation3 + $0x20] sm:$0xff]  ;;  %1996 = vmatprep.mubr.f32.mxu1 %v586_v18  ;;  %713 = vst [vmem:[#allocation10] sm:$0xff] %v585_v24  ;;  %v80_v37 = vld [vmem:[%s4557_s1 + $0x38] sm:$0xff]  ;;  %v79_v42 = vld [vmem:[%s4557_s1 + $0x30] sm:$0xff] }
  0x94   :  { %2798 = vmatpush1.bf16.msra.mxu1 %v2797_v23  ;;  %v587_v34 = vadd.f32 %v459_v26, %v331_v25  ;;  %v333_v35 = vmul.f32 %v205_v33, %v77_v32  ;;  %v461_v36 = vld [vmem:[%s4558_s2 + $0x20] sm:$0xff]  ;;  %v208_v38 = vld [vmem:[#allocation3 + $0x38] sm:$0xff]  ;;  %v207_v43 = vld [vmem:[#allocation3 + $0x30] sm:$0xff] }
  0x95   :  { %716 = vst [vmem:[#allocation10 + $0x18] sm:$0xff] %v588_v29  ;;  %v590_v39 = vadd.f32 %v462_v31, %v334_v30  ;;  %v336_v40 = vmul.f32 %v208_v38, %v80_v37  ;;  %v464_v41 = vld [vmem:[%s4558_s2 + $0x38] sm:$0xff]  ;;  %1548 = vmatmul.mubr.f32.vlgmr.msra.gmra.mrb[0].mxu0 %v585_v24  ;;  %v335_v45 = vmul.f32 %v207_v43, %v79_v42  ;;  %v463_v46 = vld [vmem:[%s4558_s2 + $0x30] sm:$0xff]  ;;  %v82_v47 = vld [vmem:[%s4557_s1 + $0x48] sm:$0xff] }
  0x96   :  { %715 = vst [vmem:[#allocation10 + $0x10] sm:$0xff] %v587_v34  ;;  %v589_v44 = vadd.f32 %v461_v36, %v333_v35  ;;  %v210_v48 = vld [vmem:[#allocation3 + $0x48] sm:$0xff]  ;;  %1553 = vmatprep.mubr.f32.mxu0 %v588_v29  ;;  %v81_v52 = vld [vmem:[%s4557_s1 + $0x40] sm:$0xff]  ;;  %v84_v57 = vld [vmem:[%s4557_s1 + $0x58] sm:$0xff] }
  0x97   :  { %1997 = vmatmul.mubr.f32.vlgmr.msra.gmra.mrb[0].mxu1 %v585_v24  ;;  %718 = vst [vmem:[#allocation10 + $0x28] sm:$0xff] %v590_v39  ;;  %v592_v49 = vadd.f32 %v464_v41, %v336_v40  ;;  %v338_v50 = vmul.f32 %v210_v48, %v82_v47  ;;  %v466_v51 = vld [vmem:[%s4558_s2 + $0x48] sm:$0xff]  ;;  %v209_v53 = vld [vmem:[#allocation3 + $0x40] sm:$0xff]  ;;  %v3210_v54 = vadd.f32 %v463_v46, %v335_v45  ;;  %v212_v58 = vld [vmem:[#allocation3 + $0x58] sm:$0xff] }
  0x98   :  { %2002 = vmatprep.mubr.f32.mxu1 %v588_v29  ;;  %717 = vst [vmem:[#allocation10 + $0x20] sm:$0xff] %v589_v44  ;;  %v337_v55 = vmul.f32 %v209_v53, %v81_v52  ;;  %v465_v56 = vld [vmem:[%s4558_s2 + $0x40] sm:$0xff]  ;;  %v340_v60 = vmul.f32 %v212_v58, %v84_v57  ;;  %v468_v61 = vld [vmem:[%s4558_s2 + $0x58] sm:$0xff]  ;;  %v83_v62 = vld [vmem:[%s4557_s1 + $0x50] sm:$0xff] }
  0x99   :  { %720 = vst [vmem:[#allocation10 + $0x38] sm:$0xff] %v592_v49  ;;  %v3218_v59 = vadd.f32 %v466_v51, %v338_v50  ;;  %v211_v63 = vld [vmem:[#allocation3 + $0x50] sm:$0xff]  ;;  %1554 = vmatmul.mubr.f32.gmra.mrb[2].mxu0 %v587_v34  ;;  %719 = vst [vmem:[#allocation10 + $0x30] sm:$0xff] %v3210_v54  ;;  %v86_v4 = vld [vmem:[%s4557_s1 + $0x68] sm:$0xff] }
  0x9a   :  { %v3227_v1 = vadd.f32 %v465_v56, %v337_v55  ;;  %v339_v2 = vmul.f32 %v211_v63, %v83_v62  ;;  %v467_v3 = vld [vmem:[%s4558_s2 + $0x50] sm:$0xff]  ;;  %v214_v5 = vld [vmem:[#allocation3 + $0x68] sm:$0xff]  ;;  %1559 = vmatprep.mubr.f32.mxu0 %v590_v39  ;;  %v3236_v6 = vadd.f32 %v468_v61, %v340_v60  ;;  %v85_v9 = vld [vmem:[%s4557_s1 + $0x60] sm:$0xff] }
  0x9b   :  { %2003 = vmatmul.mubr.f32.gmra.mrb[2].mxu1 %v587_v34  ;;  %722 = vst [vmem:[#allocation10 + $0x48] sm:$0xff] %v3218_v59  ;;  %v342_v7 = vmul.f32 %v214_v5, %v86_v4  ;;  %v470_v8 = vld [vmem:[%s4558_s2 + $0x68] sm:$0xff]  ;;  %v213_v10 = vld [vmem:[#allocation3 + $0x60] sm:$0xff]  ;;  %v88_v13 = vld [vmem:[%s4557_s1 + $0x78] sm:$0xff] }
  0x9c   :  { %2008 = vmatprep.mubr.f32.mxu1 %v590_v39  ;;  %721 = vst [vmem:[#allocation10 + $0x40] sm:$0xff] %v3227_v1  ;;  %v3245_v11 = vadd.f32 %v467_v3, %v339_v2  ;;  %v341_v0 = vmul.f32 %v213_v10, %v85_v9  ;;  %v469_v12 = vld [vmem:[%s4558_s2 + $0x60] sm:$0xff]  ;;  %v216_v14 = vld [vmem:[#allocation3 + $0x78] sm:$0xff]  ;;  %724 = vst [vmem:[#allocation10 + $0x58] sm:$0xff] %v3236_v6 }
  0x9d   :  { %v3254_v15 = vadd.f32 %v470_v8, %v342_v7  ;;  %v344_v16 = vmul.f32 %v216_v14, %v88_v13  ;;  %v472_v17 = vld [vmem:[%s4558_s2 + $0x78] sm:$0xff]  ;;  %v87_v18 = vld [vmem:[%s4557_s1 + $0x70] sm:$0xff]  ;;  %1560 = vmatmul.mubr.f32.gmra.mrb[4].mxu0 %v589_v44  ;;  %v90_v23 = vld [vmem:[%s4557_s1 + $0x88] sm:$0xff] }
  0x9e   :  { %v215_v19 = vld [vmem:[#allocation3 + $0x70] sm:$0xff]  ;;  %723 = vst [vmem:[#allocation10 + $0x50] sm:$0xff] %v3245_v11  ;;  %v3263_v20 = vadd.f32 %v469_v12, %v341_v0  ;;  %v218_v24 = vld [vmem:[#allocation3 + $0x88] sm:$0xff]  ;;  %1565 = vmatprep.mubr.f32.mxu0 %v592_v49  ;;  %v89_v28 = vld [vmem:[%s4557_s1 + $0x80] sm:$0xff] }
  0x9f   :  { %v343_v21 = vmul.f32 %v215_v19, %v87_v18  ;;  %v471_v22 = vld [vmem:[%s4558_s2 + $0x70] sm:$0xff]  ;;  %2009 = vmatmul.mubr.f32.gmra.mrb[4].mxu1 %v589_v44  ;;  %726 = vst [vmem:[#allocation10 + $0x68] sm:$0xff] %v3254_v15  ;;  %v3272_v25 = vadd.f32 %v472_v17, %v344_v16  ;;  %v346_v26 = vmul.f32 %v218_v24, %v90_v23  ;;  %v474_v27 = vld [vmem:[%s4558_s2 + $0x88] sm:$0xff]  ;;  %v217_v29 = vld [vmem:[#allocation3 + $0x80] sm:$0xff] }
  0xa0   :  { %2014 = vmatprep.mubr.f32.mxu1 %v592_v49  ;;  %725 = vst [vmem:[#allocation10 + $0x60] sm:$0xff] %v3263_v20  ;;  %v345_v31 = vmul.f32 %v217_v29, %v89_v28  ;;  %v473_v32 = vld [vmem:[%s4558_s2 + $0x80] sm:$0xff]  ;;  %v92_v33 = vld [vmem:[%s4557_s1 + $0x98] sm:$0xff]  ;;  %v91_v38 = vld [vmem:[%s4557_s1 + $0x90] sm:$0xff] }
  0xa1   :  { %v3281_v30 = vadd.f32 %v471_v22, %v343_v21  ;;  %v220_v34 = vld [vmem:[#allocation3 + $0x98] sm:$0xff]  ;;  %728 = vst [vmem:[#allocation10 + $0x78] sm:$0xff] %v3272_v25  ;;  %v3290_v35 = vadd.f32 %v474_v27, %v346_v26  ;;  %v219_v39 = vld [vmem:[#allocation3 + $0x90] sm:$0xff]  ;;  %1566 = vmatmul.mubr.f32.gmra.mrb[6].mxu0 %v3210_v54  ;;  %v94_v43 = vld [vmem:[%s4557_s1 + $0xa8] sm:$0xff] }
  0xa2   :  { %v348_v36 = vmul.f32 %v220_v34, %v92_v33  ;;  %v476_v37 = vld [vmem:[%s4558_s2 + $0x98] sm:$0xff]  ;;  %v3300_v40 = vadd.f32 %v473_v32, %v345_v31  ;;  %v347_v41 = vmul.f32 %v219_v39, %v91_v38  ;;  %v475_v42 = vld [vmem:[%s4558_s2 + $0x90] sm:$0xff]  ;;  %v222_v44 = vld [vmem:[#allocation3 + $0xa8] sm:$0xff]  ;;  %1571 = vmatprep.mubr.f32.mxu0 %v3218_v59 }
  0xa3   :  { %727 = vst [vmem:[#allocation10 + $0x70] sm:$0xff] %v3281_v30  ;;  %2015 = vmatmul.mubr.f32.gmra.mrb[6].mxu1 %v3210_v54  ;;  %730 = vst [vmem:[#allocation10 + $0x88] sm:$0xff] %v3290_v35  ;;  %v350_v46 = vmul.f32 %v222_v44, %v94_v43  ;;  %v478_v47 = vld [vmem:[%s4558_s2 + $0xa8] sm:$0xff]  ;;  %v93_v48 = vld [vmem:[%s4557_s1 + $0xa0] sm:$0xff] }
  0xa4   :  { %v3311_v45 = vadd.f32 %v476_v37, %v348_v36  ;;  %v221_v49 = vld [vmem:[#allocation3 + $0xa0] sm:$0xff]  ;;  %2020 = vmatprep.mubr.f32.mxu1 %v3218_v59  ;;  %729 = vst [vmem:[#allocation10 + $0x80] sm:$0xff] %v3300_v40  ;;  %v3321_v50 = vadd.f32 %v475_v42, %v347_v41  ;;  %v96_v53 = vld [vmem:[%s4557_s1 + $0xb8] sm:$0xff]  ;;  %v95_v58 = vld [vmem:[%s4557_s1 + $0xb0] sm:$0xff] }
  0xa5   :  { %v349_v51 = vmul.f32 %v221_v49, %v93_v48  ;;  %v477_v52 = vld [vmem:[%s4558_s2 + $0xa0] sm:$0xff]  ;;  %v224_v54 = vld [vmem:[#allocation3 + $0xb8] sm:$0xff]  ;;  %v3330_v55 = vadd.f32 %v478_v47, %v350_v46  ;;  %v223_v59 = vld [vmem:[#allocation3 + $0xb0] sm:$0xff]  ;;  %1572 = vmatmul.mubr.f32.gmra.mrb[8].mxu0 %v3227_v1 }
  0xa6   :  { %732 = vst [vmem:[#allocation10 + $0x98] sm:$0xff] %v3311_v45  ;;  %v352_v56 = vmul.f32 %v224_v54, %v96_v53  ;;  %v480_v57 = vld [vmem:[%s4558_s2 + $0xb8] sm:$0xff]  ;;  %731 = vst [vmem:[#allocation10 + $0x90] sm:$0xff] %v3321_v50  ;;  %v351_v61 = vmul.f32 %v223_v59, %v95_v58  ;;  %v479_v62 = vld [vmem:[%s4558_s2 + $0xb0] sm:$0xff]  ;;  %1577 = vmatprep.mubr.f32.mxu0 %v3236_v6 }
  0xa7   :  { %v3340_v60 = vadd.f32 %v477_v52, %v349_v51  ;;  %v98_v63 = vld [vmem:[%s4557_s1 + $0xc8] sm:$0xff]  ;;  %2021 = vmatmul.mubr.f32.gmra.mrb[8].mxu1 %v3227_v1  ;;  %734 = vst [vmem:[#allocation10 + $0xa8] sm:$0xff] %v3330_v55  ;;  %v97_v7 = vld [vmem:[%s4557_s1 + $0xc0] sm:$0xff]  ;;  %v100_v0 = vld [vmem:[%s4557_s1 + $0xd8] sm:$0xff] }
  0xa8   :  { %v226_v2 = vld [vmem:[#allocation3 + $0xc8] sm:$0xff]  ;;  %v3351_v3 = vadd.f32 %v480_v57, %v352_v56  ;;  %v225_v8 = vld [vmem:[#allocation3 + $0xc0] sm:$0xff]  ;;  %2026 = vmatprep.mubr.f32.mxu1 %v3236_v6  ;;  %v3361_v1 = vadd.f32 %v479_v62, %v351_v61  ;;  %v228_v12 = vld [vmem:[#allocation3 + $0xd8] sm:$0xff] }
  0xa9   :  { %v354_v4 = vmul.f32 %v226_v2, %v98_v63  ;;  %v482_v5 = vld [vmem:[%s4558_s2 + $0xc8] sm:$0xff]  ;;  %733 = vst [vmem:[#allocation10 + $0xa0] sm:$0xff] %v3340_v60  ;;  %v353_v9 = vmul.f32 %v225_v8, %v97_v7  ;;  %v481_v10 = vld [vmem:[%s4558_s2 + $0xc0] sm:$0xff]  ;;  %v356_v14 = vmul.f32 %v228_v12, %v100_v0  ;;  %v484_v6 = vld [vmem:[%s4558_s2 + $0xd8] sm:$0xff]  ;;  %1578 = vmatmul.mubr.f32.gmra.mrb[10].mxu0 %v3245_v11 }
  0xaa   :  { %736 = vst [vmem:[#allocation10 + $0xb8] sm:$0xff] %v3351_v3  ;;  %v99_v16 = vld [vmem:[%s4557_s1 + $0xd0] sm:$0xff]  ;;  %735 = vst [vmem:[#allocation10 + $0xb0] sm:$0xff] %v3361_v1  ;;  %v102_v22 = vld [vmem:[%s4557_s1 + $0xe8] sm:$0xff]  ;;  %1583 = vmatprep.mubr.f32.mxu0 %v3254_v15 }
  0xab   :  { %v3370_v13 = vadd.f32 %v482_v5, %v354_v4  ;;  %v227_v17 = vld [vmem:[#allocation3 + $0xd0] sm:$0xff]  ;;  %v3380_v18 = vadd.f32 %v481_v10, %v353_v9  ;;  %v230_v23 = vld [vmem:[#allocation3 + $0xe8] sm:$0xff]  ;;  %2027 = vmatmul.mubr.f32.gmra.mrb[10].mxu1 %v3245_v11  ;;  %v3391_v24 = vadd.f32 %v484_v6, %v356_v14  ;;  %v101_v28 = vld [vmem:[%s4557_s1 + $0xe0] sm:$0xff] }
  0xac   :  { %v355_v19 = vmul.f32 %v227_v17, %v99_v16  ;;  %v483_v21 = vld [vmem:[%s4558_s2 + $0xd0] sm:$0xff]  ;;  %v358_v26 = vmul.f32 %v230_v23, %v102_v22  ;;  %v486_v27 = vld [vmem:[%s4558_s2 + $0xe8] sm:$0xff]  ;;  %v229_v29 = vld [vmem:[#allocation3 + $0xe0] sm:$0xff]  ;;  %2032 = vmatprep.mubr.f32.mxu1 %v3254_v15 }
  0xad   :  { %738 = vst [vmem:[#allocation10 + $0xc8] sm:$0xff] %v3370_v13  ;;  %737 = vst [vmem:[#allocation10 + $0xc0] sm:$0xff] %v3380_v18  ;;  %v357_v31 = vmul.f32 %v229_v29, %v101_v28  ;;  %v485_v32 = vld [vmem:[%s4558_s2 + $0xe0] sm:$0xff]  ;;  %v104_v33 = vld [vmem:[%s4557_s1 + $0xf8] sm:$0xff]  ;;  %1584 = vmatmul.mubr.f32.gmra.mrb[12].mxu0 %v3263_v20 }
  0xae   :  { %v3401_v11 = vadd.f32 %v483_v21, %v355_v19  ;;  %v232_v34 = vld [vmem:[#allocation3 + $0xf8] sm:$0xff]  ;;  %740 = vst [vmem:[#allocation10 + $0xd8] sm:$0xff] %v3391_v24  ;;  %v3410_v36 = vadd.f32 %v486_v27, %v358_v26  ;;  %v103_v38 = vld [vmem:[%s4557_s1 + $0xf0] sm:$0xff]  ;;  %v106_v44 = vld [vmem:[%s4557_s1 + $0x108] sm:$0xff]  ;;  %1589 = vmatprep.mubr.f32.mxu0 %v3272_v25 }
  0xaf   :  { %v360_v37 = vmul.f32 %v232_v34, %v104_v33  ;;  %v488_v15 = vld [vmem:[%s4558_s2 + $0xf8] sm:$0xff]  ;;  %v231_v39 = vld [vmem:[#allocation3 + $0xf0] sm:$0xff]  ;;  %v3420_v41 = vadd.f32 %v485_v32, %v357_v31  ;;  %v234_v46 = vld [vmem:[#allocation3 + $0x108] sm:$0xff]  ;;  %2033 = vmatmul.mubr.f32.gmra.mrb[12].mxu1 %v3263_v20 }
  0xb0   :  { %739 = vst [vmem:[#allocation10 + $0xd0] sm:$0xff] %v3401_v11  ;;  %v359_v42 = vmul.f32 %v231_v39, %v103_v38  ;;  %v487_v43 = vld [vmem:[%s4558_s2 + $0xf0] sm:$0xff]  ;;  %742 = vst [vmem:[#allocation10 + $0xe8] sm:$0xff] %v3410_v36  ;;  %v362_v48 = vmul.f32 %v234_v46, %v106_v44  ;;  %v490_v49 = vld [vmem:[%s4558_s2 + $0x108] sm:$0xff]  ;;  %2038 = vmatprep.mubr.f32.mxu1 %v3272_v25 }
  0xb1   :  { %v3431_v47 = vadd.f32 %v488_v15, %v360_v37  ;;  %v105_v51 = vld [vmem:[%s4557_s1 + $0x100] sm:$0xff]  ;;  %741 = vst [vmem:[#allocation10 + $0xe0] sm:$0xff] %v3420_v41  ;;  %v108_v56 = vld [vmem:[%s4557_s1 + $0x118] sm:$0xff]  ;;  %v107_v61 = vld [vmem:[%s4557_s1 + $0x110] sm:$0xff]  ;;  %1590 = vmatmul.mubr.f32.gmra.mrb[14].mxu0 %v3281_v30 }
  0xb2   :  { %v233_v52 = vld [vmem:[#allocation3 + $0x100] sm:$0xff]  ;;  %v3441_v20 = vadd.f32 %v487_v43, %v359_v42  ;;  %v236_v57 = vld [vmem:[#allocation3 + $0x118] sm:$0xff]  ;;  %v3450_v58 = vadd.f32 %v490_v49, %v362_v48  ;;  %v235_v62 = vld [vmem:[#allocation3 + $0x110] sm:$0xff]  ;;  %1595 = vmatprep.mubr.f32.mxu0 %v3290_v35 }
  0xb3   :  { %v361_v53 = vmul.f32 %v233_v52, %v105_v51  ;;  %v489_v54 = vld [vmem:[%s4558_s2 + $0x100] sm:$0xff]  ;;  %744 = vst [vmem:[#allocation10 + $0xf8] sm:$0xff] %v3431_v47  ;;  %v364_v59 = vmul.f32 %v236_v57, %v108_v56  ;;  %v492_v25 = vld [vmem:[%s4558_s2 + $0x118] sm:$0xff]  ;;  %v363_v2 = vmul.f32 %v235_v62, %v107_v61  ;;  %v491_v4 = vld [vmem:[%s4558_s2 + $0x110] sm:$0xff]  ;;  %2039 = vmatmul.mubr.f32.gmra.mrb[14].mxu1 %v3281_v30 }
  0xb4   :  { %743 = vst [vmem:[#allocation10 + $0xf0] sm:$0xff] %v3441_v20  ;;  %v110_v5 = vld [vmem:[%s4557_s1 + $0x128] sm:$0xff]  ;;  %746 = vst [vmem:[#allocation10 + $0x108] sm:$0xff] %v3450_v58  ;;  %v109_v0 = vld [vmem:[%s4557_s1 + $0x120] sm:$0xff]  ;;  %2044 = vmatprep.mubr.f32.mxu1 %v3290_v35 }
  0xb5   :  { %v3460_v63 = vadd.f32 %v489_v54, %v361_v53  ;;  %v238_v7 = vld [vmem:[#allocation3 + $0x128] sm:$0xff]  ;;  %v3471_v8 = vadd.f32 %v492_v25, %v364_v59  ;;  %v237_v12 = vld [vmem:[#allocation3 + $0x120] sm:$0xff]  ;;  %v3481_v30 = vadd.f32 %v491_v4, %v363_v2  ;;  %v112_v16 = vld [vmem:[%s4557_s1 + $0x138] sm:$0xff]  ;;  %1596 = vmatmul.mubr.f32.gmra.mrb[16].mxu0 %v3300_v40 }
  0xb6   :  { %v366_v9 = vmul.f32 %v238_v7, %v110_v5  ;;  %v494_v10 = vld [vmem:[%s4558_s2 + $0x128] sm:$0xff]  ;;  %v365_v14 = vmul.f32 %v237_v12, %v109_v0  ;;  %v493_v6 = vld [vmem:[%s4558_s2 + $0x120] sm:$0xff]  ;;  %v240_v17 = vld [vmem:[#allocation3 + $0x138] sm:$0xff]  ;;  %1601 = vmatprep.mubr.f32.mxu0 %v3311_v45 }
  0xb7   :  { %745 = vst [vmem:[#allocation10 + $0x100] sm:$0xff] %v3460_v63  ;;  %748 = vst [vmem:[#allocation10 + $0x118] sm:$0xff] %v3471_v8  ;;  %v368_v21 = vmul.f32 %v240_v17, %v112_v16  ;;  %v496_v35 = vld [vmem:[%s4558_s2 + $0x138] sm:$0xff]  ;;  %v111_v22 = vld [vmem:[%s4557_s1 + $0x130] sm:$0xff]  ;;  %2045 = vmatmul.mubr.f32.gmra.mrb[16].mxu1 %v3300_v40 }
  0xb8   :  { %v3490_v19 = vadd.f32 %v494_v10, %v366_v9  ;;  %v239_v23 = vld [vmem:[#allocation3 + $0x130] sm:$0xff]  ;;  %747 = vst [vmem:[#allocation10 + $0x110] sm:$0xff] %v3481_v30  ;;  %v3500_v26 = vadd.f32 %v493_v6, %v365_v14  ;;  %v114_v29 = vld [vmem:[%s4557_s1 + $0x148] sm:$0xff]  ;;  %v113_v37 = vld [vmem:[%s4557_s1 + $0x140] sm:$0xff]  ;;  %2050 = vmatprep.mubr.f32.mxu1 %v3311_v45 }
  0xb9   :  { %v367_v27 = vmul.f32 %v239_v23, %v111_v22  ;;  %v495_v28 = vld [vmem:[%s4558_s2 + $0x130] sm:$0xff]  ;;  %v242_v31 = vld [vmem:[#allocation3 + $0x148] sm:$0xff]  ;;  %v3511_v32 = vadd.f32 %v496_v35, %v368_v21  ;;  %v241_v15 = vld [vmem:[#allocation3 + $0x140] sm:$0xff]  ;;  %1602 = vmatmul.mubr.f32.gmra.mrb[18].mxu0 %v3321_v50 }
  0xba   :  { %750 = vst [vmem:[#allocation10 + $0x128] sm:$0xff] %v3490_v19  ;;  %v370_v33 = vmul.f32 %v242_v31, %v114_v29  ;;  %v498_v34 = vld [vmem:[%s4558_s2 + $0x148] sm:$0xff]  ;;  %749 = vst [vmem:[#allocation10 + $0x120] sm:$0xff] %v3500_v26  ;;  %v369_v38 = vmul.f32 %v241_v15, %v113_v37  ;;  %v497_v39 = vld [vmem:[%s4558_s2 + $0x140] sm:$0xff]  ;;  %1607 = vmatprep.mubr.f32.mxu0 %v3330_v55 }
  0xbb   :  { %v3521_v40 = vadd.f32 %v495_v28, %v367_v27  ;;  %v116_v42 = vld [vmem:[%s4557_s1 + $0x158] sm:$0xff]  ;;  %752 = vst [vmem:[#allocation10 + $0x138] sm:$0xff] %v3511_v32  ;;  %v115_v48 = vld [vmem:[%s4557_s1 + $0x150] sm:$0xff]  ;;  %v118_v54 = vld [vmem:[%s4557_s1 + $0x168] sm:$0xff]  ;;  %2051 = vmatmul.mubr.f32.gmra.mrb[18].mxu1 %v3321_v50 }
  0xbc   :  { %v244_v43 = vld [vmem:[#allocation3 + $0x158] sm:$0xff]  ;;  %v3530_v44 = vadd.f32 %v498_v34, %v370_v33  ;;  %v243_v49 = vld [vmem:[#allocation3 + $0x150] sm:$0xff]  ;;  %v3540_v51 = vadd.f32 %v497_v39, %v369_v38  ;;  %v246_v56 = vld [vmem:[#allocation3 + $0x168] sm:$0xff]  ;;  %2056 = vmatprep.mubr.f32.mxu1 %v3330_v55 }
  0xbd   :  { %v372_v46 = vmul.f32 %v244_v43, %v116_v42  ;;  %v500_v45 = vld [vmem:[%s4558_s2 + $0x158] sm:$0xff]  ;;  %751 = vst [vmem:[#allocation10 + $0x130] sm:$0xff] %v3521_v40  ;;  %v371_v52 = vmul.f32 %v243_v49, %v115_v48  ;;  %v499_v53 = vld [vmem:[%s4558_s2 + $0x150] sm:$0xff]  ;;  %v374_v59 = vmul.f32 %v246_v56, %v118_v54  ;;  %v502_v25 = vld [vmem:[%s4558_s2 + $0x168] sm:$0xff]  ;;  %1608 = vmatmul.mubr.f32.gmra.mrb[20].mxu0 %v3340_v60 }
  0xbe   :  { %754 = vst [vmem:[#allocation10 + $0x148] sm:$0xff] %v3530_v44  ;;  %v117_v61 = vld [vmem:[%s4557_s1 + $0x160] sm:$0xff]  ;;  %753 = vst [vmem:[#allocation10 + $0x140] sm:$0xff] %v3540_v51  ;;  %v120_v5 = vld [vmem:[%s4557_s1 + $0x178] sm:$0xff]  ;;  %1613 = vmatprep.mubr.f32.mxu0 %v3351_v3 }
  0xbf   :  { %v3551_v57 = vadd.f32 %v500_v45, %v372_v46  ;;  %v245_v62 = vld [vmem:[#allocation3 + $0x160] sm:$0xff]  ;;  %v3561_v50 = vadd.f32 %v499_v53, %v371_v52  ;;  %v248_v7 = vld [vmem:[#allocation3 + $0x178] sm:$0xff]  ;;  %v3570_v9 = vadd.f32 %v502_v25, %v374_v59  ;;  %v119_v0 = vld [vmem:[%s4557_s1 + $0x170] sm:$0xff]  ;;  %2057 = vmatmul.mubr.f32.gmra.mrb[20].mxu1 %v3340_v60 }
  0xc0   :  { %v373_v2 = vmul.f32 %v245_v62, %v117_v61  ;;  %v501_v4 = vld [vmem:[%s4558_s2 + $0x160] sm:$0xff]  ;;  %v376_v10 = vmul.f32 %v248_v7, %v120_v5  ;;  %v504_v55 = vld [vmem:[%s4558_s2 + $0x178] sm:$0xff]  ;;  %v247_v12 = vld [vmem:[#allocation3 + $0x170] sm:$0xff]  ;;  %2062 = vmatprep.mubr.f32.mxu1 %v3351_v3 }
  0xc1   :  { %756 = vst [vmem:[#allocation10 + $0x158] sm:$0xff] %v3551_v57  ;;  %755 = vst [vmem:[#allocation10 + $0x150] sm:$0xff] %v3561_v50  ;;  %v375_v6 = vmul.f32 %v247_v12, %v119_v0  ;;  %v503_v16 = vld [vmem:[%s4558_s2 + $0x170] sm:$0xff]  ;;  %v122_v17 = vld [vmem:[%s4557_s1 + $0x188] sm:$0xff]  ;;  %1614 = vmatmul.mubr.f32.gmra.mrb[22].mxu0 %v3361_v1 }
  0xc2   :  { %v3580_v14 = vadd.f32 %v501_v4, %v373_v2  ;;  %v250_v21 = vld [vmem:[#allocation3 + $0x188] sm:$0xff]  ;;  %758 = vst [vmem:[#allocation10 + $0x168] sm:$0xff] %v3570_v9  ;;  %v3591_v35 = vadd.f32 %v504_v55, %v376_v10  ;;  %v121_v27 = vld [vmem:[%s4557_s1 + $0x180] sm:$0xff]  ;;  %v124_v33 = vld [vmem:[%s4557_s1 + $0x198] sm:$0xff]  ;;  %1619 = vmatprep.mubr.f32.mxu0 %v3370_v13 }
  0xc3   :  { %v378_v22 = vmul.f32 %v250_v21, %v122_v17  ;;  %v506_v23 = vld [vmem:[%s4558_s2 + $0x188] sm:$0xff]  ;;  %v249_v28 = vld [vmem:[#allocation3 + $0x180] sm:$0xff]  ;;  %v3601_v60 = vadd.f32 %v503_v16, %v375_v6  ;;  %v252_v34 = vld [vmem:[#allocation3 + $0x198] sm:$0xff]  ;;  %2063 = vmatmul.mubr.f32.gmra.mrb[22].mxu1 %v3361_v1 }
  0xc4   :  { %757 = vst [vmem:[#allocation10 + $0x160] sm:$0xff] %v3580_v14  ;;  %v377_v29 = vmul.f32 %v249_v28, %v121_v27  ;;  %v505_v31 = vld [vmem:[%s4558_s2 + $0x180] sm:$0xff]  ;;  %760 = vst [vmem:[#allocation10 + $0x178] sm:$0xff] %v3591_v35  ;;  %v380_v15 = vmul.f32 %v252_v34, %v124_v33  ;;  %v508_v3 = vld [vmem:[%s4558_s2 + $0x198] sm:$0xff]  ;;  %2068 = vmatprep.mubr.f32.mxu1 %v3370_v13 }
  0xc5   :  { %v3610_v37 = vadd.f32 %v506_v23, %v378_v22  ;;  %v123_v38 = vld [vmem:[%s4557_s1 + $0x190] sm:$0xff]  ;;  %759 = vst [vmem:[#allocation10 + $0x170] sm:$0xff] %v3601_v60  ;;  %v126_v45 = vld [vmem:[%s4557_s1 + $0x1a8] sm:$0xff]  ;;  %v125_v54 = vld [vmem:[%s4557_s1 + $0x1a0] sm:$0xff]  ;;  %1620 = vmatmul.mubr.f32.gmra.mrb[24].mxu0 %v3380_v18 }
  0xc6   :  { %v251_v39 = vld [vmem:[#allocation3 + $0x190] sm:$0xff]  ;;  %v3620_v42 = vadd.f32 %v505_v31, %v377_v29  ;;  %v254_v48 = vld [vmem:[#allocation3 + $0x1a8] sm:$0xff]  ;;  %v3631_v49 = vadd.f32 %v508_v3, %v380_v15  ;;  %v253_v56 = vld [vmem:[#allocation3 + $0x1a0] sm:$0xff]  ;;  %1625 = vmatprep.mubr.f32.mxu0 %v3391_v24 }
  0xc7   :  { %v379_v43 = vmul.f32 %v251_v39, %v123_v38  ;;  %v507_v46 = vld [vmem:[%s4558_s2 + $0x190] sm:$0xff]  ;;  %762 = vst [vmem:[#allocation10 + $0x188] sm:$0xff] %v3610_v37  ;;  %v382_v52 = vmul.f32 %v254_v48, %v126_v45  ;;  %v510_v53 = vld [vmem:[%s4558_s2 + $0x1a8] sm:$0xff]  ;;  %v381_v59 = vmul.f32 %v253_v56, %v125_v54  ;;  %v509_v25 = vld [vmem:[%s4558_s2 + $0x1a0] sm:$0xff]  ;;  %2069 = vmatmul.mubr.f32.gmra.mrb[24].mxu1 %v3380_v18 }
  0xc8   :  { %761 = vst [vmem:[#allocation10 + $0x180] sm:$0xff] %v3620_v42  ;;  %v128_v61 = vld [vmem:[%s4557_s1 + $0x1b8] sm:$0xff]  ;;  %764 = vst [vmem:[#allocation10 + $0x198] sm:$0xff] %v3631_v49  ;;  %v127_v5 = vld [vmem:[%s4557_s1 + $0x1b0] sm:$0xff]  ;;  %2074 = vmatprep.mubr.f32.mxu1 %v3391_v24 }
  0xc9   :  { %v3641_v1 = vadd.f32 %v507_v46, %v379_v43  ;;  %v256_v62 = vld [vmem:[#allocation3 + $0x1b8] sm:$0xff]  ;;  %v3650_v2 = vadd.f32 %v510_v53, %v382_v52  ;;  %v255_v7 = vld [vmem:[#allocation3 + $0x1b0] sm:$0xff]  ;;  %v3660_v10 = vadd.f32 %v509_v25, %v381_v59  ;;  %v130_v12 = vld [vmem:[%s4557_s1 + $0x1c8] sm:$0xff]  ;;  %1626 = vmatmul.mubr.f32.gmra.mrb[26].mxu0 %v3401_v11 }
  0xca   :  { %v384_v4 = vmul.f32 %v256_v62, %v128_v61  ;;  %v512_v13 = vld [vmem:[%s4558_s2 + $0x1b8] sm:$0xff]  ;;  %v383_v55 = vmul.f32 %v255_v7, %v127_v5  ;;  %v511_v0 = vld [vmem:[%s4558_s2 + $0x1b0] sm:$0xff]  ;;  %v258_v6 = vld [vmem:[#allocation3 + $0x1c8] sm:$0xff]  ;;  %1631 = vmatprep.mubr.f32.mxu0 %v3410_v36 }
  0xcb   :  { %763 = vst [vmem:[#allocation10 + $0x190] sm:$0xff] %v3641_v1  ;;  %766 = vst [vmem:[#allocation10 + $0x1a8] sm:$0xff] %v3650_v2  ;;  %v386_v17 = vmul.f32 %v258_v6, %v130_v12  ;;  %v514_v21 = vld [vmem:[%s4558_s2 + $0x1c8] sm:$0xff]  ;;  %v129_v22 = vld [vmem:[%s4557_s1 + $0x1c0] sm:$0xff]  ;;  %2075 = vmatmul.mubr.f32.gmra.mrb[26].mxu1 %v3401_v11 }
  0xcc   :  { %v3671_v16 = vadd.f32 %v512_v13, %v384_v4  ;;  %v257_v23 = vld [vmem:[#allocation3 + $0x1c0] sm:$0xff]  ;;  %765 = vst [vmem:[#allocation10 + $0x1a0] sm:$0xff] %v3660_v10  ;;  %v3681_v18 = vadd.f32 %v511_v0, %v383_v55  ;;  %v132_v29 = vld [vmem:[%s4557_s1 + $0x1d8] sm:$0xff]  ;;  %v131_v15 = vld [vmem:[%s4557_s1 + $0x1d0] sm:$0xff]  ;;  %2080 = vmatprep.mubr.f32.mxu1 %v3410_v36 }
  0xcd   :  { %v385_v27 = vmul.f32 %v257_v23, %v129_v22  ;;  %v513_v28 = vld [vmem:[%s4558_s2 + $0x1c0] sm:$0xff]  ;;  %v260_v31 = vld [vmem:[#allocation3 + $0x1d8] sm:$0xff]  ;;  %v3690_v33 = vadd.f32 %v514_v21, %v386_v17  ;;  %v259_v3 = vld [vmem:[#allocation3 + $0x1d0] sm:$0xff]  ;;  %1632 = vmatmul.mubr.f32.gmra.mrb[28].mxu0 %v3420_v41 }
  0xce   :  { %768 = vst [vmem:[#allocation10 + $0x1b8] sm:$0xff] %v3671_v16  ;;  %v388_v34 = vmul.f32 %v260_v31, %v132_v29  ;;  %v516_v24 = vld [vmem:[%s4558_s2 + $0x1d8] sm:$0xff]  ;;  %767 = vst [vmem:[#allocation10 + $0x1b0] sm:$0xff] %v3681_v18  ;;  %v387_v39 = vmul.f32 %v259_v3, %v131_v15  ;;  %v515_v43 = vld [vmem:[%s4558_s2 + $0x1d0] sm:$0xff]  ;;  %1637 = vmatprep.mubr.f32.mxu0 %v3431_v47 }
  0xcf   :  { %v3700_v38 = vadd.f32 %v513_v28, %v385_v27  ;;  %v134_v46 = vld [vmem:[%s4557_s1 + $0x1e8] sm:$0xff]  ;;  %770 = vst [vmem:[#allocation10 + $0x1c8] sm:$0xff] %v3690_v33  ;;  %v133_v54 = vld [vmem:[%s4557_s1 + $0x1e0] sm:$0xff]  ;;  %v136_v61 = vld [vmem:[%s4557_s1 + $0x1f8] sm:$0xff]  ;;  %2081 = vmatmul.mubr.f32.gmra.mrb[28].mxu1 %v3420_v41 }
  0xd0   :  { %v262_v45 = vld [vmem:[#allocation3 + $0x1e8] sm:$0xff]  ;;  %v3711_v48 = vadd.f32 %v516_v24, %v388_v34  ;;  %v261_v56 = vld [vmem:[#allocation3 + $0x1e0] sm:$0xff]  ;;  %v3721_v11 = vadd.f32 %v515_v43, %v387_v39  ;;  %v264_v62 = vld [vmem:[#allocation3 + $0x1f8] sm:$0xff]  ;;  %2086 = vmatprep.mubr.f32.mxu1 %v3431_v47 }
  0xd1   :  { %v390_v52 = vmul.f32 %v262_v45, %v134_v46  ;;  %v518_v53 = vld [vmem:[%s4558_s2 + $0x1e8] sm:$0xff]  ;;  %769 = vst [vmem:[#allocation10 + $0x1c0] sm:$0xff] %v3700_v38  ;;  %v389_v59 = vmul.f32 %v261_v56, %v133_v54  ;;  %v517_v25 = vld [vmem:[%s4558_s2 + $0x1e0] sm:$0xff]  ;;  %v392_v13 = vmul.f32 %v264_v62, %v136_v61  ;;  %v520_v36 = vld [vmem:[%s4558_s2 + $0x1f8] sm:$0xff]  ;;  %1638 = vmatmul.mubr.f32.gmra.mrb[30].mxu0 %v3441_v20 }
  0xd2   :  { %772 = vst [vmem:[#allocation10 + $0x1d8] sm:$0xff] %v3711_v48  ;;  %v135_v5 = vld [vmem:[%s4557_s1 + $0x1f0] sm:$0xff]  ;;  %771 = vst [vmem:[#allocation10 + $0x1d0] sm:$0xff] %v3721_v11  ;;  %v138_v6 = vld [vmem:[%s4557_s1 + $0x208] sm:$0xff]  ;;  %1643 = vmatprep.mubr.f32.mxu0 %v3450_v58 }
  0xd3   :  { %v3730_v4 = vadd.f32 %v518_v53, %v390_v52  ;;  %v263_v7 = vld [vmem:[#allocation3 + $0x1f0] sm:$0xff]  ;;  %v3740_v55 = vadd.f32 %v517_v25, %v389_v59  ;;  %v266_v17 = vld [vmem:[#allocation3 + $0x208] sm:$0xff]  ;;  %v3751_v21 = vadd.f32 %v520_v36, %v392_v13  ;;  %v137_v27 = vld [vmem:[%s4557_s1 + $0x200] sm:$0xff]  ;;  %2087 = vmatmul.mubr.f32.gmra.mrb[30].mxu1 %v3441_v20 }
  0xd4   :  { %v391_v0 = vmul.f32 %v263_v7, %v135_v5  ;;  %v519_v12 = vld [vmem:[%s4558_s2 + $0x1f0] sm:$0xff]  ;;  %v394_v22 = vmul.f32 %v266_v17, %v138_v6  ;;  %v522_v23 = vld [vmem:[%s4558_s2 + $0x208] sm:$0xff]  ;;  %v265_v28 = vld [vmem:[#allocation3 + $0x200] sm:$0xff]  ;;  %2092 = vmatprep.mubr.f32.mxu1 %v3450_v58 }
  0xd5   :  { %774 = vst [vmem:[#allocation10 + $0x1e8] sm:$0xff] %v3730_v4  ;;  %773 = vst [vmem:[#allocation10 + $0x1e0] sm:$0xff] %v3740_v55  ;;  %v393_v29 = vmul.f32 %v265_v28, %v137_v27  ;;  %v521_v31 = vld [vmem:[%s4558_s2 + $0x200] sm:$0xff]  ;;  %v140_v34 = vld [vmem:[%s4557_s1 + $0x218] sm:$0xff]  ;;  %1644 = vmatmul.mubr.f32.gmra.mrb[32].mxu0 %v3460_v63 }
  0xd6   :  { %v3761_v41 = vadd.f32 %v519_v12, %v391_v0  ;;  %v268_v24 = vld [vmem:[#allocation3 + $0x218] sm:$0xff]  ;;  %776 = vst [vmem:[#allocation10 + $0x1f8] sm:$0xff] %v3751_v21  ;;  %v3770_v15 = vadd.f32 %v522_v23, %v394_v22  ;;  %v139_v39 = vld [vmem:[%s4557_s1 + $0x210] sm:$0xff]  ;;  %v142_v53 = vld [vmem:[%s4557_s1 + $0x228] sm:$0xff]  ;;  %1649 = vmatprep.mubr.f32.mxu0 %v3471_v8 }
  0xd7   :  { %v396_v3 = vmul.f32 %v268_v24, %v140_v34  ;;  %v524_v47 = vld [vmem:[%s4558_s2 + $0x218] sm:$0xff]  ;;  %v267_v43 = vld [vmem:[#allocation3 + $0x210] sm:$0xff]  ;;  %v3780_v46 = vadd.f32 %v521_v31, %v393_v29  ;;  %v270_v54 = vld [vmem:[#allocation3 + $0x228] sm:$0xff]  ;;  %2093 = vmatmul.mubr.f32.gmra.mrb[32].mxu1 %v3460_v63 }
  0xd8   :  { %775 = vst [vmem:[#allocation10 + $0x1f0] sm:$0xff] %v3761_v41  ;;  %v395_v45 = vmul.f32 %v267_v43, %v139_v39  ;;  %v523_v52 = vld [vmem:[%s4558_s2 + $0x210] sm:$0xff]  ;;  %778 = vst [vmem:[#allocation10 + $0x208] sm:$0xff] %v3770_v15  ;;  %v398_v59 = vmul.f32 %v270_v54, %v142_v53  ;;  %v526_v25 = vld [vmem:[%s4558_s2 + $0x228] sm:$0xff]  ;;  %2098 = vmatprep.mubr.f32.mxu1 %v3471_v8 }
  0xd9   :  { %v3791_v56 = vadd.f32 %v524_v47, %v396_v3  ;;  %v141_v61 = vld [vmem:[%s4557_s1 + $0x220] sm:$0xff]  ;;  %777 = vst [vmem:[#allocation10 + $0x200] sm:$0xff] %v3780_v46  ;;  %v144_v5 = vld [vmem:[%s4557_s1 + $0x238] sm:$0xff]  ;;  %v143_v6 = vld [vmem:[%s4557_s1 + $0x230] sm:$0xff]  ;;  %1650 = vmatmul.mubr.f32.gmra.mrb[34].mxu0 %v3481_v30 }
  0xda   :  { %v269_v62 = vld [vmem:[#allocation3 + $0x220] sm:$0xff]  ;;  %v3801_v20 = vadd.f32 %v523_v52, %v395_v45  ;;  %v272_v7 = vld [vmem:[#allocation3 + $0x238] sm:$0xff]  ;;  %v3810_v0 = vadd.f32 %v526_v25, %v398_v59  ;;  %v271_v17 = vld [vmem:[#allocation3 + $0x230] sm:$0xff]  ;;  %1655 = vmatprep.mubr.f32.mxu0 %v3490_v19 }
  0xdb   :  { %v397_v13 = vmul.f32 %v269_v62, %v141_v61  ;;  %v525_v36 = vld [vmem:[%s4558_s2 + $0x220] sm:$0xff]  ;;  %780 = vst [vmem:[#allocation10 + $0x218] sm:$0xff] %v3791_v56  ;;  %v400_v12 = vmul.f32 %v272_v7, %v144_v5  ;;  %v528_v58 = vld [vmem:[%s4558_s2 + $0x238] sm:$0xff]  ;;  %v399_v23 = vmul.f32 %v271_v17, %v143_v6  ;;  %v527_v27 = vld [vmem:[%s4558_s2 + $0x230] sm:$0xff]  ;;  %2099 = vmatmul.mubr.f32.gmra.mrb[34].mxu1 %v3481_v30 }
  0xdc   :  { %779 = vst [vmem:[#allocation10 + $0x210] sm:$0xff] %v3801_v20  ;;  %v146_v28 = vld [vmem:[%s4557_s1 + $0x248] sm:$0xff]  ;;  %782 = vst [vmem:[#allocation10 + $0x228] sm:$0xff] %v3810_v0  ;;  %v145_v3 = vld [vmem:[%s4557_s1 + $0x240] sm:$0xff]  ;;  %2104 = vmatprep.mubr.f32.mxu1 %v3490_v19 }
  0xdd   :  { %v3820_v22 = vadd.f32 %v525_v36, %v397_v13  ;;  %v274_v29 = vld [vmem:[#allocation3 + $0x248] sm:$0xff]  ;;  %v3831_v31 = vadd.f32 %v528_v58, %v400_v12  ;;  %v273_v47 = vld [vmem:[#allocation3 + $0x240] sm:$0xff]  ;;  %v3841_v63 = vadd.f32 %v527_v27, %v399_v23  ;;  %v148_v45 = vld [vmem:[%s4557_s1 + $0x258] sm:$0xff]  ;;  %1656 = vmatmul.mubr.f32.gmra.mrb[36].mxu0 %v3500_v26 }
  0xde   :  { %v402_v34 = vmul.f32 %v274_v29, %v146_v28  ;;  %v530_v24 = vld [vmem:[%s4558_s2 + $0x248] sm:$0xff]  ;;  %v401_v39 = vmul.f32 %v273_v47, %v145_v3  ;;  %v529_v43 = vld [vmem:[%s4558_s2 + $0x240] sm:$0xff]  ;;  %v276_v52 = vld [vmem:[#allocation3 + $0x258] sm:$0xff]  ;;  %1661 = vmatprep.mubr.f32.mxu0 %v3511_v32 }
  0xdf   :  { %781 = vst [vmem:[#allocation10 + $0x220] sm:$0xff] %v3820_v22  ;;  %784 = vst [vmem:[#allocation10 + $0x238] sm:$0xff] %v3831_v31  ;;  %v404_v54 = vmul.f32 %v276_v52, %v148_v45  ;;  %v532_v8 = vld [vmem:[%s4558_s2 + $0x258] sm:$0xff]  ;;  %v147_v59 = vld [vmem:[%s4557_s1 + $0x250] sm:$0xff]  ;;  %2105 = vmatmul.mubr.f32.gmra.mrb[36].mxu1 %v3500_v26 }
  0xe0   :  { %v3850_v53 = vadd.f32 %v530_v24, %v402_v34  ;;  %v275_v25 = vld [vmem:[#allocation3 + $0x250] sm:$0xff]  ;;  %783 = vst [vmem:[#allocation10 + $0x230] sm:$0xff] %v3841_v63  ;;  %v3860_v61 = vadd.f32 %v529_v43, %v401_v39  ;;  %v150_v36 = vld [vmem:[%s4557_s1 + $0x268] sm:$0xff]  ;;  %v149_v6 = vld [vmem:[%s4557_s1 + $0x260] sm:$0xff]  ;;  %2110 = vmatprep.mubr.f32.mxu1 %v3511_v32 }
  0xe1   :  { %v403_v62 = vmul.f32 %v275_v25, %v147_v59  ;;  %v531_v13 = vld [vmem:[%s4558_s2 + $0x250] sm:$0xff]  ;;  %v278_v5 = vld [vmem:[#allocation3 + $0x268] sm:$0xff]  ;;  %v3871_v7 = vadd.f32 %v532_v8, %v404_v54  ;;  %v277_v17 = vld [vmem:[#allocation3 + $0x260] sm:$0xff]  ;;  %1662 = vmatmul.mubr.f32.gmra.mrb[38].mxu0 %v3521_v40 }
  0xe2   :  { %786 = vst [vmem:[#allocation10 + $0x248] sm:$0xff] %v3850_v53  ;;  %v406_v12 = vmul.f32 %v278_v5, %v150_v36  ;;  %v534_v58 = vld [vmem:[%s4558_s2 + $0x268] sm:$0xff]  ;;  %785 = vst [vmem:[#allocation10 + $0x240] sm:$0xff] %v3860_v61  ;;  %v405_v23 = vmul.f32 %v277_v17, %v149_v6  ;;  %v533_v27 = vld [vmem:[%s4558_s2 + $0x260] sm:$0xff]  ;;  %1667 = vmatprep.mubr.f32.mxu0 %v3530_v44 }
  0xe3   :  { %v3881_v30 = vadd.f32 %v531_v13, %v403_v62  ;;  %v152_v28 = vld [vmem:[%s4557_s1 + $0x278] sm:$0xff]  ;;  %788 = vst [vmem:[#allocation10 + $0x258] sm:$0xff] %v3871_v7  ;;  %v151_v3 = vld [vmem:[%s4557_s1 + $0x270] sm:$0xff]  ;;  %v154_v52 = vld [vmem:[%s4557_s1 + $0x288] sm:$0xff]  ;;  %2111 = vmatmul.mubr.f32.gmra.mrb[38].mxu1 %v3521_v40 }
  0xe4   :  { %v280_v29 = vld [vmem:[#allocation3 + $0x278] sm:$0xff]  ;;  %v3890_v34 = vadd.f32 %v534_v58, %v406_v12  ;;  %v279_v47 = vld [vmem:[#allocation3 + $0x270] sm:$0xff]  ;;  %v3900_v39 = vadd.f32 %v533_v27, %v405_v23  ;;  %v282_v54 = vld [vmem:[#allocation3 + $0x288] sm:$0xff]  ;;  %2116 = vmatprep.mubr.f32.mxu1 %v3530_v44 }
  0xe5   :  { %v408_v24 = vmul.f32 %v280_v29, %v152_v28  ;;  %v536_v19 = vld [vmem:[%s4558_s2 + $0x278] sm:$0xff]  ;;  %787 = vst [vmem:[#allocation10 + $0x250] sm:$0xff] %v3881_v30  ;;  %v407_v43 = vmul.f32 %v279_v47, %v151_v3  ;;  %v535_v45 = vld [vmem:[%s4558_s2 + $0x270] sm:$0xff]  ;;  %v410_v59 = vmul.f32 %v282_v54, %v154_v52  ;;  %v538_v25 = vld [vmem:[%s4558_s2 + $0x288] sm:$0xff]  ;;  %1668 = vmatmul.mubr.f32.gmra.mrb[40].mxu0 %v3540_v51 }
  0xe6   :  { %790 = vst [vmem:[#allocation10 + $0x268] sm:$0xff] %v3890_v34  ;;  %v153_v62 = vld [vmem:[%s4557_s1 + $0x280] sm:$0xff]  ;;  %789 = vst [vmem:[#allocation10 + $0x260] sm:$0xff] %v3900_v39  ;;  %v156_v12 = vld [vmem:[%s4557_s1 + $0x298] sm:$0xff]  ;;  %1673 = vmatprep.mubr.f32.mxu0 %v3551_v57 }
  0xe7   :  { %v3911_v8 = vadd.f32 %v536_v19, %v408_v24  ;;  %v281_v13 = vld [vmem:[#allocation3 + $0x280] sm:$0xff]  ;;  %v3921_v26 = vadd.f32 %v535_v45, %v407_v43  ;;  %v284_v58 = vld [vmem:[#allocation3 + $0x298] sm:$0xff]  ;;  %v3930_v6 = vadd.f32 %v538_v25, %v410_v59  ;;  %v155_v23 = vld [vmem:[%s4557_s1 + $0x290] sm:$0xff]  ;;  %2117 = vmatmul.mubr.f32.gmra.mrb[40].mxu1 %v3540_v51 }
  0xe8   :  { %v409_v36 = vmul.f32 %v281_v13, %v153_v62  ;;  %v537_v5 = vld [vmem:[%s4558_s2 + $0x280] sm:$0xff]  ;;  %v412_v17 = vmul.f32 %v284_v58, %v156_v12  ;;  %v540_v32 = vld [vmem:[%s4558_s2 + $0x298] sm:$0xff]  ;;  %v283_v27 = vld [vmem:[#allocation3 + $0x290] sm:$0xff]  ;;  %2122 = vmatprep.mubr.f32.mxu1 %v3551_v57 }
  0xe9   :  { %792 = vst [vmem:[#allocation10 + $0x278] sm:$0xff] %v3911_v8  ;;  %791 = vst [vmem:[#allocation10 + $0x270] sm:$0xff] %v3921_v26  ;;  %v411_v29 = vmul.f32 %v283_v27, %v155_v23  ;;  %v539_v24 = vld [vmem:[%s4558_s2 + $0x290] sm:$0xff]  ;;  %v158_v19 = vld [vmem:[%s4557_s1 + $0x2a8] sm:$0xff]  ;;  %1674 = vmatmul.mubr.f32.gmra.mrb[42].mxu0 %v3561_v50 }
  0xea   :  { %v3940_v28 = vadd.f32 %v537_v5, %v409_v36  ;;  %v286_v3 = vld [vmem:[#allocation3 + $0x2a8] sm:$0xff]  ;;  %794 = vst [vmem:[#allocation10 + $0x288] sm:$0xff] %v3930_v6  ;;  %v3951_v47 = vadd.f32 %v540_v32, %v412_v17  ;;  %v157_v52 = vld [vmem:[%s4557_s1 + $0x2a0] sm:$0xff]  ;;  %v160_v62 = vld [vmem:[%s4557_s1 + $0x2b8] sm:$0xff]  ;;  %1679 = vmatprep.mubr.f32.mxu0 %v3570_v9 }
  0xeb   :  { %v414_v43 = vmul.f32 %v286_v3, %v158_v19  ;;  %v542_v45 = vld [vmem:[%s4558_s2 + $0x2a8] sm:$0xff]  ;;  %v285_v54 = vld [vmem:[#allocation3 + $0x2a0] sm:$0xff]  ;;  %v3961_v40 = vadd.f32 %v539_v24, %v411_v29  ;;  %v288_v13 = vld [vmem:[#allocation3 + $0x2b8] sm:$0xff]  ;;  %2123 = vmatmul.mubr.f32.gmra.mrb[42].mxu1 %v3561_v50 }
  0xec   :  { %793 = vst [vmem:[#allocation10 + $0x280] sm:$0xff] %v3940_v28  ;;  %v413_v59 = vmul.f32 %v285_v54, %v157_v52  ;;  %v541_v25 = vld [vmem:[%s4558_s2 + $0x2a0] sm:$0xff]  ;;  %796 = vst [vmem:[#allocation10 + $0x298] sm:$0xff] %v3951_v47  ;;  %v416_v5 = vmul.f32 %v288_v13, %v160_v62  ;;  %v544_v44 = vld [vmem:[%s4558_s2 + $0x2b8] sm:$0xff]  ;;  %2128 = vmatprep.mubr.f32.mxu1 %v3570_v9 }
  0xed   :  { %v3970_v36 = vadd.f32 %v542_v45, %v414_v43  ;;  %v159_v12 = vld [vmem:[%s4557_s1 + $0x2b0] sm:$0xff]  ;;  %795 = vst [vmem:[#allocation10 + $0x290] sm:$0xff] %v3961_v40  ;;  %v162_v27 = vld [vmem:[%s4557_s1 + $0x2c8] sm:$0xff]  ;;  %v161_v43 = vld [vmem:[%s4557_s1 + $0x2c0] sm:$0xff]  ;;  %1680 = vmatmul.mubr.f32.gmra.mrb[44].mxu0 %v3580_v14 }
  0xee   :  { %v287_v58 = vld [vmem:[#allocation3 + $0x2b0] sm:$0xff]  ;;  %v3980_v17 = vadd.f32 %v541_v25, %v413_v59  ;;  %v290_v29 = vld [vmem:[#allocation3 + $0x2c8] sm:$0xff]  ;;  %v3991_v24 = vadd.f32 %v544_v44, %v416_v5  ;;  %v289_v45 = vld [vmem:[#allocation3 + $0x2c0] sm:$0xff]  ;;  %1685 = vmatprep.mubr.f32.mxu0 %v3591_v35 }
  0xef   :  { %v415_v32 = vmul.f32 %v287_v58, %v159_v12  ;;  %v543_v23 = vld [vmem:[%s4558_s2 + $0x2b0] sm:$0xff]  ;;  %798 = vst [vmem:[#allocation10 + $0x2a8] sm:$0xff] %v3970_v36  ;;  %v418_v19 = vmul.f32 %v290_v29, %v162_v27  ;;  %v546_v3 = vld [vmem:[%s4558_s2 + $0x2c8] sm:$0xff]  ;;  %v417_v52 = vmul.f32 %v289_v45, %v161_v43  ;;  %v545_v54 = vld [vmem:[%s4558_s2 + $0x2c0] sm:$0xff]  ;;  %2129 = vmatmul.mubr.f32.gmra.mrb[44].mxu1 %v3580_v14 }
  0xf0   :  { %797 = vst [vmem:[#allocation10 + $0x2a0] sm:$0xff] %v3980_v17  ;;  %v164_v59 = vld [vmem:[%s4557_s1 + $0x2d8] sm:$0xff]  ;;  %800 = vst [vmem:[#allocation10 + $0x2b8] sm:$0xff] %v3991_v24  ;;  %v163_v5 = vld [vmem:[%s4557_s1 + $0x2d0] sm:$0xff]  ;;  %2134 = vmatprep.mubr.f32.mxu1 %v3591_v35 }
  0xf1   :  { %v4001_v51 = vadd.f32 %v543_v23, %v415_v32  ;;  %v292_v25 = vld [vmem:[#allocation3 + $0x2d8] sm:$0xff]  ;;  %v4010_v62 = vadd.f32 %v546_v3, %v418_v19  ;;  %v291_v44 = vld [vmem:[#allocation3 + $0x2d0] sm:$0xff]  ;;  %v4020_v12 = vadd.f32 %v545_v54, %v417_v52  ;;  %v166_v23 = vld [vmem:[%s4557_s1 + $0x2e8] sm:$0xff]  ;;  %1686 = vmatmul.mubr.f32.gmra.mrb[46].mxu0 %v3601_v60 }
  0xf2   :  { %v420_v13 = vmul.f32 %v292_v25, %v164_v59  ;;  %v548_v57 = vld [vmem:[%s4558_s2 + $0x2d8] sm:$0xff]  ;;  %v419_v58 = vmul.f32 %v291_v44, %v163_v5  ;;  %v547_v32 = vld [vmem:[%s4558_s2 + $0x2d0] sm:$0xff]  ;;  %v294_v27 = vld [vmem:[#allocation3 + $0x2e8] sm:$0xff]  ;;  %1691 = vmatprep.mubr.f32.mxu0 %v3610_v37 }
  0xf3   :  { %799 = vst [vmem:[#allocation10 + $0x2b0] sm:$0xff] %v4001_v51  ;;  %802 = vst [vmem:[#allocation10 + $0x2c8] sm:$0xff] %v4010_v62  ;;  %v422_v19 = vmul.f32 %v294_v27, %v166_v23  ;;  %v550_v3 = vld [vmem:[%s4558_s2 + $0x2e8] sm:$0xff]  ;;  %v165_v43 = vld [vmem:[%s4557_s1 + $0x2e0] sm:$0xff]  ;;  %2135 = vmatmul.mubr.f32.gmra.mrb[46].mxu1 %v3601_v60 }
  0xf4   :  { %v4031_v29 = vadd.f32 %v548_v57, %v420_v13  ;;  %v293_v45 = vld [vmem:[#allocation3 + $0x2e0] sm:$0xff]  ;;  %801 = vst [vmem:[#allocation10 + $0x2c0] sm:$0xff] %v4020_v12  ;;  %v4041_v50 = vadd.f32 %v547_v32, %v419_v58  ;;  %v168_v59 = vld [vmem:[%s4557_s1 + $0x2f8] sm:$0xff]  ;;  %v167_v5 = vld [vmem:[%s4557_s1 + $0x2f0] sm:$0xff]  ;;  %2140 = vmatprep.mubr.f32.mxu1 %v3610_v37 }
  0xf5   :  { %v421_v52 = vmul.f32 %v293_v45, %v165_v43  ;;  %v549_v54 = vld [vmem:[%s4558_s2 + $0x2e0] sm:$0xff]  ;;  %v296_v25 = vld [vmem:[#allocation3 + $0x2f8] sm:$0xff]  ;;  %v4050_v13 = vadd.f32 %v550_v3, %v422_v19  ;;  %v295_v44 = vld [vmem:[#allocation3 + $0x2f0] sm:$0xff]  ;;  %1692 = vmatmul.mubr.f32.gmra.mrb[48].mxu0 %v3620_v42 }
  0xf6   :  { %804 = vst [vmem:[#allocation10 + $0x2d8] sm:$0xff] %v4031_v29  ;;  %v424_v57 = vmul.f32 %v296_v25, %v168_v59  ;;  %v552_v9 = vld [vmem:[%s4558_s2 + $0x2f8] sm:$0xff]  ;;  %803 = vst [vmem:[#allocation10 + $0x2d0] sm:$0xff] %v4041_v50  ;;  %v423_v32 = vmul.f32 %v295_v44, %v167_v5  ;;  %v551_v23 = vld [vmem:[%s4558_s2 + $0x2f0] sm:$0xff]  ;;  %1697 = vmatprep.mubr.f32.mxu0 %v3631_v49 }
  0xf7   :  { %v4060_v58 = vadd.f32 %v549_v54, %v421_v52  ;;  %v170_v27 = vld [vmem:[%s4557_s1 + $0x308] sm:$0xff]  ;;  %806 = vst [vmem:[#allocation10 + $0x2e8] sm:$0xff] %v4050_v13  ;;  %v169_v52 = vld [vmem:[%s4557_s1 + $0x300] sm:$0xff]  ;;  %v556_v35 = vld [vmem:[%s4558_s2 + $0x318] sm:$0xff]  ;;  %2141 = vmatmul.mubr.f32.gmra.mrb[48].mxu1 %v3620_v42 }
  0xf8   :  { %v298_v19 = vld [vmem:[#allocation3 + $0x308] sm:$0xff]  ;;  %v4071_v3 = vadd.f32 %v552_v9, %v424_v57  ;;  %v297_v54 = vld [vmem:[#allocation3 + $0x300] sm:$0xff]  ;;  %v4081_v14 = vadd.f32 %v551_v23, %v423_v32  ;;  %v172_v57 = vld [vmem:[%s4557_s1 + $0x318] sm:$0xff]  ;;  %2146 = vmatprep.mubr.f32.mxu1 %v3631_v49 }
  0xf9   :  { %v426_v43 = vmul.f32 %v298_v19, %v170_v27  ;;  %v554_v45 = vld [vmem:[%s4558_s2 + $0x308] sm:$0xff]  ;;  %805 = vst [vmem:[#allocation10 + $0x2e0] sm:$0xff] %v4060_v58  ;;  %v425_v59 = vmul.f32 %v297_v54, %v169_v52  ;;  %v553_v25 = vld [vmem:[%s4558_s2 + $0x300] sm:$0xff]  ;;  %v300_v9 = vld [vmem:[#allocation3 + $0x318] sm:$0xff]  ;;  %1698 = vmatmul.mubr.f32.gmra.mrb[50].mxu0 %v3641_v1 }
  0xfa   :  { %808 = vst [vmem:[#allocation10 + $0x2f8] sm:$0xff] %v4071_v3  ;;  %v428_v44 = vmul.f32 %v300_v9, %v172_v57  ;;  %v171_v32 = vld [vmem:[%s4557_s1 + $0x310] sm:$0xff]  ;;  %807 = vst [vmem:[#allocation10 + $0x2f0] sm:$0xff] %v4081_v14  ;;  %v302_v52 = vld [vmem:[#allocation3 + $0x328] sm:$0xff]  ;;  %1703 = vmatprep.mubr.f32.mxu0 %v3650_v2 }
  0xfb   :  { %v4090_v5 = vadd.f32 %v554_v45, %v426_v43  ;;  %v299_v23 = vld [vmem:[#allocation3 + $0x310] sm:$0xff]  ;;  %v4100_v27 = vadd.f32 %v553_v25, %v425_v59  ;;  %v174_v45 = vld [vmem:[%s4557_s1 + $0x328] sm:$0xff]  ;;  %v173_v57 = vld [vmem:[%s4557_s1 + $0x320] sm:$0xff]  ;;  %2147 = vmatmul.mubr.f32.gmra.mrb[50].mxu1 %v3641_v1 }
  0xfc   :  { %v427_v19 = vmul.f32 %v299_v23, %v171_v32  ;;  %v555_v43 = vld [vmem:[%s4558_s2 + $0x310] sm:$0xff]  ;;  %v4111_v54 = vadd.f32 %v556_v35, %v428_v44  ;;  %v430_v59 = vmul.f32 %v302_v52, %v174_v45  ;;  %v558_v25 = vld [vmem:[%s4558_s2 + $0x328] sm:$0xff]  ;;  %v301_v9 = vld [vmem:[#allocation3 + $0x320] sm:$0xff]  ;;  %2152 = vmatprep.mubr.f32.mxu1 %v3650_v2 }
  0xfd   :  { %810 = vst [vmem:[#allocation10 + $0x308] sm:$0xff] %v4090_v5  ;;  %809 = vst [vmem:[#allocation10 + $0x300] sm:$0xff] %v4100_v27  ;;  %v429_v32 = vmul.f32 %v301_v9, %v173_v57  ;;  %v557_v44 = vld [vmem:[%s4558_s2 + $0x320] sm:$0xff]  ;;  %v176_v35 = vld [vmem:[%s4557_s1 + $0x338] sm:$0xff]  ;;  %1704 = vmatmul.mubr.f32.gmra.mrb[52].mxu0 %v3660_v10 }
  0xfe   :  { %v4121_v60 = vadd.f32 %v555_v43, %v427_v19  ;;  %v304_v23 = vld [vmem:[#allocation3 + $0x338] sm:$0xff]  ;;  %812 = vst [vmem:[#allocation10 + $0x318] sm:$0xff] %v4111_v54  ;;  %v4130_v45 = vadd.f32 %v558_v25, %v430_v59  ;;  %v175_v19 = vld [vmem:[%s4557_s1 + $0x330] sm:$0xff]  ;;  %v178_v25 = vld [vmem:[%s4557_s1 + $0x348] sm:$0xff]  ;;  %1709 = vmatprep.mubr.f32.mxu0 %v3671_v16 }
  0xff   :  { %v432_v52 = vmul.f32 %v304_v23, %v176_v35  ;;  %v560_v37 = vld [vmem:[%s4558_s2 + $0x338] sm:$0xff]  ;;  %v303_v43 = vld [vmem:[#allocation3 + $0x330] sm:$0xff]  ;;  %v4140_v57 = vadd.f32 %v557_v44, %v429_v32  ;;  %v306_v35 = vld [vmem:[#allocation3 + $0x348] sm:$0xff]  ;;  %2153 = vmatmul.mubr.f32.gmra.mrb[52].mxu1 %v3660_v10 }
 0x100   :  { %4586 = vst [vmem:[#allocation16_spill] sm:$0xff] %v4121_v60  ;;  %4587 = vst [vmem:[#allocation17_spill] sm:$0xff] %v4130_v45  ;;  %v431_v9 = vmul.f32 %v303_v43, %v175_v19  ;;  %v559_v59 = vld [vmem:[%s4558_s2 + $0x330] sm:$0xff]  ;;  %v434_v32 = vmul.f32 %v306_v35, %v178_v25  ;;  %v562_v44 = vld [vmem:[%s4558_s2 + $0x348] sm:$0xff]  ;;  %2158 = vmatprep.mubr.f32.mxu1 %v3671_v16 }
 0x101   :  { %811 = vst [vmem:[#allocation10 + $0x310] sm:$0xff] %v4121_v60  ;;  %814 = vst [vmem:[#allocation10 + $0x328] sm:$0xff] %v4130_v45  ;;  %v4151_v23 = vadd.f32 %v560_v37, %v432_v52  ;;  %v177_v19 = vld [vmem:[%s4557_s1 + $0x340] sm:$0xff]  ;;  %v180_v37 = vld [vmem:[%s4557_s1 + $0x358] sm:$0xff]  ;;  %1710 = vmatmul.mubr.f32.gmra.mrb[54].mxu0 %v3681_v18 }
 0x102   :  { %v305_v43 = vld [vmem:[#allocation3 + $0x340] sm:$0xff]  ;;  %813 = vst [vmem:[#allocation10 + $0x320] sm:$0xff] %v4140_v57  ;;  %v4161_v42 = vadd.f32 %v559_v59, %v431_v9  ;;  %v308_v25 = vld [vmem:[#allocation3 + $0x358] sm:$0xff]  ;;  %v4170_v35 = vadd.f32 %v562_v44, %v434_v32  ;;  %v179_v9 = vld [vmem:[%s4557_s1 + $0x350] sm:$0xff]  ;;  %1715 = vmatprep.mubr.f32.mxu0 %v3690_v33 }
 0x103   :  { %v433_v60 = vmul.f32 %v305_v43, %v177_v19  ;;  %v561_v52 = vld [vmem:[%s4558_s2 + $0x340] sm:$0xff]  ;;  %816 = vst [vmem:[#allocation10 + $0x338] sm:$0xff] %v4151_v23  ;;  %v436_v45 = vmul.f32 %v308_v25, %v180_v37  ;;  %v564_v49 = vld [vmem:[%s4558_s2 + $0x358] sm:$0xff]  ;;  %v307_v59 = vld [vmem:[#allocation3 + $0x350] sm:$0xff]  ;;  %2159 = vmatmul.mubr.f32.gmra.mrb[54].mxu1 %v3681_v18 }
 0x104   :  { %4588 = vst [vmem:[#allocation18_spill] sm:$0xff] %v4161_v42  ;;  %4589 = vst [vmem:[#allocation19_spill] sm:$0xff] %v4170_v35  ;;  %v435_v43 = vmul.f32 %v307_v59, %v179_v9  ;;  %v563_v32 = vld [vmem:[%s4558_s2 + $0x350] sm:$0xff]  ;;  %v182_v44 = vld [vmem:[%s4557_s1 + $0x368] sm:$0xff]  ;;  %2164 = vmatprep.mubr.f32.mxu1 %v3690_v33 }
 0x105   :  { %815 = vst [vmem:[#allocation10 + $0x330] sm:$0xff] %v4161_v42  ;;  %v4180_v19 = vadd.f32 %v561_v52, %v433_v60  ;;  %v310_v37 = vld [vmem:[#allocation3 + $0x368] sm:$0xff]  ;;  %818 = vst [vmem:[#allocation10 + $0x348] sm:$0xff] %v4170_v35  ;;  %v4191_v25 = vadd.f32 %v564_v49, %v436_v45  ;;  %v181_v9 = vld [vmem:[%s4557_s1 + $0x360] sm:$0xff]  ;;  %1716 = vmatmul.mubr.f32.gmra.mrb[56].mxu0 %v3700_v38 }
 0x106   :  { %v438_v60 = vmul.f32 %v310_v37, %v182_v44  ;;  %v566_v52 = vld [vmem:[%s4558_s2 + $0x368] sm:$0xff]  ;;  %v309_v59 = vld [vmem:[#allocation3 + $0x360] sm:$0xff]  ;;  %v4201_v1 = vadd.f32 %v563_v32, %v435_v43  ;;  %v184_v49 = vld [vmem:[%s4557_s1 + $0x378] sm:$0xff]  ;;  %1721 = vmatprep.mubr.f32.mxu0 %v3711_v48 }
 0x107   :  { %817 = vst [vmem:[#allocation10 + $0x340] sm:$0xff] %v4180_v19  ;;  %v437_v42 = vmul.f32 %v309_v59, %v181_v9  ;;  %v565_v45 = vld [vmem:[%s4558_s2 + $0x360] sm:$0xff]  ;;  %v312_v44 = vld [vmem:[#allocation3 + $0x378] sm:$0xff]  ;;  %820 = vst [vmem:[#allocation10 + $0x358] sm:$0xff] %v4191_v25  ;;  %2165 = vmatmul.mubr.f32.gmra.mrb[56].mxu1 %v3700_v38 }
 0x108   :  { %4590 = vst [vmem:[#allocation20_spill] sm:$0xff] %v4201_v1  ;;  %v4210_v37 = vadd.f32 %v566_v52, %v438_v60  ;;  %v440_v35 = vmul.f32 %v312_v44, %v184_v49  ;;  %v568_v2 = vld [vmem:[%s4558_s2 + $0x378] sm:$0xff]  ;;  %v183_v43 = vld [vmem:[%s4557_s1 + $0x370] sm:$0xff]  ;;  %819 = vst [vmem:[#allocation10 + $0x350] sm:$0xff] %v4201_v1  ;;  %2170 = vmatprep.mubr.f32.mxu1 %v3711_v48 }
 0x109   :  { %v311_v32 = vld [vmem:[#allocation3 + $0x370] sm:$0xff]  ;;  %v4220_v9 = vadd.f32 %v565_v45, %v437_v42  ;;  %v186_v52 = vld [vmem:[%s4557_s1 + $0x388] sm:$0xff]  ;;  %v572_v16 = vld [vmem:[%s4558_s2 + $0x398] sm:$0xff]  ;;  %1722 = vmatmul.mubr.f32.gmra.mrb[58].mxu0 %v3721_v11 }
 0x10a   :  { %4591 = vst [vmem:[#allocation21_spill] sm:$0xff] %v4210_v37  ;;  %v439_v59 = vmul.f32 %v311_v32, %v183_v43  ;;  %v567_v60 = vld [vmem:[%s4558_s2 + $0x370] sm:$0xff]  ;;  %v314_v49 = vld [vmem:[#allocation3 + $0x388] sm:$0xff]  ;;  %822 = vst [vmem:[#allocation10 + $0x368] sm:$0xff] %v4210_v37  ;;  %v4231_v44 = vadd.f32 %v568_v2, %v440_v35  ;;  %1727 = vmatprep.mubr.f32.mxu0 %v3730_v4 }
 0x10b   :  { %v442_v42 = vmul.f32 %v314_v49, %v186_v52  ;;  %v570_v45 = vld [vmem:[%s4558_s2 + $0x388] sm:$0xff]  ;;  %v185_v43 = vld [vmem:[%s4557_s1 + $0x380] sm:$0xff]  ;;  %821 = vst [vmem:[#allocation10 + $0x360] sm:$0xff] %v4220_v9  ;;  %v188_v2 = vld [vmem:[%s4557_s1 + $0x398] sm:$0xff]  ;;  %2171 = vmatmul.mubr.f32.gmra.mrb[58].mxu1 %v3721_v11 }
 0x10c   :  { %v313_v32 = vld [vmem:[#allocation3 + $0x380] sm:$0xff]  ;;  %v4241_v10 = vadd.f32 %v567_v60, %v439_v59  ;;  %v316_v52 = vld [vmem:[#allocation3 + $0x398] sm:$0xff]  ;;  %824 = vst [vmem:[#allocation10 + $0x378] sm:$0xff] %v4231_v44  ;;  %v187_v59 = vld [vmem:[%s4557_s1 + $0x390] sm:$0xff]  ;;  %2176 = vmatprep.mubr.f32.mxu1 %v3730_v4 }
 0x10d   :  { %v441_v1 = vmul.f32 %v313_v32, %v185_v43  ;;  %v569_v35 = vld [vmem:[%s4558_s2 + $0x380] sm:$0xff]  ;;  %v4250_v49 = vadd.f32 %v570_v45, %v442_v42  ;;  %v444_v37 = vmul.f32 %v316_v52, %v188_v2  ;;  %v315_v60 = vld [vmem:[#allocation3 + $0x390] sm:$0xff]  ;;  %v190_v45 = vld [vmem:[%s4557_s1 + $0x3a8] sm:$0xff]  ;;  %1728 = vmatmul.mubr.f32.gmra.mrb[60].mxu0 %v3740_v55 }
 0x10e   :  { %4592 = vst [vmem:[#allocation22_spill] sm:$0xff] %v4241_v10  ;;  %823 = vst [vmem:[#allocation10 + $0x370] sm:$0xff] %v4241_v10  ;;  %v443_v32 = vmul.f32 %v315_v60, %v187_v59  ;;  %v571_v42 = vld [vmem:[%s4558_s2 + $0x390] sm:$0xff]  ;;  %v318_v2 = vld [vmem:[#allocation3 + $0x3a8] sm:$0xff]  ;;  %1733 = vmatprep.mubr.f32.mxu0 %v3751_v21 }
 0x10f   :  { %4593 = vst [vmem:[#allocation23_spill] sm:$0xff] %v4250_v49  ;;  %v4260_v43 = vadd.f32 %v569_v35, %v441_v1  ;;  %826 = vst [vmem:[#allocation10 + $0x388] sm:$0xff] %v4250_v49  ;;  %v4271_v52 = vadd.f32 %v572_v16, %v444_v37  ;;  %v446_v1 = vmul.f32 %v318_v2, %v190_v45  ;;  %v574_v35 = vld [vmem:[%s4558_s2 + $0x3a8] sm:$0xff]  ;;  %v189_v59 = vld [vmem:[%s4557_s1 + $0x3a0] sm:$0xff]  ;;  %2177 = vmatmul.mubr.f32.gmra.mrb[60].mxu1 %v3740_v55 }
 0x110   :  { %v317_v60 = vld [vmem:[#allocation3 + $0x3a0] sm:$0xff]  ;;  %v4281_v18 = vadd.f32 %v571_v42, %v443_v32  ;;  %v192_v16 = vld [vmem:[%s4557_s1 + $0x3b8] sm:$0xff]  ;;  %v191_v32 = vld [vmem:[%s4557_s1 + $0x3b0] sm:$0xff]  ;;  %2182 = vmatprep.mubr.f32.mxu1 %v3751_v21 }
 0x111   :  { %825 = vst [vmem:[#allocation10 + $0x380] sm:$0xff] %v4260_v43  ;;  %v445_v10 = vmul.f32 %v317_v60, %v189_v59  ;;  %v573_v37 = vld [vmem:[%s4558_s2 + $0x3a0] sm:$0xff]  ;;  %v320_v45 = vld [vmem:[#allocation3 + $0x3b8] sm:$0xff]  ;;  %828 = vst [vmem:[#allocation10 + $0x398] sm:$0xff] %v4271_v52  ;;  %v4290_v2 = vadd.f32 %v574_v35, %v446_v1  ;;  %1734 = vmatmul.mubr.f32.gmra.mrb[62].mxu0 %v3761_v41 }
 0x112   :  { %4594 = vst [vmem:[#allocation24_spill] sm:$0xff] %v4281_v18  ;;  %v448_v49 = vmul.f32 %v320_v45, %v192_v16  ;;  %v576_v33 = vld [vmem:[%s4558_s2 + $0x3b8] sm:$0xff]  ;;  %v319_v42 = vld [vmem:[#allocation3 + $0x3b0] sm:$0xff]  ;;  %827 = vst [vmem:[#allocation10 + $0x390] sm:$0xff] %v4281_v18  ;;  %1739 = vmatprep.mubr.f32.mxu0 %v3770_v15 }
 0x113   :  { %4595 = vst [vmem:[#allocation25_spill] sm:$0xff] %v4290_v2  ;;  %v4300_v59 = vadd.f32 %v573_v37, %v445_v10  ;;  %v447_v60 = vmul.f32 %v319_v42, %v191_v32  ;;  %v575_v1 = vld [vmem:[%s4558_s2 + $0x3b0] sm:$0xff]  ;;  %v194_v35 = vld [vmem:[%s4557_s1 + $0x3c8] sm:$0xff]  ;;  %830 = vst [vmem:[#allocation10 + $0x3a8] sm:$0xff] %v4290_v2  ;;  %2183 = vmatmul.mubr.f32.gmra.mrb[62].mxu1 %v3761_v41 }
 0x114   :  { %v322_v16 = vld [vmem:[#allocation3 + $0x3c8] sm:$0xff]  ;;  %v4311_v45 = vadd.f32 %v576_v33, %v448_v49  ;;  %v193_v32 = vld [vmem:[%s4557_s1 + $0x3c0] sm:$0xff]  ;;  %v196_v33 = vld [vmem:[%s4557_s1 + $0x3d8] sm:$0xff]  ;;  %2188 = vmatprep.mubr.f32.mxu1 %v3770_v15 }
 0x115   :  { %v450_v10 = vmul.f32 %v322_v16, %v194_v35  ;;  %v578_v37 = vld [vmem:[%s4558_s2 + $0x3c8] sm:$0xff]  ;;  %v321_v42 = vld [vmem:[#allocation3 + $0x3c0] sm:$0xff]  ;;  %829 = vst [vmem:[#allocation10 + $0x3a0] sm:$0xff] %v4300_v59  ;;  %v4321_v38 = vadd.f32 %v575_v1, %v447_v60  ;;  %v324_v35 = vld [vmem:[#allocation3 + $0x3d8] sm:$0xff]  ;;  %1740 = vmatmul.mubr.f32.gmra.mrb[64].mxu0 %v3780_v46 }
 0x116   :  { %v449_v18 = vmul.f32 %v321_v42, %v193_v32  ;;  %v577_v49 = vld [vmem:[%s4558_s2 + $0x3c0] sm:$0xff]  ;;  %832 = vst [vmem:[#allocation10 + $0x3b8] sm:$0xff] %v4311_v45  ;;  %v452_v2 = vmul.f32 %v324_v35, %v196_v33  ;;  %v580_v48 = vld [vmem:[%s4558_s2 + $0x3d8] sm:$0xff]  ;;  %v195_v60 = vld [vmem:[%s4557_s1 + $0x3d0] sm:$0xff]  ;;  %1745 = vmatprep.mubr.f32.mxu0 %v3791_v56 }
 0x117   :  { %4596 = vst [vmem:[#allocation26_spill] sm:$0xff] %v4321_v38  ;;  %v4330_v16 = vadd.f32 %v578_v37, %v450_v10  ;;  %v323_v1 = vld [vmem:[#allocation3 + $0x3d0] sm:$0xff]  ;;  %831 = vst [vmem:[#allocation10 + $0x3b0] sm:$0xff] %v4321_v38  ;;  %v198_v37 = vld [vmem:[%s4557_s1 + $0x3e8] sm:$0xff]  ;;  %2189 = vmatmul.mubr.f32.gmra.mrb[64].mxu1 %v3780_v46 }
 0x118   :  { %v4340_v32 = vadd.f32 %v577_v49, %v449_v18  ;;  %v451_v42 = vmul.f32 %v323_v1, %v195_v60  ;;  %v579_v10 = vld [vmem:[%s4558_s2 + $0x3d0] sm:$0xff]  ;;  %v326_v33 = vld [vmem:[#allocation3 + $0x3e8] sm:$0xff]  ;;  %v4351_v35 = vadd.f32 %v580_v48, %v452_v2  ;;  %v197_v60 = vld [vmem:[%s4557_s1 + $0x3e0] sm:$0xff]  ;;  %2194 = vmatprep.mubr.f32.mxu1 %v3791_v56 }
 0x119   :  { %834 = vst [vmem:[#allocation10 + $0x3c8] sm:$0xff] %v4330_v16  ;;  %v454_v18 = vmul.f32 %v326_v33, %v198_v37  ;;  %v582_v49 = vld [vmem:[%s4558_s2 + $0x3e8] sm:$0xff]  ;;  %v325_v1 = vld [vmem:[#allocation3 + $0x3e0] sm:$0xff]  ;;  %v200_v37 = vld [vmem:[%s4557_s1 + $0x3f8] sm:$0xff]  ;;  %1746 = vmatmul.mubr.f32.gmra.mrb[66].mxu0 %v3801_v20 }
 0x11a   :  { %833 = vst [vmem:[#allocation10 + $0x3c0] sm:$0xff] %v4340_v32  ;;  %v4361_v11 = vadd.f32 %v579_v10, %v451_v42  ;;  %v453_v38 = vmul.f32 %v325_v1, %v197_v60  ;;  %v581_v2 = vld [vmem:[%s4558_s2 + $0x3e0] sm:$0xff]  ;;  %836 = vst [vmem:[#allocation10 + $0x3d8] sm:$0xff] %v4351_v35  ;;  %v328_v33 = vld [vmem:[#allocation3 + $0x3f8] sm:$0xff]  ;;  %1751 = vmatprep.mubr.f32.mxu0 %v3810_v0 }
 0x11b   :  { %v4367_v48 = vadd.f32 %v582_v49, %v454_v18  ;;  %v456_v42 = vmul.f32 %v328_v33, %v200_v37  ;;  %v199_v10 = vld [vmem:[%s4557_s1 + $0x3f0] sm:$0xff]  ;;  %v584_v18 = vld [vmem:[%s4558_s2 + $0x3f8] sm:$0xff]  ;;  %2195 = vmatmul.mubr.f32.gmra.mrb[66].mxu1 %v3801_v20  ;;  %v4597_v21 = vld [vmem:[#allocation16_spill] sm:$0xff] }
 0x11c   :  { %835 = vst [vmem:[#allocation10 + $0x3d0] sm:$0xff] %v4361_v11  ;;  %v4374_v4 = vadd.f32 %v581_v2, %v453_v38  ;;  %v327_v60 = vld [vmem:[#allocation3 + $0x3f0] sm:$0xff]  ;;  %2200 = vmatprep.mubr.f32.mxu1 %v3810_v0  ;;  %v4598_v41 = vld [vmem:[#allocation17_spill] sm:$0xff]  ;;  %v4600_v46 = vld [vmem:[#allocation19_spill] sm:$0xff] }
 0x11d   :  { %838 = vst [vmem:[#allocation10 + $0x3e8] sm:$0xff] %v4367_v48  ;;  %v455_v49 = vmul.f32 %v327_v60, %v199_v10  ;;  %v4387_v38 = vadd.f32 %v584_v18, %v456_v42  ;;  %v583_v1 = vld [vmem:[%s4558_s2 + $0x3f0] sm:$0xff]  ;;  %1752 = vmatmul.mubr.f32.gmra.mrb[68].mxu0 %v3820_v22  ;;  %s2933_s2 = smov [#allocation10]  }
 0x11e   :  { %837 = vst [vmem:[#allocation10 + $0x3e0] sm:$0xff] %v4374_v4  ;;  %1757 = vmatprep.mubr.f32.mxu0 %v3831_v31  ;;  %v4599_v15 = vld [vmem:[#allocation18_spill] sm:$0xff]  ;;  %s2654_s23 = sshll.u32 %s2933_s2, 4  ;;  %s2655_s23 = int_to_ptr.vmem [resolvable:$true] %s2654_s23 }
 0x11f   :  { %v4392_v55 = vadd.f32 %v583_v1, %v455_v49  ;;  %840 = vst [vmem:[#allocation10 + $0x3f8] sm:$0xff] %v4387_v38  ;;  %2201 = vmatmul.mubr.f32.gmra.mrb[68].mxu1 %v3820_v22  ;;  %v4601_v22 = vld [vmem:[#allocation20_spill] sm:$0xff]  ;;  %s2874_s24 = scalar_lea.vmem %s2655_s23, 16384  ;;  %p2879_p11 = scmp.lt.s32.totalorder %s2655_s23, %s2655_s23 }
 0x120   :  { %2206 = vmatprep.mubr.f32.mxu1 %v3831_v31  ;;  %p2875_p10 = scmp.ne.s32.totalorder %s2655_s23, %s2874_s24  ;;  %p2880_p12 = scmp.lt.s32.totalorder %s2874_s24, %s2874_s24 }
 0x121   :  { %839 = vst [vmem:[#allocation10 + $0x3f0] sm:$0xff] %v4392_v55  ;;  %1758 = vmatmul.mubr.f32.gmra.mrb[70].mxu0 %v3841_v63 }
 0x122   :  { %1763 = vmatprep.mubr.f32.mxu0 %v3850_v53  ;;  %p2881_p13 = por %p2880_p12, %p2879_p11 }
 0x123   :  { %2207 = vmatmul.mubr.f32.gmra.mrb[70].mxu1 %v3841_v63  ;;  %v4602_v63 = vld [vmem:[#allocation21_spill] sm:$0xff] }
 0x124   :  { %2212 = vmatprep.mubr.f32.mxu1 %v3850_v53  ;;  %p2882_p0 = pnand %p2881_p13, %p2875_p10 }
 0x125   :  { %1764 = vmatmul.mubr.f32.gmra.mrb[72].mxu0 %v3860_v61 }
 0x126   :  { %1769 = vmatprep.mubr.f32.mxu0 %v3871_v7 }
 0x127   :  { %2213 = vmatmul.mubr.f32.gmra.mrb[72].mxu1 %v3860_v61 }
 0x128   :  { %2218 = vmatprep.mubr.f32.mxu1 %v3871_v7 }
 0x129   :  { %1770 = vmatmul.mubr.f32.gmra.mrb[74].mxu0 %v3881_v30 }
 0x12a   :  { %1775 = vmatprep.mubr.f32.mxu0 %v3890_v34 }
 0x12b   :  { %2219 = vmatmul.mubr.f32.gmra.mrb[74].mxu1 %v3881_v30 }
 0x12c   :  { %2224 = vmatprep.mubr.f32.mxu1 %v3890_v34 }
 0x12d   :  { %1776 = vmatmul.mubr.f32.gmra.mrb[76].mxu0 %v3900_v39 }
 0x12e   :  { %1781 = vmatprep.mubr.f32.mxu0 %v3911_v8 }
 0x12f   :  { %2225 = vmatmul.mubr.f32.gmra.mrb[76].mxu1 %v3900_v39 }
 0x130   :  { %2230 = vmatprep.mubr.f32.mxu1 %v3911_v8 }
 0x131   :  { %1782 = vmatmul.mubr.f32.gmra.mrb[78].mxu0 %v3921_v26 }
 0x132   :  { %1787 = vmatprep.mubr.f32.mxu0 %v3930_v6 }
 0x133   :  { %2231 = vmatmul.mubr.f32.gmra.mrb[78].mxu1 %v3921_v26  ;;  %v4603_v26 = vld [vmem:[#allocation22_spill] sm:$0xff] }
 0x134   :  { %2236 = vmatprep.mubr.f32.mxu1 %v3930_v6 }
 0x135   :  { %1788 = vmatmul.mubr.f32.gmra.mrb[80].mxu0 %v3940_v28 }
 0x136   :  { %1793 = vmatprep.mubr.f32.mxu0 %v3951_v47 }
 0x137   :  { %2237 = vmatmul.mubr.f32.gmra.mrb[80].mxu1 %v3940_v28  ;;  %v4604_v28 = vld [vmem:[#allocation23_spill] sm:$0xff] }
 0x138   :  { %2242 = vmatprep.mubr.f32.mxu1 %v3951_v47 }
 0x139   :  { %1794 = vmatmul.mubr.f32.gmra.mrb[82].mxu0 %v3961_v40 }
 0x13a   :  { %1799 = vmatprep.mubr.f32.mxu0 %v3970_v36 }
 0x13b   :  { %2243 = vmatmul.mubr.f32.gmra.mrb[82].mxu1 %v3961_v40 }
 0x13c   :  { %2248 = vmatprep.mubr.f32.mxu1 %v3970_v36 }
 0x13d   :  { %1800 = vmatmul.mubr.f32.gmra.mrb[84].mxu0 %v3980_v17 }
 0x13e   :  { %1805 = vmatprep.mubr.f32.mxu0 %v3991_v24 }
 0x13f   :  { %2249 = vmatmul.mubr.f32.gmra.mrb[84].mxu1 %v3980_v17 }
 0x140   :  { %2254 = vmatprep.mubr.f32.mxu1 %v3991_v24 }
 0x141   :  { %1806 = vmatmul.mubr.f32.gmra.mrb[86].mxu0 %v4001_v51 }
 0x142   :  { %1811 = vmatprep.mubr.f32.mxu0 %v4010_v62 }
 0x143   :  { %2255 = vmatmul.mubr.f32.gmra.mrb[86].mxu1 %v4001_v51 }
 0x144   :  { %2260 = vmatprep.mubr.f32.mxu1 %v4010_v62 }
 0x145   :  { %1812 = vmatmul.mubr.f32.gmra.mrb[88].mxu0 %v4020_v12 }
 0x146   :  { %1817 = vmatprep.mubr.f32.mxu0 %v4031_v29 }
 0x147   :  { %2261 = vmatmul.mubr.f32.gmra.mrb[88].mxu1 %v4020_v12  ;;  %v4605_v12 = vld [vmem:[#allocation24_spill] sm:$0xff] }
 0x148   :  { %2266 = vmatprep.mubr.f32.mxu1 %v4031_v29 }
 0x149   :  { %1818 = vmatmul.mubr.f32.gmra.mrb[90].mxu0 %v4041_v50 }
 0x14a   :  { %1823 = vmatprep.mubr.f32.mxu0 %v4050_v13 }
 0x14b   :  { %2267 = vmatmul.mubr.f32.gmra.mrb[90].mxu1 %v4041_v50  ;;  %v4606_v50 = vld [vmem:[#allocation25_spill] sm:$0xff] }
 0x14c   :  { %2272 = vmatprep.mubr.f32.mxu1 %v4050_v13 }
 0x14d   :  { %1824 = vmatmul.mubr.f32.gmra.mrb[92].mxu0 %v4060_v58 }
 0x14e   :  { %1829 = vmatprep.mubr.f32.mxu0 %v4071_v3 }
 0x14f   :  { %2273 = vmatmul.mubr.f32.gmra.mrb[92].mxu1 %v4060_v58 }
 0x150   :  { %2278 = vmatprep.mubr.f32.mxu1 %v4071_v3 }
 0x151   :  { %1830 = vmatmul.mubr.f32.gmra.mrb[94].mxu0 %v4081_v14 }
 0x152   :  { %1835 = vmatprep.mubr.f32.mxu0 %v4090_v5 }
 0x153   :  { %2279 = vmatmul.mubr.f32.gmra.mrb[94].mxu1 %v4081_v14 }
 0x154   :  { %2284 = vmatprep.mubr.f32.mxu1 %v4090_v5 }
 0x155   :  { %1836 = vmatmul.mubr.f32.gmra.mrb[96].mxu0 %v4100_v27 }
 0x156   :  { %1841 = vmatprep.mubr.f32.mxu0 %v4111_v54 }
 0x157   :  { %2285 = vmatmul.mubr.f32.gmra.mrb[96].mxu1 %v4100_v27 }
 0x158   :  { %2290 = vmatprep.mubr.f32.mxu1 %v4111_v54 }
 0x159   :  { %1842 = vmatmul.mubr.f32.gmra.mrb[98].mxu0 %v4597_v21 }
 0x15a   :  { %1847 = vmatprep.mubr.f32.mxu0 %v4598_v41 }
 0x15b   :  { %2291 = vmatmul.mubr.f32.gmra.mrb[98].mxu1 %v4597_v21 }
 0x15c   :  { %2296 = vmatprep.mubr.f32.mxu1 %v4598_v41 }
 0x15d   :  { %1848 = vmatmul.mubr.f32.gmra.mrb[100].mxu0 %v4140_v57 }
 0x15e   :  { %1853 = vmatprep.mubr.f32.mxu0 %v4151_v23 }
 0x15f   :  { %2297 = vmatmul.mubr.f32.gmra.mrb[100].mxu1 %v4140_v57  ;;  %v4607_v57 = vld [vmem:[#allocation26_spill] sm:$0xff] }
 0x160   :  { %2302 = vmatprep.mubr.f32.mxu1 %v4151_v23 }
 0x161   :  { %1854 = vmatmul.mubr.f32.gmra.mrb[102].mxu0 %v4599_v15 }
 0x162   :  { %1859 = vmatprep.mubr.f32.mxu0 %v4600_v46 }
 0x163   :  { %2303 = vmatmul.mubr.f32.gmra.mrb[102].mxu1 %v4599_v15 }
 0x164   :  { %2308 = vmatprep.mubr.f32.mxu1 %v4600_v46 }
 0x165   :  { %1860 = vmatmul.mubr.f32.gmra.mrb[104].mxu0 %v4180_v19 }
 0x166   :  { %1865 = vmatprep.mubr.f32.mxu0 %v4191_v25 }
 0x167   :  { %2309 = vmatmul.mubr.f32.gmra.mrb[104].mxu1 %v4180_v19 }
 0x168   :  { %2314 = vmatprep.mubr.f32.mxu1 %v4191_v25  ;;  %v1549_v56 = vpop.f32.mrb[0].mxu0 }
 0x169   :  { %2381 = vst [vmem:[#allocation9] sm:$0xff] %v1549_v56  ;;  %v1551_v0 = vpop.f32.mrb[1].mxu0  ;;  %1866 = vmatmul.mubr.f32.gmra.mrb[106].mxu0 %v4601_v22 }
 0x16a   :  { %v1998_v20 = vpop.f32.mrb[0].mxu1  ;;  %2382 = vst [vmem:[#allocation9 + $0x8] sm:$0xff] %v1551_v0  ;;  %1871 = vmatprep.mubr.f32.mxu0 %v4602_v63 }
 0x16b   :  { %2383 = vst [vmem:[#allocation9 + $0x10] sm:$0xff] %v1998_v20  ;;  %v2000_v31 = vpop.f32.mrb[1].mxu1  ;;  %2315 = vmatmul.mubr.f32.gmra.mrb[106].mxu1 %v4601_v22 }
 0x16c   :  { %2384 = vst [vmem:[#allocation9 + $0x18] sm:$0xff] %v2000_v31  ;;  %2320 = vmatprep.mubr.f32.mxu1 %v4602_v63  ;;  %v1555_v53 = vpop.f32.mrb[2].mxu0 }
 0x16d   :  { %2385 = vst [vmem:[#allocation9 + $0x20] sm:$0xff] %v1555_v53  ;;  %v1557_v7 = vpop.f32.mrb[3].mxu0  ;;  %1872 = vmatmul.mubr.f32.gmra.mrb[108].mxu0 %v4220_v9 }
 0x16e   :  { %v2004_v61 = vpop.f32.mrb[2].mxu1  ;;  %2386 = vst [vmem:[#allocation9 + $0x28] sm:$0xff] %v1557_v7  ;;  %1877 = vmatprep.mubr.f32.mxu0 %v4231_v44 }
 0x16f   :  { %2387 = vst [vmem:[#allocation9 + $0x30] sm:$0xff] %v2004_v61  ;;  %v2006_v30 = vpop.f32.mrb[3].mxu1  ;;  %2321 = vmatmul.mubr.f32.gmra.mrb[108].mxu1 %v4220_v9 }
 0x170   :  { %2388 = vst [vmem:[#allocation9 + $0x38] sm:$0xff] %v2006_v30  ;;  %2326 = vmatprep.mubr.f32.mxu1 %v4231_v44  ;;  %v1561_v34 = vpop.f32.mrb[4].mxu0 }
 0x171   :  { %2389 = vst [vmem:[#allocation9 + $0x40] sm:$0xff] %v1561_v34  ;;  %v1563_v8 = vpop.f32.mrb[5].mxu0  ;;  %1878 = vmatmul.mubr.f32.gmra.mrb[110].mxu0 %v4603_v26 }
 0x172   :  { %v2010_v39 = vpop.f32.mrb[4].mxu1  ;;  %2390 = vst [vmem:[#allocation9 + $0x48] sm:$0xff] %v1563_v8  ;;  %1883 = vmatprep.mubr.f32.mxu0 %v4604_v28 }
 0x173   :  { %2391 = vst [vmem:[#allocation9 + $0x50] sm:$0xff] %v2010_v39  ;;  %v2012_v6 = vpop.f32.mrb[5].mxu1  ;;  %2327 = vmatmul.mubr.f32.gmra.mrb[110].mxu1 %v4603_v26 }
 0x174   :  { %2392 = vst [vmem:[#allocation9 + $0x58] sm:$0xff] %v2012_v6  ;;  %2332 = vmatprep.mubr.f32.mxu1 %v4604_v28  ;;  %v1567_v47 = vpop.f32.mrb[6].mxu0 }
 0x175   :  { %2393 = vst [vmem:[#allocation9 + $0x60] sm:$0xff] %v1567_v47  ;;  %v1569_v36 = vpop.f32.mrb[7].mxu0  ;;  %1884 = vmatmul.mubr.f32.gmra.mrb[112].mxu0 %v4260_v43 }
 0x176   :  { %v2016_v40 = vpop.f32.mrb[6].mxu1  ;;  %2394 = vst [vmem:[#allocation9 + $0x68] sm:$0xff] %v1569_v36  ;;  %1889 = vmatprep.mubr.f32.mxu0 %v4271_v52 }
 0x177   :  { %2395 = vst [vmem:[#allocation9 + $0x70] sm:$0xff] %v2016_v40  ;;  %v2018_v17 = vpop.f32.mrb[7].mxu1  ;;  %2333 = vmatmul.mubr.f32.gmra.mrb[112].mxu1 %v4260_v43 }
 0x178   :  { %2396 = vst [vmem:[#allocation9 + $0x78] sm:$0xff] %v2018_v17  ;;  %2338 = vmatprep.mubr.f32.mxu1 %v4271_v52  ;;  %v1573_v24 = vpop.f32.mrb[8].mxu0 }
 0x179   :  { %2397 = vst [vmem:[#allocation9 + $0x80] sm:$0xff] %v1573_v24  ;;  %v1575_v62 = vpop.f32.mrb[9].mxu0  ;;  %1890 = vmatmul.mubr.f32.gmra.mrb[114].mxu0 %v4605_v12 }
 0x17a   :  { %v2022_v51 = vpop.f32.mrb[8].mxu1  ;;  %2398 = vst [vmem:[#allocation9 + $0x88] sm:$0xff] %v1575_v62  ;;  %1895 = vmatprep.mubr.f32.mxu0 %v4606_v50 }
 0x17b   :  { %2399 = vst [vmem:[#allocation9 + $0x90] sm:$0xff] %v2022_v51  ;;  %v2024_v29 = vpop.f32.mrb[9].mxu1  ;;  %2339 = vmatmul.mubr.f32.gmra.mrb[114].mxu1 %v4605_v12 }
 0x17c   :  { %2400 = vst [vmem:[#allocation9 + $0x98] sm:$0xff] %v2024_v29  ;;  %2344 = vmatprep.mubr.f32.mxu1 %v4606_v50  ;;  %v1579_v13 = vpop.f32.mrb[10].mxu0 }
 0x17d   :  { %2401 = vst [vmem:[#allocation9 + $0xa0] sm:$0xff] %v1579_v13  ;;  %v1581_v3 = vpop.f32.mrb[11].mxu0  ;;  %1896 = vmatmul.mubr.f32.gmra.mrb[116].mxu0 %v4300_v59 }
 0x17e   :  { %v2028_v58 = vpop.f32.mrb[10].mxu1  ;;  %2402 = vst [vmem:[#allocation9 + $0xa8] sm:$0xff] %v1581_v3  ;;  %1901 = vmatprep.mubr.f32.mxu0 %v4311_v45 }
 0x17f   :  { %2403 = vst [vmem:[#allocation9 + $0xb0] sm:$0xff] %v2028_v58  ;;  %v2030_v14 = vpop.f32.mrb[11].mxu1  ;;  %2345 = vmatmul.mubr.f32.gmra.mrb[116].mxu1 %v4300_v59 }
 0x180   :  { %2404 = vst [vmem:[#allocation9 + $0xb8] sm:$0xff] %v2030_v14  ;;  %2350 = vmatprep.mubr.f32.mxu1 %v4311_v45  ;;  %v1585_v5 = vpop.f32.mrb[12].mxu0 }
 0x181   :  { %2405 = vst [vmem:[#allocation9 + $0xc0] sm:$0xff] %v1585_v5  ;;  %v1587_v54 = vpop.f32.mrb[13].mxu0  ;;  %1902 = vmatmul.mubr.f32.gmra.mrb[118].mxu0 %v4607_v57 }
 0x182   :  { %v2034_v27 = vpop.f32.mrb[12].mxu1  ;;  %2406 = vst [vmem:[#allocation9 + $0xc8] sm:$0xff] %v1587_v54  ;;  %1907 = vmatprep.mubr.f32.mxu0 %v4330_v16 }
 0x183   :  { %2407 = vst [vmem:[#allocation9 + $0xd0] sm:$0xff] %v2034_v27  ;;  %v2036_v23 = vpop.f32.mrb[13].mxu1  ;;  %2351 = vmatmul.mubr.f32.gmra.mrb[118].mxu1 %v4607_v57 }
 0x184   :  { %2408 = vst [vmem:[#allocation9 + $0xd8] sm:$0xff] %v2036_v23  ;;  %2356 = vmatprep.mubr.f32.mxu1 %v4330_v16  ;;  %v1591_v19 = vpop.f32.mrb[14].mxu0 }
 0x185   :  { %2409 = vst [vmem:[#allocation9 + $0xe0] sm:$0xff] %v1591_v19  ;;  %v1593_v9 = vpop.f32.mrb[15].mxu0  ;;  %1908 = vmatmul.mubr.f32.gmra.mrb[120].mxu0 %v4340_v32 }
 0x186   :  { %v2040_v25 = vpop.f32.mrb[14].mxu1  ;;  %2410 = vst [vmem:[#allocation9 + $0xe8] sm:$0xff] %v1593_v9  ;;  %1913 = vmatprep.mubr.f32.mxu0 %v4351_v35 }
 0x187   :  { %2411 = vst [vmem:[#allocation9 + $0xf0] sm:$0xff] %v2040_v25  ;;  %v2042_v44 = vpop.f32.mrb[15].mxu1  ;;  %2357 = vmatmul.mubr.f32.gmra.mrb[120].mxu1 %v4340_v32 }
 0x188   :  { %2412 = vst [vmem:[#allocation9 + $0xf8] sm:$0xff] %v2042_v44  ;;  %2362 = vmatprep.mubr.f32.mxu1 %v4351_v35  ;;  %v1597_v43 = vpop.f32.mrb[16].mxu0 }
 0x189   :  { %2413 = vst [vmem:[#allocation9 + $0x100] sm:$0xff] %v1597_v43  ;;  %v1599_v59 = vpop.f32.mrb[17].mxu0  ;;  %1914 = vmatmul.mubr.f32.gmra.mrb[122].mxu0 %v4361_v11 }
 0x18a   :  { %v2046_v52 = vpop.f32.mrb[16].mxu1  ;;  %2414 = vst [vmem:[#allocation9 + $0x108] sm:$0xff] %v1599_v59  ;;  %1919 = vmatprep.mubr.f32.mxu0 %v4367_v48 }
 0x18b   :  { %2415 = vst [vmem:[#allocation9 + $0x110] sm:$0xff] %v2046_v52  ;;  %v2048_v45 = vpop.f32.mrb[17].mxu1  ;;  %2363 = vmatmul.mubr.f32.gmra.mrb[122].mxu1 %v4361_v11 }
 0x18c   :  { %2416 = vst [vmem:[#allocation9 + $0x118] sm:$0xff] %v2048_v45  ;;  %2368 = vmatprep.mubr.f32.mxu1 %v4367_v48  ;;  %v1603_v16 = vpop.f32.mrb[18].mxu0 }
 0x18d   :  { %2417 = vst [vmem:[#allocation9 + $0x120] sm:$0xff] %v1603_v16  ;;  %v1605_v35 = vpop.f32.mrb[19].mxu0  ;;  %1920 = vmatmul.mubr.f32.gmra.mrb[124].mxu0 %v4374_v4 }
 0x18e   :  { %v2052_v32 = vpop.f32.mrb[18].mxu1  ;;  %2418 = vst [vmem:[#allocation9 + $0x128] sm:$0xff] %v1605_v35  ;;  %1925 = vmatprep.mubr.f32.mxu0 %v4387_v38 }
 0x18f   :  { %2419 = vst [vmem:[#allocation9 + $0x130] sm:$0xff] %v2052_v32  ;;  %v2054_v2 = vpop.f32.mrb[19].mxu1  ;;  %2369 = vmatmul.mubr.f32.gmra.mrb[124].mxu1 %v4374_v4 }
 0x190   :  { %2420 = vst [vmem:[#allocation9 + $0x138] sm:$0xff] %v2054_v2  ;;  %2374 = vmatprep.mubr.f32.mxu1 %v4387_v38  ;;  %v1609_v11 = vpop.f32.mrb[20].mxu0 }
 0x191   :  { %2421 = vst [vmem:[#allocation9 + $0x140] sm:$0xff] %v1609_v11  ;;  %v1611_v48 = vpop.f32.mrb[21].mxu0  ;;  %1926 = vmatmul.mubr.f32.gmra.mrb[126].mxu0 %v4392_v55 }
 0x192   :  { %v2058_v37 = vpop.f32.mrb[20].mxu1  ;;  %2422 = vst [vmem:[#allocation9 + $0x148] sm:$0xff] %v1611_v48 }
 0x193   :  { %2423 = vst [vmem:[#allocation9 + $0x150] sm:$0xff] %v2058_v37  ;;  %v2060_v33 = vpop.f32.mrb[21].mxu1  ;;  %2375 = vmatmul.mubr.f32.gmra.mrb[126].mxu1 %v4392_v55 }
 0x194   :  { %2424 = vst [vmem:[#allocation9 + $0x158] sm:$0xff] %v2060_v33  ;;  %v1615_v42 = vpop.f32.mrb[22].mxu0 }
 0x195   :  { %2425 = vst [vmem:[#allocation9 + $0x160] sm:$0xff] %v1615_v42  ;;  %v1617_v10 = vpop.f32.mrb[23].mxu0 }
 0x196   :  { %v2064_v4 = vpop.f32.mrb[22].mxu1  ;;  %2426 = vst [vmem:[#allocation9 + $0x168] sm:$0xff] %v1617_v10 }
 0x197   :  { %2427 = vst [vmem:[#allocation9 + $0x170] sm:$0xff] %v2064_v4  ;;  %v2066_v60 = vpop.f32.mrb[23].mxu1 }
 0x198   :  { %2428 = vst [vmem:[#allocation9 + $0x178] sm:$0xff] %v2066_v60  ;;  %v1621_v18 = vpop.f32.mrb[24].mxu0 }
 0x199   :  { %2429 = vst [vmem:[#allocation9 + $0x180] sm:$0xff] %v1621_v18  ;;  %v1623_v38 = vpop.f32.mrb[25].mxu0 }
 0x19a   :  { %v2070_v49 = vpop.f32.mrb[24].mxu1  ;;  %2430 = vst [vmem:[#allocation9 + $0x188] sm:$0xff] %v1623_v38 }
 0x19b   :  { %2431 = vst [vmem:[#allocation9 + $0x190] sm:$0xff] %v2070_v49  ;;  %v2072_v1 = vpop.f32.mrb[25].mxu1 }
 0x19c   :  { %2432 = vst [vmem:[#allocation9 + $0x198] sm:$0xff] %v2072_v1  ;;  %v1627_v21 = vpop.f32.mrb[26].mxu0 }
 0x19d   :  { %2433 = vst [vmem:[#allocation9 + $0x1a0] sm:$0xff] %v1627_v21  ;;  %v1629_v41 = vpop.f32.mrb[27].mxu0 }
 0x19e   :  { %v2076_v55 = vpop.f32.mrb[26].mxu1  ;;  %2434 = vst [vmem:[#allocation9 + $0x1a8] sm:$0xff] %v1629_v41 }
 0x19f   :  { %2435 = vst [vmem:[#allocation9 + $0x1b0] sm:$0xff] %v2076_v55  ;;  %v2078_v15 = vpop.f32.mrb[27].mxu1 }
 0x1a0   :  { %2436 = vst [vmem:[#allocation9 + $0x1b8] sm:$0xff] %v2078_v15  ;;  %v1633_v46 = vpop.f32.mrb[28].mxu0 }
 0x1a1   :  { %2437 = vst [vmem:[#allocation9 + $0x1c0] sm:$0xff] %v1633_v46  ;;  %v1635_v20 = vpop.f32.mrb[29].mxu0 }
 0x1a2   :  { %v2082_v56 = vpop.f32.mrb[28].mxu1  ;;  %2438 = vst [vmem:[#allocation9 + $0x1c8] sm:$0xff] %v1635_v20 }
 0x1a3   :  { %2439 = vst [vmem:[#allocation9 + $0x1d0] sm:$0xff] %v2082_v56  ;;  %v2084_v0 = vpop.f32.mrb[29].mxu1 }
 0x1a4   :  { %2440 = vst [vmem:[#allocation9 + $0x1d8] sm:$0xff] %v2084_v0  ;;  %v1639_v22 = vpop.f32.mrb[30].mxu0 }
 0x1a5   :  { %2441 = vst [vmem:[#allocation9 + $0x1e0] sm:$0xff] %v1639_v22  ;;  %v1641_v63 = vpop.f32.mrb[31].mxu0 }
 0x1a6   :  { %v2088_v31 = vpop.f32.mrb[30].mxu1  ;;  %2442 = vst [vmem:[#allocation9 + $0x1e8] sm:$0xff] %v1641_v63 }
 0x1a7   :  { %2443 = vst [vmem:[#allocation9 + $0x1f0] sm:$0xff] %v2088_v31  ;;  %v2090_v53 = vpop.f32.mrb[31].mxu1 }
 0x1a8   :  { %2444 = vst [vmem:[#allocation9 + $0x1f8] sm:$0xff] %v2090_v53  ;;  %v1645_v61 = vpop.f32.mrb[32].mxu0 }
 0x1a9   :  { %2445 = vst [vmem:[#allocation9 + $0x200] sm:$0xff] %v1645_v61  ;;  %v1647_v30 = vpop.f32.mrb[33].mxu0 }
 0x1aa   :  { %v2094_v7 = vpop.f32.mrb[32].mxu1  ;;  %2446 = vst [vmem:[#allocation9 + $0x208] sm:$0xff] %v1647_v30 }
 0x1ab   :  { %2447 = vst [vmem:[#allocation9 + $0x210] sm:$0xff] %v2094_v7  ;;  %v2096_v34 = vpop.f32.mrb[33].mxu1 }
 0x1ac   :  { %2448 = vst [vmem:[#allocation9 + $0x218] sm:$0xff] %v2096_v34  ;;  %v1651_v39 = vpop.f32.mrb[34].mxu0 }
 0x1ad   :  { %2449 = vst [vmem:[#allocation9 + $0x220] sm:$0xff] %v1651_v39  ;;  %v1653_v26 = vpop.f32.mrb[35].mxu0 }
 0x1ae   :  { %v2100_v8 = vpop.f32.mrb[34].mxu1  ;;  %2450 = vst [vmem:[#allocation9 + $0x228] sm:$0xff] %v1653_v26 }
 0x1af   :  { %2451 = vst [vmem:[#allocation9 + $0x230] sm:$0xff] %v2100_v8  ;;  %v2102_v6 = vpop.f32.mrb[35].mxu1 }
 0x1b0   :  { %2452 = vst [vmem:[#allocation9 + $0x238] sm:$0xff] %v2102_v6  ;;  %v1657_v28 = vpop.f32.mrb[36].mxu0 }
 0x1b1   :  { %2453 = vst [vmem:[#allocation9 + $0x240] sm:$0xff] %v1657_v28  ;;  %v1659_v40 = vpop.f32.mrb[37].mxu0 }
 0x1b2   :  { %v2106_v47 = vpop.f32.mrb[36].mxu1  ;;  %2454 = vst [vmem:[#allocation9 + $0x248] sm:$0xff] %v1659_v40 }
 0x1b3   :  { %2455 = vst [vmem:[#allocation9 + $0x250] sm:$0xff] %v2106_v47  ;;  %v2108_v36 = vpop.f32.mrb[37].mxu1 }
 0x1b4   :  { %2456 = vst [vmem:[#allocation9 + $0x258] sm:$0xff] %v2108_v36  ;;  %v1663_v17 = vpop.f32.mrb[38].mxu0 }
 0x1b5   :  { %2457 = vst [vmem:[#allocation9 + $0x260] sm:$0xff] %v1663_v17  ;;  %v1665_v51 = vpop.f32.mrb[39].mxu0 }
 0x1b6   :  { %v2112_v24 = vpop.f32.mrb[38].mxu1  ;;  %2458 = vst [vmem:[#allocation9 + $0x268] sm:$0xff] %v1665_v51 }
 0x1b7   :  { %2459 = vst [vmem:[#allocation9 + $0x270] sm:$0xff] %v2112_v24  ;;  %v2114_v62 = vpop.f32.mrb[39].mxu1 }
 0x1b8   :  { %2460 = vst [vmem:[#allocation9 + $0x278] sm:$0xff] %v2114_v62  ;;  %v1669_v12 = vpop.f32.mrb[40].mxu0 }
 0x1b9   :  { %2461 = vst [vmem:[#allocation9 + $0x280] sm:$0xff] %v1669_v12  ;;  %v1671_v50 = vpop.f32.mrb[41].mxu0 }
 0x1ba   :  { %v2118_v29 = vpop.f32.mrb[40].mxu1  ;;  %2462 = vst [vmem:[#allocation9 + $0x288] sm:$0xff] %v1671_v50 }
 0x1bb   :  { %2463 = vst [vmem:[#allocation9 + $0x290] sm:$0xff] %v2118_v29  ;;  %v2120_v13 = vpop.f32.mrb[41].mxu1 }
 0x1bc   :  { %2464 = vst [vmem:[#allocation9 + $0x298] sm:$0xff] %v2120_v13  ;;  %v1675_v58 = vpop.f32.mrb[42].mxu0 }
 0x1bd   :  { %2465 = vst [vmem:[#allocation9 + $0x2a0] sm:$0xff] %v1675_v58  ;;  %v1677_v14 = vpop.f32.mrb[43].mxu0 }
 0x1be   :  { %v2124_v3 = vpop.f32.mrb[42].mxu1  ;;  %2466 = vst [vmem:[#allocation9 + $0x2a8] sm:$0xff] %v1677_v14 }
 0x1bf   :  { %2467 = vst [vmem:[#allocation9 + $0x2b0] sm:$0xff] %v2124_v3  ;;  %v2126_v5 = vpop.f32.mrb[43].mxu1 }
 0x1c0   :  { %2468 = vst [vmem:[#allocation9 + $0x2b8] sm:$0xff] %v2126_v5  ;;  %v1681_v27 = vpop.f32.mrb[44].mxu0 }
 0x1c1   :  { %2469 = vst [vmem:[#allocation9 + $0x2c0] sm:$0xff] %v1681_v27  ;;  %v1683_v57 = vpop.f32.mrb[45].mxu0 }
 0x1c2   :  { %v2130_v54 = vpop.f32.mrb[44].mxu1  ;;  %2470 = vst [vmem:[#allocation9 + $0x2c8] sm:$0xff] %v1683_v57 }
 0x1c3   :  { %2471 = vst [vmem:[#allocation9 + $0x2d0] sm:$0xff] %v2130_v54  ;;  %v2132_v23 = vpop.f32.mrb[45].mxu1 }
 0x1c4   :  { %2472 = vst [vmem:[#allocation9 + $0x2d8] sm:$0xff] %v2132_v23  ;;  %v1687_v19 = vpop.f32.mrb[46].mxu0 }
 0x1c5   :  { %2473 = vst [vmem:[#allocation9 + $0x2e0] sm:$0xff] %v1687_v19  ;;  %v1689_v9 = vpop.f32.mrb[47].mxu0 }
 0x1c6   :  { %v2136_v25 = vpop.f32.mrb[46].mxu1  ;;  %2474 = vst [vmem:[#allocation9 + $0x2e8] sm:$0xff] %v1689_v9 }
 0x1c7   :  { %2475 = vst [vmem:[#allocation9 + $0x2f0] sm:$0xff] %v2136_v25  ;;  %v2138_v44 = vpop.f32.mrb[47].mxu1 }
 0x1c8   :  { %2476 = vst [vmem:[#allocation9 + $0x2f8] sm:$0xff] %v2138_v44  ;;  %v1693_v43 = vpop.f32.mrb[48].mxu0 }
 0x1c9   :  { %2477 = vst [vmem:[#allocation9 + $0x300] sm:$0xff] %v1693_v43  ;;  %v1695_v59 = vpop.f32.mrb[49].mxu0 }
 0x1ca   :  { %v2142_v52 = vpop.f32.mrb[48].mxu1  ;;  %2478 = vst [vmem:[#allocation9 + $0x308] sm:$0xff] %v1695_v59 }
 0x1cb   :  { %2479 = vst [vmem:[#allocation9 + $0x310] sm:$0xff] %v2142_v52  ;;  %v2144_v45 = vpop.f32.mrb[49].mxu1 }
 0x1cc   :  { %2480 = vst [vmem:[#allocation9 + $0x318] sm:$0xff] %v2144_v45  ;;  %v1699_v16 = vpop.f32.mrb[50].mxu0 }
 0x1cd   :  { %2481 = vst [vmem:[#allocation9 + $0x320] sm:$0xff] %v1699_v16  ;;  %v1701_v35 = vpop.f32.mrb[51].mxu0 }
 0x1ce   :  { %v2148_v32 = vpop.f32.mrb[50].mxu1  ;;  %2482 = vst [vmem:[#allocation9 + $0x328] sm:$0xff] %v1701_v35 }
 0x1cf   :  { %2483 = vst [vmem:[#allocation9 + $0x330] sm:$0xff] %v2148_v32  ;;  %v2150_v2 = vpop.f32.mrb[51].mxu1 }
 0x1d0   :  { %2484 = vst [vmem:[#allocation9 + $0x338] sm:$0xff] %v2150_v2  ;;  %v1705_v11 = vpop.f32.mrb[52].mxu0 }
 0x1d1   :  { %2485 = vst [vmem:[#allocation9 + $0x340] sm:$0xff] %v1705_v11  ;;  %v1707_v48 = vpop.f32.mrb[53].mxu0 }
 0x1d2   :  { %v2154_v37 = vpop.f32.mrb[52].mxu1  ;;  %2486 = vst [vmem:[#allocation9 + $0x348] sm:$0xff] %v1707_v48 }
 0x1d3   :  { %2487 = vst [vmem:[#allocation9 + $0x350] sm:$0xff] %v2154_v37  ;;  %v2156_v33 = vpop.f32.mrb[53].mxu1 }
 0x1d4   :  { %2488 = vst [vmem:[#allocation9 + $0x358] sm:$0xff] %v2156_v33  ;;  %v1711_v42 = vpop.f32.mrb[54].mxu0 }
 0x1d5   :  { %2489 = vst [vmem:[#allocation9 + $0x360] sm:$0xff] %v1711_v42  ;;  %v1713_v10 = vpop.f32.mrb[55].mxu0 }
 0x1d6   :  { %v2160_v4 = vpop.f32.mrb[54].mxu1  ;;  %2490 = vst [vmem:[#allocation9 + $0x368] sm:$0xff] %v1713_v10 }
 0x1d7   :  { %2491 = vst [vmem:[#allocation9 + $0x370] sm:$0xff] %v2160_v4  ;;  %v2162_v60 = vpop.f32.mrb[55].mxu1 }
 0x1d8   :  { %2492 = vst [vmem:[#allocation9 + $0x378] sm:$0xff] %v2162_v60  ;;  %v1717_v18 = vpop.f32.mrb[56].mxu0 }
 0x1d9   :  { %2493 = vst [vmem:[#allocation9 + $0x380] sm:$0xff] %v1717_v18  ;;  %v1719_v38 = vpop.f32.mrb[57].mxu0 }
 0x1da   :  { %v2166_v49 = vpop.f32.mrb[56].mxu1  ;;  %2494 = vst [vmem:[#allocation9 + $0x388] sm:$0xff] %v1719_v38 }
 0x1db   :  { %2495 = vst [vmem:[#allocation9 + $0x390] sm:$0xff] %v2166_v49  ;;  %v2168_v1 = vpop.f32.mrb[57].mxu1 }
 0x1dc   :  { %2496 = vst [vmem:[#allocation9 + $0x398] sm:$0xff] %v2168_v1  ;;  %v1723_v21 = vpop.f32.mrb[58].mxu0 }
 0x1dd   :  { %2497 = vst [vmem:[#allocation9 + $0x3a0] sm:$0xff] %v1723_v21  ;;  %v1725_v41 = vpop.f32.mrb[59].mxu0 }
 0x1de   :  { %v2172_v55 = vpop.f32.mrb[58].mxu1  ;;  %2498 = vst [vmem:[#allocation9 + $0x3a8] sm:$0xff] %v1725_v41 }
 0x1df   :  { %2499 = vst [vmem:[#allocation9 + $0x3b0] sm:$0xff] %v2172_v55  ;;  %v2174_v15 = vpop.f32.mrb[59].mxu1 }
 0x1e0   :  { %2500 = vst [vmem:[#allocation9 + $0x3b8] sm:$0xff] %v2174_v15  ;;  %v1729_v46 = vpop.f32.mrb[60].mxu0 }
 0x1e1   :  { %2501 = vst [vmem:[#allocation9 + $0x3c0] sm:$0xff] %v1729_v46  ;;  %v1731_v20 = vpop.f32.mrb[61].mxu0 }
 0x1e2   :  { %v2178_v56 = vpop.f32.mrb[60].mxu1  ;;  %2502 = vst [vmem:[#allocation9 + $0x3c8] sm:$0xff] %v1731_v20 }
 0x1e3   :  { %2503 = vst [vmem:[#allocation9 + $0x3d0] sm:$0xff] %v2178_v56  ;;  %v2180_v0 = vpop.f32.mrb[61].mxu1 }
 0x1e4   :  { %2504 = vst [vmem:[#allocation9 + $0x3d8] sm:$0xff] %v2180_v0  ;;  %v1735_v22 = vpop.f32.mrb[62].mxu0 }
 0x1e5   :  { %2505 = vst [vmem:[#allocation9 + $0x3e0] sm:$0xff] %v1735_v22  ;;  %v1737_v63 = vpop.f32.mrb[63].mxu0 }
 0x1e6   :  { %v2184_v31 = vpop.f32.mrb[62].mxu1  ;;  %2506 = vst [vmem:[#allocation9 + $0x3e8] sm:$0xff] %v1737_v63 }
 0x1e7   :  { %2507 = vst [vmem:[#allocation9 + $0x3f0] sm:$0xff] %v2184_v31  ;;  %v2186_v53 = vpop.f32.mrb[63].mxu1 }
 0x1e8   :  { %2508 = vst [vmem:[#allocation9 + $0x3f8] sm:$0xff] %v2186_v53  ;;  %v1741_v61 = vpop.f32.mrb[64].mxu0 }
 0x1e9   :  { %2885 = shalt.err (!%p2882_p0)
}
 0x1ea   :  { %s2886_s28 = scalar_lea.hbm %s4563_s7, 16384 }
 0x1eb   :  { %p2887_p1 = scmp.ne.s32.totalorder %s4563_s7, %s2886_s28  ;;  %p2890_p2 = scmp.lt.u32.totalorder %s2886_s28, %s4563_s7 }
 0x1ed   :  { %p2892_p3 = pnand %p2890_p2, %p2887_p1 }
 0x1ef   :  { %2895 = shalt.err (!%p2892_p3)
}
 0x1f0   :  { %2660 = dma.vmem_to_hbm [thread:$0]  %s2655_s23, 16384, %s4563_s7, [#allocation11], %s2930_s4, %s2930_s4, %s2931_s25   ;;  %2509 = vst [vmem:[#allocation9 + $0x400] sm:$0xff] %v1741_v61  ;;  %v2190_v7 = vpop.f32.mrb[64].mxu1  ;;  %v1743_v30 = vpop.f32.mrb[65].mxu0 }
 0x1f1   :  { %2511 = vst [vmem:[#allocation9 + $0x410] sm:$0xff] %v2190_v7  ;;  %2510 = vst [vmem:[#allocation9 + $0x408] sm:$0xff] %v1743_v30  ;;  %v2192_v34 = vpop.f32.mrb[65].mxu1  ;;  %v1747_v39 = vpop.f32.mrb[66].mxu0  ;;  %s2934_s7 = smov [#allocation9]  }
 0x1f2   :  { %2512 = vst [vmem:[#allocation9 + $0x418] sm:$0xff] %v2192_v34  ;;  %2513 = vst [vmem:[#allocation9 + $0x420] sm:$0xff] %v1747_v39  ;;  %v2196_v8 = vpop.f32.mrb[66].mxu1  ;;  %v1749_v26 = vpop.f32.mrb[67].mxu0  ;;  %s2642_s4 = sshll.u32 %s2934_s7, 4  ;;  %s2643_s4 = int_to_ptr.vmem [resolvable:$true] %s2642_s4 }
 0x1f3   :  { %2515 = vst [vmem:[#allocation9 + $0x430] sm:$0xff] %v2196_v8  ;;  %2514 = vst [vmem:[#allocation9 + $0x428] sm:$0xff] %v1749_v26  ;;  %v2198_v6 = vpop.f32.mrb[67].mxu1  ;;  %v1753_v28 = vpop.f32.mrb[68].mxu0  ;;  %s2896_s25 = scalar_lea.vmem %s2643_s4, 32768  ;;  %p2901_p5 = scmp.lt.s32.totalorder %s2643_s4, %s2643_s4 }
 0x1f4   :  { %2516 = vst [vmem:[#allocation9 + $0x438] sm:$0xff] %v2198_v6  ;;  %2517 = vst [vmem:[#allocation9 + $0x440] sm:$0xff] %v1753_v28  ;;  %v2202_v47 = vpop.f32.mrb[68].mxu1  ;;  %v1755_v40 = vpop.f32.mrb[69].mxu0  ;;  %p2897_p4 = scmp.ne.s32.totalorder %s2643_s4, %s2896_s25  ;;  %p2902_p6 = scmp.lt.s32.totalorder %s2896_s25, %s2896_s25 }
 0x1f5   :  { %2519 = vst [vmem:[#allocation9 + $0x450] sm:$0xff] %v2202_v47  ;;  %2518 = vst [vmem:[#allocation9 + $0x448] sm:$0xff] %v1755_v40  ;;  %v2204_v36 = vpop.f32.mrb[69].mxu1  ;;  %v1759_v17 = vpop.f32.mrb[70].mxu0 }
 0x1f6   :  { %2520 = vst [vmem:[#allocation9 + $0x458] sm:$0xff] %v2204_v36  ;;  %2521 = vst [vmem:[#allocation9 + $0x460] sm:$0xff] %v1759_v17  ;;  %v2208_v24 = vpop.f32.mrb[70].mxu1  ;;  %v1761_v51 = vpop.f32.mrb[71].mxu0  ;;  %p2903_p7 = por %p2902_p6, %p2901_p5 }
 0x1f7   :  { %2523 = vst [vmem:[#allocation9 + $0x470] sm:$0xff] %v2208_v24  ;;  %2522 = vst [vmem:[#allocation9 + $0x468] sm:$0xff] %v1761_v51  ;;  %v2210_v62 = vpop.f32.mrb[71].mxu1 }
 0x1f8   :  { %2524 = vst [vmem:[#allocation9 + $0x478] sm:$0xff] %v2210_v62  ;;  %v1765_v12 = vpop.f32.mrb[72].mxu0  ;;  %p2904_p8 = pnand %p2903_p7, %p2897_p4 }
 0x1f9   :  { %2525 = vst [vmem:[#allocation9 + $0x480] sm:$0xff] %v1765_v12  ;;  %v1767_v50 = vpop.f32.mrb[73].mxu0 }
 0x1fa   :  { %v2214_v29 = vpop.f32.mrb[72].mxu1  ;;  %2526 = vst [vmem:[#allocation9 + $0x488] sm:$0xff] %v1767_v50 }
 0x1fb   :  { %2527 = vst [vmem:[#allocation9 + $0x490] sm:$0xff] %v2214_v29  ;;  %v2216_v13 = vpop.f32.mrb[73].mxu1 }
 0x1fc   :  { %2528 = vst [vmem:[#allocation9 + $0x498] sm:$0xff] %v2216_v13  ;;  %v1771_v58 = vpop.f32.mrb[74].mxu0 }
 0x1fd   :  { %2529 = vst [vmem:[#allocation9 + $0x4a0] sm:$0xff] %v1771_v58  ;;  %v1773_v14 = vpop.f32.mrb[75].mxu0 }
 0x1fe   :  { %v2220_v3 = vpop.f32.mrb[74].mxu1  ;;  %2530 = vst [vmem:[#allocation9 + $0x4a8] sm:$0xff] %v1773_v14 }
 0x1ff   :  { %2531 = vst [vmem:[#allocation9 + $0x4b0] sm:$0xff] %v2220_v3  ;;  %v2222_v5 = vpop.f32.mrb[75].mxu1 }
 0x200   :  { %2532 = vst [vmem:[#allocation9 + $0x4b8] sm:$0xff] %v2222_v5  ;;  %v1777_v27 = vpop.f32.mrb[76].mxu0 }
 0x201   :  { %2533 = vst [vmem:[#allocation9 + $0x4c0] sm:$0xff] %v1777_v27  ;;  %v1779_v57 = vpop.f32.mrb[77].mxu0 }
 0x202   :  { %v2226_v54 = vpop.f32.mrb[76].mxu1  ;;  %2534 = vst [vmem:[#allocation9 + $0x4c8] sm:$0xff] %v1779_v57 }
 0x203   :  { %2535 = vst [vmem:[#allocation9 + $0x4d0] sm:$0xff] %v2226_v54  ;;  %v2228_v23 = vpop.f32.mrb[77].mxu1 }
 0x204   :  { %2536 = vst [vmem:[#allocation9 + $0x4d8] sm:$0xff] %v2228_v23  ;;  %v1783_v19 = vpop.f32.mrb[78].mxu0 }
 0x205   :  { %2537 = vst [vmem:[#allocation9 + $0x4e0] sm:$0xff] %v1783_v19  ;;  %v1785_v9 = vpop.f32.mrb[79].mxu0 }
 0x206   :  { %v2232_v25 = vpop.f32.mrb[78].mxu1  ;;  %2538 = vst [vmem:[#allocation9 + $0x4e8] sm:$0xff] %v1785_v9 }
 0x207   :  { %2539 = vst [vmem:[#allocation9 + $0x4f0] sm:$0xff] %v2232_v25  ;;  %v2234_v44 = vpop.f32.mrb[79].mxu1 }
 0x208   :  { %2540 = vst [vmem:[#allocation9 + $0x4f8] sm:$0xff] %v2234_v44  ;;  %v1789_v43 = vpop.f32.mrb[80].mxu0 }
 0x209   :  { %2541 = vst [vmem:[#allocation9 + $0x500] sm:$0xff] %v1789_v43  ;;  %v1791_v59 = vpop.f32.mrb[81].mxu0 }
 0x20a   :  { %v2238_v52 = vpop.f32.mrb[80].mxu1  ;;  %2542 = vst [vmem:[#allocation9 + $0x508] sm:$0xff] %v1791_v59 }
 0x20b   :  { %2543 = vst [vmem:[#allocation9 + $0x510] sm:$0xff] %v2238_v52  ;;  %v2240_v45 = vpop.f32.mrb[81].mxu1 }
 0x20c   :  { %2544 = vst [vmem:[#allocation9 + $0x518] sm:$0xff] %v2240_v45  ;;  %v1795_v16 = vpop.f32.mrb[82].mxu0 }
 0x20d   :  { %2545 = vst [vmem:[#allocation9 + $0x520] sm:$0xff] %v1795_v16  ;;  %v1797_v35 = vpop.f32.mrb[83].mxu0 }
 0x20e   :  { %v2244_v32 = vpop.f32.mrb[82].mxu1  ;;  %2546 = vst [vmem:[#allocation9 + $0x528] sm:$0xff] %v1797_v35 }
 0x20f   :  { %2547 = vst [vmem:[#allocation9 + $0x530] sm:$0xff] %v2244_v32  ;;  %v2246_v2 = vpop.f32.mrb[83].mxu1 }
 0x210   :  { %2548 = vst [vmem:[#allocation9 + $0x538] sm:$0xff] %v2246_v2  ;;  %v1801_v11 = vpop.f32.mrb[84].mxu0 }
 0x211   :  { %2549 = vst [vmem:[#allocation9 + $0x540] sm:$0xff] %v1801_v11  ;;  %v1803_v48 = vpop.f32.mrb[85].mxu0 }
 0x212   :  { %v2250_v37 = vpop.f32.mrb[84].mxu1  ;;  %2550 = vst [vmem:[#allocation9 + $0x548] sm:$0xff] %v1803_v48 }
 0x213   :  { %2551 = vst [vmem:[#allocation9 + $0x550] sm:$0xff] %v2250_v37  ;;  %v2252_v33 = vpop.f32.mrb[85].mxu1 }
 0x214   :  { %2552 = vst [vmem:[#allocation9 + $0x558] sm:$0xff] %v2252_v33  ;;  %v1807_v42 = vpop.f32.mrb[86].mxu0 }
 0x215   :  { %2553 = vst [vmem:[#allocation9 + $0x560] sm:$0xff] %v1807_v42  ;;  %v1809_v10 = vpop.f32.mrb[87].mxu0 }
 0x216   :  { %v2256_v4 = vpop.f32.mrb[86].mxu1  ;;  %2554 = vst [vmem:[#allocation9 + $0x568] sm:$0xff] %v1809_v10 }
 0x217   :  { %2555 = vst [vmem:[#allocation9 + $0x570] sm:$0xff] %v2256_v4  ;;  %v2258_v60 = vpop.f32.mrb[87].mxu1 }
 0x218   :  { %2556 = vst [vmem:[#allocation9 + $0x578] sm:$0xff] %v2258_v60  ;;  %v1813_v18 = vpop.f32.mrb[88].mxu0 }
 0x219   :  { %2557 = vst [vmem:[#allocation9 + $0x580] sm:$0xff] %v1813_v18  ;;  %v1815_v38 = vpop.f32.mrb[89].mxu0 }
 0x21a   :  { %v2262_v49 = vpop.f32.mrb[88].mxu1  ;;  %2558 = vst [vmem:[#allocation9 + $0x588] sm:$0xff] %v1815_v38 }
 0x21b   :  { %2559 = vst [vmem:[#allocation9 + $0x590] sm:$0xff] %v2262_v49  ;;  %v2264_v1 = vpop.f32.mrb[89].mxu1 }
 0x21c   :  { %2560 = vst [vmem:[#allocation9 + $0x598] sm:$0xff] %v2264_v1  ;;  %v1819_v21 = vpop.f32.mrb[90].mxu0 }
 0x21d   :  { %2561 = vst [vmem:[#allocation9 + $0x5a0] sm:$0xff] %v1819_v21  ;;  %v1821_v41 = vpop.f32.mrb[91].mxu0 }
 0x21e   :  { %v2268_v55 = vpop.f32.mrb[90].mxu1  ;;  %2562 = vst [vmem:[#allocation9 + $0x5a8] sm:$0xff] %v1821_v41 }
 0x21f   :  { %2563 = vst [vmem:[#allocation9 + $0x5b0] sm:$0xff] %v2268_v55  ;;  %v2270_v15 = vpop.f32.mrb[91].mxu1 }
 0x220   :  { %2564 = vst [vmem:[#allocation9 + $0x5b8] sm:$0xff] %v2270_v15  ;;  %v1825_v46 = vpop.f32.mrb[92].mxu0 }
 0x221   :  { %2565 = vst [vmem:[#allocation9 + $0x5c0] sm:$0xff] %v1825_v46  ;;  %v1827_v20 = vpop.f32.mrb[93].mxu0 }
 0x222   :  { %v2274_v56 = vpop.f32.mrb[92].mxu1  ;;  %2566 = vst [vmem:[#allocation9 + $0x5c8] sm:$0xff] %v1827_v20 }
 0x223   :  { %2567 = vst [vmem:[#allocation9 + $0x5d0] sm:$0xff] %v2274_v56  ;;  %v2276_v0 = vpop.f32.mrb[93].mxu1 }
 0x224   :  { %2568 = vst [vmem:[#allocation9 + $0x5d8] sm:$0xff] %v2276_v0  ;;  %v1831_v22 = vpop.f32.mrb[94].mxu0 }
 0x225   :  { %2569 = vst [vmem:[#allocation9 + $0x5e0] sm:$0xff] %v1831_v22  ;;  %v1833_v63 = vpop.f32.mrb[95].mxu0 }
 0x226   :  { %v2280_v31 = vpop.f32.mrb[94].mxu1  ;;  %2570 = vst [vmem:[#allocation9 + $0x5e8] sm:$0xff] %v1833_v63 }
 0x227   :  { %2571 = vst [vmem:[#allocation9 + $0x5f0] sm:$0xff] %v2280_v31  ;;  %v2282_v53 = vpop.f32.mrb[95].mxu1 }
 0x228   :  { %2572 = vst [vmem:[#allocation9 + $0x5f8] sm:$0xff] %v2282_v53  ;;  %v1837_v61 = vpop.f32.mrb[96].mxu0 }
 0x229   :  { %2573 = vst [vmem:[#allocation9 + $0x600] sm:$0xff] %v1837_v61  ;;  %v1839_v30 = vpop.f32.mrb[97].mxu0 }
 0x22a   :  { %v2286_v7 = vpop.f32.mrb[96].mxu1  ;;  %2574 = vst [vmem:[#allocation9 + $0x608] sm:$0xff] %v1839_v30 }
 0x22b   :  { %2575 = vst [vmem:[#allocation9 + $0x610] sm:$0xff] %v2286_v7  ;;  %v2288_v34 = vpop.f32.mrb[97].mxu1 }
 0x22c   :  { %2576 = vst [vmem:[#allocation9 + $0x618] sm:$0xff] %v2288_v34  ;;  %v1843_v39 = vpop.f32.mrb[98].mxu0 }
 0x22d   :  { %2577 = vst [vmem:[#allocation9 + $0x620] sm:$0xff] %v1843_v39  ;;  %v1845_v26 = vpop.f32.mrb[99].mxu0 }
 0x22e   :  { %v2292_v8 = vpop.f32.mrb[98].mxu1  ;;  %2578 = vst [vmem:[#allocation9 + $0x628] sm:$0xff] %v1845_v26 }
 0x22f   :  { %2579 = vst [vmem:[#allocation9 + $0x630] sm:$0xff] %v2292_v8  ;;  %v2294_v6 = vpop.f32.mrb[99].mxu1 }
 0x230   :  { %2580 = vst [vmem:[#allocation9 + $0x638] sm:$0xff] %v2294_v6  ;;  %v1849_v28 = vpop.f32.mrb[100].mxu0 }
 0x231   :  { %2581 = vst [vmem:[#allocation9 + $0x640] sm:$0xff] %v1849_v28  ;;  %v1851_v40 = vpop.f32.mrb[101].mxu0 }
 0x232   :  { %v2298_v47 = vpop.f32.mrb[100].mxu1  ;;  %2582 = vst [vmem:[#allocation9 + $0x648] sm:$0xff] %v1851_v40 }
 0x233   :  { %2583 = vst [vmem:[#allocation9 + $0x650] sm:$0xff] %v2298_v47  ;;  %v2300_v36 = vpop.f32.mrb[101].mxu1 }
 0x234   :  { %2584 = vst [vmem:[#allocation9 + $0x658] sm:$0xff] %v2300_v36  ;;  %v1855_v17 = vpop.f32.mrb[102].mxu0 }
 0x235   :  { %2585 = vst [vmem:[#allocation9 + $0x660] sm:$0xff] %v1855_v17  ;;  %v1857_v51 = vpop.f32.mrb[103].mxu0 }
 0x236   :  { %v2304_v24 = vpop.f32.mrb[102].mxu1  ;;  %2586 = vst [vmem:[#allocation9 + $0x668] sm:$0xff] %v1857_v51 }
 0x237   :  { %2587 = vst [vmem:[#allocation9 + $0x670] sm:$0xff] %v2304_v24  ;;  %v2306_v62 = vpop.f32.mrb[103].mxu1 }
 0x238   :  { %2588 = vst [vmem:[#allocation9 + $0x678] sm:$0xff] %v2306_v62  ;;  %v1861_v12 = vpop.f32.mrb[104].mxu0 }
 0x239   :  { %2589 = vst [vmem:[#allocation9 + $0x680] sm:$0xff] %v1861_v12  ;;  %v1863_v50 = vpop.f32.mrb[105].mxu0 }
 0x23a   :  { %v2310_v29 = vpop.f32.mrb[104].mxu1  ;;  %2590 = vst [vmem:[#allocation9 + $0x688] sm:$0xff] %v1863_v50 }
 0x23b   :  { %2591 = vst [vmem:[#allocation9 + $0x690] sm:$0xff] %v2310_v29  ;;  %v2312_v13 = vpop.f32.mrb[105].mxu1 }
 0x23c   :  { %2592 = vst [vmem:[#allocation9 + $0x698] sm:$0xff] %v2312_v13  ;;  %v1867_v58 = vpop.f32.mrb[106].mxu0 }
 0x23d   :  { %2593 = vst [vmem:[#allocation9 + $0x6a0] sm:$0xff] %v1867_v58  ;;  %v1869_v14 = vpop.f32.mrb[107].mxu0 }
 0x23e   :  { %v2316_v3 = vpop.f32.mrb[106].mxu1  ;;  %2594 = vst [vmem:[#allocation9 + $0x6a8] sm:$0xff] %v1869_v14 }
 0x23f   :  { %2595 = vst [vmem:[#allocation9 + $0x6b0] sm:$0xff] %v2316_v3  ;;  %v2318_v5 = vpop.f32.mrb[107].mxu1 }
 0x240   :  { %2596 = vst [vmem:[#allocation9 + $0x6b8] sm:$0xff] %v2318_v5  ;;  %v1873_v27 = vpop.f32.mrb[108].mxu0 }
 0x241   :  { %2597 = vst [vmem:[#allocation9 + $0x6c0] sm:$0xff] %v1873_v27  ;;  %v1875_v57 = vpop.f32.mrb[109].mxu0 }
 0x242   :  { %v2322_v54 = vpop.f32.mrb[108].mxu1  ;;  %2598 = vst [vmem:[#allocation9 + $0x6c8] sm:$0xff] %v1875_v57 }
 0x243   :  { %2599 = vst [vmem:[#allocation9 + $0x6d0] sm:$0xff] %v2322_v54  ;;  %v2324_v23 = vpop.f32.mrb[109].mxu1 }
 0x244   :  { %2600 = vst [vmem:[#allocation9 + $0x6d8] sm:$0xff] %v2324_v23  ;;  %v1879_v19 = vpop.f32.mrb[110].mxu0 }
 0x245   :  { %2601 = vst [vmem:[#allocation9 + $0x6e0] sm:$0xff] %v1879_v19  ;;  %v1881_v9 = vpop.f32.mrb[111].mxu0 }
 0x246   :  { %v2328_v25 = vpop.f32.mrb[110].mxu1  ;;  %2602 = vst [vmem:[#allocation9 + $0x6e8] sm:$0xff] %v1881_v9 }
 0x247   :  { %2603 = vst [vmem:[#allocation9 + $0x6f0] sm:$0xff] %v2328_v25  ;;  %v2330_v44 = vpop.f32.mrb[111].mxu1 }
 0x248   :  { %2604 = vst [vmem:[#allocation9 + $0x6f8] sm:$0xff] %v2330_v44  ;;  %v1885_v43 = vpop.f32.mrb[112].mxu0 }
 0x249   :  { %2605 = vst [vmem:[#allocation9 + $0x700] sm:$0xff] %v1885_v43  ;;  %v1887_v59 = vpop.f32.mrb[113].mxu0 }
 0x24a   :  { %v2334_v52 = vpop.f32.mrb[112].mxu1  ;;  %2606 = vst [vmem:[#allocation9 + $0x708] sm:$0xff] %v1887_v59 }
 0x24b   :  { %2607 = vst [vmem:[#allocation9 + $0x710] sm:$0xff] %v2334_v52  ;;  %v2336_v45 = vpop.f32.mrb[113].mxu1 }
 0x24c   :  { %2608 = vst [vmem:[#allocation9 + $0x718] sm:$0xff] %v2336_v45  ;;  %v1891_v16 = vpop.f32.mrb[114].mxu0 }
 0x24d   :  { %2609 = vst [vmem:[#allocation9 + $0x720] sm:$0xff] %v1891_v16  ;;  %v1893_v35 = vpop.f32.mrb[115].mxu0 }
 0x24e   :  { %v2340_v32 = vpop.f32.mrb[114].mxu1  ;;  %2610 = vst [vmem:[#allocation9 + $0x728] sm:$0xff] %v1893_v35 }
 0x24f   :  { %2611 = vst [vmem:[#allocation9 + $0x730] sm:$0xff] %v2340_v32  ;;  %v2342_v2 = vpop.f32.mrb[115].mxu1 }
 0x250   :  { %2612 = vst [vmem:[#allocation9 + $0x738] sm:$0xff] %v2342_v2  ;;  %v1897_v11 = vpop.f32.mrb[116].mxu0 }
 0x251   :  { %2613 = vst [vmem:[#allocation9 + $0x740] sm:$0xff] %v1897_v11  ;;  %v1899_v48 = vpop.f32.mrb[117].mxu0 }
 0x252   :  { %v2346_v37 = vpop.f32.mrb[116].mxu1  ;;  %2614 = vst [vmem:[#allocation9 + $0x748] sm:$0xff] %v1899_v48 }
 0x253   :  { %2615 = vst [vmem:[#allocation9 + $0x750] sm:$0xff] %v2346_v37  ;;  %v2348_v33 = vpop.f32.mrb[117].mxu1 }
 0x254   :  { %2616 = vst [vmem:[#allocation9 + $0x758] sm:$0xff] %v2348_v33  ;;  %v1903_v42 = vpop.f32.mrb[118].mxu0 }
 0x255   :  { %2617 = vst [vmem:[#allocation9 + $0x760] sm:$0xff] %v1903_v42  ;;  %v1905_v10 = vpop.f32.mrb[119].mxu0 }
 0x256   :  { %v2352_v4 = vpop.f32.mrb[118].mxu1  ;;  %2618 = vst [vmem:[#allocation9 + $0x768] sm:$0xff] %v1905_v10 }
 0x257   :  { %2619 = vst [vmem:[#allocation9 + $0x770] sm:$0xff] %v2352_v4  ;;  %v2354_v60 = vpop.f32.mrb[119].mxu1 }
 0x258   :  { %2620 = vst [vmem:[#allocation9 + $0x778] sm:$0xff] %v2354_v60  ;;  %v1909_v18 = vpop.f32.mrb[120].mxu0 }
 0x259   :  { %2621 = vst [vmem:[#allocation9 + $0x780] sm:$0xff] %v1909_v18  ;;  %v1911_v38 = vpop.f32.mrb[121].mxu0 }
 0x25a   :  { %v2358_v49 = vpop.f32.mrb[120].mxu1  ;;  %2622 = vst [vmem:[#allocation9 + $0x788] sm:$0xff] %v1911_v38 }
 0x25b   :  { %2623 = vst [vmem:[#allocation9 + $0x790] sm:$0xff] %v2358_v49  ;;  %v2360_v1 = vpop.f32.mrb[121].mxu1 }
 0x25c   :  { %2624 = vst [vmem:[#allocation9 + $0x798] sm:$0xff] %v2360_v1  ;;  %v1915_v21 = vpop.f32.mrb[122].mxu0 }
 0x25d   :  { %2625 = vst [vmem:[#allocation9 + $0x7a0] sm:$0xff] %v1915_v21  ;;  %v1917_v41 = vpop.f32.mrb[123].mxu0 }
 0x25e   :  { %v2364_v55 = vpop.f32.mrb[122].mxu1  ;;  %2626 = vst [vmem:[#allocation9 + $0x7a8] sm:$0xff] %v1917_v41 }
 0x25f   :  { %2627 = vst [vmem:[#allocation9 + $0x7b0] sm:$0xff] %v2364_v55  ;;  %v2366_v15 = vpop.f32.mrb[123].mxu1 }
 0x260   :  { %2628 = vst [vmem:[#allocation9 + $0x7b8] sm:$0xff] %v2366_v15  ;;  %v1921_v46 = vpop.f32.mrb[124].mxu0 }
 0x261   :  { %2629 = vst [vmem:[#allocation9 + $0x7c0] sm:$0xff] %v1921_v46  ;;  %v1923_v20 = vpop.f32.mrb[125].mxu0 }
 0x262   :  { %v2370_v56 = vpop.f32.mrb[124].mxu1  ;;  %2630 = vst [vmem:[#allocation9 + $0x7c8] sm:$0xff] %v1923_v20 }
 0x263   :  { %2631 = vst [vmem:[#allocation9 + $0x7d0] sm:$0xff] %v2370_v56  ;;  %v2372_v0 = vpop.f32.mrb[125].mxu1 }
 0x264   :  { %2632 = vst [vmem:[#allocation9 + $0x7d8] sm:$0xff] %v2372_v0  ;;  %v1927_v22 = vpop.f32.mrb[126].mxu0 }
 0x265   :  { %2633 = vst [vmem:[#allocation9 + $0x7e0] sm:$0xff] %v1927_v22  ;;  %v1929_v63 = vpop.f32.mrb[127].mxu0 }
 0x266   :  { %v2376_v31 = vpop.f32.mrb[126].mxu1  ;;  %2634 = vst [vmem:[#allocation9 + $0x7e8] sm:$0xff] %v1929_v63 }
 0x267   :  { %2635 = vst [vmem:[#allocation9 + $0x7f0] sm:$0xff] %v2376_v31  ;;  %v2378_v53 = vpop.f32.mrb[127].mxu1 }
 0x268   :  { %2636 = vst [vmem:[#allocation9 + $0x7f8] sm:$0xff] %v2378_v53 }
 0x269   :  { %2907 = shalt.err (!%p2904_p8)
}
 0x26a   :  { %s2908_s17 = scalar_lea.hbm %s4562_s6, 32768 }
 0x26b   :  { %p2909_p9 = scmp.ne.s32.totalorder %s4562_s6, %s2908_s17  ;;  %p2912_p10 = scmp.lt.u32.totalorder %s2908_s17, %s4562_s6 }
 0x26d   :  { %p2914_p11 = pnand %p2912_p10, %p2909_p9 }
 0x26f   :  { %2917 = shalt.err (!%p2914_p11)
}
 0x270   :  { %2648 = dma.vmem_to_hbm [thread:$0]  %s2643_s4, 32768, %s4562_s6, [#allocation5], %s2927_s11, %s2927_s11, %s2928_s12  }
 0x271   :  { %2922 = dma.done.wait [#allocation5], 32768  }
 0x272   :  { %2923 = vsyncadd [#allocation5], 4294934528 }
 0x273   :  { %2924 = dma.done.wait [#allocation11], 16384  }
 0x274   :  { %2925 = vsyncadd [#allocation11], 4294950912 }
 0x275   :  { %2667 = vsyncpa [#allocation4], 1 }
 0x276   :  { %2668 = vsyncpa [#allocation7], 1 }
 0x277   :  { %2669 = vsyncpa [#allocation5], 1 }
 0x278   :  { %2670 = vsyncpa [#allocation11], 1 }

// kernel: updating_q_layer_0.1
= control target key start
LH: loop header
LB: loop body
LE: loop exit
PB: predicated region body
PF: predicated region fallthrough
CT: control target
= control target key end

     0   :  { %14 = vsyncpa [#allocation4], 0  ;;  %s4556_s0 = inlined_call_operand.<no memory space> [shape: f32[1], index: 0, kind: input, shape index: {}]   ;;  %s4557_s1 = inlined_call_operand.vmem [shape: f32[512,256], index: 1, kind: input, shape index: {}]   ;;  %s4558_s2 = inlined_call_operand.vmem [shape: f32[512,256], index: 2, kind: input, shape index: {}]   ;;  %s4559_s3 = inlined_call_operand.hbm [shape: f32[512,256], index: 3, kind: input, shape index: {}, may-alias: {3,7}]   ;;  %s4560_s4 = inlined_call_operand.hbm [shape: f32[256,512], index: 4, kind: input, shape index: {}]   ;;  %s4561_s5 = inlined_call_operand.hbm [shape: f32[256,512], index: 5, kind: input, shape index: {}]   ;;  %s4562_s6 = inlined_call_operand.hbm [shape: f32[512,512], index: 6, kind: output, shape index: {0}]   ;;  %s4563_s7 = inlined_call_operand.hbm [shape: f32[512,256], index: 7, kind: output, shape index: {1}, may-alias: {3,7}]  }
   0x1   :  { %15 = vsyncpa [#allocation7], 0 }
   0x2   :  { %16 = vsyncpa [#allocation5], 0 }
   0x3   :  { %17 = vsyncpa [#allocation11], 0  ;;  %s2926_s24 = smov [#allocation6]   ;;  %s2808_s28 = scalar_lea.hbm %s4560_s4, 16384 }
   0x4   :  { %s41_s25 = sshll.u32 %s2926_s24, 4  ;;  %p2809_p0 = scmp.ne.s32.totalorder %s4560_s4, %s2808_s28  ;;  %s42_s25 = int_to_ptr.vmem [resolvable:$true] %s41_s25 }
   0x5   :  { %p2812_p1 = scmp.lt.u32.totalorder %s2808_s28, %s4560_s4 }
   0x7   :  { %p2814_p2 = pnand %p2812_p1, %p2809_p0 }
   0x9   :  { %2817 = shalt.err (!%p2814_p2)
}
   0xa   :  { %s2818_s10 = scalar_lea.vmem %s42_s25, 16384  ;;  %p2823_p4 = scmp.lt.s32.totalorder %s42_s25, %s42_s25 }
   0xb   :  { %p2819_p3 = scmp.ne.s32.totalorder %s42_s25, %s2818_s10  ;;  %p2824_p5 = scmp.lt.s32.totalorder %s2818_s10, %s2818_s10 }
   0xd   :  { %p2825_p6 = por %p2824_p5, %p2823_p4 }
   0xf   :  { %p2826_p7 = pnand %p2825_p6, %p2819_p3 }
  0x11   :  { %2829 = shalt.err (!%p2826_p7)
}
  0x12   :  { %s2927_s11 = smov 512   ;;  %s2928_s12 = smov 32  }
  0x13   :  { %47 = dma.hbm_to_vmem [thread:$0]  %s4560_s4, 16384, %s42_s25, [#allocation7], %s2927_s11, %s2927_s11, %s2928_s12  }
  0x14   :  { %s2929_s15 = smov [#allocation3]   ;;  %s2830_s19 = scalar_lea.hbm %s4559_s3, 16384 }
  0x15   :  { %s29_s16 = sshll.u32 %s2929_s15, 4  ;;  %p2831_p8 = scmp.ne.s32.totalorder %s4559_s3, %s2830_s19  ;;  %s30_s16 = int_to_ptr.vmem [resolvable:$true] %s29_s16 }
  0x16   :  { %p2834_p9 = scmp.lt.u32.totalorder %s2830_s19, %s4559_s3 }
  0x18   :  { %p2836_p10 = pnand %p2834_p9, %p2831_p8 }
  0x1a   :  { %2839 = shalt.err (!%p2836_p10)
}
  0x1b   :  { %s2840_s24 = scalar_lea.vmem %s30_s16, 16384  ;;  %p2845_p12 = scmp.lt.s32.totalorder %s30_s16, %s30_s16 }
  0x1c   :  { %p2841_p11 = scmp.ne.s32.totalorder %s30_s16, %s2840_s24  ;;  %p2846_p13 = scmp.lt.s32.totalorder %s2840_s24, %s2840_s24 }
  0x1e   :  { %p2847_p0 = por %p2846_p13, %p2845_p12 }
  0x20   :  { %p2848_p1 = pnand %p2847_p0, %p2841_p11 }
  0x22   :  { %2851 = shalt.err (!%p2848_p1)
}
  0x23   :  { %s2930_s4 = smov 256   ;;  %s2931_s25 = smov 16  }
  0x24   :  { %35 = dma.hbm_to_vmem [thread:$0]  %s4559_s3, 16384, %s30_s16, [#allocation4], %s2930_s4, %s2930_s4, %s2931_s25  }
  0x25   :  { %s2932_s28 = smov [#allocation8]   ;;  %s2852_s9 = scalar_lea.hbm %s4561_s5, 16384 }
  0x26   :  { %s53_s29 = sshll.u32 %s2932_s28, 4  ;;  %p2853_p2 = scmp.ne.s32.totalorder %s4561_s5, %s2852_s9  ;;  %s54_s29 = int_to_ptr.vmem [resolvable:$true] %s53_s29 }
  0x27   :  { %p2856_p3 = scmp.lt.u32.totalorder %s2852_s9, %s4561_s5 }
  0x29   :  { %p2858_p4 = pnand %p2856_p3, %p2853_p2 }
  0x2b   :  { %2861 = shalt.err (!%p2858_p4)
}
  0x2c   :  { %s2862_s17 = scalar_lea.vmem %s54_s29, 16384  ;;  %p2867_p6 = scmp.lt.s32.totalorder %s54_s29, %s54_s29 }
  0x2d   :  { %p2863_p5 = scmp.ne.s32.totalorder %s54_s29, %s2862_s17  ;;  %p2868_p7 = scmp.lt.s32.totalorder %s2862_s17, %s2862_s17 }
  0x2f   :  { %p2869_p8 = por %p2868_p7, %p2867_p6 }
  0x31   :  { %p2870_p9 = pnand %p2869_p8, %p2863_p5 }
  0x33   :  { %2873 = shalt.err (!%p2870_p9)
}
  0x34   :  { %59 = dma.hbm_to_vmem [thread:$0]  %s4561_s5, 16384, %s54_s29, [#allocation7], %s2927_s11, %s2927_s11, %s2928_s12  }
  0x35   :  { %2918 = dma.done.wait [#allocation4], 16384  }
  0x36   :  { %2919 = vsyncadd [#allocation4], 4294950912 }
  0x37   :  { %2920 = dma.done.wait [#allocation7], 32768  }
  0x38   :  { %2921 = vsyncadd [#allocation7], 4294934528  ;;  %v3023_v0 = vstv %s4556_s0  ;;  %v843_v1 = vld [vmem:[#allocation6 + $0x8] sm:$0xff]  ;;  %v845_v7 = vld [vmem:[#allocation6 + $0x18] sm:$0xff] }
  0x39   :  { %v847_v2 = vld [vmem:[#allocation6 + $0x28] sm:$0xff]  ;;  %v972_v4 = vmul.f32 %v3023_v0, %v843_v1  ;;  %v849_v8 = vld [vmem:[#allocation6 + $0x38] sm:$0xff]  ;;  %v974_v9 = vmul.f32 %v3023_v0, %v845_v7  ;;  %v842_v13 = vld [vmem:[#allocation6] sm:$0xff] }
  0x3a   :  { %v1100_v3 = vld [vmem:[#allocation8 + $0x8] sm:$0xff]  ;;  %v976_v5 = vmul.f32 %v3023_v0, %v847_v2  ;;  %v978_v10 = vmul.f32 %v3023_v0, %v849_v8  ;;  %v1102_v11 = vld [vmem:[#allocation8 + $0x18] sm:$0xff]  ;;  %v846_v16 = vld [vmem:[#allocation6 + $0x20] sm:$0xff]  ;;  %v971_v17 = vmul.f32 %v3023_v0, %v842_v13 }
  0x3b   :  { %v1104_v6 = vld [vmem:[#allocation8 + $0x28] sm:$0xff]  ;;  %v1106_v12 = vld [vmem:[#allocation8 + $0x38] sm:$0xff]  ;;  %v1228_v14 = vadd.f32 %v1100_v3, %v972_v4  ;;  %v1099_v18 = vld [vmem:[#allocation8] sm:$0xff]  ;;  %v1230_v20 = vadd.f32 %v1102_v11, %v974_v9  ;;  %v975_v22 = vmul.f32 %v3023_v0, %v846_v16 }
  0x3c   :  { %v1232_v15 = vadd.f32 %v1104_v6, %v976_v5  ;;  %v1103_v19 = vld [vmem:[#allocation8 + $0x20] sm:$0xff]  ;;  %v1234_v21 = vadd.f32 %v1106_v12, %v978_v10  ;;  %v844_v23 = vld [vmem:[#allocation6 + $0x10] sm:$0xff]  ;;  %v1227_v27 = vadd.f32 %v1099_v18, %v971_v17  ;;  %v851_v31 = vld [vmem:[#allocation6 + $0x48] sm:$0xff] }
  0x3d   :  { %v848_v24 = vld [vmem:[#allocation6 + $0x30] sm:$0xff]  ;;  %v973_v28 = vmul.f32 %v3023_v0, %v844_v23  ;;  %v855_v32 = vld [vmem:[#allocation6 + $0x68] sm:$0xff]  ;;  %v1231_v34 = vadd.f32 %v1103_v19, %v975_v22  ;;  %v980_v35 = vmul.f32 %v3023_v0, %v851_v31  ;;  %v853_v39 = vld [vmem:[#allocation6 + $0x58] sm:$0xff] }
  0x3e   :  { %v1101_v25 = vld [vmem:[#allocation8 + $0x10] sm:$0xff]  ;;  %v2671_v26 = vpack.c.bf16 %v1232_v15, %v1228_v14  ;;  %v977_v29 = vmul.f32 %v3023_v0, %v848_v24  ;;  %v2735_v33 = vpack.c.bf16 %v1234_v21, %v1230_v20  ;;  %v984_v36 = vmul.f32 %v3023_v0, %v855_v32  ;;  %v1108_v37 = vld [vmem:[#allocation8 + $0x48] sm:$0xff]  ;;  %v857_v42 = vld [vmem:[#allocation6 + $0x78] sm:$0xff] }
  0x3f   :  { %v1105_v30 = vld [vmem:[#allocation8 + $0x30] sm:$0xff]  ;;  %v1112_v38 = vld [vmem:[#allocation8 + $0x68] sm:$0xff]  ;;  %v1229_v40 = vadd.f32 %v1101_v25, %v973_v28  ;;  %v982_v43 = vmul.f32 %v3023_v0, %v853_v39  ;;  %v1110_v44 = vld [vmem:[#allocation8 + $0x58] sm:$0xff]  ;;  %v2673_v46 = vpack.c.bf16 %v1231_v34, %v1227_v27  ;;  %v1236_v47 = vadd.f32 %v1108_v37, %v980_v35 }
  0x40   :  { %2672 = vmatprep.subr.bf16.mxu0 %v2671_v26  ;;  %v1233_v41 = vadd.f32 %v1105_v30, %v977_v29  ;;  %v1114_v45 = vld [vmem:[#allocation8 + $0x78] sm:$0xff]  ;;  %2736 = vmatprep.subr.bf16.mxu1 %v2735_v33  ;;  %v1240_v48 = vadd.f32 %v1112_v38, %v984_v36  ;;  %v986_v49 = vmul.f32 %v3023_v0, %v857_v42  ;;  %v850_v50 = vld [vmem:[#allocation6 + $0x40] sm:$0xff]  ;;  %v852_v58 = vld [vmem:[#allocation6 + $0x50] sm:$0xff] }
  0x41   :  { %v854_v51 = vld [vmem:[#allocation6 + $0x60] sm:$0xff]  ;;  %v1238_v54 = vadd.f32 %v1110_v44, %v982_v43  ;;  %v979_v55 = vmul.f32 %v3023_v0, %v850_v50  ;;  %v856_v59 = vld [vmem:[#allocation6 + $0x70] sm:$0xff]  ;;  %2674 = vmatpush1.bf16.msra.mxu0 %v2673_v46  ;;  %v981_v62 = vmul.f32 %v3023_v0, %v852_v58  ;;  %v859_v3 = vld [vmem:[#allocation6 + $0x88] sm:$0xff] }
  0x42   :  { %v1107_v52 = vld [vmem:[#allocation8 + $0x40] sm:$0xff]  ;;  %v2737_v53 = vpack.c.bf16 %v1233_v41, %v1229_v40  ;;  %v983_v56 = vmul.f32 %v3023_v0, %v854_v51  ;;  %v2675_v60 = vpack.c.bf16 %v1240_v48, %v1236_v47  ;;  %v1242_v61 = vadd.f32 %v1114_v45, %v986_v49  ;;  %v1109_v1 = vld [vmem:[#allocation8 + $0x50] sm:$0xff]  ;;  %v863_v6 = vld [vmem:[#allocation6 + $0xa8] sm:$0xff] }
  0x43   :  { %v1111_v57 = vld [vmem:[#allocation8 + $0x60] sm:$0xff]  ;;  %v985_v63 = vmul.f32 %v3023_v0, %v856_v59  ;;  %v1113_v2 = vld [vmem:[#allocation8 + $0x70] sm:$0xff]  ;;  %v1235_v4 = vadd.f32 %v1107_v52, %v979_v55  ;;  %v988_v7 = vmul.f32 %v3023_v0, %v859_v3  ;;  %v1116_v8 = vld [vmem:[#allocation8 + $0x88] sm:$0xff]  ;;  %v1237_v11 = vadd.f32 %v1109_v1, %v981_v62 }
  0x44   :  { %2738 = vmatpush1.bf16.msra.mxu1 %v2737_v53  ;;  %v1239_v5 = vadd.f32 %v1111_v57, %v983_v56  ;;  %v1120_v9 = vld [vmem:[#allocation8 + $0xa8] sm:$0xff]  ;;  %2676 = vmatprep.subr.bf16.mxu0 %v2675_v60  ;;  %v2739_v10 = vpack.c.bf16 %v1242_v61, %v1238_v54  ;;  %v992_v13 = vmul.f32 %v3023_v0, %v863_v6  ;;  %v861_v14 = vld [vmem:[#allocation6 + $0x98] sm:$0xff]  ;;  %v858_v22 = vld [vmem:[#allocation6 + $0x80] sm:$0xff] }
  0x45   :  { %v1241_v12 = vadd.f32 %v1113_v2, %v985_v63  ;;  %v865_v15 = vld [vmem:[#allocation6 + $0xb8] sm:$0xff]  ;;  %v1244_v18 = vadd.f32 %v1116_v8, %v988_v7  ;;  %v990_v19 = vmul.f32 %v3023_v0, %v861_v14  ;;  %v862_v23 = vld [vmem:[#allocation6 + $0xa0] sm:$0xff]  ;;  %v987_v26 = vmul.f32 %v3023_v0, %v858_v22  ;;  %v860_v30 = vld [vmem:[#allocation6 + $0x90] sm:$0xff] }
  0x46   :  { %v1118_v16 = vld [vmem:[#allocation8 + $0x98] sm:$0xff]  ;;  %v2677_v17 = vpack.c.bf16 %v1239_v5, %v1235_v4  ;;  %v994_v20 = vmul.f32 %v3023_v0, %v865_v15  ;;  %2740 = vmatprep.subr.bf16.mxu1 %v2739_v10  ;;  %v1248_v25 = vadd.f32 %v1120_v9, %v992_v13  ;;  %v991_v27 = vmul.f32 %v3023_v0, %v862_v23  ;;  %v1115_v28 = vld [vmem:[#allocation8 + $0x80] sm:$0xff]  ;;  %v864_v33 = vld [vmem:[#allocation6 + $0xb0] sm:$0xff] }
  0x47   :  { %v1122_v21 = vld [vmem:[#allocation8 + $0xb8] sm:$0xff]  ;;  %v2741_v24 = vpack.c.bf16 %v1241_v12, %v1237_v11  ;;  %v1119_v29 = vld [vmem:[#allocation8 + $0xa0] sm:$0xff]  ;;  %v1246_v31 = vadd.f32 %v1118_v16, %v990_v19  ;;  %v989_v34 = vmul.f32 %v3023_v0, %v860_v30  ;;  %v1117_v35 = vld [vmem:[#allocation8 + $0x90] sm:$0xff]  ;;  %v1243_v38 = vadd.f32 %v1115_v28, %v987_v26 }
  0x48   :  { %2678 = vmatpush1.bf16.msra.mxu0 %v2677_v17  ;;  %v1250_v32 = vadd.f32 %v1122_v21, %v994_v20  ;;  %v1121_v36 = vld [vmem:[#allocation8 + $0xb0] sm:$0xff]  ;;  %v2679_v37 = vpack.c.bf16 %v1248_v25, %v1244_v18  ;;  %v1247_v39 = vadd.f32 %v1119_v29, %v991_v27  ;;  %v993_v40 = vmul.f32 %v3023_v0, %v864_v33  ;;  %v867_v41 = vld [vmem:[#allocation6 + $0xc8] sm:$0xff]  ;;  %v869_v49 = vld [vmem:[#allocation6 + $0xd8] sm:$0xff] }
  0x49   :  { %2742 = vmatpush1.bf16.msra.mxu1 %v2741_v24  ;;  %v871_v42 = vld [vmem:[#allocation6 + $0xe8] sm:$0xff]  ;;  %v1245_v45 = vadd.f32 %v1117_v35, %v989_v34  ;;  %v996_v46 = vmul.f32 %v3023_v0, %v867_v41  ;;  %v873_v50 = vld [vmem:[#allocation6 + $0xf8] sm:$0xff]  ;;  %v998_v53 = vmul.f32 %v3023_v0, %v869_v49  ;;  %v866_v57 = vld [vmem:[#allocation6 + $0xc0] sm:$0xff] }
  0x4a   :  { %v1124_v43 = vld [vmem:[#allocation8 + $0xc8] sm:$0xff]  ;;  %v2743_v44 = vpack.c.bf16 %v1250_v32, %v1246_v31  ;;  %v1000_v47 = vmul.f32 %v3023_v0, %v871_v42  ;;  %2680 = vmatprep.subr.bf16.mxu0 %v2679_v37  ;;  %v2681_v51 = vpack.c.bf16 %v1247_v39, %v1243_v38  ;;  %v1249_v52 = vadd.f32 %v1121_v36, %v993_v40  ;;  %v1126_v55 = vld [vmem:[#allocation8 + $0xd8] sm:$0xff]  ;;  %v870_v60 = vld [vmem:[#allocation6 + $0xe0] sm:$0xff] }
  0x4b   :  { %v1128_v48 = vld [vmem:[#allocation8 + $0xe8] sm:$0xff]  ;;  %v1002_v54 = vmul.f32 %v3023_v0, %v873_v50  ;;  %v1130_v56 = vld [vmem:[#allocation8 + $0xf8] sm:$0xff]  ;;  %v1252_v58 = vadd.f32 %v1124_v43, %v996_v46  ;;  %v995_v61 = vmul.f32 %v3023_v0, %v866_v57  ;;  %v1123_v62 = vld [vmem:[#allocation8 + $0xc0] sm:$0xff]  ;;  %v1254_v2 = vadd.f32 %v1126_v55, %v998_v53 }
  0x4c   :  { %2744 = vmatprep.subr.bf16.mxu1 %v2743_v44  ;;  %v1256_v59 = vadd.f32 %v1128_v48, %v1000_v47  ;;  %v1127_v63 = vld [vmem:[#allocation8 + $0xe0] sm:$0xff]  ;;  %2682 = vmatpush1.bf16.msra.mxu0 %v2681_v51  ;;  %v2745_v1 = vpack.c.bf16 %v1249_v52, %v1245_v45  ;;  %v999_v4 = vmul.f32 %v3023_v0, %v870_v60  ;;  %v868_v5 = vld [vmem:[#allocation6 + $0xd0] sm:$0xff]  ;;  %v875_v13 = vld [vmem:[#allocation6 + $0x108] sm:$0xff] }
  0x4d   :  { %v1258_v3 = vadd.f32 %v1130_v56, %v1002_v54  ;;  %v872_v6 = vld [vmem:[#allocation6 + $0xf0] sm:$0xff]  ;;  %v1251_v9 = vadd.f32 %v1123_v62, %v995_v61  ;;  %v997_v10 = vmul.f32 %v3023_v0, %v868_v5  ;;  %v879_v14 = vld [vmem:[#allocation6 + $0x128] sm:$0xff]  ;;  %v1004_v17 = vmul.f32 %v3023_v0, %v875_v13  ;;  %v877_v21 = vld [vmem:[#allocation6 + $0x118] sm:$0xff] }
  0x4e   :  { %v1125_v7 = vld [vmem:[#allocation8 + $0xd0] sm:$0xff]  ;;  %v2683_v8 = vpack.c.bf16 %v1256_v59, %v1252_v58  ;;  %v1001_v11 = vmul.f32 %v3023_v0, %v872_v6  ;;  %2746 = vmatpush1.bf16.msra.mxu1 %v2745_v1  ;;  %v1255_v16 = vadd.f32 %v1127_v63, %v999_v4  ;;  %v1008_v18 = vmul.f32 %v3023_v0, %v879_v14  ;;  %v1132_v19 = vld [vmem:[#allocation8 + $0x108] sm:$0xff]  ;;  %v881_v24 = vld [vmem:[#allocation6 + $0x138] sm:$0xff] }
  0x4f   :  { %v1129_v12 = vld [vmem:[#allocation8 + $0xf0] sm:$0xff]  ;;  %v2747_v15 = vpack.c.bf16 %v1258_v3, %v1254_v2  ;;  %v1136_v20 = vld [vmem:[#allocation8 + $0x128] sm:$0xff]  ;;  %v1253_v22 = vadd.f32 %v1125_v7, %v997_v10  ;;  %v1006_v25 = vmul.f32 %v3023_v0, %v877_v21  ;;  %v1134_v26 = vld [vmem:[#allocation8 + $0x118] sm:$0xff]  ;;  %v1260_v29 = vadd.f32 %v1132_v19, %v1004_v17 }
  0x50   :  { %2684 = vmatprep.subr.bf16.mxu0 %v2683_v8  ;;  %v1257_v23 = vadd.f32 %v1129_v12, %v1001_v11  ;;  %v1138_v27 = vld [vmem:[#allocation8 + $0x138] sm:$0xff]  ;;  %v2685_v28 = vpack.c.bf16 %v1255_v16, %v1251_v9  ;;  %v1264_v30 = vadd.f32 %v1136_v20, %v1008_v18  ;;  %v1010_v31 = vmul.f32 %v3023_v0, %v881_v24  ;;  %v874_v32 = vld [vmem:[#allocation6 + $0x100] sm:$0xff]  ;;  %v876_v40 = vld [vmem:[#allocation6 + $0x110] sm:$0xff] }
  0x51   :  { %2748 = vmatprep.subr.bf16.mxu1 %v2747_v15  ;;  %v878_v33 = vld [vmem:[#allocation6 + $0x120] sm:$0xff]  ;;  %v1262_v36 = vadd.f32 %v1134_v26, %v1006_v25  ;;  %v1003_v37 = vmul.f32 %v3023_v0, %v874_v32  ;;  %v880_v41 = vld [vmem:[#allocation6 + $0x130] sm:$0xff]  ;;  %v1005_v44 = vmul.f32 %v3023_v0, %v876_v40  ;;  %v883_v48 = vld [vmem:[#allocation6 + $0x148] sm:$0xff] }
  0x52   :  { %v1131_v34 = vld [vmem:[#allocation8 + $0x100] sm:$0xff]  ;;  %v2749_v35 = vpack.c.bf16 %v1257_v23, %v1253_v22  ;;  %v1007_v38 = vmul.f32 %v3023_v0, %v878_v33  ;;  %2686 = vmatpush1.bf16.msra.mxu0 %v2685_v28  ;;  %v2687_v42 = vpack.c.bf16 %v1264_v30, %v1260_v29  ;;  %v1266_v43 = vadd.f32 %v1138_v27, %v1010_v31  ;;  %v1133_v46 = vld [vmem:[#allocation8 + $0x110] sm:$0xff]  ;;  %v887_v51 = vld [vmem:[#allocation6 + $0x168] sm:$0xff] }
  0x53   :  { %v1135_v39 = vld [vmem:[#allocation8 + $0x120] sm:$0xff]  ;;  %v1009_v45 = vmul.f32 %v3023_v0, %v880_v41  ;;  %v1137_v47 = vld [vmem:[#allocation8 + $0x130] sm:$0xff]  ;;  %v1259_v49 = vadd.f32 %v1131_v34, %v1003_v37  ;;  %v1012_v52 = vmul.f32 %v3023_v0, %v883_v48  ;;  %v1140_v53 = vld [vmem:[#allocation8 + $0x148] sm:$0xff]  ;;  %v1261_v56 = vadd.f32 %v1133_v46, %v1005_v44 }
  0x54   :  { %2750 = vmatpush1.bf16.msra.mxu1 %v2749_v35  ;;  %v1263_v50 = vadd.f32 %v1135_v39, %v1007_v38  ;;  %v1144_v54 = vld [vmem:[#allocation8 + $0x168] sm:$0xff]  ;;  %2688 = vmatprep.subr.bf16.mxu0 %v2687_v42  ;;  %v2751_v55 = vpack.c.bf16 %v1266_v43, %v1262_v36  ;;  %v1016_v58 = vmul.f32 %v3023_v0, %v887_v51  ;;  %v885_v59 = vld [vmem:[#allocation6 + $0x158] sm:$0xff]  ;;  %v882_v4 = vld [vmem:[#allocation6 + $0x140] sm:$0xff] }
  0x55   :  { %v1265_v57 = vadd.f32 %v1137_v47, %v1009_v45  ;;  %v889_v60 = vld [vmem:[#allocation6 + $0x178] sm:$0xff]  ;;  %v1268_v63 = vadd.f32 %v1140_v53, %v1012_v52  ;;  %v1014_v1 = vmul.f32 %v3023_v0, %v885_v59  ;;  %v886_v5 = vld [vmem:[#allocation6 + $0x160] sm:$0xff]  ;;  %v1011_v8 = vmul.f32 %v3023_v0, %v882_v4  ;;  %v884_v12 = vld [vmem:[#allocation6 + $0x150] sm:$0xff] }
  0x56   :  { %v1142_v61 = vld [vmem:[#allocation8 + $0x158] sm:$0xff]  ;;  %v2689_v62 = vpack.c.bf16 %v1263_v50, %v1259_v49  ;;  %v1018_v2 = vmul.f32 %v3023_v0, %v889_v60  ;;  %2752 = vmatprep.subr.bf16.mxu1 %v2751_v55  ;;  %v1272_v7 = vadd.f32 %v1144_v54, %v1016_v58  ;;  %v1015_v9 = vmul.f32 %v3023_v0, %v886_v5  ;;  %v1139_v10 = vld [vmem:[#allocation8 + $0x140] sm:$0xff]  ;;  %v888_v15 = vld [vmem:[#allocation6 + $0x170] sm:$0xff] }
  0x57   :  { %v1146_v3 = vld [vmem:[#allocation8 + $0x178] sm:$0xff]  ;;  %v2753_v6 = vpack.c.bf16 %v1265_v57, %v1261_v56  ;;  %v1143_v11 = vld [vmem:[#allocation8 + $0x160] sm:$0xff]  ;;  %v1270_v13 = vadd.f32 %v1142_v61, %v1014_v1  ;;  %v1013_v16 = vmul.f32 %v3023_v0, %v884_v12  ;;  %v1141_v17 = vld [vmem:[#allocation8 + $0x150] sm:$0xff]  ;;  %v1267_v20 = vadd.f32 %v1139_v10, %v1011_v8 }
  0x58   :  { %2690 = vmatpush1.bf16.msra.mxu0 %v2689_v62  ;;  %v1274_v14 = vadd.f32 %v1146_v3, %v1018_v2  ;;  %v1145_v18 = vld [vmem:[#allocation8 + $0x170] sm:$0xff]  ;;  %v2691_v19 = vpack.c.bf16 %v1272_v7, %v1268_v63  ;;  %v1271_v21 = vadd.f32 %v1143_v11, %v1015_v9  ;;  %v1017_v22 = vmul.f32 %v3023_v0, %v888_v15  ;;  %v891_v23 = vld [vmem:[#allocation6 + $0x188] sm:$0xff]  ;;  %v893_v31 = vld [vmem:[#allocation6 + $0x198] sm:$0xff] }
  0x59   :  { %2754 = vmatpush1.bf16.msra.mxu1 %v2753_v6  ;;  %v895_v24 = vld [vmem:[#allocation6 + $0x1a8] sm:$0xff]  ;;  %v1269_v27 = vadd.f32 %v1141_v17, %v1013_v16  ;;  %v1020_v28 = vmul.f32 %v3023_v0, %v891_v23  ;;  %v897_v32 = vld [vmem:[#allocation6 + $0x1b8] sm:$0xff]  ;;  %v1022_v35 = vmul.f32 %v3023_v0, %v893_v31  ;;  %v890_v39 = vld [vmem:[#allocation6 + $0x180] sm:$0xff] }
  0x5a   :  { %v1148_v25 = vld [vmem:[#allocation8 + $0x188] sm:$0xff]  ;;  %v2755_v26 = vpack.c.bf16 %v1274_v14, %v1270_v13  ;;  %v1024_v29 = vmul.f32 %v3023_v0, %v895_v24  ;;  %2692 = vmatprep.subr.bf16.mxu0 %v2691_v19  ;;  %v2693_v33 = vpack.c.bf16 %v1271_v21, %v1267_v20  ;;  %v1273_v34 = vadd.f32 %v1145_v18, %v1017_v22  ;;  %v1150_v37 = vld [vmem:[#allocation8 + $0x198] sm:$0xff]  ;;  %v894_v42 = vld [vmem:[#allocation6 + $0x1a0] sm:$0xff] }
  0x5b   :  { %v1152_v30 = vld [vmem:[#allocation8 + $0x1a8] sm:$0xff]  ;;  %v1026_v36 = vmul.f32 %v3023_v0, %v897_v32  ;;  %v1154_v38 = vld [vmem:[#allocation8 + $0x1b8] sm:$0xff]  ;;  %v1276_v40 = vadd.f32 %v1148_v25, %v1020_v28  ;;  %v1019_v43 = vmul.f32 %v3023_v0, %v890_v39  ;;  %v1147_v44 = vld [vmem:[#allocation8 + $0x180] sm:$0xff]  ;;  %v1278_v47 = vadd.f32 %v1150_v37, %v1022_v35 }
  0x5c   :  { %2756 = vmatprep.subr.bf16.mxu1 %v2755_v26  ;;  %v1280_v41 = vadd.f32 %v1152_v30, %v1024_v29  ;;  %v1151_v45 = vld [vmem:[#allocation8 + $0x1a0] sm:$0xff]  ;;  %2694 = vmatpush1.bf16.msra.mxu0 %v2693_v33  ;;  %v2757_v46 = vpack.c.bf16 %v1273_v34, %v1269_v27  ;;  %v1023_v49 = vmul.f32 %v3023_v0, %v894_v42  ;;  %v892_v50 = vld [vmem:[#allocation6 + $0x190] sm:$0xff]  ;;  %v899_v58 = vld [vmem:[#allocation6 + $0x1c8] sm:$0xff] }
  0x5d   :  { %v1282_v48 = vadd.f32 %v1154_v38, %v1026_v36  ;;  %v896_v51 = vld [vmem:[#allocation6 + $0x1b0] sm:$0xff]  ;;  %v1275_v54 = vadd.f32 %v1147_v44, %v1019_v43  ;;  %v1021_v55 = vmul.f32 %v3023_v0, %v892_v50  ;;  %v903_v59 = vld [vmem:[#allocation6 + $0x1e8] sm:$0xff]  ;;  %v1028_v62 = vmul.f32 %v3023_v0, %v899_v58  ;;  %v901_v3 = vld [vmem:[#allocation6 + $0x1d8] sm:$0xff] }
  0x5e   :  { %v1149_v52 = vld [vmem:[#allocation8 + $0x190] sm:$0xff]  ;;  %v2695_v53 = vpack.c.bf16 %v1280_v41, %v1276_v40  ;;  %v1025_v56 = vmul.f32 %v3023_v0, %v896_v51  ;;  %2758 = vmatpush1.bf16.msra.mxu1 %v2757_v46  ;;  %v1279_v61 = vadd.f32 %v1151_v45, %v1023_v49  ;;  %v1032_v63 = vmul.f32 %v3023_v0, %v903_v59  ;;  %v1156_v1 = vld [vmem:[#allocation8 + $0x1c8] sm:$0xff]  ;;  %v905_v6 = vld [vmem:[#allocation6 + $0x1f8] sm:$0xff] }
  0x5f   :  { %v1153_v57 = vld [vmem:[#allocation8 + $0x1b0] sm:$0xff]  ;;  %v2759_v60 = vpack.c.bf16 %v1282_v48, %v1278_v47  ;;  %v1160_v2 = vld [vmem:[#allocation8 + $0x1e8] sm:$0xff]  ;;  %v1277_v4 = vadd.f32 %v1149_v52, %v1021_v55  ;;  %v1030_v7 = vmul.f32 %v3023_v0, %v901_v3  ;;  %v1158_v8 = vld [vmem:[#allocation8 + $0x1d8] sm:$0xff]  ;;  %v1284_v11 = vadd.f32 %v1156_v1, %v1028_v62 }
  0x60   :  { %2696 = vmatprep.subr.bf16.mxu0 %v2695_v53  ;;  %v1281_v5 = vadd.f32 %v1153_v57, %v1025_v56  ;;  %v1162_v9 = vld [vmem:[#allocation8 + $0x1f8] sm:$0xff]  ;;  %v2697_v10 = vpack.c.bf16 %v1279_v61, %v1275_v54  ;;  %v1288_v12 = vadd.f32 %v1160_v2, %v1032_v63  ;;  %v1034_v13 = vmul.f32 %v3023_v0, %v905_v6  ;;  %v898_v14 = vld [vmem:[#allocation6 + $0x1c0] sm:$0xff]  ;;  %v900_v22 = vld [vmem:[#allocation6 + $0x1d0] sm:$0xff] }
  0x61   :  { %2760 = vmatprep.subr.bf16.mxu1 %v2759_v60  ;;  %v902_v15 = vld [vmem:[#allocation6 + $0x1e0] sm:$0xff]  ;;  %v1286_v18 = vadd.f32 %v1158_v8, %v1030_v7  ;;  %v1027_v19 = vmul.f32 %v3023_v0, %v898_v14  ;;  %v904_v23 = vld [vmem:[#allocation6 + $0x1f0] sm:$0xff]  ;;  %v1029_v26 = vmul.f32 %v3023_v0, %v900_v22  ;;  %v907_v30 = vld [vmem:[#allocation6 + $0x208] sm:$0xff] }
  0x62   :  { %v1155_v16 = vld [vmem:[#allocation8 + $0x1c0] sm:$0xff]  ;;  %v2761_v17 = vpack.c.bf16 %v1281_v5, %v1277_v4  ;;  %v1031_v20 = vmul.f32 %v3023_v0, %v902_v15  ;;  %2698 = vmatpush1.bf16.msra.mxu0 %v2697_v10  ;;  %v2699_v24 = vpack.c.bf16 %v1288_v12, %v1284_v11  ;;  %v1290_v25 = vadd.f32 %v1162_v9, %v1034_v13  ;;  %v1157_v28 = vld [vmem:[#allocation8 + $0x1d0] sm:$0xff]  ;;  %v911_v33 = vld [vmem:[#allocation6 + $0x228] sm:$0xff] }
  0x63   :  { %v1159_v21 = vld [vmem:[#allocation8 + $0x1e0] sm:$0xff]  ;;  %v1033_v27 = vmul.f32 %v3023_v0, %v904_v23  ;;  %v1161_v29 = vld [vmem:[#allocation8 + $0x1f0] sm:$0xff]  ;;  %v1283_v31 = vadd.f32 %v1155_v16, %v1027_v19  ;;  %v1036_v34 = vmul.f32 %v3023_v0, %v907_v30  ;;  %v1164_v35 = vld [vmem:[#allocation8 + $0x208] sm:$0xff]  ;;  %v1285_v38 = vadd.f32 %v1157_v28, %v1029_v26 }
  0x64   :  { %2762 = vmatpush1.bf16.msra.mxu1 %v2761_v17  ;;  %v1287_v32 = vadd.f32 %v1159_v21, %v1031_v20  ;;  %v1168_v36 = vld [vmem:[#allocation8 + $0x228] sm:$0xff]  ;;  %2700 = vmatprep.subr.bf16.mxu0 %v2699_v24  ;;  %v2763_v37 = vpack.c.bf16 %v1290_v25, %v1286_v18  ;;  %v1040_v40 = vmul.f32 %v3023_v0, %v911_v33  ;;  %v909_v41 = vld [vmem:[#allocation6 + $0x218] sm:$0xff]  ;;  %v906_v49 = vld [vmem:[#allocation6 + $0x200] sm:$0xff] }
  0x65   :  { %v1289_v39 = vadd.f32 %v1161_v29, %v1033_v27  ;;  %v913_v42 = vld [vmem:[#allocation6 + $0x238] sm:$0xff]  ;;  %v1292_v45 = vadd.f32 %v1164_v35, %v1036_v34  ;;  %v1038_v46 = vmul.f32 %v3023_v0, %v909_v41  ;;  %v910_v50 = vld [vmem:[#allocation6 + $0x220] sm:$0xff]  ;;  %v1035_v53 = vmul.f32 %v3023_v0, %v906_v49  ;;  %v908_v57 = vld [vmem:[#allocation6 + $0x210] sm:$0xff] }
  0x66   :  { %v1166_v43 = vld [vmem:[#allocation8 + $0x218] sm:$0xff]  ;;  %v2701_v44 = vpack.c.bf16 %v1287_v32, %v1283_v31  ;;  %v1042_v47 = vmul.f32 %v3023_v0, %v913_v42  ;;  %2764 = vmatprep.subr.bf16.mxu1 %v2763_v37  ;;  %v1296_v52 = vadd.f32 %v1168_v36, %v1040_v40  ;;  %v1039_v54 = vmul.f32 %v3023_v0, %v910_v50  ;;  %v1163_v55 = vld [vmem:[#allocation8 + $0x200] sm:$0xff]  ;;  %v912_v60 = vld [vmem:[#allocation6 + $0x230] sm:$0xff] }
  0x67   :  { %v1170_v48 = vld [vmem:[#allocation8 + $0x238] sm:$0xff]  ;;  %v2765_v51 = vpack.c.bf16 %v1289_v39, %v1285_v38  ;;  %v1167_v56 = vld [vmem:[#allocation8 + $0x220] sm:$0xff]  ;;  %v1294_v58 = vadd.f32 %v1166_v43, %v1038_v46  ;;  %v1037_v61 = vmul.f32 %v3023_v0, %v908_v57  ;;  %v1165_v62 = vld [vmem:[#allocation8 + $0x210] sm:$0xff]  ;;  %v1291_v2 = vadd.f32 %v1163_v55, %v1035_v53 }
  0x68   :  { %2702 = vmatpush1.bf16.msra.mxu0 %v2701_v44  ;;  %v1298_v59 = vadd.f32 %v1170_v48, %v1042_v47  ;;  %v1169_v63 = vld [vmem:[#allocation8 + $0x230] sm:$0xff]  ;;  %v2703_v1 = vpack.c.bf16 %v1296_v52, %v1292_v45  ;;  %v1295_v3 = vadd.f32 %v1167_v56, %v1039_v54  ;;  %v1041_v4 = vmul.f32 %v3023_v0, %v912_v60  ;;  %v915_v5 = vld [vmem:[#allocation6 + $0x248] sm:$0xff]  ;;  %v917_v13 = vld [vmem:[#allocation6 + $0x258] sm:$0xff] }
  0x69   :  { %2766 = vmatpush1.bf16.msra.mxu1 %v2765_v51  ;;  %v919_v6 = vld [vmem:[#allocation6 + $0x268] sm:$0xff]  ;;  %v1293_v9 = vadd.f32 %v1165_v62, %v1037_v61  ;;  %v1044_v10 = vmul.f32 %v3023_v0, %v915_v5  ;;  %v921_v14 = vld [vmem:[#allocation6 + $0x278] sm:$0xff]  ;;  %v1046_v17 = vmul.f32 %v3023_v0, %v917_v13  ;;  %v914_v21 = vld [vmem:[#allocation6 + $0x240] sm:$0xff] }
  0x6a   :  { %v1172_v7 = vld [vmem:[#allocation8 + $0x248] sm:$0xff]  ;;  %v2767_v8 = vpack.c.bf16 %v1298_v59, %v1294_v58  ;;  %v1048_v11 = vmul.f32 %v3023_v0, %v919_v6  ;;  %2704 = vmatprep.subr.bf16.mxu0 %v2703_v1  ;;  %v2705_v15 = vpack.c.bf16 %v1295_v3, %v1291_v2  ;;  %v1297_v16 = vadd.f32 %v1169_v63, %v1041_v4  ;;  %v1174_v19 = vld [vmem:[#allocation8 + $0x258] sm:$0xff]  ;;  %v918_v24 = vld [vmem:[#allocation6 + $0x260] sm:$0xff] }
  0x6b   :  { %v1176_v12 = vld [vmem:[#allocation8 + $0x268] sm:$0xff]  ;;  %v1050_v18 = vmul.f32 %v3023_v0, %v921_v14  ;;  %v1178_v20 = vld [vmem:[#allocation8 + $0x278] sm:$0xff]  ;;  %v1300_v22 = vadd.f32 %v1172_v7, %v1044_v10  ;;  %v1043_v25 = vmul.f32 %v3023_v0, %v914_v21  ;;  %v1171_v26 = vld [vmem:[#allocation8 + $0x240] sm:$0xff]  ;;  %v1302_v29 = vadd.f32 %v1174_v19, %v1046_v17 }
  0x6c   :  { %2768 = vmatprep.subr.bf16.mxu1 %v2767_v8  ;;  %v1304_v23 = vadd.f32 %v1176_v12, %v1048_v11  ;;  %v1175_v27 = vld [vmem:[#allocation8 + $0x260] sm:$0xff]  ;;  %2706 = vmatpush1.bf16.msra.mxu0 %v2705_v15  ;;  %v2769_v28 = vpack.c.bf16 %v1297_v16, %v1293_v9  ;;  %v1047_v31 = vmul.f32 %v3023_v0, %v918_v24  ;;  %v916_v32 = vld [vmem:[#allocation6 + $0x250] sm:$0xff]  ;;  %v923_v40 = vld [vmem:[#allocation6 + $0x288] sm:$0xff] }
  0x6d   :  { %v1306_v30 = vadd.f32 %v1178_v20, %v1050_v18  ;;  %v920_v33 = vld [vmem:[#allocation6 + $0x270] sm:$0xff]  ;;  %v1299_v36 = vadd.f32 %v1171_v26, %v1043_v25  ;;  %v1045_v37 = vmul.f32 %v3023_v0, %v916_v32  ;;  %v927_v41 = vld [vmem:[#allocation6 + $0x2a8] sm:$0xff]  ;;  %v1052_v44 = vmul.f32 %v3023_v0, %v923_v40  ;;  %v925_v48 = vld [vmem:[#allocation6 + $0x298] sm:$0xff] }
  0x6e   :  { %v1173_v34 = vld [vmem:[#allocation8 + $0x250] sm:$0xff]  ;;  %v2707_v35 = vpack.c.bf16 %v1304_v23, %v1300_v22  ;;  %v1049_v38 = vmul.f32 %v3023_v0, %v920_v33  ;;  %2770 = vmatpush1.bf16.msra.mxu1 %v2769_v28  ;;  %v1303_v43 = vadd.f32 %v1175_v27, %v1047_v31  ;;  %v1056_v45 = vmul.f32 %v3023_v0, %v927_v41  ;;  %v1180_v46 = vld [vmem:[#allocation8 + $0x288] sm:$0xff]  ;;  %v929_v51 = vld [vmem:[#allocation6 + $0x2b8] sm:$0xff] }
  0x6f   :  { %v1177_v39 = vld [vmem:[#allocation8 + $0x270] sm:$0xff]  ;;  %v2771_v42 = vpack.c.bf16 %v1306_v30, %v1302_v29  ;;  %v1184_v47 = vld [vmem:[#allocation8 + $0x2a8] sm:$0xff]  ;;  %v1301_v49 = vadd.f32 %v1173_v34, %v1045_v37  ;;  %v1054_v52 = vmul.f32 %v3023_v0, %v925_v48  ;;  %v1182_v53 = vld [vmem:[#allocation8 + $0x298] sm:$0xff]  ;;  %v1308_v56 = vadd.f32 %v1180_v46, %v1052_v44 }
  0x70   :  { %2708 = vmatprep.subr.bf16.mxu0 %v2707_v35  ;;  %v1305_v50 = vadd.f32 %v1177_v39, %v1049_v38  ;;  %v1186_v54 = vld [vmem:[#allocation8 + $0x2b8] sm:$0xff]  ;;  %v2709_v55 = vpack.c.bf16 %v1303_v43, %v1299_v36  ;;  %v1312_v57 = vadd.f32 %v1184_v47, %v1056_v45  ;;  %v1058_v58 = vmul.f32 %v3023_v0, %v929_v51  ;;  %v922_v59 = vld [vmem:[#allocation6 + $0x280] sm:$0xff]  ;;  %v924_v4 = vld [vmem:[#allocation6 + $0x290] sm:$0xff] }
  0x71   :  { %2772 = vmatprep.subr.bf16.mxu1 %v2771_v42  ;;  %v926_v60 = vld [vmem:[#allocation6 + $0x2a0] sm:$0xff]  ;;  %v1310_v63 = vadd.f32 %v1182_v53, %v1054_v52  ;;  %v1051_v1 = vmul.f32 %v3023_v0, %v922_v59  ;;  %v928_v5 = vld [vmem:[#allocation6 + $0x2b0] sm:$0xff]  ;;  %v1053_v8 = vmul.f32 %v3023_v0, %v924_v4  ;;  %v931_v12 = vld [vmem:[#allocation6 + $0x2c8] sm:$0xff] }
  0x72   :  { %v1179_v61 = vld [vmem:[#allocation8 + $0x280] sm:$0xff]  ;;  %v2773_v62 = vpack.c.bf16 %v1305_v50, %v1301_v49  ;;  %v1055_v2 = vmul.f32 %v3023_v0, %v926_v60  ;;  %2710 = vmatpush1.bf16.msra.mxu0 %v2709_v55  ;;  %v2711_v6 = vpack.c.bf16 %v1312_v57, %v1308_v56  ;;  %v1314_v7 = vadd.f32 %v1186_v54, %v1058_v58  ;;  %v1181_v10 = vld [vmem:[#allocation8 + $0x290] sm:$0xff]  ;;  %v935_v15 = vld [vmem:[#allocation6 + $0x2e8] sm:$0xff] }
  0x73   :  { %v1183_v3 = vld [vmem:[#allocation8 + $0x2a0] sm:$0xff]  ;;  %v1057_v9 = vmul.f32 %v3023_v0, %v928_v5  ;;  %v1185_v11 = vld [vmem:[#allocation8 + $0x2b0] sm:$0xff]  ;;  %v1307_v13 = vadd.f32 %v1179_v61, %v1051_v1  ;;  %v1060_v16 = vmul.f32 %v3023_v0, %v931_v12  ;;  %v1188_v17 = vld [vmem:[#allocation8 + $0x2c8] sm:$0xff]  ;;  %v1309_v20 = vadd.f32 %v1181_v10, %v1053_v8 }
  0x74   :  { %2774 = vmatpush1.bf16.msra.mxu1 %v2773_v62  ;;  %v1311_v14 = vadd.f32 %v1183_v3, %v1055_v2  ;;  %v1192_v18 = vld [vmem:[#allocation8 + $0x2e8] sm:$0xff]  ;;  %2712 = vmatprep.subr.bf16.mxu0 %v2711_v6  ;;  %v2775_v19 = vpack.c.bf16 %v1314_v7, %v1310_v63  ;;  %v1064_v22 = vmul.f32 %v3023_v0, %v935_v15  ;;  %v933_v23 = vld [vmem:[#allocation6 + $0x2d8] sm:$0xff]  ;;  %v930_v31 = vld [vmem:[#allocation6 + $0x2c0] sm:$0xff] }
  0x75   :  { %v1313_v21 = vadd.f32 %v1185_v11, %v1057_v9  ;;  %v937_v24 = vld [vmem:[#allocation6 + $0x2f8] sm:$0xff]  ;;  %v1316_v27 = vadd.f32 %v1188_v17, %v1060_v16  ;;  %v1062_v28 = vmul.f32 %v3023_v0, %v933_v23  ;;  %v934_v32 = vld [vmem:[#allocation6 + $0x2e0] sm:$0xff]  ;;  %v1059_v35 = vmul.f32 %v3023_v0, %v930_v31  ;;  %v932_v39 = vld [vmem:[#allocation6 + $0x2d0] sm:$0xff] }
  0x76   :  { %v1190_v25 = vld [vmem:[#allocation8 + $0x2d8] sm:$0xff]  ;;  %v2713_v26 = vpack.c.bf16 %v1311_v14, %v1307_v13  ;;  %v1066_v29 = vmul.f32 %v3023_v0, %v937_v24  ;;  %2776 = vmatprep.subr.bf16.mxu1 %v2775_v19  ;;  %v1320_v34 = vadd.f32 %v1192_v18, %v1064_v22  ;;  %v1063_v36 = vmul.f32 %v3023_v0, %v934_v32  ;;  %v1187_v37 = vld [vmem:[#allocation8 + $0x2c0] sm:$0xff]  ;;  %v936_v42 = vld [vmem:[#allocation6 + $0x2f0] sm:$0xff] }
  0x77   :  { %v1194_v30 = vld [vmem:[#allocation8 + $0x2f8] sm:$0xff]  ;;  %v2777_v33 = vpack.c.bf16 %v1313_v21, %v1309_v20  ;;  %v1191_v38 = vld [vmem:[#allocation8 + $0x2e0] sm:$0xff]  ;;  %v1318_v40 = vadd.f32 %v1190_v25, %v1062_v28  ;;  %v1061_v43 = vmul.f32 %v3023_v0, %v932_v39  ;;  %v1189_v44 = vld [vmem:[#allocation8 + $0x2d0] sm:$0xff]  ;;  %v1315_v47 = vadd.f32 %v1187_v37, %v1059_v35 }
  0x78   :  { %2714 = vmatpush1.bf16.msra.mxu0 %v2713_v26  ;;  %v1322_v41 = vadd.f32 %v1194_v30, %v1066_v29  ;;  %v1193_v45 = vld [vmem:[#allocation8 + $0x2f0] sm:$0xff]  ;;  %v2715_v46 = vpack.c.bf16 %v1320_v34, %v1316_v27  ;;  %v1319_v48 = vadd.f32 %v1191_v38, %v1063_v36  ;;  %v1065_v49 = vmul.f32 %v3023_v0, %v936_v42  ;;  %v939_v50 = vld [vmem:[#allocation6 + $0x308] sm:$0xff]  ;;  %v941_v58 = vld [vmem:[#allocation6 + $0x318] sm:$0xff] }
  0x79   :  { %2778 = vmatpush1.bf16.msra.mxu1 %v2777_v33  ;;  %v943_v51 = vld [vmem:[#allocation6 + $0x328] sm:$0xff]  ;;  %v1317_v54 = vadd.f32 %v1189_v44, %v1061_v43  ;;  %v1068_v55 = vmul.f32 %v3023_v0, %v939_v50  ;;  %v945_v59 = vld [vmem:[#allocation6 + $0x338] sm:$0xff]  ;;  %v1070_v62 = vmul.f32 %v3023_v0, %v941_v58  ;;  %v938_v3 = vld [vmem:[#allocation6 + $0x300] sm:$0xff] }
  0x7a   :  { %v1196_v52 = vld [vmem:[#allocation8 + $0x308] sm:$0xff]  ;;  %v2779_v53 = vpack.c.bf16 %v1322_v41, %v1318_v40  ;;  %v1072_v56 = vmul.f32 %v3023_v0, %v943_v51  ;;  %2716 = vmatprep.subr.bf16.mxu0 %v2715_v46  ;;  %v2717_v60 = vpack.c.bf16 %v1319_v48, %v1315_v47  ;;  %v1321_v61 = vadd.f32 %v1193_v45, %v1065_v49  ;;  %v1198_v1 = vld [vmem:[#allocation8 + $0x318] sm:$0xff]  ;;  %v942_v6 = vld [vmem:[#allocation6 + $0x320] sm:$0xff] }
  0x7b   :  { %v1200_v57 = vld [vmem:[#allocation8 + $0x328] sm:$0xff]  ;;  %v1074_v63 = vmul.f32 %v3023_v0, %v945_v59  ;;  %v1202_v2 = vld [vmem:[#allocation8 + $0x338] sm:$0xff]  ;;  %v1324_v4 = vadd.f32 %v1196_v52, %v1068_v55  ;;  %v1067_v7 = vmul.f32 %v3023_v0, %v938_v3  ;;  %v1195_v8 = vld [vmem:[#allocation8 + $0x300] sm:$0xff]  ;;  %v1326_v11 = vadd.f32 %v1198_v1, %v1070_v62 }
  0x7c   :  { %2780 = vmatprep.subr.bf16.mxu1 %v2779_v53  ;;  %v1328_v5 = vadd.f32 %v1200_v57, %v1072_v56  ;;  %v1199_v9 = vld [vmem:[#allocation8 + $0x320] sm:$0xff]  ;;  %2718 = vmatpush1.bf16.msra.mxu0 %v2717_v60  ;;  %v2781_v10 = vpack.c.bf16 %v1321_v61, %v1317_v54  ;;  %v1071_v13 = vmul.f32 %v3023_v0, %v942_v6  ;;  %v940_v14 = vld [vmem:[#allocation6 + $0x310] sm:$0xff]  ;;  %v947_v22 = vld [vmem:[#allocation6 + $0x348] sm:$0xff] }
  0x7d   :  { %v1330_v12 = vadd.f32 %v1202_v2, %v1074_v63  ;;  %v944_v15 = vld [vmem:[#allocation6 + $0x330] sm:$0xff]  ;;  %v1323_v18 = vadd.f32 %v1195_v8, %v1067_v7  ;;  %v1069_v19 = vmul.f32 %v3023_v0, %v940_v14  ;;  %v951_v23 = vld [vmem:[#allocation6 + $0x368] sm:$0xff]  ;;  %v1076_v26 = vmul.f32 %v3023_v0, %v947_v22  ;;  %v949_v30 = vld [vmem:[#allocation6 + $0x358] sm:$0xff] }
  0x7e   :  { %v1197_v16 = vld [vmem:[#allocation8 + $0x310] sm:$0xff]  ;;  %v2719_v17 = vpack.c.bf16 %v1328_v5, %v1324_v4  ;;  %v1073_v20 = vmul.f32 %v3023_v0, %v944_v15  ;;  %2782 = vmatpush1.bf16.msra.mxu1 %v2781_v10  ;;  %v1327_v25 = vadd.f32 %v1199_v9, %v1071_v13  ;;  %v1080_v27 = vmul.f32 %v3023_v0, %v951_v23  ;;  %v1204_v28 = vld [vmem:[#allocation8 + $0x348] sm:$0xff]  ;;  %v953_v33 = vld [vmem:[#allocation6 + $0x378] sm:$0xff] }
  0x7f   :  { %v1201_v21 = vld [vmem:[#allocation8 + $0x330] sm:$0xff]  ;;  %v2783_v24 = vpack.c.bf16 %v1330_v12, %v1326_v11  ;;  %v1208_v29 = vld [vmem:[#allocation8 + $0x368] sm:$0xff]  ;;  %v1325_v31 = vadd.f32 %v1197_v16, %v1069_v19  ;;  %v1078_v34 = vmul.f32 %v3023_v0, %v949_v30  ;;  %v1206_v35 = vld [vmem:[#allocation8 + $0x358] sm:$0xff]  ;;  %v1332_v38 = vadd.f32 %v1204_v28, %v1076_v26 }
  0x80   :  { %2720 = vmatprep.subr.bf16.mxu0 %v2719_v17  ;;  %v1329_v32 = vadd.f32 %v1201_v21, %v1073_v20  ;;  %v1210_v36 = vld [vmem:[#allocation8 + $0x378] sm:$0xff]  ;;  %v2721_v37 = vpack.c.bf16 %v1327_v25, %v1323_v18  ;;  %v1336_v39 = vadd.f32 %v1208_v29, %v1080_v27  ;;  %v1082_v40 = vmul.f32 %v3023_v0, %v953_v33  ;;  %v946_v41 = vld [vmem:[#allocation6 + $0x340] sm:$0xff]  ;;  %v948_v49 = vld [vmem:[#allocation6 + $0x350] sm:$0xff] }
  0x81   :  { %2784 = vmatprep.subr.bf16.mxu1 %v2783_v24  ;;  %v950_v42 = vld [vmem:[#allocation6 + $0x360] sm:$0xff]  ;;  %v1334_v45 = vadd.f32 %v1206_v35, %v1078_v34  ;;  %v1075_v46 = vmul.f32 %v3023_v0, %v946_v41  ;;  %v952_v50 = vld [vmem:[#allocation6 + $0x370] sm:$0xff]  ;;  %v1077_v53 = vmul.f32 %v3023_v0, %v948_v49  ;;  %v955_v57 = vld [vmem:[#allocation6 + $0x388] sm:$0xff] }
  0x82   :  { %v1203_v43 = vld [vmem:[#allocation8 + $0x340] sm:$0xff]  ;;  %v2785_v44 = vpack.c.bf16 %v1329_v32, %v1325_v31  ;;  %v1079_v47 = vmul.f32 %v3023_v0, %v950_v42  ;;  %2722 = vmatpush1.bf16.msra.mxu0 %v2721_v37  ;;  %v2723_v51 = vpack.c.bf16 %v1336_v39, %v1332_v38  ;;  %v1338_v52 = vadd.f32 %v1210_v36, %v1082_v40  ;;  %v1205_v55 = vld [vmem:[#allocation8 + $0x350] sm:$0xff]  ;;  %v959_v60 = vld [vmem:[#allocation6 + $0x3a8] sm:$0xff] }
  0x83   :  { %v1207_v48 = vld [vmem:[#allocation8 + $0x360] sm:$0xff]  ;;  %v1081_v54 = vmul.f32 %v3023_v0, %v952_v50  ;;  %v1209_v56 = vld [vmem:[#allocation8 + $0x370] sm:$0xff]  ;;  %v1331_v58 = vadd.f32 %v1203_v43, %v1075_v46  ;;  %v1084_v61 = vmul.f32 %v3023_v0, %v955_v57  ;;  %v1212_v62 = vld [vmem:[#allocation8 + $0x388] sm:$0xff]  ;;  %v1333_v2 = vadd.f32 %v1205_v55, %v1077_v53 }
  0x84   :  { %2786 = vmatpush1.bf16.msra.mxu1 %v2785_v44  ;;  %v1335_v59 = vadd.f32 %v1207_v48, %v1079_v47  ;;  %v1216_v63 = vld [vmem:[#allocation8 + $0x3a8] sm:$0xff]  ;;  %2724 = vmatprep.subr.bf16.mxu0 %v2723_v51  ;;  %v2787_v1 = vpack.c.bf16 %v1338_v52, %v1334_v45  ;;  %v1088_v4 = vmul.f32 %v3023_v0, %v959_v60  ;;  %v957_v5 = vld [vmem:[#allocation6 + $0x398] sm:$0xff]  ;;  %v954_v13 = vld [vmem:[#allocation6 + $0x380] sm:$0xff] }
  0x85   :  { %v1337_v3 = vadd.f32 %v1209_v56, %v1081_v54  ;;  %v961_v6 = vld [vmem:[#allocation6 + $0x3b8] sm:$0xff]  ;;  %v1340_v9 = vadd.f32 %v1212_v62, %v1084_v61  ;;  %v1086_v10 = vmul.f32 %v3023_v0, %v957_v5  ;;  %v958_v14 = vld [vmem:[#allocation6 + $0x3a0] sm:$0xff]  ;;  %v1083_v17 = vmul.f32 %v3023_v0, %v954_v13  ;;  %v956_v21 = vld [vmem:[#allocation6 + $0x390] sm:$0xff] }
  0x86   :  { %v1214_v7 = vld [vmem:[#allocation8 + $0x398] sm:$0xff]  ;;  %v2725_v8 = vpack.c.bf16 %v1335_v59, %v1331_v58  ;;  %v1090_v11 = vmul.f32 %v3023_v0, %v961_v6  ;;  %2788 = vmatprep.subr.bf16.mxu1 %v2787_v1  ;;  %v1344_v16 = vadd.f32 %v1216_v63, %v1088_v4  ;;  %v1087_v18 = vmul.f32 %v3023_v0, %v958_v14  ;;  %v1211_v19 = vld [vmem:[#allocation8 + $0x380] sm:$0xff]  ;;  %v960_v24 = vld [vmem:[#allocation6 + $0x3b0] sm:$0xff] }
  0x87   :  { %v1218_v12 = vld [vmem:[#allocation8 + $0x3b8] sm:$0xff]  ;;  %v2789_v15 = vpack.c.bf16 %v1337_v3, %v1333_v2  ;;  %v1215_v20 = vld [vmem:[#allocation8 + $0x3a0] sm:$0xff]  ;;  %v1342_v22 = vadd.f32 %v1214_v7, %v1086_v10  ;;  %v1085_v25 = vmul.f32 %v3023_v0, %v956_v21  ;;  %v1213_v26 = vld [vmem:[#allocation8 + $0x390] sm:$0xff]  ;;  %v1339_v29 = vadd.f32 %v1211_v19, %v1083_v17 }
  0x88   :  { %2726 = vmatpush1.bf16.msra.mxu0 %v2725_v8  ;;  %v1346_v23 = vadd.f32 %v1218_v12, %v1090_v11  ;;  %v1217_v27 = vld [vmem:[#allocation8 + $0x3b0] sm:$0xff]  ;;  %v2727_v28 = vpack.c.bf16 %v1344_v16, %v1340_v9  ;;  %v1343_v30 = vadd.f32 %v1215_v20, %v1087_v18  ;;  %v1089_v31 = vmul.f32 %v3023_v0, %v960_v24  ;;  %v963_v32 = vld [vmem:[#allocation6 + $0x3c8] sm:$0xff]  ;;  %v965_v40 = vld [vmem:[#allocation6 + $0x3d8] sm:$0xff] }
  0x89   :  { %2790 = vmatpush1.bf16.msra.mxu1 %v2789_v15  ;;  %v967_v33 = vld [vmem:[#allocation6 + $0x3e8] sm:$0xff]  ;;  %v1341_v36 = vadd.f32 %v1213_v26, %v1085_v25  ;;  %v1092_v37 = vmul.f32 %v3023_v0, %v963_v32  ;;  %v969_v41 = vld [vmem:[#allocation6 + $0x3f8] sm:$0xff]  ;;  %v1094_v44 = vmul.f32 %v3023_v0, %v965_v40  ;;  %v962_v48 = vld [vmem:[#allocation6 + $0x3c0] sm:$0xff] }
  0x8a   :  { %v1220_v34 = vld [vmem:[#allocation8 + $0x3c8] sm:$0xff]  ;;  %v2791_v35 = vpack.c.bf16 %v1346_v23, %v1342_v22  ;;  %v1096_v38 = vmul.f32 %v3023_v0, %v967_v33  ;;  %2728 = vmatprep.subr.bf16.mxu0 %v2727_v28  ;;  %v2729_v42 = vpack.c.bf16 %v1343_v30, %v1339_v29  ;;  %v1345_v43 = vadd.f32 %v1217_v27, %v1089_v31  ;;  %v1222_v46 = vld [vmem:[#allocation8 + $0x3d8] sm:$0xff]  ;;  %v966_v51 = vld [vmem:[#allocation6 + $0x3e0] sm:$0xff] }
  0x8b   :  { %v1224_v39 = vld [vmem:[#allocation8 + $0x3e8] sm:$0xff]  ;;  %v1098_v45 = vmul.f32 %v3023_v0, %v969_v41  ;;  %v1226_v47 = vld [vmem:[#allocation8 + $0x3f8] sm:$0xff]  ;;  %v1348_v49 = vadd.f32 %v1220_v34, %v1092_v37  ;;  %v1091_v52 = vmul.f32 %v3023_v0, %v962_v48  ;;  %v1219_v53 = vld [vmem:[#allocation8 + $0x3c0] sm:$0xff]  ;;  %v1350_v56 = vadd.f32 %v1222_v46, %v1094_v44 }
  0x8c   :  { %2792 = vmatprep.subr.bf16.mxu1 %v2791_v35  ;;  %v1352_v50 = vadd.f32 %v1224_v39, %v1096_v38  ;;  %v1223_v54 = vld [vmem:[#allocation8 + $0x3e0] sm:$0xff]  ;;  %2730 = vmatpush1.bf16.msra.mxu0 %v2729_v42  ;;  %v2793_v55 = vpack.c.bf16 %v1345_v43, %v1341_v36  ;;  %v1095_v58 = vmul.f32 %v3023_v0, %v966_v51  ;;  %v964_v59 = vld [vmem:[#allocation6 + $0x3d0] sm:$0xff]  ;;  %v74_v4 = vld [vmem:[%s4557_s1 + $0x8] sm:$0xff] }
  0x8d   :  { %v1354_v57 = vadd.f32 %v1226_v47, %v1098_v45  ;;  %v968_v60 = vld [vmem:[#allocation6 + $0x3f0] sm:$0xff]  ;;  %v1347_v63 = vadd.f32 %v1219_v53, %v1091_v52  ;;  %v1093_v1 = vmul.f32 %v3023_v0, %v964_v59  ;;  %v202_v5 = vld [vmem:[#allocation3 + $0x8] sm:$0xff]  ;;  %v73_v10 = vld [vmem:[%s4557_s1] sm:$0xff] }
  0x8e   :  { %v1221_v61 = vld [vmem:[#allocation8 + $0x3d0] sm:$0xff]  ;;  %v2731_v62 = vpack.c.bf16 %v1352_v50, %v1348_v49  ;;  %v1097_v2 = vmul.f32 %v3023_v0, %v968_v60  ;;  %2794 = vmatpush1.bf16.msra.mxu1 %v2793_v55  ;;  %v1351_v7 = vadd.f32 %v1223_v54, %v1095_v58  ;;  %v330_v8 = vmul.f32 %v202_v5, %v74_v4  ;;  %v458_v9 = vld [vmem:[%s4558_s2 + $0x8] sm:$0xff]  ;;  %v201_v11 = vld [vmem:[#allocation3] sm:$0xff] }
  0x8f   :  { %v1225_v3 = vld [vmem:[#allocation8 + $0x3f0] sm:$0xff]  ;;  %v2795_v6 = vpack.c.bf16 %v1354_v57, %v1350_v56  ;;  %v1349_v0 = vadd.f32 %v1221_v61, %v1093_v1  ;;  %v329_v13 = vmul.f32 %v201_v11, %v73_v10  ;;  %v457_v14 = vld [vmem:[%s4558_s2] sm:$0xff]  ;;  %v76_v15 = vld [vmem:[%s4557_s1 + $0x18] sm:$0xff] }
  0x90   :  { %2732 = vmatprep.subr.bf16.mxu0 %v2731_v62  ;;  %v1353_v12 = vadd.f32 %v1225_v3, %v1097_v2  ;;  %v204_v16 = vld [vmem:[#allocation3 + $0x18] sm:$0xff]  ;;  %v2733_v17 = vpack.c.bf16 %v1351_v7, %v1347_v63  ;;  %v586_v18 = vadd.f32 %v458_v9, %v330_v8  ;;  %v75_v21 = vld [vmem:[%s4557_s1 + $0x10] sm:$0xff]  ;;  %v78_v27 = vld [vmem:[%s4557_s1 + $0x28] sm:$0xff] }
  0x91   :  { %2796 = vmatprep.subr.bf16.mxu1 %v2795_v6  ;;  %v332_v19 = vmul.f32 %v204_v16, %v76_v15  ;;  %v460_v20 = vld [vmem:[%s4558_s2 + $0x18] sm:$0xff]  ;;  %v203_v22 = vld [vmem:[#allocation3 + $0x10] sm:$0xff]  ;;  %v585_v24 = vadd.f32 %v457_v14, %v329_v13  ;;  %v206_v28 = vld [vmem:[#allocation3 + $0x28] sm:$0xff] }
  0x92   :  { %v2797_v23 = vpack.c.bf16 %v1353_v12, %v1349_v0  ;;  %v331_v25 = vmul.f32 %v203_v22, %v75_v21  ;;  %v459_v26 = vld [vmem:[%s4558_s2 + $0x10] sm:$0xff]  ;;  %2734 = vmatpush1.bf16.msra.mxu0 %v2733_v17  ;;  %714 = vst [vmem:[#allocation10 + $0x8] sm:$0xff] %v586_v18  ;;  %1547 = vmatprep.mubr.f32.mxu0 %v586_v18  ;;  %v462_v31 = vld [vmem:[%s4558_s2 + $0x28] sm:$0xff]  ;;  %v77_v32 = vld [vmem:[%s4557_s1 + $0x20] sm:$0xff] }
  0x93   :  { %v588_v29 = vadd.f32 %v460_v20, %v332_v19  ;;  %v334_v30 = vmul.f32 %v206_v28, %v78_v27  ;;  %v205_v33 = vld [vmem:[#allocation3 + $0x20] sm:$0xff]  ;;  %1996 = vmatprep.mubr.f32.mxu1 %v586_v18  ;;  %713 = vst [vmem:[#allocation10] sm:$0xff] %v585_v24  ;;  %v80_v37 = vld [vmem:[%s4557_s1 + $0x38] sm:$0xff]  ;;  %v79_v42 = vld [vmem:[%s4557_s1 + $0x30] sm:$0xff] }
  0x94   :  { %2798 = vmatpush1.bf16.msra.mxu1 %v2797_v23  ;;  %v587_v34 = vadd.f32 %v459_v26, %v331_v25  ;;  %v333_v35 = vmul.f32 %v205_v33, %v77_v32  ;;  %v461_v36 = vld [vmem:[%s4558_s2 + $0x20] sm:$0xff]  ;;  %v208_v38 = vld [vmem:[#allocation3 + $0x38] sm:$0xff]  ;;  %v207_v43 = vld [vmem:[#allocation3 + $0x30] sm:$0xff] }
  0x95   :  { %716 = vst [vmem:[#allocation10 + $0x18] sm:$0xff] %v588_v29  ;;  %v590_v39 = vadd.f32 %v462_v31, %v334_v30  ;;  %v336_v40 = vmul.f32 %v208_v38, %v80_v37  ;;  %v464_v41 = vld [vmem:[%s4558_s2 + $0x38] sm:$0xff]  ;;  %1548 = vmatmul.mubr.f32.vlgmr.msra.gmra.mrb[0].mxu0 %v585_v24  ;;  %v335_v45 = vmul.f32 %v207_v43, %v79_v42  ;;  %v463_v46 = vld [vmem:[%s4558_s2 + $0x30] sm:$0xff]  ;;  %v82_v47 = vld [vmem:[%s4557_s1 + $0x48] sm:$0xff] }
  0x96   :  { %715 = vst [vmem:[#allocation10 + $0x10] sm:$0xff] %v587_v34  ;;  %v589_v44 = vadd.f32 %v461_v36, %v333_v35  ;;  %v210_v48 = vld [vmem:[#allocation3 + $0x48] sm:$0xff]  ;;  %1553 = vmatprep.mubr.f32.mxu0 %v588_v29  ;;  %v81_v52 = vld [vmem:[%s4557_s1 + $0x40] sm:$0xff]  ;;  %v84_v57 = vld [vmem:[%s4557_s1 + $0x58] sm:$0xff] }
  0x97   :  { %1997 = vmatmul.mubr.f32.vlgmr.msra.gmra.mrb[0].mxu1 %v585_v24  ;;  %718 = vst [vmem:[#allocation10 + $0x28] sm:$0xff] %v590_v39  ;;  %v592_v49 = vadd.f32 %v464_v41, %v336_v40  ;;  %v338_v50 = vmul.f32 %v210_v48, %v82_v47  ;;  %v466_v51 = vld [vmem:[%s4558_s2 + $0x48] sm:$0xff]  ;;  %v209_v53 = vld [vmem:[#allocation3 + $0x40] sm:$0xff]  ;;  %v3210_v54 = vadd.f32 %v463_v46, %v335_v45  ;;  %v212_v58 = vld [vmem:[#allocation3 + $0x58] sm:$0xff] }
  0x98   :  { %2002 = vmatprep.mubr.f32.mxu1 %v588_v29  ;;  %717 = vst [vmem:[#allocation10 + $0x20] sm:$0xff] %v589_v44  ;;  %v337_v55 = vmul.f32 %v209_v53, %v81_v52  ;;  %v465_v56 = vld [vmem:[%s4558_s2 + $0x40] sm:$0xff]  ;;  %v340_v60 = vmul.f32 %v212_v58, %v84_v57  ;;  %v468_v61 = vld [vmem:[%s4558_s2 + $0x58] sm:$0xff]  ;;  %v83_v62 = vld [vmem:[%s4557_s1 + $0x50] sm:$0xff] }
  0x99   :  { %720 = vst [vmem:[#allocation10 + $0x38] sm:$0xff] %v592_v49  ;;  %v3218_v59 = vadd.f32 %v466_v51, %v338_v50  ;;  %v211_v63 = vld [vmem:[#allocation3 + $0x50] sm:$0xff]  ;;  %1554 = vmatmul.mubr.f32.gmra.mrb[2].mxu0 %v587_v34  ;;  %719 = vst [vmem:[#allocation10 + $0x30] sm:$0xff] %v3210_v54  ;;  %v86_v4 = vld [vmem:[%s4557_s1 + $0x68] sm:$0xff] }
  0x9a   :  { %v3227_v1 = vadd.f32 %v465_v56, %v337_v55  ;;  %v339_v2 = vmul.f32 %v211_v63, %v83_v62  ;;  %v467_v3 = vld [vmem:[%s4558_s2 + $0x50] sm:$0xff]  ;;  %v214_v5 = vld [vmem:[#allocation3 + $0x68] sm:$0xff]  ;;  %1559 = vmatprep.mubr.f32.mxu0 %v590_v39  ;;  %v3236_v6 = vadd.f32 %v468_v61, %v340_v60  ;;  %v85_v9 = vld [vmem:[%s4557_s1 + $0x60] sm:$0xff] }
  0x9b   :  { %2003 = vmatmul.mubr.f32.gmra.mrb[2].mxu1 %v587_v34  ;;  %722 = vst [vmem:[#allocation10 + $0x48] sm:$0xff] %v3218_v59  ;;  %v342_v7 = vmul.f32 %v214_v5, %v86_v4  ;;  %v470_v8 = vld [vmem:[%s4558_s2 + $0x68] sm:$0xff]  ;;  %v213_v10 = vld [vmem:[#allocation3 + $0x60] sm:$0xff]  ;;  %v88_v13 = vld [vmem:[%s4557_s1 + $0x78] sm:$0xff] }
  0x9c   :  { %2008 = vmatprep.mubr.f32.mxu1 %v590_v39  ;;  %721 = vst [vmem:[#allocation10 + $0x40] sm:$0xff] %v3227_v1  ;;  %v3245_v11 = vadd.f32 %v467_v3, %v339_v2  ;;  %v341_v0 = vmul.f32 %v213_v10, %v85_v9  ;;  %v469_v12 = vld [vmem:[%s4558_s2 + $0x60] sm:$0xff]  ;;  %v216_v14 = vld [vmem:[#allocation3 + $0x78] sm:$0xff]  ;;  %724 = vst [vmem:[#allocation10 + $0x58] sm:$0xff] %v3236_v6 }
  0x9d   :  { %v3254_v15 = vadd.f32 %v470_v8, %v342_v7  ;;  %v344_v16 = vmul.f32 %v216_v14, %v88_v13  ;;  %v472_v17 = vld [vmem:[%s4558_s2 + $0x78] sm:$0xff]  ;;  %v87_v18 = vld [vmem:[%s4557_s1 + $0x70] sm:$0xff]  ;;  %1560 = vmatmul.mubr.f32.gmra.mrb[4].mxu0 %v589_v44  ;;  %v90_v23 = vld [vmem:[%s4557_s1 + $0x88] sm:$0xff] }
  0x9e   :  { %v215_v19 = vld [vmem:[#allocation3 + $0x70] sm:$0xff]  ;;  %723 = vst [vmem:[#allocation10 + $0x50] sm:$0xff] %v3245_v11  ;;  %v3263_v20 = vadd.f32 %v469_v12, %v341_v0  ;;  %v218_v24 = vld [vmem:[#allocation3 + $0x88] sm:$0xff]  ;;  %1565 = vmatprep.mubr.f32.mxu0 %v592_v49  ;;  %v89_v28 = vld [vmem:[%s4557_s1 + $0x80] sm:$0xff] }
  0x9f   :  { %v343_v21 = vmul.f32 %v215_v19, %v87_v18  ;;  %v471_v22 = vld [vmem:[%s4558_s2 + $0x70] sm:$0xff]  ;;  %2009 = vmatmul.mubr.f32.gmra.mrb[4].mxu1 %v589_v44  ;;  %726 = vst [vmem:[#allocation10 + $0x68] sm:$0xff] %v3254_v15  ;;  %v3272_v25 = vadd.f32 %v472_v17, %v344_v16  ;;  %v346_v26 = vmul.f32 %v218_v24, %v90_v23  ;;  %v474_v27 = vld [vmem:[%s4558_s2 + $0x88] sm:$0xff]  ;;  %v217_v29 = vld [vmem:[#allocation3 + $0x80] sm:$0xff] }
  0xa0   :  { %2014 = vmatprep.mubr.f32.mxu1 %v592_v49  ;;  %725 = vst [vmem:[#allocation10 + $0x60] sm:$0xff] %v3263_v20  ;;  %v345_v31 = vmul.f32 %v217_v29, %v89_v28  ;;  %v473_v32 = vld [vmem:[%s4558_s2 + $0x80] sm:$0xff]  ;;  %v92_v33 = vld [vmem:[%s4557_s1 + $0x98] sm:$0xff]  ;;  %v91_v38 = vld [vmem:[%s4557_s1 + $0x90] sm:$0xff] }
  0xa1   :  { %v3281_v30 = vadd.f32 %v471_v22, %v343_v21  ;;  %v220_v34 = vld [vmem:[#allocation3 + $0x98] sm:$0xff]  ;;  %728 = vst [vmem:[#allocation10 + $0x78] sm:$0xff] %v3272_v25  ;;  %v3290_v35 = vadd.f32 %v474_v27, %v346_v26  ;;  %v219_v39 = vld [vmem:[#allocation3 + $0x90] sm:$0xff]  ;;  %1566 = vmatmul.mubr.f32.gmra.mrb[6].mxu0 %v3210_v54  ;;  %v94_v43 = vld [vmem:[%s4557_s1 + $0xa8] sm:$0xff] }
  0xa2   :  { %v348_v36 = vmul.f32 %v220_v34, %v92_v33  ;;  %v476_v37 = vld [vmem:[%s4558_s2 + $0x98] sm:$0xff]  ;;  %v3300_v40 = vadd.f32 %v473_v32, %v345_v31  ;;  %v347_v41 = vmul.f32 %v219_v39, %v91_v38  ;;  %v475_v42 = vld [vmem:[%s4558_s2 + $0x90] sm:$0xff]  ;;  %v222_v44 = vld [vmem:[#allocation3 + $0xa8] sm:$0xff]  ;;  %1571 = vmatprep.mubr.f32.mxu0 %v3218_v59 }
  0xa3   :  { %727 = vst [vmem:[#allocation10 + $0x70] sm:$0xff] %v3281_v30  ;;  %2015 = vmatmul.mubr.f32.gmra.mrb[6].mxu1 %v3210_v54  ;;  %730 = vst [vmem:[#allocation10 + $0x88] sm:$0xff] %v3290_v35  ;;  %v350_v46 = vmul.f32 %v222_v44, %v94_v43  ;;  %v478_v47 = vld [vmem:[%s4558_s2 + $0xa8] sm:$0xff]  ;;  %v93_v48 = vld [vmem:[%s4557_s1 + $0xa0] sm:$0xff] }
  0xa4   :  { %v3311_v45 = vadd.f32 %v476_v37, %v348_v36  ;;  %v221_v49 = vld [vmem:[#allocation3 + $0xa0] sm:$0xff]  ;;  %2020 = vmatprep.mubr.f32.mxu1 %v3218_v59  ;;  %729 = vst [vmem:[#allocation10 + $0x80] sm:$0xff] %v3300_v40  ;;  %v3321_v50 = vadd.f32 %v475_v42, %v347_v41  ;;  %v96_v53 = vld [vmem:[%s4557_s1 + $0xb8] sm:$0xff]  ;;  %v95_v58 = vld [vmem:[%s4557_s1 + $0xb0] sm:$0xff] }
  0xa5   :  { %v349_v51 = vmul.f32 %v221_v49, %v93_v48  ;;  %v477_v52 = vld [vmem:[%s4558_s2 + $0xa0] sm:$0xff]  ;;  %v224_v54 = vld [vmem:[#allocation3 + $0xb8] sm:$0xff]  ;;  %v3330_v55 = vadd.f32 %v478_v47, %v350_v46  ;;  %v223_v59 = vld [vmem:[#allocation3 + $0xb0] sm:$0xff]  ;;  %1572 = vmatmul.mubr.f32.gmra.mrb[8].mxu0 %v3227_v1 }
  0xa6   :  { %732 = vst [vmem:[#allocation10 + $0x98] sm:$0xff] %v3311_v45  ;;  %v352_v56 = vmul.f32 %v224_v54, %v96_v53  ;;  %v480_v57 = vld [vmem:[%s4558_s2 + $0xb8] sm:$0xff]  ;;  %731 = vst [vmem:[#allocation10 + $0x90] sm:$0xff] %v3321_v50  ;;  %v351_v61 = vmul.f32 %v223_v59, %v95_v58  ;;  %v479_v62 = vld [vmem:[%s4558_s2 + $0xb0] sm:$0xff]  ;;  %1577 = vmatprep.mubr.f32.mxu0 %v3236_v6 }
  0xa7   :  { %v3340_v60 = vadd.f32 %v477_v52, %v349_v51  ;;  %v98_v63 = vld [vmem:[%s4557_s1 + $0xc8] sm:$0xff]  ;;  %2021 = vmatmul.mubr.f32.gmra.mrb[8].mxu1 %v3227_v1  ;;  %734 = vst [vmem:[#allocation10 + $0xa8] sm:$0xff] %v3330_v55  ;;  %v97_v7 = vld [vmem:[%s4557_s1 + $0xc0] sm:$0xff]  ;;  %v100_v0 = vld [vmem:[%s4557_s1 + $0xd8] sm:$0xff] }
  0xa8   :  { %v226_v2 = vld [vmem:[#allocation3 + $0xc8] sm:$0xff]  ;;  %v3351_v3 = vadd.f32 %v480_v57, %v352_v56  ;;  %v225_v8 = vld [vmem:[#allocation3 + $0xc0] sm:$0xff]  ;;  %2026 = vmatprep.mubr.f32.mxu1 %v3236_v6  ;;  %v3361_v1 = vadd.f32 %v479_v62, %v351_v61  ;;  %v228_v12 = vld [vmem:[#allocation3 + $0xd8] sm:$0xff] }
  0xa9   :  { %v354_v4 = vmul.f32 %v226_v2, %v98_v63  ;;  %v482_v5 = vld [vmem:[%s4558_s2 + $0xc8] sm:$0xff]  ;;  %733 = vst [vmem:[#allocation10 + $0xa0] sm:$0xff] %v3340_v60  ;;  %v353_v9 = vmul.f32 %v225_v8, %v97_v7  ;;  %v481_v10 = vld [vmem:[%s4558_s2 + $0xc0] sm:$0xff]  ;;  %v356_v14 = vmul.f32 %v228_v12, %v100_v0  ;;  %v484_v6 = vld [vmem:[%s4558_s2 + $0xd8] sm:$0xff]  ;;  %1578 = vmatmul.mubr.f32.gmra.mrb[10].mxu0 %v3245_v11 }
  0xaa   :  { %736 = vst [vmem:[#allocation10 + $0xb8] sm:$0xff] %v3351_v3  ;;  %v99_v16 = vld [vmem:[%s4557_s1 + $0xd0] sm:$0xff]  ;;  %735 = vst [vmem:[#allocation10 + $0xb0] sm:$0xff] %v3361_v1  ;;  %v102_v22 = vld [vmem:[%s4557_s1 + $0xe8] sm:$0xff]  ;;  %1583 = vmatprep.mubr.f32.mxu0 %v3254_v15 }
  0xab   :  { %v3370_v13 = vadd.f32 %v482_v5, %v354_v4  ;;  %v227_v17 = vld [vmem:[#allocation3 + $0xd0] sm:$0xff]  ;;  %v3380_v18 = vadd.f32 %v481_v10, %v353_v9  ;;  %v230_v23 = vld [vmem:[#allocation3 + $0xe8] sm:$0xff]  ;;  %2027 = vmatmul.mubr.f32.gmra.mrb[10].mxu1 %v3245_v11  ;;  %v3391_v24 = vadd.f32 %v484_v6, %v356_v14  ;;  %v101_v28 = vld [vmem:[%s4557_s1 + $0xe0] sm:$0xff] }
  0xac   :  { %v355_v19 = vmul.f32 %v227_v17, %v99_v16  ;;  %v483_v21 = vld [vmem:[%s4558_s2 + $0xd0] sm:$0xff]  ;;  %v358_v26 = vmul.f32 %v230_v23, %v102_v22  ;;  %v486_v27 = vld [vmem:[%s4558_s2 + $0xe8] sm:$0xff]  ;;  %v229_v29 = vld [vmem:[#allocation3 + $0xe0] sm:$0xff]  ;;  %2032 = vmatprep.mubr.f32.mxu1 %v3254_v15 }
  0xad   :  { %738 = vst [vmem:[#allocation10 + $0xc8] sm:$0xff] %v3370_v13  ;;  %737 = vst [vmem:[#allocation10 + $0xc0] sm:$0xff] %v3380_v18  ;;  %v357_v31 = vmul.f32 %v229_v29, %v101_v28  ;;  %v485_v32 = vld [vmem:[%s4558_s2 + $0xe0] sm:$0xff]  ;;  %v104_v33 = vld [vmem:[%s4557_s1 + $0xf8] sm:$0xff]  ;;  %1584 = vmatmul.mubr.f32.gmra.mrb[12].mxu0 %v3263_v20 }
  0xae   :  { %v3401_v11 = vadd.f32 %v483_v21, %v355_v19  ;;  %v232_v34 = vld [vmem:[#allocation3 + $0xf8] sm:$0xff]  ;;  %740 = vst [vmem:[#allocation10 + $0xd8] sm:$0xff] %v3391_v24  ;;  %v3410_v36 = vadd.f32 %v486_v27, %v358_v26  ;;  %v103_v38 = vld [vmem:[%s4557_s1 + $0xf0] sm:$0xff]  ;;  %v106_v44 = vld [vmem:[%s4557_s1 + $0x108] sm:$0xff]  ;;  %1589 = vmatprep.mubr.f32.mxu0 %v3272_v25 }
  0xaf   :  { %v360_v37 = vmul.f32 %v232_v34, %v104_v33  ;;  %v488_v15 = vld [vmem:[%s4558_s2 + $0xf8] sm:$0xff]  ;;  %v231_v39 = vld [vmem:[#allocation3 + $0xf0] sm:$0xff]  ;;  %v3420_v41 = vadd.f32 %v485_v32, %v357_v31  ;;  %v234_v46 = vld [vmem:[#allocation3 + $0x108] sm:$0xff]  ;;  %2033 = vmatmul.mubr.f32.gmra.mrb[12].mxu1 %v3263_v20 }
  0xb0   :  { %739 = vst [vmem:[#allocation10 + $0xd0] sm:$0xff] %v3401_v11  ;;  %v359_v42 = vmul.f32 %v231_v39, %v103_v38  ;;  %v487_v43 = vld [vmem:[%s4558_s2 + $0xf0] sm:$0xff]  ;;  %742 = vst [vmem:[#allocation10 + $0xe8] sm:$0xff] %v3410_v36  ;;  %v362_v48 = vmul.f32 %v234_v46, %v106_v44  ;;  %v490_v49 = vld [vmem:[%s4558_s2 + $0x108] sm:$0xff]  ;;  %2038 = vmatprep.mubr.f32.mxu1 %v3272_v25 }
  0xb1   :  { %v3431_v47 = vadd.f32 %v488_v15, %v360_v37  ;;  %v105_v51 = vld [vmem:[%s4557_s1 + $0x100] sm:$0xff]  ;;  %741 = vst [vmem:[#allocation10 + $0xe0] sm:$0xff] %v3420_v41  ;;  %v108_v56 = vld [vmem:[%s4557_s1 + $0x118] sm:$0xff]  ;;  %v107_v61 = vld [vmem:[%s4557_s1 + $0x110] sm:$0xff]  ;;  %1590 = vmatmul.mubr.f32.gmra.mrb[14].mxu0 %v3281_v30 }
  0xb2   :  { %v233_v52 = vld [vmem:[#allocation3 + $0x100] sm:$0xff]  ;;  %v3441_v20 = vadd.f32 %v487_v43, %v359_v42  ;;  %v236_v57 = vld [vmem:[#allocation3 + $0x118] sm:$0xff]  ;;  %v3450_v58 = vadd.f32 %v490_v49, %v362_v48  ;;  %v235_v62 = vld [vmem:[#allocation3 + $0x110] sm:$0xff]  ;;  %1595 = vmatprep.mubr.f32.mxu0 %v3290_v35 }
  0xb3   :  { %v361_v53 = vmul.f32 %v233_v52, %v105_v51  ;;  %v489_v54 = vld [vmem:[%s4558_s2 + $0x100] sm:$0xff]  ;;  %744 = vst [vmem:[#allocation10 + $0xf8] sm:$0xff] %v3431_v47  ;;  %v364_v59 = vmul.f32 %v236_v57, %v108_v56  ;;  %v492_v25 = vld [vmem:[%s4558_s2 + $0x118] sm:$0xff]  ;;  %v363_v2 = vmul.f32 %v235_v62, %v107_v61  ;;  %v491_v4 = vld [vmem:[%s4558_s2 + $0x110] sm:$0xff]  ;;  %2039 = vmatmul.mubr.f32.gmra.mrb[14].mxu1 %v3281_v30 }
  0xb4   :  { %743 = vst [vmem:[#allocation10 + $0xf0] sm:$0xff] %v3441_v20  ;;  %v110_v5 = vld [vmem:[%s4557_s1 + $0x128] sm:$0xff]  ;;  %746 = vst [vmem:[#allocation10 + $0x108] sm:$0xff] %v3450_v58  ;;  %v109_v0 = vld [vmem:[%s4557_s1 + $0x120] sm:$0xff]  ;;  %2044 = vmatprep.mubr.f32.mxu1 %v3290_v35 }
  0xb5   :  { %v3460_v63 = vadd.f32 %v489_v54, %v361_v53  ;;  %v238_v7 = vld [vmem:[#allocation3 + $0x128] sm:$0xff]  ;;  %v3471_v8 = vadd.f32 %v492_v25, %v364_v59  ;;  %v237_v12 = vld [vmem:[#allocation3 + $0x120] sm:$0xff]  ;;  %v3481_v30 = vadd.f32 %v491_v4, %v363_v2  ;;  %v112_v16 = vld [vmem:[%s4557_s1 + $0x138] sm:$0xff]  ;;  %1596 = vmatmul.mubr.f32.gmra.mrb[16].mxu0 %v3300_v40 }
  0xb6   :  { %v366_v9 = vmul.f32 %v238_v7, %v110_v5  ;;  %v494_v10 = vld [vmem:[%s4558_s2 + $0x128] sm:$0xff]  ;;  %v365_v14 = vmul.f32 %v237_v12, %v109_v0  ;;  %v493_v6 = vld [vmem:[%s4558_s2 + $0x120] sm:$0xff]  ;;  %v240_v17 = vld [vmem:[#allocation3 + $0x138] sm:$0xff]  ;;  %1601 = vmatprep.mubr.f32.mxu0 %v3311_v45 }
  0xb7   :  { %745 = vst [vmem:[#allocation10 + $0x100] sm:$0xff] %v3460_v63  ;;  %748 = vst [vmem:[#allocation10 + $0x118] sm:$0xff] %v3471_v8  ;;  %v368_v21 = vmul.f32 %v240_v17, %v112_v16  ;;  %v496_v35 = vld [vmem:[%s4558_s2 + $0x138] sm:$0xff]  ;;  %v111_v22 = vld [vmem:[%s4557_s1 + $0x130] sm:$0xff]  ;;  %2045 = vmatmul.mubr.f32.gmra.mrb[16].mxu1 %v3300_v40 }
  0xb8   :  { %v3490_v19 = vadd.f32 %v494_v10, %v366_v9  ;;  %v239_v23 = vld [vmem:[#allocation3 + $0x130] sm:$0xff]  ;;  %747 = vst [vmem:[#allocation10 + $0x110] sm:$0xff] %v3481_v30  ;;  %v3500_v26 = vadd.f32 %v493_v6, %v365_v14  ;;  %v114_v29 = vld [vmem:[%s4557_s1 + $0x148] sm:$0xff]  ;;  %v113_v37 = vld [vmem:[%s4557_s1 + $0x140] sm:$0xff]  ;;  %2050 = vmatprep.mubr.f32.mxu1 %v3311_v45 }
  0xb9   :  { %v367_v27 = vmul.f32 %v239_v23, %v111_v22  ;;  %v495_v28 = vld [vmem:[%s4558_s2 + $0x130] sm:$0xff]  ;;  %v242_v31 = vld [vmem:[#allocation3 + $0x148] sm:$0xff]  ;;  %v3511_v32 = vadd.f32 %v496_v35, %v368_v21  ;;  %v241_v15 = vld [vmem:[#allocation3 + $0x140] sm:$0xff]  ;;  %1602 = vmatmul.mubr.f32.gmra.mrb[18].mxu0 %v3321_v50 }
  0xba   :  { %750 = vst [vmem:[#allocation10 + $0x128] sm:$0xff] %v3490_v19  ;;  %v370_v33 = vmul.f32 %v242_v31, %v114_v29  ;;  %v498_v34 = vld [vmem:[%s4558_s2 + $0x148] sm:$0xff]  ;;  %749 = vst [vmem:[#allocation10 + $0x120] sm:$0xff] %v3500_v26  ;;  %v369_v38 = vmul.f32 %v241_v15, %v113_v37  ;;  %v497_v39 = vld [vmem:[%s4558_s2 + $0x140] sm:$0xff]  ;;  %1607 = vmatprep.mubr.f32.mxu0 %v3330_v55 }
  0xbb   :  { %v3521_v40 = vadd.f32 %v495_v28, %v367_v27  ;;  %v116_v42 = vld [vmem:[%s4557_s1 + $0x158] sm:$0xff]  ;;  %752 = vst [vmem:[#allocation10 + $0x138] sm:$0xff] %v3511_v32  ;;  %v115_v48 = vld [vmem:[%s4557_s1 + $0x150] sm:$0xff]  ;;  %v118_v54 = vld [vmem:[%s4557_s1 + $0x168] sm:$0xff]  ;;  %2051 = vmatmul.mubr.f32.gmra.mrb[18].mxu1 %v3321_v50 }
  0xbc   :  { %v244_v43 = vld [vmem:[#allocation3 + $0x158] sm:$0xff]  ;;  %v3530_v44 = vadd.f32 %v498_v34, %v370_v33  ;;  %v243_v49 = vld [vmem:[#allocation3 + $0x150] sm:$0xff]  ;;  %v3540_v51 = vadd.f32 %v497_v39, %v369_v38  ;;  %v246_v56 = vld [vmem:[#allocation3 + $0x168] sm:$0xff]  ;;  %2056 = vmatprep.mubr.f32.mxu1 %v3330_v55 }
  0xbd   :  { %v372_v46 = vmul.f32 %v244_v43, %v116_v42  ;;  %v500_v45 = vld [vmem:[%s4558_s2 + $0x158] sm:$0xff]  ;;  %751 = vst [vmem:[#allocation10 + $0x130] sm:$0xff] %v3521_v40  ;;  %v371_v52 = vmul.f32 %v243_v49, %v115_v48  ;;  %v499_v53 = vld [vmem:[%s4558_s2 + $0x150] sm:$0xff]  ;;  %v374_v59 = vmul.f32 %v246_v56, %v118_v54  ;;  %v502_v25 = vld [vmem:[%s4558_s2 + $0x168] sm:$0xff]  ;;  %1608 = vmatmul.mubr.f32.gmra.mrb[20].mxu0 %v3340_v60 }
  0xbe   :  { %754 = vst [vmem:[#allocation10 + $0x148] sm:$0xff] %v3530_v44  ;;  %v117_v61 = vld [vmem:[%s4557_s1 + $0x160] sm:$0xff]  ;;  %753 = vst [vmem:[#allocation10 + $0x140] sm:$0xff] %v3540_v51  ;;  %v120_v5 = vld [vmem:[%s4557_s1 + $0x178] sm:$0xff]  ;;  %1613 = vmatprep.mubr.f32.mxu0 %v3351_v3 }
  0xbf   :  { %v3551_v57 = vadd.f32 %v500_v45, %v372_v46  ;;  %v245_v62 = vld [vmem:[#allocation3 + $0x160] sm:$0xff]  ;;  %v3561_v50 = vadd.f32 %v499_v53, %v371_v52  ;;  %v248_v7 = vld [vmem:[#allocation3 + $0x178] sm:$0xff]  ;;  %v3570_v9 = vadd.f32 %v502_v25, %v374_v59  ;;  %v119_v0 = vld [vmem:[%s4557_s1 + $0x170] sm:$0xff]  ;;  %2057 = vmatmul.mubr.f32.gmra.mrb[20].mxu1 %v3340_v60 }
  0xc0   :  { %v373_v2 = vmul.f32 %v245_v62, %v117_v61  ;;  %v501_v4 = vld [vmem:[%s4558_s2 + $0x160] sm:$0xff]  ;;  %v376_v10 = vmul.f32 %v248_v7, %v120_v5  ;;  %v504_v55 = vld [vmem:[%s4558_s2 + $0x178] sm:$0xff]  ;;  %v247_v12 = vld [vmem:[#allocation3 + $0x170] sm:$0xff]  ;;  %2062 = vmatprep.mubr.f32.mxu1 %v3351_v3 }
  0xc1   :  { %756 = vst [vmem:[#allocation10 + $0x158] sm:$0xff] %v3551_v57  ;;  %755 = vst [vmem:[#allocation10 + $0x150] sm:$0xff] %v3561_v50  ;;  %v375_v6 = vmul.f32 %v247_v12, %v119_v0  ;;  %v503_v16 = vld [vmem:[%s4558_s2 + $0x170] sm:$0xff]  ;;  %v122_v17 = vld [vmem:[%s4557_s1 + $0x188] sm:$0xff]  ;;  %1614 = vmatmul.mubr.f32.gmra.mrb[22].mxu0 %v3361_v1 }
  0xc2   :  { %v3580_v14 = vadd.f32 %v501_v4, %v373_v2  ;;  %v250_v21 = vld [vmem:[#allocation3 + $0x188] sm:$0xff]  ;;  %758 = vst [vmem:[#allocation10 + $0x168] sm:$0xff] %v3570_v9  ;;  %v3591_v35 = vadd.f32 %v504_v55, %v376_v10  ;;  %v121_v27 = vld [vmem:[%s4557_s1 + $0x180] sm:$0xff]  ;;  %v124_v33 = vld [vmem:[%s4557_s1 + $0x198] sm:$0xff]  ;;  %1619 = vmatprep.mubr.f32.mxu0 %v3370_v13 }
  0xc3   :  { %v378_v22 = vmul.f32 %v250_v21, %v122_v17  ;;  %v506_v23 = vld [vmem:[%s4558_s2 + $0x188] sm:$0xff]  ;;  %v249_v28 = vld [vmem:[#allocation3 + $0x180] sm:$0xff]  ;;  %v3601_v60 = vadd.f32 %v503_v16, %v375_v6  ;;  %v252_v34 = vld [vmem:[#allocation3 + $0x198] sm:$0xff]  ;;  %2063 = vmatmul.mubr.f32.gmra.mrb[22].mxu1 %v3361_v1 }
  0xc4   :  { %757 = vst [vmem:[#allocation10 + $0x160] sm:$0xff] %v3580_v14  ;;  %v377_v29 = vmul.f32 %v249_v28, %v121_v27  ;;  %v505_v31 = vld [vmem:[%s4558_s2 + $0x180] sm:$0xff]  ;;  %760 = vst [vmem:[#allocation10 + $0x178] sm:$0xff] %v3591_v35  ;;  %v380_v15 = vmul.f32 %v252_v34, %v124_v33  ;;  %v508_v3 = vld [vmem:[%s4558_s2 + $0x198] sm:$0xff]  ;;  %2068 = vmatprep.mubr.f32.mxu1 %v3370_v13 }
  0xc5   :  { %v3610_v37 = vadd.f32 %v506_v23, %v378_v22  ;;  %v123_v38 = vld [vmem:[%s4557_s1 + $0x190] sm:$0xff]  ;;  %759 = vst [vmem:[#allocation10 + $0x170] sm:$0xff] %v3601_v60  ;;  %v126_v45 = vld [vmem:[%s4557_s1 + $0x1a8] sm:$0xff]  ;;  %v125_v54 = vld [vmem:[%s4557_s1 + $0x1a0] sm:$0xff]  ;;  %1620 = vmatmul.mubr.f32.gmra.mrb[24].mxu0 %v3380_v18 }
  0xc6   :  { %v251_v39 = vld [vmem:[#allocation3 + $0x190] sm:$0xff]  ;;  %v3620_v42 = vadd.f32 %v505_v31, %v377_v29  ;;  %v254_v48 = vld [vmem:[#allocation3 + $0x1a8] sm:$0xff]  ;;  %v3631_v49 = vadd.f32 %v508_v3, %v380_v15  ;;  %v253_v56 = vld [vmem:[#allocation3 + $0x1a0] sm:$0xff]  ;;  %1625 = vmatprep.mubr.f32.mxu0 %v3391_v24 }
  0xc7   :  { %v379_v43 = vmul.f32 %v251_v39, %v123_v38  ;;  %v507_v46 = vld [vmem:[%s4558_s2 + $0x190] sm:$0xff]  ;;  %762 = vst [vmem:[#allocation10 + $0x188] sm:$0xff] %v3610_v37  ;;  %v382_v52 = vmul.f32 %v254_v48, %v126_v45  ;;  %v510_v53 = vld [vmem:[%s4558_s2 + $0x1a8] sm:$0xff]  ;;  %v381_v59 = vmul.f32 %v253_v56, %v125_v54  ;;  %v509_v25 = vld [vmem:[%s4558_s2 + $0x1a0] sm:$0xff]  ;;  %2069 = vmatmul.mubr.f32.gmra.mrb[24].mxu1 %v3380_v18 }
  0xc8   :  { %761 = vst [vmem:[#allocation10 + $0x180] sm:$0xff] %v3620_v42  ;;  %v128_v61 = vld [vmem:[%s4557_s1 + $0x1b8] sm:$0xff]  ;;  %764 = vst [vmem:[#allocation10 + $0x198] sm:$0xff] %v3631_v49  ;;  %v127_v5 = vld [vmem:[%s4557_s1 + $0x1b0] sm:$0xff]  ;;  %2074 = vmatprep.mubr.f32.mxu1 %v3391_v24 }
  0xc9   :  { %v3641_v1 = vadd.f32 %v507_v46, %v379_v43  ;;  %v256_v62 = vld [vmem:[#allocation3 + $0x1b8] sm:$0xff]  ;;  %v3650_v2 = vadd.f32 %v510_v53, %v382_v52  ;;  %v255_v7 = vld [vmem:[#allocation3 + $0x1b0] sm:$0xff]  ;;  %v3660_v10 = vadd.f32 %v509_v25, %v381_v59  ;;  %v130_v12 = vld [vmem:[%s4557_s1 + $0x1c8] sm:$0xff]  ;;  %1626 = vmatmul.mubr.f32.gmra.mrb[26].mxu0 %v3401_v11 }
  0xca   :  { %v384_v4 = vmul.f32 %v256_v62, %v128_v61  ;;  %v512_v13 = vld [vmem:[%s4558_s2 + $0x1b8] sm:$0xff]  ;;  %v383_v55 = vmul.f32 %v255_v7, %v127_v5  ;;  %v511_v0 = vld [vmem:[%s4558_s2 + $0x1b0] sm:$0xff]  ;;  %v258_v6 = vld [vmem:[#allocation3 + $0x1c8] sm:$0xff]  ;;  %1631 = vmatprep.mubr.f32.mxu0 %v3410_v36 }
  0xcb   :  { %763 = vst [vmem:[#allocation10 + $0x190] sm:$0xff] %v3641_v1  ;;  %766 = vst [vmem:[#allocation10 + $0x1a8] sm:$0xff] %v3650_v2  ;;  %v386_v17 = vmul.f32 %v258_v6, %v130_v12  ;;  %v514_v21 = vld [vmem:[%s4558_s2 + $0x1c8] sm:$0xff]  ;;  %v129_v22 = vld [vmem:[%s4557_s1 + $0x1c0] sm:$0xff]  ;;  %2075 = vmatmul.mubr.f32.gmra.mrb[26].mxu1 %v3401_v11 }
  0xcc   :  { %v3671_v16 = vadd.f32 %v512_v13, %v384_v4  ;;  %v257_v23 = vld [vmem:[#allocation3 + $0x1c0] sm:$0xff]  ;;  %765 = vst [vmem:[#allocation10 + $0x1a0] sm:$0xff] %v3660_v10  ;;  %v3681_v18 = vadd.f32 %v511_v0, %v383_v55  ;;  %v132_v29 = vld [vmem:[%s4557_s1 + $0x1d8] sm:$0xff]  ;;  %v131_v15 = vld [vmem:[%s4557_s1 + $0x1d0] sm:$0xff]  ;;  %2080 = vmatprep.mubr.f32.mxu1 %v3410_v36 }
  0xcd   :  { %v385_v27 = vmul.f32 %v257_v23, %v129_v22  ;;  %v513_v28 = vld [vmem:[%s4558_s2 + $0x1c0] sm:$0xff]  ;;  %v260_v31 = vld [vmem:[#allocation3 + $0x1d8] sm:$0xff]  ;;  %v3690_v33 = vadd.f32 %v514_v21, %v386_v17  ;;  %v259_v3 = vld [vmem:[#allocation3 + $0x1d0] sm:$0xff]  ;;  %1632 = vmatmul.mubr.f32.gmra.mrb[28].mxu0 %v3420_v41 }
  0xce   :  { %768 = vst [vmem:[#allocation10 + $0x1b8] sm:$0xff] %v3671_v16  ;;  %v388_v34 = vmul.f32 %v260_v31, %v132_v29  ;;  %v516_v24 = vld [vmem:[%s4558_s2 + $0x1d8] sm:$0xff]  ;;  %767 = vst [vmem:[#allocation10 + $0x1b0] sm:$0xff] %v3681_v18  ;;  %v387_v39 = vmul.f32 %v259_v3, %v131_v15  ;;  %v515_v43 = vld [vmem:[%s4558_s2 + $0x1d0] sm:$0xff]  ;;  %1637 = vmatprep.mubr.f32.mxu0 %v3431_v47 }
  0xcf   :  { %v3700_v38 = vadd.f32 %v513_v28, %v385_v27  ;;  %v134_v46 = vld [vmem:[%s4557_s1 + $0x1e8] sm:$0xff]  ;;  %770 = vst [vmem:[#allocation10 + $0x1c8] sm:$0xff] %v3690_v33  ;;  %v133_v54 = vld [vmem:[%s4557_s1 + $0x1e0] sm:$0xff]  ;;  %v136_v61 = vld [vmem:[%s4557_s1 + $0x1f8] sm:$0xff]  ;;  %2081 = vmatmul.mubr.f32.gmra.mrb[28].mxu1 %v3420_v41 }
  0xd0   :  { %v262_v45 = vld [vmem:[#allocation3 + $0x1e8] sm:$0xff]  ;;  %v3711_v48 = vadd.f32 %v516_v24, %v388_v34  ;;  %v261_v56 = vld [vmem:[#allocation3 + $0x1e0] sm:$0xff]  ;;  %v3721_v11 = vadd.f32 %v515_v43, %v387_v39  ;;  %v264_v62 = vld [vmem:[#allocation3 + $0x1f8] sm:$0xff]  ;;  %2086 = vmatprep.mubr.f32.mxu1 %v3431_v47 }
  0xd1   :  { %v390_v52 = vmul.f32 %v262_v45, %v134_v46  ;;  %v518_v53 = vld [vmem:[%s4558_s2 + $0x1e8] sm:$0xff]  ;;  %769 = vst [vmem:[#allocation10 + $0x1c0] sm:$0xff] %v3700_v38  ;;  %v389_v59 = vmul.f32 %v261_v56, %v133_v54  ;;  %v517_v25 = vld [vmem:[%s4558_s2 + $0x1e0] sm:$0xff]  ;;  %v392_v13 = vmul.f32 %v264_v62, %v136_v61  ;;  %v520_v36 = vld [vmem:[%s4558_s2 + $0x1f8] sm:$0xff]  ;;  %1638 = vmatmul.mubr.f32.gmra.mrb[30].mxu0 %v3441_v20 }
  0xd2   :  { %772 = vst [vmem:[#allocation10 + $0x1d8] sm:$0xff] %v3711_v48  ;;  %v135_v5 = vld [vmem:[%s4557_s1 + $0x1f0] sm:$0xff]  ;;  %771 = vst [vmem:[#allocation10 + $0x1d0] sm:$0xff] %v3721_v11  ;;  %v138_v6 = vld [vmem:[%s4557_s1 + $0x208] sm:$0xff]  ;;  %1643 = vmatprep.mubr.f32.mxu0 %v3450_v58 }
  0xd3   :  { %v3730_v4 = vadd.f32 %v518_v53, %v390_v52  ;;  %v263_v7 = vld [vmem:[#allocation3 + $0x1f0] sm:$0xff]  ;;  %v3740_v55 = vadd.f32 %v517_v25, %v389_v59  ;;  %v266_v17 = vld [vmem:[#allocation3 + $0x208] sm:$0xff]  ;;  %v3751_v21 = vadd.f32 %v520_v36, %v392_v13  ;;  %v137_v27 = vld [vmem:[%s4557_s1 + $0x200] sm:$0xff]  ;;  %2087 = vmatmul.mubr.f32.gmra.mrb[30].mxu1 %v3441_v20 }
  0xd4   :  { %v391_v0 = vmul.f32 %v263_v7, %v135_v5  ;;  %v519_v12 = vld [vmem:[%s4558_s2 + $0x1f0] sm:$0xff]  ;;  %v394_v22 = vmul.f32 %v266_v17, %v138_v6  ;;  %v522_v23 = vld [vmem:[%s4558_s2 + $0x208] sm:$0xff]  ;;  %v265_v28 = vld [vmem:[#allocation3 + $0x200] sm:$0xff]  ;;  %2092 = vmatprep.mubr.f32.mxu1 %v3450_v58 }
  0xd5   :  { %774 = vst [vmem:[#allocation10 + $0x1e8] sm:$0xff] %v3730_v4  ;;  %773 = vst [vmem:[#allocation10 + $0x1e0] sm:$0xff] %v3740_v55  ;;  %v393_v29 = vmul.f32 %v265_v28, %v137_v27  ;;  %v521_v31 = vld [vmem:[%s4558_s2 + $0x200] sm:$0xff]  ;;  %v140_v34 = vld [vmem:[%s4557_s1 + $0x218] sm:$0xff]  ;;  %1644 = vmatmul.mubr.f32.gmra.mrb[32].mxu0 %v3460_v63 }
  0xd6   :  { %v3761_v41 = vadd.f32 %v519_v12, %v391_v0  ;;  %v268_v24 = vld [vmem:[#allocation3 + $0x218] sm:$0xff]  ;;  %776 = vst [vmem:[#allocation10 + $0x1f8] sm:$0xff] %v3751_v21  ;;  %v3770_v15 = vadd.f32 %v522_v23, %v394_v22  ;;  %v139_v39 = vld [vmem:[%s4557_s1 + $0x210] sm:$0xff]  ;;  %v142_v53 = vld [vmem:[%s4557_s1 + $0x228] sm:$0xff]  ;;  %1649 = vmatprep.mubr.f32.mxu0 %v3471_v8 }
  0xd7   :  { %v396_v3 = vmul.f32 %v268_v24, %v140_v34  ;;  %v524_v47 = vld [vmem:[%s4558_s2 + $0x218] sm:$0xff]  ;;  %v267_v43 = vld [vmem:[#allocation3 + $0x210] sm:$0xff]  ;;  %v3780_v46 = vadd.f32 %v521_v31, %v393_v29  ;;  %v270_v54 = vld [vmem:[#allocation3 + $0x228] sm:$0xff]  ;;  %2093 = vmatmul.mubr.f32.gmra.mrb[32].mxu1 %v3460_v63 }
  0xd8   :  { %775 = vst [vmem:[#allocation10 + $0x1f0] sm:$0xff] %v3761_v41  ;;  %v395_v45 = vmul.f32 %v267_v43, %v139_v39  ;;  %v523_v52 = vld [vmem:[%s4558_s2 + $0x210] sm:$0xff]  ;;  %778 = vst [vmem:[#allocation10 + $0x208] sm:$0xff] %v3770_v15  ;;  %v398_v59 = vmul.f32 %v270_v54, %v142_v53  ;;  %v526_v25 = vld [vmem:[%s4558_s2 + $0x228] sm:$0xff]  ;;  %2098 = vmatprep.mubr.f32.mxu1 %v3471_v8 }
  0xd9   :  { %v3791_v56 = vadd.f32 %v524_v47, %v396_v3  ;;  %v141_v61 = vld [vmem:[%s4557_s1 + $0x220] sm:$0xff]  ;;  %777 = vst [vmem:[#allocation10 + $0x200] sm:$0xff] %v3780_v46  ;;  %v144_v5 = vld [vmem:[%s4557_s1 + $0x238] sm:$0xff]  ;;  %v143_v6 = vld [vmem:[%s4557_s1 + $0x230] sm:$0xff]  ;;  %1650 = vmatmul.mubr.f32.gmra.mrb[34].mxu0 %v3481_v30 }
  0xda   :  { %v269_v62 = vld [vmem:[#allocation3 + $0x220] sm:$0xff]  ;;  %v3801_v20 = vadd.f32 %v523_v52, %v395_v45  ;;  %v272_v7 = vld [vmem:[#allocation3 + $0x238] sm:$0xff]  ;;  %v3810_v0 = vadd.f32 %v526_v25, %v398_v59  ;;  %v271_v17 = vld [vmem:[#allocation3 + $0x230] sm:$0xff]  ;;  %1655 = vmatprep.mubr.f32.mxu0 %v3490_v19 }
  0xdb   :  { %v397_v13 = vmul.f32 %v269_v62, %v141_v61  ;;  %v525_v36 = vld [vmem:[%s4558_s2 + $0x220] sm:$0xff]  ;;  %780 = vst [vmem:[#allocation10 + $0x218] sm:$0xff] %v3791_v56  ;;  %v400_v12 = vmul.f32 %v272_v7, %v144_v5  ;;  %v528_v58 = vld [vmem:[%s4558_s2 + $0x238] sm:$0xff]  ;;  %v399_v23 = vmul.f32 %v271_v17, %v143_v6  ;;  %v527_v27 = vld [vmem:[%s4558_s2 + $0x230] sm:$0xff]  ;;  %2099 = vmatmul.mubr.f32.gmra.mrb[34].mxu1 %v3481_v30 }
  0xdc   :  { %779 = vst [vmem:[#allocation10 + $0x210] sm:$0xff] %v3801_v20  ;;  %v146_v28 = vld [vmem:[%s4557_s1 + $0x248] sm:$0xff]  ;;  %782 = vst [vmem:[#allocation10 + $0x228] sm:$0xff] %v3810_v0  ;;  %v145_v3 = vld [vmem:[%s4557_s1 + $0x240] sm:$0xff]  ;;  %2104 = vmatprep.mubr.f32.mxu1 %v3490_v19 }
  0xdd   :  { %v3820_v22 = vadd.f32 %v525_v36, %v397_v13  ;;  %v274_v29 = vld [vmem:[#allocation3 + $0x248] sm:$0xff]  ;;  %v3831_v31 = vadd.f32 %v528_v58, %v400_v12  ;;  %v273_v47 = vld [vmem:[#allocation3 + $0x240] sm:$0xff]  ;;  %v3841_v63 = vadd.f32 %v527_v27, %v399_v23  ;;  %v148_v45 = vld [vmem:[%s4557_s1 + $0x258] sm:$0xff]  ;;  %1656 = vmatmul.mubr.f32.gmra.mrb[36].mxu0 %v3500_v26 }
  0xde   :  { %v402_v34 = vmul.f32 %v274_v29, %v146_v28  ;;  %v530_v24 = vld [vmem:[%s4558_s2 + $0x248] sm:$0xff]  ;;  %v401_v39 = vmul.f32 %v273_v47, %v145_v3  ;;  %v529_v43 = vld [vmem:[%s4558_s2 + $0x240] sm:$0xff]  ;;  %v276_v52 = vld [vmem:[#allocation3 + $0x258] sm:$0xff]  ;;  %1661 = vmatprep.mubr.f32.mxu0 %v3511_v32 }
  0xdf   :  { %781 = vst [vmem:[#allocation10 + $0x220] sm:$0xff] %v3820_v22  ;;  %784 = vst [vmem:[#allocation10 + $0x238] sm:$0xff] %v3831_v31  ;;  %v404_v54 = vmul.f32 %v276_v52, %v148_v45  ;;  %v532_v8 = vld [vmem:[%s4558_s2 + $0x258] sm:$0xff]  ;;  %v147_v59 = vld [vmem:[%s4557_s1 + $0x250] sm:$0xff]  ;;  %2105 = vmatmul.mubr.f32.gmra.mrb[36].mxu1 %v3500_v26 }
  0xe0   :  { %v3850_v53 = vadd.f32 %v530_v24, %v402_v34  ;;  %v275_v25 = vld [vmem:[#allocation3 + $0x250] sm:$0xff]  ;;  %783 = vst [vmem:[#allocation10 + $0x230] sm:$0xff] %v3841_v63  ;;  %v3860_v61 = vadd.f32 %v529_v43, %v401_v39  ;;  %v150_v36 = vld [vmem:[%s4557_s1 + $0x268] sm:$0xff]  ;;  %v149_v6 = vld [vmem:[%s4557_s1 + $0x260] sm:$0xff]  ;;  %2110 = vmatprep.mubr.f32.mxu1 %v3511_v32 }
  0xe1   :  { %v403_v62 = vmul.f32 %v275_v25, %v147_v59  ;;  %v531_v13 = vld [vmem:[%s4558_s2 + $0x250] sm:$0xff]  ;;  %v278_v5 = vld [vmem:[#allocation3 + $0x268] sm:$0xff]  ;;  %v3871_v7 = vadd.f32 %v532_v8, %v404_v54  ;;  %v277_v17 = vld [vmem:[#allocation3 + $0x260] sm:$0xff]  ;;  %1662 = vmatmul.mubr.f32.gmra.mrb[38].mxu0 %v3521_v40 }
  0xe2   :  { %786 = vst [vmem:[#allocation10 + $0x248] sm:$0xff] %v3850_v53  ;;  %v406_v12 = vmul.f32 %v278_v5, %v150_v36  ;;  %v534_v58 = vld [vmem:[%s4558_s2 + $0x268] sm:$0xff]  ;;  %785 = vst [vmem:[#allocation10 + $0x240] sm:$0xff] %v3860_v61  ;;  %v405_v23 = vmul.f32 %v277_v17, %v149_v6  ;;  %v533_v27 = vld [vmem:[%s4558_s2 + $0x260] sm:$0xff]  ;;  %1667 = vmatprep.mubr.f32.mxu0 %v3530_v44 }
  0xe3   :  { %v3881_v30 = vadd.f32 %v531_v13, %v403_v62  ;;  %v152_v28 = vld [vmem:[%s4557_s1 + $0x278] sm:$0xff]  ;;  %788 = vst [vmem:[#allocation10 + $0x258] sm:$0xff] %v3871_v7  ;;  %v151_v3 = vld [vmem:[%s4557_s1 + $0x270] sm:$0xff]  ;;  %v154_v52 = vld [vmem:[%s4557_s1 + $0x288] sm:$0xff]  ;;  %2111 = vmatmul.mubr.f32.gmra.mrb[38].mxu1 %v3521_v40 }
  0xe4   :  { %v280_v29 = vld [vmem:[#allocation3 + $0x278] sm:$0xff]  ;;  %v3890_v34 = vadd.f32 %v534_v58, %v406_v12  ;;  %v279_v47 = vld [vmem:[#allocation3 + $0x270] sm:$0xff]  ;;  %v3900_v39 = vadd.f32 %v533_v27, %v405_v23  ;;  %v282_v54 = vld [vmem:[#allocation3 + $0x288] sm:$0xff]  ;;  %2116 = vmatprep.mubr.f32.mxu1 %v3530_v44 }
  0xe5   :  { %v408_v24 = vmul.f32 %v280_v29, %v152_v28  ;;  %v536_v19 = vld [vmem:[%s4558_s2 + $0x278] sm:$0xff]  ;;  %787 = vst [vmem:[#allocation10 + $0x250] sm:$0xff] %v3881_v30  ;;  %v407_v43 = vmul.f32 %v279_v47, %v151_v3  ;;  %v535_v45 = vld [vmem:[%s4558_s2 + $0x270] sm:$0xff]  ;;  %v410_v59 = vmul.f32 %v282_v54, %v154_v52  ;;  %v538_v25 = vld [vmem:[%s4558_s2 + $0x288] sm:$0xff]  ;;  %1668 = vmatmul.mubr.f32.gmra.mrb[40].mxu0 %v3540_v51 }
  0xe6   :  { %790 = vst [vmem:[#allocation10 + $0x268] sm:$0xff] %v3890_v34  ;;  %v153_v62 = vld [vmem:[%s4557_s1 + $0x280] sm:$0xff]  ;;  %789 = vst [vmem:[#allocation10 + $0x260] sm:$0xff] %v3900_v39  ;;  %v156_v12 = vld [vmem:[%s4557_s1 + $0x298] sm:$0xff]  ;;  %1673 = vmatprep.mubr.f32.mxu0 %v3551_v57 }
  0xe7   :  { %v3911_v8 = vadd.f32 %v536_v19, %v408_v24  ;;  %v281_v13 = vld [vmem:[#allocation3 + $0x280] sm:$0xff]  ;;  %v3921_v26 = vadd.f32 %v535_v45, %v407_v43  ;;  %v284_v58 = vld [vmem:[#allocation3 + $0x298] sm:$0xff]  ;;  %v3930_v6 = vadd.f32 %v538_v25, %v410_v59  ;;  %v155_v23 = vld [vmem:[%s4557_s1 + $0x290] sm:$0xff]  ;;  %2117 = vmatmul.mubr.f32.gmra.mrb[40].mxu1 %v3540_v51 }
  0xe8   :  { %v409_v36 = vmul.f32 %v281_v13, %v153_v62  ;;  %v537_v5 = vld [vmem:[%s4558_s2 + $0x280] sm:$0xff]  ;;  %v412_v17 = vmul.f32 %v284_v58, %v156_v12  ;;  %v540_v32 = vld [vmem:[%s4558_s2 + $0x298] sm:$0xff]  ;;  %v283_v27 = vld [vmem:[#allocation3 + $0x290] sm:$0xff]  ;;  %2122 = vmatprep.mubr.f32.mxu1 %v3551_v57 }
  0xe9   :  { %792 = vst [vmem:[#allocation10 + $0x278] sm:$0xff] %v3911_v8  ;;  %791 = vst [vmem:[#allocation10 + $0x270] sm:$0xff] %v3921_v26  ;;  %v411_v29 = vmul.f32 %v283_v27, %v155_v23  ;;  %v539_v24 = vld [vmem:[%s4558_s2 + $0x290] sm:$0xff]  ;;  %v158_v19 = vld [vmem:[%s4557_s1 + $0x2a8] sm:$0xff]  ;;  %1674 = vmatmul.mubr.f32.gmra.mrb[42].mxu0 %v3561_v50 }
  0xea   :  { %v3940_v28 = vadd.f32 %v537_v5, %v409_v36  ;;  %v286_v3 = vld [vmem:[#allocation3 + $0x2a8] sm:$0xff]  ;;  %794 = vst [vmem:[#allocation10 + $0x288] sm:$0xff] %v3930_v6  ;;  %v3951_v47 = vadd.f32 %v540_v32, %v412_v17  ;;  %v157_v52 = vld [vmem:[%s4557_s1 + $0x2a0] sm:$0xff]  ;;  %v160_v62 = vld [vmem:[%s4557_s1 + $0x2b8] sm:$0xff]  ;;  %1679 = vmatprep.mubr.f32.mxu0 %v3570_v9 }
  0xeb   :  { %v414_v43 = vmul.f32 %v286_v3, %v158_v19  ;;  %v542_v45 = vld [vmem:[%s4558_s2 + $0x2a8] sm:$0xff]  ;;  %v285_v54 = vld [vmem:[#allocation3 + $0x2a0] sm:$0xff]  ;;  %v3961_v40 = vadd.f32 %v539_v24, %v411_v29  ;;  %v288_v13 = vld [vmem:[#allocation3 + $0x2b8] sm:$0xff]  ;;  %2123 = vmatmul.mubr.f32.gmra.mrb[42].mxu1 %v3561_v50 }
  0xec   :  { %793 = vst [vmem:[#allocation10 + $0x280] sm:$0xff] %v3940_v28  ;;  %v413_v59 = vmul.f32 %v285_v54, %v157_v52  ;;  %v541_v25 = vld [vmem:[%s4558_s2 + $0x2a0] sm:$0xff]  ;;  %796 = vst [vmem:[#allocation10 + $0x298] sm:$0xff] %v3951_v47  ;;  %v416_v5 = vmul.f32 %v288_v13, %v160_v62  ;;  %v544_v44 = vld [vmem:[%s4558_s2 + $0x2b8] sm:$0xff]  ;;  %2128 = vmatprep.mubr.f32.mxu1 %v3570_v9 }
  0xed   :  { %v3970_v36 = vadd.f32 %v542_v45, %v414_v43  ;;  %v159_v12 = vld [vmem:[%s4557_s1 + $0x2b0] sm:$0xff]  ;;  %795 = vst [vmem:[#allocation10 + $0x290] sm:$0xff] %v3961_v40  ;;  %v162_v27 = vld [vmem:[%s4557_s1 + $0x2c8] sm:$0xff]  ;;  %v161_v43 = vld [vmem:[%s4557_s1 + $0x2c0] sm:$0xff]  ;;  %1680 = vmatmul.mubr.f32.gmra.mrb[44].mxu0 %v3580_v14 }
  0xee   :  { %v287_v58 = vld [vmem:[#allocation3 + $0x2b0] sm:$0xff]  ;;  %v3980_v17 = vadd.f32 %v541_v25, %v413_v59  ;;  %v290_v29 = vld [vmem:[#allocation3 + $0x2c8] sm:$0xff]  ;;  %v3991_v24 = vadd.f32 %v544_v44, %v416_v5  ;;  %v289_v45 = vld [vmem:[#allocation3 + $0x2c0] sm:$0xff]  ;;  %1685 = vmatprep.mubr.f32.mxu0 %v3591_v35 }
  0xef   :  { %v415_v32 = vmul.f32 %v287_v58, %v159_v12  ;;  %v543_v23 = vld [vmem:[%s4558_s2 + $0x2b0] sm:$0xff]  ;;  %798 = vst [vmem:[#allocation10 + $0x2a8] sm:$0xff] %v3970_v36  ;;  %v418_v19 = vmul.f32 %v290_v29, %v162_v27  ;;  %v546_v3 = vld [vmem:[%s4558_s2 + $0x2c8] sm:$0xff]  ;;  %v417_v52 = vmul.f32 %v289_v45, %v161_v43  ;;  %v545_v54 = vld [vmem:[%s4558_s2 + $0x2c0] sm:$0xff]  ;;  %2129 = vmatmul.mubr.f32.gmra.mrb[44].mxu1 %v3580_v14 }
  0xf0   :  { %797 = vst [vmem:[#allocation10 + $0x2a0] sm:$0xff] %v3980_v17  ;;  %v164_v59 = vld [vmem:[%s4557_s1 + $0x2d8] sm:$0xff]  ;;  %800 = vst [vmem:[#allocation10 + $0x2b8] sm:$0xff] %v3991_v24  ;;  %v163_v5 = vld [vmem:[%s4557_s1 + $0x2d0] sm:$0xff]  ;;  %2134 = vmatprep.mubr.f32.mxu1 %v3591_v35 }
  0xf1   :  { %v4001_v51 = vadd.f32 %v543_v23, %v415_v32  ;;  %v292_v25 = vld [vmem:[#allocation3 + $0x2d8] sm:$0xff]  ;;  %v4010_v62 = vadd.f32 %v546_v3, %v418_v19  ;;  %v291_v44 = vld [vmem:[#allocation3 + $0x2d0] sm:$0xff]  ;;  %v4020_v12 = vadd.f32 %v545_v54, %v417_v52  ;;  %v166_v23 = vld [vmem:[%s4557_s1 + $0x2e8] sm:$0xff]  ;;  %1686 = vmatmul.mubr.f32.gmra.mrb[46].mxu0 %v3601_v60 }
  0xf2   :  { %v420_v13 = vmul.f32 %v292_v25, %v164_v59  ;;  %v548_v57 = vld [vmem:[%s4558_s2 + $0x2d8] sm:$0xff]  ;;  %v419_v58 = vmul.f32 %v291_v44, %v163_v5  ;;  %v547_v32 = vld [vmem:[%s4558_s2 + $0x2d0] sm:$0xff]  ;;  %v294_v27 = vld [vmem:[#allocation3 + $0x2e8] sm:$0xff]  ;;  %1691 = vmatprep.mubr.f32.mxu0 %v3610_v37 }
  0xf3   :  { %799 = vst [vmem:[#allocation10 + $0x2b0] sm:$0xff] %v4001_v51  ;;  %802 = vst [vmem:[#allocation10 + $0x2c8] sm:$0xff] %v4010_v62  ;;  %v422_v19 = vmul.f32 %v294_v27, %v166_v23  ;;  %v550_v3 = vld [vmem:[%s4558_s2 + $0x2e8] sm:$0xff]  ;;  %v165_v43 = vld [vmem:[%s4557_s1 + $0x2e0] sm:$0xff]  ;;  %2135 = vmatmul.mubr.f32.gmra.mrb[46].mxu1 %v3601_v60 }
  0xf4   :  { %v4031_v29 = vadd.f32 %v548_v57, %v420_v13  ;;  %v293_v45 = vld [vmem:[#allocation3 + $0x2e0] sm:$0xff]  ;;  %801 = vst [vmem:[#allocation10 + $0x2c0] sm:$0xff] %v4020_v12  ;;  %v4041_v50 = vadd.f32 %v547_v32, %v419_v58  ;;  %v168_v59 = vld [vmem:[%s4557_s1 + $0x2f8] sm:$0xff]  ;;  %v167_v5 = vld [vmem:[%s4557_s1 + $0x2f0] sm:$0xff]  ;;  %2140 = vmatprep.mubr.f32.mxu1 %v3610_v37 }
  0xf5   :  { %v421_v52 = vmul.f32 %v293_v45, %v165_v43  ;;  %v549_v54 = vld [vmem:[%s4558_s2 + $0x2e0] sm:$0xff]  ;;  %v296_v25 = vld [vmem:[#allocation3 + $0x2f8] sm:$0xff]  ;;  %v4050_v13 = vadd.f32 %v550_v3, %v422_v19  ;;  %v295_v44 = vld [vmem:[#allocation3 + $0x2f0] sm:$0xff]  ;;  %1692 = vmatmul.mubr.f32.gmra.mrb[48].mxu0 %v3620_v42 }
  0xf6   :  { %804 = vst [vmem:[#allocation10 + $0x2d8] sm:$0xff] %v4031_v29  ;;  %v424_v57 = vmul.f32 %v296_v25, %v168_v59  ;;  %v552_v9 = vld [vmem:[%s4558_s2 + $0x2f8] sm:$0xff]  ;;  %803 = vst [vmem:[#allocation10 + $0x2d0] sm:$0xff] %v4041_v50  ;;  %v423_v32 = vmul.f32 %v295_v44, %v167_v5  ;;  %v551_v23 = vld [vmem:[%s4558_s2 + $0x2f0] sm:$0xff]  ;;  %1697 = vmatprep.mubr.f32.mxu0 %v3631_v49 }
  0xf7   :  { %v4060_v58 = vadd.f32 %v549_v54, %v421_v52  ;;  %v170_v27 = vld [vmem:[%s4557_s1 + $0x308] sm:$0xff]  ;;  %806 = vst [vmem:[#allocation10 + $0x2e8] sm:$0xff] %v4050_v13  ;;  %v169_v52 = vld [vmem:[%s4557_s1 + $0x300] sm:$0xff]  ;;  %v556_v35 = vld [vmem:[%s4558_s2 + $0x318] sm:$0xff]  ;;  %2141 = vmatmul.mubr.f32.gmra.mrb[48].mxu1 %v3620_v42 }
  0xf8   :  { %v298_v19 = vld [vmem:[#allocation3 + $0x308] sm:$0xff]  ;;  %v4071_v3 = vadd.f32 %v552_v9, %v424_v57  ;;  %v297_v54 = vld [vmem:[#allocation3 + $0x300] sm:$0xff]  ;;  %v4081_v14 = vadd.f32 %v551_v23, %v423_v32  ;;  %v172_v57 = vld [vmem:[%s4557_s1 + $0x318] sm:$0xff]  ;;  %2146 = vmatprep.mubr.f32.mxu1 %v3631_v49 }
  0xf9   :  { %v426_v43 = vmul.f32 %v298_v19, %v170_v27  ;;  %v554_v45 = vld [vmem:[%s4558_s2 + $0x308] sm:$0xff]  ;;  %805 = vst [vmem:[#allocation10 + $0x2e0] sm:$0xff] %v4060_v58  ;;  %v425_v59 = vmul.f32 %v297_v54, %v169_v52  ;;  %v553_v25 = vld [vmem:[%s4558_s2 + $0x300] sm:$0xff]  ;;  %v300_v9 = vld [vmem:[#allocation3 + $0x318] sm:$0xff]  ;;  %1698 = vmatmul.mubr.f32.gmra.mrb[50].mxu0 %v3641_v1 }
  0xfa   :  { %808 = vst [vmem:[#allocation10 + $0x2f8] sm:$0xff] %v4071_v3  ;;  %v428_v44 = vmul.f32 %v300_v9, %v172_v57  ;;  %v171_v32 = vld [vmem:[%s4557_s1 + $0x310] sm:$0xff]  ;;  %807 = vst [vmem:[#allocation10 + $0x2f0] sm:$0xff] %v4081_v14  ;;  %v302_v52 = vld [vmem:[#allocation3 + $0x328] sm:$0xff]  ;;  %1703 = vmatprep.mubr.f32.mxu0 %v3650_v2 }
  0xfb   :  { %v4090_v5 = vadd.f32 %v554_v45, %v426_v43  ;;  %v299_v23 = vld [vmem:[#allocation3 + $0x310] sm:$0xff]  ;;  %v4100_v27 = vadd.f32 %v553_v25, %v425_v59  ;;  %v174_v45 = vld [vmem:[%s4557_s1 + $0x328] sm:$0xff]  ;;  %v173_v57 = vld [vmem:[%s4557_s1 + $0x320] sm:$0xff]  ;;  %2147 = vmatmul.mubr.f32.gmra.mrb[50].mxu1 %v3641_v1 }
  0xfc   :  { %v427_v19 = vmul.f32 %v299_v23, %v171_v32  ;;  %v555_v43 = vld [vmem:[%s4558_s2 + $0x310] sm:$0xff]  ;;  %v4111_v54 = vadd.f32 %v556_v35, %v428_v44  ;;  %v430_v59 = vmul.f32 %v302_v52, %v174_v45  ;;  %v558_v25 = vld [vmem:[%s4558_s2 + $0x328] sm:$0xff]  ;;  %v301_v9 = vld [vmem:[#allocation3 + $0x320] sm:$0xff]  ;;  %2152 = vmatprep.mubr.f32.mxu1 %v3650_v2 }
  0xfd   :  { %810 = vst [vmem:[#allocation10 + $0x308] sm:$0xff] %v4090_v5  ;;  %809 = vst [vmem:[#allocation10 + $0x300] sm:$0xff] %v4100_v27  ;;  %v429_v32 = vmul.f32 %v301_v9, %v173_v57  ;;  %v557_v44 = vld [vmem:[%s4558_s2 + $0x320] sm:$0xff]  ;;  %v176_v35 = vld [vmem:[%s4557_s1 + $0x338] sm:$0xff]  ;;  %1704 = vmatmul.mubr.f32.gmra.mrb[52].mxu0 %v3660_v10 }
  0xfe   :  { %v4121_v60 = vadd.f32 %v555_v43, %v427_v19  ;;  %v304_v23 = vld [vmem:[#allocation3 + $0x338] sm:$0xff]  ;;  %812 = vst [vmem:[#allocation10 + $0x318] sm:$0xff] %v4111_v54  ;;  %v4130_v45 = vadd.f32 %v558_v25, %v430_v59  ;;  %v175_v19 = vld [vmem:[%s4557_s1 + $0x330] sm:$0xff]  ;;  %v178_v25 = vld [vmem:[%s4557_s1 + $0x348] sm:$0xff]  ;;  %1709 = vmatprep.mubr.f32.mxu0 %v3671_v16 }
  0xff   :  { %v432_v52 = vmul.f32 %v304_v23, %v176_v35  ;;  %v560_v37 = vld [vmem:[%s4558_s2 + $0x338] sm:$0xff]  ;;  %v303_v43 = vld [vmem:[#allocation3 + $0x330] sm:$0xff]  ;;  %v4140_v57 = vadd.f32 %v557_v44, %v429_v32  ;;  %v306_v35 = vld [vmem:[#allocation3 + $0x348] sm:$0xff]  ;;  %2153 = vmatmul.mubr.f32.gmra.mrb[52].mxu1 %v3660_v10 }
 0x100   :  { %4586 = vst [vmem:[#allocation16_spill] sm:$0xff] %v4121_v60  ;;  %4587 = vst [vmem:[#allocation17_spill] sm:$0xff] %v4130_v45  ;;  %v431_v9 = vmul.f32 %v303_v43, %v175_v19  ;;  %v559_v59 = vld [vmem:[%s4558_s2 + $0x330] sm:$0xff]  ;;  %v434_v32 = vmul.f32 %v306_v35, %v178_v25  ;;  %v562_v44 = vld [vmem:[%s4558_s2 + $0x348] sm:$0xff]  ;;  %2158 = vmatprep.mubr.f32.mxu1 %v3671_v16 }
 0x101   :  { %811 = vst [vmem:[#allocation10 + $0x310] sm:$0xff] %v4121_v60  ;;  %814 = vst [vmem:[#allocation10 + $0x328] sm:$0xff] %v4130_v45  ;;  %v4151_v23 = vadd.f32 %v560_v37, %v432_v52  ;;  %v177_v19 = vld [vmem:[%s4557_s1 + $0x340] sm:$0xff]  ;;  %v180_v37 = vld [vmem:[%s4557_s1 + $0x358] sm:$0xff]  ;;  %1710 = vmatmul.mubr.f32.gmra.mrb[54].mxu0 %v3681_v18 }
 0x102   :  { %v305_v43 = vld [vmem:[#allocation3 + $0x340] sm:$0xff]  ;;  %813 = vst [vmem:[#allocation10 + $0x320] sm:$0xff] %v4140_v57  ;;  %v4161_v42 = vadd.f32 %v559_v59, %v431_v9  ;;  %v308_v25 = vld [vmem:[#allocation3 + $0x358] sm:$0xff]  ;;  %v4170_v35 = vadd.f32 %v562_v44, %v434_v32  ;;  %v179_v9 = vld [vmem:[%s4557_s1 + $0x350] sm:$0xff]  ;;  %1715 = vmatprep.mubr.f32.mxu0 %v3690_v33 }
 0x103   :  { %v433_v60 = vmul.f32 %v305_v43, %v177_v19  ;;  %v561_v52 = vld [vmem:[%s4558_s2 + $0x340] sm:$0xff]  ;;  %816 = vst [vmem:[#allocation10 + $0x338] sm:$0xff] %v4151_v23  ;;  %v436_v45 = vmul.f32 %v308_v25, %v180_v37  ;;  %v564_v49 = vld [vmem:[%s4558_s2 + $0x358] sm:$0xff]  ;;  %v307_v59 = vld [vmem:[#allocation3 + $0x350] sm:$0xff]  ;;  %2159 = vmatmul.mubr.f32.gmra.mrb[54].mxu1 %v3681_v18 }
 0x104   :  { %4588 = vst [vmem:[#allocation18_spill] sm:$0xff] %v4161_v42  ;;  %4589 = vst [vmem:[#allocation19_spill] sm:$0xff] %v4170_v35  ;;  %v435_v43 = vmul.f32 %v307_v59, %v179_v9  ;;  %v563_v32 = vld [vmem:[%s4558_s2 + $0x350] sm:$0xff]  ;;  %v182_v44 = vld [vmem:[%s4557_s1 + $0x368] sm:$0xff]  ;;  %2164 = vmatprep.mubr.f32.mxu1 %v3690_v33 }
 0x105   :  { %815 = vst [vmem:[#allocation10 + $0x330] sm:$0xff] %v4161_v42  ;;  %v4180_v19 = vadd.f32 %v561_v52, %v433_v60  ;;  %v310_v37 = vld [vmem:[#allocation3 + $0x368] sm:$0xff]  ;;  %818 = vst [vmem:[#allocation10 + $0x348] sm:$0xff] %v4170_v35  ;;  %v4191_v25 = vadd.f32 %v564_v49, %v436_v45  ;;  %v181_v9 = vld [vmem:[%s4557_s1 + $0x360] sm:$0xff]  ;;  %1716 = vmatmul.mubr.f32.gmra.mrb[56].mxu0 %v3700_v38 }
 0x106   :  { %v438_v60 = vmul.f32 %v310_v37, %v182_v44  ;;  %v566_v52 = vld [vmem:[%s4558_s2 + $0x368] sm:$0xff]  ;;  %v309_v59 = vld [vmem:[#allocation3 + $0x360] sm:$0xff]  ;;  %v4201_v1 = vadd.f32 %v563_v32, %v435_v43  ;;  %v184_v49 = vld [vmem:[%s4557_s1 + $0x378] sm:$0xff]  ;;  %1721 = vmatprep.mubr.f32.mxu0 %v3711_v48 }
 0x107   :  { %817 = vst [vmem:[#allocation10 + $0x340] sm:$0xff] %v4180_v19  ;;  %v437_v42 = vmul.f32 %v309_v59, %v181_v9  ;;  %v565_v45 = vld [vmem:[%s4558_s2 + $0x360] sm:$0xff]  ;;  %v312_v44 = vld [vmem:[#allocation3 + $0x378] sm:$0xff]  ;;  %820 = vst [vmem:[#allocation10 + $0x358] sm:$0xff] %v4191_v25  ;;  %2165 = vmatmul.mubr.f32.gmra.mrb[56].mxu1 %v3700_v38 }
 0x108   :  { %4590 = vst [vmem:[#allocation20_spill] sm:$0xff] %v4201_v1  ;;  %v4210_v37 = vadd.f32 %v566_v52, %v438_v60  ;;  %v440_v35 = vmul.f32 %v312_v44, %v184_v49  ;;  %v568_v2 = vld [vmem:[%s4558_s2 + $0x378] sm:$0xff]  ;;  %v183_v43 = vld [vmem:[%s4557_s1 + $0x370] sm:$0xff]  ;;  %819 = vst [vmem:[#allocation10 + $0x350] sm:$0xff] %v4201_v1  ;;  %2170 = vmatprep.mubr.f32.mxu1 %v3711_v48 }
 0x109   :  { %v311_v32 = vld [vmem:[#allocation3 + $0x370] sm:$0xff]  ;;  %v4220_v9 = vadd.f32 %v565_v45, %v437_v42  ;;  %v186_v52 = vld [vmem:[%s4557_s1 + $0x388] sm:$0xff]  ;;  %v572_v16 = vld [vmem:[%s4558_s2 + $0x398] sm:$0xff]  ;;  %1722 = vmatmul.mubr.f32.gmra.mrb[58].mxu0 %v3721_v11 }
 0x10a   :  { %4591 = vst [vmem:[#allocation21_spill] sm:$0xff] %v4210_v37  ;;  %v439_v59 = vmul.f32 %v311_v32, %v183_v43  ;;  %v567_v60 = vld [vmem:[%s4558_s2 + $0x370] sm:$0xff]  ;;  %v314_v49 = vld [vmem:[#allocation3 + $0x388] sm:$0xff]  ;;  %822 = vst [vmem:[#allocation10 + $0x368] sm:$0xff] %v4210_v37  ;;  %v4231_v44 = vadd.f32 %v568_v2, %v440_v35  ;;  %1727 = vmatprep.mubr.f32.mxu0 %v3730_v4 }
 0x10b   :  { %v442_v42 = vmul.f32 %v314_v49, %v186_v52  ;;  %v570_v45 = vld [vmem:[%s4558_s2 + $0x388] sm:$0xff]  ;;  %v185_v43 = vld [vmem:[%s4557_s1 + $0x380] sm:$0xff]  ;;  %821 = vst [vmem:[#allocation10 + $0x360] sm:$0xff] %v4220_v9  ;;  %v188_v2 = vld [vmem:[%s4557_s1 + $0x398] sm:$0xff]  ;;  %2171 = vmatmul.mubr.f32.gmra.mrb[58].mxu1 %v3721_v11 }
 0x10c   :  { %v313_v32 = vld [vmem:[#allocation3 + $0x380] sm:$0xff]  ;;  %v4241_v10 = vadd.f32 %v567_v60, %v439_v59  ;;  %v316_v52 = vld [vmem:[#allocation3 + $0x398] sm:$0xff]  ;;  %824 = vst [vmem:[#allocation10 + $0x378] sm:$0xff] %v4231_v44  ;;  %v187_v59 = vld [vmem:[%s4557_s1 + $0x390] sm:$0xff]  ;;  %2176 = vmatprep.mubr.f32.mxu1 %v3730_v4 }
 0x10d   :  { %v441_v1 = vmul.f32 %v313_v32, %v185_v43  ;;  %v569_v35 = vld [vmem:[%s4558_s2 + $0x380] sm:$0xff]  ;;  %v4250_v49 = vadd.f32 %v570_v45, %v442_v42  ;;  %v444_v37 = vmul.f32 %v316_v52, %v188_v2  ;;  %v315_v60 = vld [vmem:[#allocation3 + $0x390] sm:$0xff]  ;;  %v190_v45 = vld [vmem:[%s4557_s1 + $0x3a8] sm:$0xff]  ;;  %1728 = vmatmul.mubr.f32.gmra.mrb[60].mxu0 %v3740_v55 }
 0x10e   :  { %4592 = vst [vmem:[#allocation22_spill] sm:$0xff] %v4241_v10  ;;  %823 = vst [vmem:[#allocation10 + $0x370] sm:$0xff] %v4241_v10  ;;  %v443_v32 = vmul.f32 %v315_v60, %v187_v59  ;;  %v571_v42 = vld [vmem:[%s4558_s2 + $0x390] sm:$0xff]  ;;  %v318_v2 = vld [vmem:[#allocation3 + $0x3a8] sm:$0xff]  ;;  %1733 = vmatprep.mubr.f32.mxu0 %v3751_v21 }
 0x10f   :  { %4593 = vst [vmem:[#allocation23_spill] sm:$0xff] %v4250_v49  ;;  %v4260_v43 = vadd.f32 %v569_v35, %v441_v1  ;;  %826 = vst [vmem:[#allocation10 + $0x388] sm:$0xff] %v4250_v49  ;;  %v4271_v52 = vadd.f32 %v572_v16, %v444_v37  ;;  %v446_v1 = vmul.f32 %v318_v2, %v190_v45  ;;  %v574_v35 = vld [vmem:[%s4558_s2 + $0x3a8] sm:$0xff]  ;;  %v189_v59 = vld [vmem:[%s4557_s1 + $0x3a0] sm:$0xff]  ;;  %2177 = vmatmul.mubr.f32.gmra.mrb[60].mxu1 %v3740_v55 }
 0x110   :  { %v317_v60 = vld [vmem:[#allocation3 + $0x3a0] sm:$0xff]  ;;  %v4281_v18 = vadd.f32 %v571_v42, %v443_v32  ;;  %v192_v16 = vld [vmem:[%s4557_s1 + $0x3b8] sm:$0xff]  ;;  %v191_v32 = vld [vmem:[%s4557_s1 + $0x3b0] sm:$0xff]  ;;  %2182 = vmatprep.mubr.f32.mxu1 %v3751_v21 }
 0x111   :  { %825 = vst [vmem:[#allocation10 + $0x380] sm:$0xff] %v4260_v43  ;;  %v445_v10 = vmul.f32 %v317_v60, %v189_v59  ;;  %v573_v37 = vld [vmem:[%s4558_s2 + $0x3a0] sm:$0xff]  ;;  %v320_v45 = vld [vmem:[#allocation3 + $0x3b8] sm:$0xff]  ;;  %828 = vst [vmem:[#allocation10 + $0x398] sm:$0xff] %v4271_v52  ;;  %v4290_v2 = vadd.f32 %v574_v35, %v446_v1  ;;  %1734 = vmatmul.mubr.f32.gmra.mrb[62].mxu0 %v3761_v41 }
 0x112   :  { %4594 = vst [vmem:[#allocation24_spill] sm:$0xff] %v4281_v18  ;;  %v448_v49 = vmul.f32 %v320_v45, %v192_v16  ;;  %v576_v33 = vld [vmem:[%s4558_s2 + $0x3b8] sm:$0xff]  ;;  %v319_v42 = vld [vmem:[#allocation3 + $0x3b0] sm:$0xff]  ;;  %827 = vst [vmem:[#allocation10 + $0x390] sm:$0xff] %v4281_v18  ;;  %1739 = vmatprep.mubr.f32.mxu0 %v3770_v15 }
 0x113   :  { %4595 = vst [vmem:[#allocation25_spill] sm:$0xff] %v4290_v2  ;;  %v4300_v59 = vadd.f32 %v573_v37, %v445_v10  ;;  %v447_v60 = vmul.f32 %v319_v42, %v191_v32  ;;  %v575_v1 = vld [vmem:[%s4558_s2 + $0x3b0] sm:$0xff]  ;;  %v194_v35 = vld [vmem:[%s4557_s1 + $0x3c8] sm:$0xff]  ;;  %830 = vst [vmem:[#allocation10 + $0x3a8] sm:$0xff] %v4290_v2  ;;  %2183 = vmatmul.mubr.f32.gmra.mrb[62].mxu1 %v3761_v41 }
 0x114   :  { %v322_v16 = vld [vmem:[#allocation3 + $0x3c8] sm:$0xff]  ;;  %v4311_v45 = vadd.f32 %v576_v33, %v448_v49  ;;  %v193_v32 = vld [vmem:[%s4557_s1 + $0x3c0] sm:$0xff]  ;;  %v196_v33 = vld [vmem:[%s4557_s1 + $0x3d8] sm:$0xff]  ;;  %2188 = vmatprep.mubr.f32.mxu1 %v3770_v15 }
 0x115   :  { %v450_v10 = vmul.f32 %v322_v16, %v194_v35  ;;  %v578_v37 = vld [vmem:[%s4558_s2 + $0x3c8] sm:$0xff]  ;;  %v321_v42 = vld [vmem:[#allocation3 + $0x3c0] sm:$0xff]  ;;  %829 = vst [vmem:[#allocation10 + $0x3a0] sm:$0xff] %v4300_v59  ;;  %v4321_v38 = vadd.f32 %v575_v1, %v447_v60  ;;  %v324_v35 = vld [vmem:[#allocation3 + $0x3d8] sm:$0xff]  ;;  %1740 = vmatmul.mubr.f32.gmra.mrb[64].mxu0 %v3780_v46 }
 0x116   :  { %v449_v18 = vmul.f32 %v321_v42, %v193_v32  ;;  %v577_v49 = vld [vmem:[%s4558_s2 + $0x3c0] sm:$0xff]  ;;  %832 = vst [vmem:[#allocation10 + $0x3b8] sm:$0xff] %v4311_v45  ;;  %v452_v2 = vmul.f32 %v324_v35, %v196_v33  ;;  %v580_v48 = vld [vmem:[%s4558_s2 + $0x3d8] sm:$0xff]  ;;  %v195_v60 = vld [vmem:[%s4557_s1 + $0x3d0] sm:$0xff]  ;;  %1745 = vmatprep.mubr.f32.mxu0 %v3791_v56 }
 0x117   :  { %4596 = vst [vmem:[#allocation26_spill] sm:$0xff] %v4321_v38  ;;  %v4330_v16 = vadd.f32 %v578_v37, %v450_v10  ;;  %v323_v1 = vld [vmem:[#allocation3 + $0x3d0] sm:$0xff]  ;;  %831 = vst [vmem:[#allocation10 + $0x3b0] sm:$0xff] %v4321_v38  ;;  %v198_v37 = vld [vmem:[%s4557_s1 + $0x3e8] sm:$0xff]  ;;  %2189 = vmatmul.mubr.f32.gmra.mrb[64].mxu1 %v3780_v46 }
 0x118   :  { %v4340_v32 = vadd.f32 %v577_v49, %v449_v18  ;;  %v451_v42 = vmul.f32 %v323_v1, %v195_v60  ;;  %v579_v10 = vld [vmem:[%s4558_s2 + $0x3d0] sm:$0xff]  ;;  %v326_v33 = vld [vmem:[#allocation3 + $0x3e8] sm:$0xff]  ;;  %v4351_v35 = vadd.f32 %v580_v48, %v452_v2  ;;  %v197_v60 = vld [vmem:[%s4557_s1 + $0x3e0] sm:$0xff]  ;;  %2194 = vmatprep.mubr.f32.mxu1 %v3791_v56 }
 0x119   :  { %834 = vst [vmem:[#allocation10 + $0x3c8] sm:$0xff] %v4330_v16  ;;  %v454_v18 = vmul.f32 %v326_v33, %v198_v37  ;;  %v582_v49 = vld [vmem:[%s4558_s2 + $0x3e8] sm:$0xff]  ;;  %v325_v1 = vld [vmem:[#allocation3 + $0x3e0] sm:$0xff]  ;;  %v200_v37 = vld [vmem:[%s4557_s1 + $0x3f8] sm:$0xff]  ;;  %1746 = vmatmul.mubr.f32.gmra.mrb[66].mxu0 %v3801_v20 }
 0x11a   :  { %833 = vst [vmem:[#allocation10 + $0x3c0] sm:$0xff] %v4340_v32  ;;  %v4361_v11 = vadd.f32 %v579_v10, %v451_v42  ;;  %v453_v38 = vmul.f32 %v325_v1, %v197_v60  ;;  %v581_v2 = vld [vmem:[%s4558_s2 + $0x3e0] sm:$0xff]  ;;  %836 = vst [vmem:[#allocation10 + $0x3d8] sm:$0xff] %v4351_v35  ;;  %v328_v33 = vld [vmem:[#allocation3 + $0x3f8] sm:$0xff]  ;;  %1751 = vmatprep.mubr.f32.mxu0 %v3810_v0 }
 0x11b   :  { %v4367_v48 = vadd.f32 %v582_v49, %v454_v18  ;;  %v456_v42 = vmul.f32 %v328_v33, %v200_v37  ;;  %v199_v10 = vld [vmem:[%s4557_s1 + $0x3f0] sm:$0xff]  ;;  %v584_v18 = vld [vmem:[%s4558_s2 + $0x3f8] sm:$0xff]  ;;  %2195 = vmatmul.mubr.f32.gmra.mrb[66].mxu1 %v3801_v20  ;;  %v4597_v21 = vld [vmem:[#allocation16_spill] sm:$0xff] }
 0x11c   :  { %835 = vst [vmem:[#allocation10 + $0x3d0] sm:$0xff] %v4361_v11  ;;  %v4374_v4 = vadd.f32 %v581_v2, %v453_v38  ;;  %v327_v60 = vld [vmem:[#allocation3 + $0x3f0] sm:$0xff]  ;;  %2200 = vmatprep.mubr.f32.mxu1 %v3810_v0  ;;  %v4598_v41 = vld [vmem:[#allocation17_spill] sm:$0xff]  ;;  %v4600_v46 = vld [vmem:[#allocation19_spill] sm:$0xff] }
 0x11d   :  { %838 = vst [vmem:[#allocation10 + $0x3e8] sm:$0xff] %v4367_v48  ;;  %v455_v49 = vmul.f32 %v327_v60, %v199_v10  ;;  %v4387_v38 = vadd.f32 %v584_v18, %v456_v42  ;;  %v583_v1 = vld [vmem:[%s4558_s2 + $0x3f0] sm:$0xff]  ;;  %1752 = vmatmul.mubr.f32.gmra.mrb[68].mxu0 %v3820_v22  ;;  %s2933_s2 = smov [#allocation10]  }
 0x11e   :  { %837 = vst [vmem:[#allocation10 + $0x3e0] sm:$0xff] %v4374_v4  ;;  %1757 = vmatprep.mubr.f32.mxu0 %v3831_v31  ;;  %v4599_v15 = vld [vmem:[#allocation18_spill] sm:$0xff]  ;;  %s2654_s23 = sshll.u32 %s2933_s2, 4  ;;  %s2655_s23 = int_to_ptr.vmem [resolvable:$true] %s2654_s23 }
 0x11f   :  { %v4392_v55 = vadd.f32 %v583_v1, %v455_v49  ;;  %840 = vst [vmem:[#allocation10 + $0x3f8] sm:$0xff] %v4387_v38  ;;  %2201 = vmatmul.mubr.f32.gmra.mrb[68].mxu1 %v3820_v22  ;;  %v4601_v22 = vld [vmem:[#allocation20_spill] sm:$0xff]  ;;  %s2874_s24 = scalar_lea.vmem %s2655_s23, 16384  ;;  %p2879_p11 = scmp.lt.s32.totalorder %s2655_s23, %s2655_s23 }
 0x120   :  { %2206 = vmatprep.mubr.f32.mxu1 %v3831_v31  ;;  %p2875_p10 = scmp.ne.s32.totalorder %s2655_s23, %s2874_s24  ;;  %p2880_p12 = scmp.lt.s32.totalorder %s2874_s24, %s2874_s24 }
 0x121   :  { %839 = vst [vmem:[#allocation10 + $0x3f0] sm:$0xff] %v4392_v55  ;;  %1758 = vmatmul.mubr.f32.gmra.mrb[70].mxu0 %v3841_v63 }
 0x122   :  { %1763 = vmatprep.mubr.f32.mxu0 %v3850_v53  ;;  %p2881_p13 = por %p2880_p12, %p2879_p11 }
 0x123   :  { %2207 = vmatmul.mubr.f32.gmra.mrb[70].mxu1 %v3841_v63  ;;  %v4602_v63 = vld [vmem:[#allocation21_spill] sm:$0xff] }
 0x124   :  { %2212 = vmatprep.mubr.f32.mxu1 %v3850_v53  ;;  %p2882_p0 = pnand %p2881_p13, %p2875_p10 }
 0x125   :  { %1764 = vmatmul.mubr.f32.gmra.mrb[72].mxu0 %v3860_v61 }
 0x126   :  { %1769 = vmatprep.mubr.f32.mxu0 %v3871_v7 }
 0x127   :  { %2213 = vmatmul.mubr.f32.gmra.mrb[72].mxu1 %v3860_v61 }
 0x128   :  { %2218 = vmatprep.mubr.f32.mxu1 %v3871_v7 }
 0x129   :  { %1770 = vmatmul.mubr.f32.gmra.mrb[74].mxu0 %v3881_v30 }
 0x12a   :  { %1775 = vmatprep.mubr.f32.mxu0 %v3890_v34 }
 0x12b   :  { %2219 = vmatmul.mubr.f32.gmra.mrb[74].mxu1 %v3881_v30 }
 0x12c   :  { %2224 = vmatprep.mubr.f32.mxu1 %v3890_v34 }
 0x12d   :  { %1776 = vmatmul.mubr.f32.gmra.mrb[76].mxu0 %v3900_v39 }
 0x12e   :  { %1781 = vmatprep.mubr.f32.mxu0 %v3911_v8 }
 0x12f   :  { %2225 = vmatmul.mubr.f32.gmra.mrb[76].mxu1 %v3900_v39 }
 0x130   :  { %2230 = vmatprep.mubr.f32.mxu1 %v3911_v8 }
 0x131   :  { %1782 = vmatmul.mubr.f32.gmra.mrb[78].mxu0 %v3921_v26 }
 0x132   :  { %1787 = vmatprep.mubr.f32.mxu0 %v3930_v6 }
 0x133   :  { %2231 = vmatmul.mubr.f32.gmra.mrb[78].mxu1 %v3921_v26  ;;  %v4603_v26 = vld [vmem:[#allocation22_spill] sm:$0xff] }
 0x134   :  { %2236 = vmatprep.mubr.f32.mxu1 %v3930_v6 }
 0x135   :  { %1788 = vmatmul.mubr.f32.gmra.mrb[80].mxu0 %v3940_v28 }
 0x136   :  { %1793 = vmatprep.mubr.f32.mxu0 %v3951_v47 }
 0x137   :  { %2237 = vmatmul.mubr.f32.gmra.mrb[80].mxu1 %v3940_v28  ;;  %v4604_v28 = vld [vmem:[#allocation23_spill] sm:$0xff] }
 0x138   :  { %2242 = vmatprep.mubr.f32.mxu1 %v3951_v47 }
 0x139   :  { %1794 = vmatmul.mubr.f32.gmra.mrb[82].mxu0 %v3961_v40 }
 0x13a   :  { %1799 = vmatprep.mubr.f32.mxu0 %v3970_v36 }
 0x13b   :  { %2243 = vmatmul.mubr.f32.gmra.mrb[82].mxu1 %v3961_v40 }
 0x13c   :  { %2248 = vmatprep.mubr.f32.mxu1 %v3970_v36 }
 0x13d   :  { %1800 = vmatmul.mubr.f32.gmra.mrb[84].mxu0 %v3980_v17 }
 0x13e   :  { %1805 = vmatprep.mubr.f32.mxu0 %v3991_v24 }
 0x13f   :  { %2249 = vmatmul.mubr.f32.gmra.mrb[84].mxu1 %v3980_v17 }
 0x140   :  { %2254 = vmatprep.mubr.f32.mxu1 %v3991_v24 }
 0x141   :  { %1806 = vmatmul.mubr.f32.gmra.mrb[86].mxu0 %v4001_v51 }
 0x142   :  { %1811 = vmatprep.mubr.f32.mxu0 %v4010_v62 }
 0x143   :  { %2255 = vmatmul.mubr.f32.gmra.mrb[86].mxu1 %v4001_v51 }
 0x144   :  { %2260 = vmatprep.mubr.f32.mxu1 %v4010_v62 }
 0x145   :  { %1812 = vmatmul.mubr.f32.gmra.mrb[88].mxu0 %v4020_v12 }
 0x146   :  { %1817 = vmatprep.mubr.f32.mxu0 %v4031_v29 }
 0x147   :  { %2261 = vmatmul.mubr.f32.gmra.mrb[88].mxu1 %v4020_v12  ;;  %v4605_v12 = vld [vmem:[#allocation24_spill] sm:$0xff] }
 0x148   :  { %2266 = vmatprep.mubr.f32.mxu1 %v4031_v29 }
 0x149   :  { %1818 = vmatmul.mubr.f32.gmra.mrb[90].mxu0 %v4041_v50 }
 0x14a   :  { %1823 = vmatprep.mubr.f32.mxu0 %v4050_v13 }
 0x14b   :  { %2267 = vmatmul.mubr.f32.gmra.mrb[90].mxu1 %v4041_v50  ;;  %v4606_v50 = vld [vmem:[#allocation25_spill] sm:$0xff] }
 0x14c   :  { %2272 = vmatprep.mubr.f32.mxu1 %v4050_v13 }
 0x14d   :  { %1824 = vmatmul.mubr.f32.gmra.mrb[92].mxu0 %v4060_v58 }
 0x14e   :  { %1829 = vmatprep.mubr.f32.mxu0 %v4071_v3 }
 0x14f   :  { %2273 = vmatmul.mubr.f32.gmra.mrb[92].mxu1 %v4060_v58 }
 0x150   :  { %2278 = vmatprep.mubr.f32.mxu1 %v4071_v3 }
 0x151   :  { %1830 = vmatmul.mubr.f32.gmra.mrb[94].mxu0 %v4081_v14 }
 0x152   :  { %1835 = vmatprep.mubr.f32.mxu0 %v4090_v5 }
 0x153   :  { %2279 = vmatmul.mubr.f32.gmra.mrb[94].mxu1 %v4081_v14 }
 0x154   :  { %2284 = vmatprep.mubr.f32.mxu1 %v4090_v5 }
 0x155   :  { %1836 = vmatmul.mubr.f32.gmra.mrb[96].mxu0 %v4100_v27 }
 0x156   :  { %1841 = vmatprep.mubr.f32.mxu0 %v4111_v54 }
 0x157   :  { %2285 = vmatmul.mubr.f32.gmra.mrb[96].mxu1 %v4100_v27 }
 0x158   :  { %2290 = vmatprep.mubr.f32.mxu1 %v4111_v54 }
 0x159   :  { %1842 = vmatmul.mubr.f32.gmra.mrb[98].mxu0 %v4597_v21 }
 0x15a   :  { %1847 = vmatprep.mubr.f32.mxu0 %v4598_v41 }
 0x15b   :  { %2291 = vmatmul.mubr.f32.gmra.mrb[98].mxu1 %v4597_v21 }
 0x15c   :  { %2296 = vmatprep.mubr.f32.mxu1 %v4598_v41 }
 0x15d   :  { %1848 = vmatmul.mubr.f32.gmra.mrb[100].mxu0 %v4140_v57 }
 0x15e   :  { %1853 = vmatprep.mubr.f32.mxu0 %v4151_v23 }
 0x15f   :  { %2297 = vmatmul.mubr.f32.gmra.mrb[100].mxu1 %v4140_v57  ;;  %v4607_v57 = vld [vmem:[#allocation26_spill] sm:$0xff] }
 0x160   :  { %2302 = vmatprep.mubr.f32.mxu1 %v4151_v23 }
 0x161   :  { %1854 = vmatmul.mubr.f32.gmra.mrb[102].mxu0 %v4599_v15 }
 0x162   :  { %1859 = vmatprep.mubr.f32.mxu0 %v4600_v46 }
 0x163   :  { %2303 = vmatmul.mubr.f32.gmra.mrb[102].mxu1 %v4599_v15 }
 0x164   :  { %2308 = vmatprep.mubr.f32.mxu1 %v4600_v46 }
 0x165   :  { %1860 = vmatmul.mubr.f32.gmra.mrb[104].mxu0 %v4180_v19 }
 0x166   :  { %1865 = vmatprep.mubr.f32.mxu0 %v4191_v25 }
 0x167   :  { %2309 = vmatmul.mubr.f32.gmra.mrb[104].mxu1 %v4180_v19 }
 0x168   :  { %2314 = vmatprep.mubr.f32.mxu1 %v4191_v25  ;;  %v1549_v56 = vpop.f32.mrb[0].mxu0 }
 0x169   :  { %2381 = vst [vmem:[#allocation9] sm:$0xff] %v1549_v56  ;;  %v1551_v0 = vpop.f32.mrb[1].mxu0  ;;  %1866 = vmatmul.mubr.f32.gmra.mrb[106].mxu0 %v4601_v22 }
 0x16a   :  { %v1998_v20 = vpop.f32.mrb[0].mxu1  ;;  %2382 = vst [vmem:[#allocation9 + $0x8] sm:$0xff] %v1551_v0  ;;  %1871 = vmatprep.mubr.f32.mxu0 %v4602_v63 }
 0x16b   :  { %2383 = vst [vmem:[#allocation9 + $0x10] sm:$0xff] %v1998_v20  ;;  %v2000_v31 = vpop.f32.mrb[1].mxu1  ;;  %2315 = vmatmul.mubr.f32.gmra.mrb[106].mxu1 %v4601_v22 }
 0x16c   :  { %2384 = vst [vmem:[#allocation9 + $0x18] sm:$0xff] %v2000_v31  ;;  %2320 = vmatprep.mubr.f32.mxu1 %v4602_v63  ;;  %v1555_v53 = vpop.f32.mrb[2].mxu0 }
 0x16d   :  { %2385 = vst [vmem:[#allocation9 + $0x20] sm:$0xff] %v1555_v53  ;;  %v1557_v7 = vpop.f32.mrb[3].mxu0  ;;  %1872 = vmatmul.mubr.f32.gmra.mrb[108].mxu0 %v4220_v9 }
 0x16e   :  { %v2004_v61 = vpop.f32.mrb[2].mxu1  ;;  %2386 = vst [vmem:[#allocation9 + $0x28] sm:$0xff] %v1557_v7  ;;  %1877 = vmatprep.mubr.f32.mxu0 %v4231_v44 }
 0x16f   :  { %2387 = vst [vmem:[#allocation9 + $0x30] sm:$0xff] %v2004_v61  ;;  %v2006_v30 = vpop.f32.mrb[3].mxu1  ;;  %2321 = vmatmul.mubr.f32.gmra.mrb[108].mxu1 %v4220_v9 }
 0x170   :  { %2388 = vst [vmem:[#allocation9 + $0x38] sm:$0xff] %v2006_v30  ;;  %2326 = vmatprep.mubr.f32.mxu1 %v4231_v44  ;;  %v1561_v34 = vpop.f32.mrb[4].mxu0 }
 0x171   :  { %2389 = vst [vmem:[#allocation9 + $0x40] sm:$0xff] %v1561_v34  ;;  %v1563_v8 = vpop.f32.mrb[5].mxu0  ;;  %1878 = vmatmul.mubr.f32.gmra.mrb[110].mxu0 %v4603_v26 }
 0x172   :  { %v2010_v39 = vpop.f32.mrb[4].mxu1  ;;  %2390 = vst [vmem:[#allocation9 + $0x48] sm:$0xff] %v1563_v8  ;;  %1883 = vmatprep.mubr.f32.mxu0 %v4604_v28 }
 0x173   :  { %2391 = vst [vmem:[#allocation9 + $0x50] sm:$0xff] %v2010_v39  ;;  %v2012_v6 = vpop.f32.mrb[5].mxu1  ;;  %2327 = vmatmul.mubr.f32.gmra.mrb[110].mxu1 %v4603_v26 }
 0x174   :  { %2392 = vst [vmem:[#allocation9 + $0x58] sm:$0xff] %v2012_v6  ;;  %2332 = vmatprep.mubr.f32.mxu1 %v4604_v28  ;;  %v1567_v47 = vpop.f32.mrb[6].mxu0 }
 0x175   :  { %2393 = vst [vmem:[#allocation9 + $0x60] sm:$0xff] %v1567_v47  ;;  %v1569_v36 = vpop.f32.mrb[7].mxu0  ;;  %1884 = vmatmul.mubr.f32.gmra.mrb[112].mxu0 %v4260_v43 }
 0x176   :  { %v2016_v40 = vpop.f32.mrb[6].mxu1  ;;  %2394 = vst [vmem:[#allocation9 + $0x68] sm:$0xff] %v1569_v36  ;;  %1889 = vmatprep.mubr.f32.mxu0 %v4271_v52 }
 0x177   :  { %2395 = vst [vmem:[#allocation9 + $0x70] sm:$0xff] %v2016_v40  ;;  %v2018_v17 = vpop.f32.mrb[7].mxu1  ;;  %2333 = vmatmul.mubr.f32.gmra.mrb[112].mxu1 %v4260_v43 }
 0x178   :  { %2396 = vst [vmem:[#allocation9 + $0x78] sm:$0xff] %v2018_v17  ;;  %2338 = vmatprep.mubr.f32.mxu1 %v4271_v52  ;;  %v1573_v24 = vpop.f32.mrb[8].mxu0 }
 0x179   :  { %2397 = vst [vmem:[#allocation9 + $0x80] sm:$0xff] %v1573_v24  ;;  %v1575_v62 = vpop.f32.mrb[9].mxu0  ;;  %1890 = vmatmul.mubr.f32.gmra.mrb[114].mxu0 %v4605_v12 }
 0x17a   :  { %v2022_v51 = vpop.f32.mrb[8].mxu1  ;;  %2398 = vst [vmem:[#allocation9 + $0x88] sm:$0xff] %v1575_v62  ;;  %1895 = vmatprep.mubr.f32.mxu0 %v4606_v50 }
 0x17b   :  { %2399 = vst [vmem:[#allocation9 + $0x90] sm:$0xff] %v2022_v51  ;;  %v2024_v29 = vpop.f32.mrb[9].mxu1  ;;  %2339 = vmatmul.mubr.f32.gmra.mrb[114].mxu1 %v4605_v12 }
 0x17c   :  { %2400 = vst [vmem:[#allocation9 + $0x98] sm:$0xff] %v2024_v29  ;;  %2344 = vmatprep.mubr.f32.mxu1 %v4606_v50  ;;  %v1579_v13 = vpop.f32.mrb[10].mxu0 }
 0x17d   :  { %2401 = vst [vmem:[#allocation9 + $0xa0] sm:$0xff] %v1579_v13  ;;  %v1581_v3 = vpop.f32.mrb[11].mxu0  ;;  %1896 = vmatmul.mubr.f32.gmra.mrb[116].mxu0 %v4300_v59 }
 0x17e   :  { %v2028_v58 = vpop.f32.mrb[10].mxu1  ;;  %2402 = vst [vmem:[#allocation9 + $0xa8] sm:$0xff] %v1581_v3  ;;  %1901 = vmatprep.mubr.f32.mxu0 %v4311_v45 }
 0x17f   :  { %2403 = vst [vmem:[#allocation9 + $0xb0] sm:$0xff] %v2028_v58  ;;  %v2030_v14 = vpop.f32.mrb[11].mxu1  ;;  %2345 = vmatmul.mubr.f32.gmra.mrb[116].mxu1 %v4300_v59 }
 0x180   :  { %2404 = vst [vmem:[#allocation9 + $0xb8] sm:$0xff] %v2030_v14  ;;  %2350 = vmatprep.mubr.f32.mxu1 %v4311_v45  ;;  %v1585_v5 = vpop.f32.mrb[12].mxu0 }
 0x181   :  { %2405 = vst [vmem:[#allocation9 + $0xc0] sm:$0xff] %v1585_v5  ;;  %v1587_v54 = vpop.f32.mrb[13].mxu0  ;;  %1902 = vmatmul.mubr.f32.gmra.mrb[118].mxu0 %v4607_v57 }
 0x182   :  { %v2034_v27 = vpop.f32.mrb[12].mxu1  ;;  %2406 = vst [vmem:[#allocation9 + $0xc8] sm:$0xff] %v1587_v54  ;;  %1907 = vmatprep.mubr.f32.mxu0 %v4330_v16 }
 0x183   :  { %2407 = vst [vmem:[#allocation9 + $0xd0] sm:$0xff] %v2034_v27  ;;  %v2036_v23 = vpop.f32.mrb[13].mxu1  ;;  %2351 = vmatmul.mubr.f32.gmra.mrb[118].mxu1 %v4607_v57 }
 0x184   :  { %2408 = vst [vmem:[#allocation9 + $0xd8] sm:$0xff] %v2036_v23  ;;  %2356 = vmatprep.mubr.f32.mxu1 %v4330_v16  ;;  %v1591_v19 = vpop.f32.mrb[14].mxu0 }
 0x185   :  { %2409 = vst [vmem:[#allocation9 + $0xe0] sm:$0xff] %v1591_v19  ;;  %v1593_v9 = vpop.f32.mrb[15].mxu0  ;;  %1908 = vmatmul.mubr.f32.gmra.mrb[120].mxu0 %v4340_v32 }
 0x186   :  { %v2040_v25 = vpop.f32.mrb[14].mxu1  ;;  %2410 = vst [vmem:[#allocation9 + $0xe8] sm:$0xff] %v1593_v9  ;;  %1913 = vmatprep.mubr.f32.mxu0 %v4351_v35 }
 0x187   :  { %2411 = vst [vmem:[#allocation9 + $0xf0] sm:$0xff] %v2040_v25  ;;  %v2042_v44 = vpop.f32.mrb[15].mxu1  ;;  %2357 = vmatmul.mubr.f32.gmra.mrb[120].mxu1 %v4340_v32 }
 0x188   :  { %2412 = vst [vmem:[#allocation9 + $0xf8] sm:$0xff] %v2042_v44  ;;  %2362 = vmatprep.mubr.f32.mxu1 %v4351_v35  ;;  %v1597_v43 = vpop.f32.mrb[16].mxu0 }
 0x189   :  { %2413 = vst [vmem:[#allocation9 + $0x100] sm:$0xff] %v1597_v43  ;;  %v1599_v59 = vpop.f32.mrb[17].mxu0  ;;  %1914 = vmatmul.mubr.f32.gmra.mrb[122].mxu0 %v4361_v11 }
 0x18a   :  { %v2046_v52 = vpop.f32.mrb[16].mxu1  ;;  %2414 = vst [vmem:[#allocation9 + $0x108] sm:$0xff] %v1599_v59  ;;  %1919 = vmatprep.mubr.f32.mxu0 %v4367_v48 }
 0x18b   :  { %2415 = vst [vmem:[#allocation9 + $0x110] sm:$0xff] %v2046_v52  ;;  %v2048_v45 = vpop.f32.mrb[17].mxu1  ;;  %2363 = vmatmul.mubr.f32.gmra.mrb[122].mxu1 %v4361_v11 }
 0x18c   :  { %2416 = vst [vmem:[#allocation9 + $0x118] sm:$0xff] %v2048_v45  ;;  %2368 = vmatprep.mubr.f32.mxu1 %v4367_v48  ;;  %v1603_v16 = vpop.f32.mrb[18].mxu0 }
 0x18d   :  { %2417 = vst [vmem:[#allocation9 + $0x120] sm:$0xff] %v1603_v16  ;;  %v1605_v35 = vpop.f32.mrb[19].mxu0  ;;  %1920 = vmatmul.mubr.f32.gmra.mrb[124].mxu0 %v4374_v4 }
 0x18e   :  { %v2052_v32 = vpop.f32.mrb[18].mxu1  ;;  %2418 = vst [vmem:[#allocation9 + $0x128] sm:$0xff] %v1605_v35  ;;  %1925 = vmatprep.mubr.f32.mxu0 %v4387_v38 }
 0x18f   :  { %2419 = vst [vmem:[#allocation9 + $0x130] sm:$0xff] %v2052_v32  ;;  %v2054_v2 = vpop.f32.mrb[19].mxu1  ;;  %2369 = vmatmul.mubr.f32.gmra.mrb[124].mxu1 %v4374_v4 }
 0x190   :  { %2420 = vst [vmem:[#allocation9 + $0x138] sm:$0xff] %v2054_v2  ;;  %2374 = vmatprep.mubr.f32.mxu1 %v4387_v38  ;;  %v1609_v11 = vpop.f32.mrb[20].mxu0 }
 0x191   :  { %2421 = vst [vmem:[#allocation9 + $0x140] sm:$0xff] %v1609_v11  ;;  %v1611_v48 = vpop.f32.mrb[21].mxu0  ;;  %1926 = vmatmul.mubr.f32.gmra.mrb[126].mxu0 %v4392_v55 }
 0x192   :  { %v2058_v37 = vpop.f32.mrb[20].mxu1  ;;  %2422 = vst [vmem:[#allocation9 + $0x148] sm:$0xff] %v1611_v48 }
 0x193   :  { %2423 = vst [vmem:[#allocation9 + $0x150] sm:$0xff] %v2058_v37  ;;  %v2060_v33 = vpop.f32.mrb[21].mxu1  ;;  %2375 = vmatmul.mubr.f32.gmra.mrb[126].mxu1 %v4392_v55 }
 0x194   :  { %2424 = vst [vmem:[#allocation9 + $0x158] sm:$0xff] %v2060_v33  ;;  %v1615_v42 = vpop.f32.mrb[22].mxu0 }
 0x195   :  { %2425 = vst [vmem:[#allocation9 + $0x160] sm:$0xff] %v1615_v42  ;;  %v1617_v10 = vpop.f32.mrb[23].mxu0 }
 0x196   :  { %v2064_v4 = vpop.f32.mrb[22].mxu1  ;;  %2426 = vst [vmem:[#allocation9 + $0x168] sm:$0xff] %v1617_v10 }
 0x197   :  { %2427 = vst [vmem:[#allocation9 + $0x170] sm:$0xff] %v2064_v4  ;;  %v2066_v60 = vpop.f32.mrb[23].mxu1 }
 0x198   :  { %2428 = vst [vmem:[#allocation9 + $0x178] sm:$0xff] %v2066_v60  ;;  %v1621_v18 = vpop.f32.mrb[24].mxu0 }
 0x199   :  { %2429 = vst [vmem:[#allocation9 + $0x180] sm:$0xff] %v1621_v18  ;;  %v1623_v38 = vpop.f32.mrb[25].mxu0 }
 0x19a   :  { %v2070_v49 = vpop.f32.mrb[24].mxu1  ;;  %2430 = vst [vmem:[#allocation9 + $0x188] sm:$0xff] %v1623_v38 }
 0x19b   :  { %2431 = vst [vmem:[#allocation9 + $0x190] sm:$0xff] %v2070_v49  ;;  %v2072_v1 = vpop.f32.mrb[25].mxu1 }
 0x19c   :  { %2432 = vst [vmem:[#allocation9 + $0x198] sm:$0xff] %v2072_v1  ;;  %v1627_v21 = vpop.f32.mrb[26].mxu0 }
 0x19d   :  { %2433 = vst [vmem:[#allocation9 + $0x1a0] sm:$0xff] %v1627_v21  ;;  %v1629_v41 = vpop.f32.mrb[27].mxu0 }
 0x19e   :  { %v2076_v55 = vpop.f32.mrb[26].mxu1  ;;  %2434 = vst [vmem:[#allocation9 + $0x1a8] sm:$0xff] %v1629_v41 }
 0x19f   :  { %2435 = vst [vmem:[#allocation9 + $0x1b0] sm:$0xff] %v2076_v55  ;;  %v2078_v15 = vpop.f32.mrb[27].mxu1 }
 0x1a0   :  { %2436 = vst [vmem:[#allocation9 + $0x1b8] sm:$0xff] %v2078_v15  ;;  %v1633_v46 = vpop.f32.mrb[28].mxu0 }
 0x1a1   :  { %2437 = vst [vmem:[#allocation9 + $0x1c0] sm:$0xff] %v1633_v46  ;;  %v1635_v20 = vpop.f32.mrb[29].mxu0 }
 0x1a2   :  { %v2082_v56 = vpop.f32.mrb[28].mxu1  ;;  %2438 = vst [vmem:[#allocation9 + $0x1c8] sm:$0xff] %v1635_v20 }
 0x1a3   :  { %2439 = vst [vmem:[#allocation9 + $0x1d0] sm:$0xff] %v2082_v56  ;;  %v2084_v0 = vpop.f32.mrb[29].mxu1 }
 0x1a4   :  { %2440 = vst [vmem:[#allocation9 + $0x1d8] sm:$0xff] %v2084_v0  ;;  %v1639_v22 = vpop.f32.mrb[30].mxu0 }
 0x1a5   :  { %2441 = vst [vmem:[#allocation9 + $0x1e0] sm:$0xff] %v1639_v22  ;;  %v1641_v63 = vpop.f32.mrb[31].mxu0 }
 0x1a6   :  { %v2088_v31 = vpop.f32.mrb[30].mxu1  ;;  %2442 = vst [vmem:[#allocation9 + $0x1e8] sm:$0xff] %v1641_v63 }
 0x1a7   :  { %2443 = vst [vmem:[#allocation9 + $0x1f0] sm:$0xff] %v2088_v31  ;;  %v2090_v53 = vpop.f32.mrb[31].mxu1 }
 0x1a8   :  { %2444 = vst [vmem:[#allocation9 + $0x1f8] sm:$0xff] %v2090_v53  ;;  %v1645_v61 = vpop.f32.mrb[32].mxu0 }
 0x1a9   :  { %2445 = vst [vmem:[#allocation9 + $0x200] sm:$0xff] %v1645_v61  ;;  %v1647_v30 = vpop.f32.mrb[33].mxu0 }
 0x1aa   :  { %v2094_v7 = vpop.f32.mrb[32].mxu1  ;;  %2446 = vst [vmem:[#allocation9 + $0x208] sm:$0xff] %v1647_v30 }
 0x1ab   :  { %2447 = vst [vmem:[#allocation9 + $0x210] sm:$0xff] %v2094_v7  ;;  %v2096_v34 = vpop.f32.mrb[33].mxu1 }
 0x1ac   :  { %2448 = vst [vmem:[#allocation9 + $0x218] sm:$0xff] %v2096_v34  ;;  %v1651_v39 = vpop.f32.mrb[34].mxu0 }
 0x1ad   :  { %2449 = vst [vmem:[#allocation9 + $0x220] sm:$0xff] %v1651_v39  ;;  %v1653_v26 = vpop.f32.mrb[35].mxu0 }
 0x1ae   :  { %v2100_v8 = vpop.f32.mrb[34].mxu1  ;;  %2450 = vst [vmem:[#allocation9 + $0x228] sm:$0xff] %v1653_v26 }
 0x1af   :  { %2451 = vst [vmem:[#allocation9 + $0x230] sm:$0xff] %v2100_v8  ;;  %v2102_v6 = vpop.f32.mrb[35].mxu1 }
 0x1b0   :  { %2452 = vst [vmem:[#allocation9 + $0x238] sm:$0xff] %v2102_v6  ;;  %v1657_v28 = vpop.f32.mrb[36].mxu0 }
 0x1b1   :  { %2453 = vst [vmem:[#allocation9 + $0x240] sm:$0xff] %v1657_v28  ;;  %v1659_v40 = vpop.f32.mrb[37].mxu0 }
 0x1b2   :  { %v2106_v47 = vpop.f32.mrb[36].mxu1  ;;  %2454 = vst [vmem:[#allocation9 + $0x248] sm:$0xff] %v1659_v40 }
 0x1b3   :  { %2455 = vst [vmem:[#allocation9 + $0x250] sm:$0xff] %v2106_v47  ;;  %v2108_v36 = vpop.f32.mrb[37].mxu1 }
 0x1b4   :  { %2456 = vst [vmem:[#allocation9 + $0x258] sm:$0xff] %v2108_v36  ;;  %v1663_v17 = vpop.f32.mrb[38].mxu0 }
 0x1b5   :  { %2457 = vst [vmem:[#allocation9 + $0x260] sm:$0xff] %v1663_v17  ;;  %v1665_v51 = vpop.f32.mrb[39].mxu0 }
 0x1b6   :  { %v2112_v24 = vpop.f32.mrb[38].mxu1  ;;  %2458 = vst [vmem:[#allocation9 + $0x268] sm:$0xff] %v1665_v51 }
 0x1b7   :  { %2459 = vst [vmem:[#allocation9 + $0x270] sm:$0xff] %v2112_v24  ;;  %v2114_v62 = vpop.f32.mrb[39].mxu1 }
 0x1b8   :  { %2460 = vst [vmem:[#allocation9 + $0x278] sm:$0xff] %v2114_v62  ;;  %v1669_v12 = vpop.f32.mrb[40].mxu0 }
 0x1b9   :  { %2461 = vst [vmem:[#allocation9 + $0x280] sm:$0xff] %v1669_v12  ;;  %v1671_v50 = vpop.f32.mrb[41].mxu0 }
 0x1ba   :  { %v2118_v29 = vpop.f32.mrb[40].mxu1  ;;  %2462 = vst [vmem:[#allocation9 + $0x288] sm:$0xff] %v1671_v50 }
 0x1bb   :  { %2463 = vst [vmem:[#allocation9 + $0x290] sm:$0xff] %v2118_v29  ;;  %v2120_v13 = vpop.f32.mrb[41].mxu1 }
 0x1bc   :  { %2464 = vst [vmem:[#allocation9 + $0x298] sm:$0xff] %v2120_v13  ;;  %v1675_v58 = vpop.f32.mrb[42].mxu0 }
 0x1bd   :  { %2465 = vst [vmem:[#allocation9 + $0x2a0] sm:$0xff] %v1675_v58  ;;  %v1677_v14 = vpop.f32.mrb[43].mxu0 }
 0x1be   :  { %v2124_v3 = vpop.f32.mrb[42].mxu1  ;;  %2466 = vst [vmem:[#allocation9 + $0x2a8] sm:$0xff] %v1677_v14 }
 0x1bf   :  { %2467 = vst [vmem:[#allocation9 + $0x2b0] sm:$0xff] %v2124_v3  ;;  %v2126_v5 = vpop.f32.mrb[43].mxu1 }
 0x1c0   :  { %2468 = vst [vmem:[#allocation9 + $0x2b8] sm:$0xff] %v2126_v5  ;;  %v1681_v27 = vpop.f32.mrb[44].mxu0 }
 0x1c1   :  { %2469 = vst [vmem:[#allocation9 + $0x2c0] sm:$0xff] %v1681_v27  ;;  %v1683_v57 = vpop.f32.mrb[45].mxu0 }
 0x1c2   :  { %v2130_v54 = vpop.f32.mrb[44].mxu1  ;;  %2470 = vst [vmem:[#allocation9 + $0x2c8] sm:$0xff] %v1683_v57 }
 0x1c3   :  { %2471 = vst [vmem:[#allocation9 + $0x2d0] sm:$0xff] %v2130_v54  ;;  %v2132_v23 = vpop.f32.mrb[45].mxu1 }
 0x1c4   :  { %2472 = vst [vmem:[#allocation9 + $0x2d8] sm:$0xff] %v2132_v23  ;;  %v1687_v19 = vpop.f32.mrb[46].mxu0 }
 0x1c5   :  { %2473 = vst [vmem:[#allocation9 + $0x2e0] sm:$0xff] %v1687_v19  ;;  %v1689_v9 = vpop.f32.mrb[47].mxu0 }
 0x1c6   :  { %v2136_v25 = vpop.f32.mrb[46].mxu1  ;;  %2474 = vst [vmem:[#allocation9 + $0x2e8] sm:$0xff] %v1689_v9 }
 0x1c7   :  { %2475 = vst [vmem:[#allocation9 + $0x2f0] sm:$0xff] %v2136_v25  ;;  %v2138_v44 = vpop.f32.mrb[47].mxu1 }
 0x1c8   :  { %2476 = vst [vmem:[#allocation9 + $0x2f8] sm:$0xff] %v2138_v44  ;;  %v1693_v43 = vpop.f32.mrb[48].mxu0 }
 0x1c9   :  { %2477 = vst [vmem:[#allocation9 + $0x300] sm:$0xff] %v1693_v43  ;;  %v1695_v59 = vpop.f32.mrb[49].mxu0 }
 0x1ca   :  { %v2142_v52 = vpop.f32.mrb[48].mxu1  ;;  %2478 = vst [vmem:[#allocation9 + $0x308] sm:$0xff] %v1695_v59 }
 0x1cb   :  { %2479 = vst [vmem:[#allocation9 + $0x310] sm:$0xff] %v2142_v52  ;;  %v2144_v45 = vpop.f32.mrb[49].mxu1 }
 0x1cc   :  { %2480 = vst [vmem:[#allocation9 + $0x318] sm:$0xff] %v2144_v45  ;;  %v1699_v16 = vpop.f32.mrb[50].mxu0 }
 0x1cd   :  { %2481 = vst [vmem:[#allocation9 + $0x320] sm:$0xff] %v1699_v16  ;;  %v1701_v35 = vpop.f32.mrb[51].mxu0 }
 0x1ce   :  { %v2148_v32 = vpop.f32.mrb[50].mxu1  ;;  %2482 = vst [vmem:[#allocation9 + $0x328] sm:$0xff] %v1701_v35 }
 0x1cf   :  { %2483 = vst [vmem:[#allocation9 + $0x330] sm:$0xff] %v2148_v32  ;;  %v2150_v2 = vpop.f32.mrb[51].mxu1 }
 0x1d0   :  { %2484 = vst [vmem:[#allocation9 + $0x338] sm:$0xff] %v2150_v2  ;;  %v1705_v11 = vpop.f32.mrb[52].mxu0 }
 0x1d1   :  { %2485 = vst [vmem:[#allocation9 + $0x340] sm:$0xff] %v1705_v11  ;;  %v1707_v48 = vpop.f32.mrb[53].mxu0 }
 0x1d2   :  { %v2154_v37 = vpop.f32.mrb[52].mxu1  ;;  %2486 = vst [vmem:[#allocation9 + $0x348] sm:$0xff] %v1707_v48 }
 0x1d3   :  { %2487 = vst [vmem:[#allocation9 + $0x350] sm:$0xff] %v2154_v37  ;;  %v2156_v33 = vpop.f32.mrb[53].mxu1 }
 0x1d4   :  { %2488 = vst [vmem:[#allocation9 + $0x358] sm:$0xff] %v2156_v33  ;;  %v1711_v42 = vpop.f32.mrb[54].mxu0 }
 0x1d5   :  { %2489 = vst [vmem:[#allocation9 + $0x360] sm:$0xff] %v1711_v42  ;;  %v1713_v10 = vpop.f32.mrb[55].mxu0 }
 0x1d6   :  { %v2160_v4 = vpop.f32.mrb[54].mxu1  ;;  %2490 = vst [vmem:[#allocation9 + $0x368] sm:$0xff] %v1713_v10 }
 0x1d7   :  { %2491 = vst [vmem:[#allocation9 + $0x370] sm:$0xff] %v2160_v4  ;;  %v2162_v60 = vpop.f32.mrb[55].mxu1 }
 0x1d8   :  { %2492 = vst [vmem:[#allocation9 + $0x378] sm:$0xff] %v2162_v60  ;;  %v1717_v18 = vpop.f32.mrb[56].mxu0 }
 0x1d9   :  { %2493 = vst [vmem:[#allocation9 + $0x380] sm:$0xff] %v1717_v18  ;;  %v1719_v38 = vpop.f32.mrb[57].mxu0 }
 0x1da   :  { %v2166_v49 = vpop.f32.mrb[56].mxu1  ;;  %2494 = vst [vmem:[#allocation9 + $0x388] sm:$0xff] %v1719_v38 }
 0x1db   :  { %2495 = vst [vmem:[#allocation9 + $0x390] sm:$0xff] %v2166_v49  ;;  %v2168_v1 = vpop.f32.mrb[57].mxu1 }
 0x1dc   :  { %2496 = vst [vmem:[#allocation9 + $0x398] sm:$0xff] %v2168_v1  ;;  %v1723_v21 = vpop.f32.mrb[58].mxu0 }
 0x1dd   :  { %2497 = vst [vmem:[#allocation9 + $0x3a0] sm:$0xff] %v1723_v21  ;;  %v1725_v41 = vpop.f32.mrb[59].mxu0 }
 0x1de   :  { %v2172_v55 = vpop.f32.mrb[58].mxu1  ;;  %2498 = vst [vmem:[#allocation9 + $0x3a8] sm:$0xff] %v1725_v41 }
 0x1df   :  { %2499 = vst [vmem:[#allocation9 + $0x3b0] sm:$0xff] %v2172_v55  ;;  %v2174_v15 = vpop.f32.mrb[59].mxu1 }
 0x1e0   :  { %2500 = vst [vmem:[#allocation9 + $0x3b8] sm:$0xff] %v2174_v15  ;;  %v1729_v46 = vpop.f32.mrb[60].mxu0 }
 0x1e1   :  { %2501 = vst [vmem:[#allocation9 + $0x3c0] sm:$0xff] %v1729_v46  ;;  %v1731_v20 = vpop.f32.mrb[61].mxu0 }
 0x1e2   :  { %v2178_v56 = vpop.f32.mrb[60].mxu1  ;;  %2502 = vst [vmem:[#allocation9 + $0x3c8] sm:$0xff] %v1731_v20 }
 0x1e3   :  { %2503 = vst [vmem:[#allocation9 + $0x3d0] sm:$0xff] %v2178_v56  ;;  %v2180_v0 = vpop.f32.mrb[61].mxu1 }
 0x1e4   :  { %2504 = vst [vmem:[#allocation9 + $0x3d8] sm:$0xff] %v2180_v0  ;;  %v1735_v22 = vpop.f32.mrb[62].mxu0 }
 0x1e5   :  { %2505 = vst [vmem:[#allocation9 + $0x3e0] sm:$0xff] %v1735_v22  ;;  %v1737_v63 = vpop.f32.mrb[63].mxu0 }
 0x1e6   :  { %v2184_v31 = vpop.f32.mrb[62].mxu1  ;;  %2506 = vst [vmem:[#allocation9 + $0x3e8] sm:$0xff] %v1737_v63 }
 0x1e7   :  { %2507 = vst [vmem:[#allocation9 + $0x3f0] sm:$0xff] %v2184_v31  ;;  %v2186_v53 = vpop.f32.mrb[63].mxu1 }
 0x1e8   :  { %2508 = vst [vmem:[#allocation9 + $0x3f8] sm:$0xff] %v2186_v53  ;;  %v1741_v61 = vpop.f32.mrb[64].mxu0 }
 0x1e9   :  { %2885 = shalt.err (!%p2882_p0)
}
 0x1ea   :  { %s2886_s28 = scalar_lea.hbm %s4563_s7, 16384 }
 0x1eb   :  { %p2887_p1 = scmp.ne.s32.totalorder %s4563_s7, %s2886_s28  ;;  %p2890_p2 = scmp.lt.u32.totalorder %s2886_s28, %s4563_s7 }
 0x1ed   :  { %p2892_p3 = pnand %p2890_p2, %p2887_p1 }
 0x1ef   :  { %2895 = shalt.err (!%p2892_p3)
}
 0x1f0   :  { %2660 = dma.vmem_to_hbm [thread:$0]  %s2655_s23, 16384, %s4563_s7, [#allocation11], %s2930_s4, %s2930_s4, %s2931_s25   ;;  %2509 = vst [vmem:[#allocation9 + $0x400] sm:$0xff] %v1741_v61  ;;  %v2190_v7 = vpop.f32.mrb[64].mxu1  ;;  %v1743_v30 = vpop.f32.mrb[65].mxu0 }
 0x1f1   :  { %2511 = vst [vmem:[#allocation9 + $0x410] sm:$0xff] %v2190_v7  ;;  %2510 = vst [vmem:[#allocation9 + $0x408] sm:$0xff] %v1743_v30  ;;  %v2192_v34 = vpop.f32.mrb[65].mxu1  ;;  %v1747_v39 = vpop.f32.mrb[66].mxu0  ;;  %s2934_s7 = smov [#allocation9]  }
 0x1f2   :  { %2512 = vst [vmem:[#allocation9 + $0x418] sm:$0xff] %v2192_v34  ;;  %2513 = vst [vmem:[#allocation9 + $0x420] sm:$0xff] %v1747_v39  ;;  %v2196_v8 = vpop.f32.mrb[66].mxu1  ;;  %v1749_v26 = vpop.f32.mrb[67].mxu0  ;;  %s2642_s4 = sshll.u32 %s2934_s7, 4  ;;  %s2643_s4 = int_to_ptr.vmem [resolvable:$true] %s2642_s4 }
 0x1f3   :  { %2515 = vst [vmem:[#allocation9 + $0x430] sm:$0xff] %v2196_v8  ;;  %2514 = vst [vmem:[#allocation9 + $0x428] sm:$0xff] %v1749_v26  ;;  %v2198_v6 = vpop.f32.mrb[67].mxu1  ;;  %v1753_v28 = vpop.f32.mrb[68].mxu0  ;;  %s2896_s25 = scalar_lea.vmem %s2643_s4, 32768  ;;  %p2901_p5 = scmp.lt.s32.totalorder %s2643_s4, %s2643_s4 }
 0x1f4   :  { %2516 = vst [vmem:[#allocation9 + $0x438] sm:$0xff] %v2198_v6  ;;  %2517 = vst [vmem:[#allocation9 + $0x440] sm:$0xff] %v1753_v28  ;;  %v2202_v47 = vpop.f32.mrb[68].mxu1  ;;  %v1755_v40 = vpop.f32.mrb[69].mxu0  ;;  %p2897_p4 = scmp.ne.s32.totalorder %s2643_s4, %s2896_s25  ;;  %p2902_p6 = scmp.lt.s32.totalorder %s2896_s25, %s2896_s25 }
 0x1f5   :  { %2519 = vst [vmem:[#allocation9 + $0x450] sm:$0xff] %v2202_v47  ;;  %2518 = vst [vmem:[#allocation9 + $0x448] sm:$0xff] %v1755_v40  ;;  %v2204_v36 = vpop.f32.mrb[69].mxu1  ;;  %v1759_v17 = vpop.f32.mrb[70].mxu0 }
 0x1f6   :  { %2520 = vst [vmem:[#allocation9 + $0x458] sm:$0xff] %v2204_v36  ;;  %2521 = vst [vmem:[#allocation9 + $0x460] sm:$0xff] %v1759_v17  ;;  %v2208_v24 = vpop.f32.mrb[70].mxu1  ;;  %v1761_v51 = vpop.f32.mrb[71].mxu0  ;;  %p2903_p7 = por %p2902_p6, %p2901_p5 }
 0x1f7   :  { %2523 = vst [vmem:[#allocation9 + $0x470] sm:$0xff] %v2208_v24  ;;  %2522 = vst [vmem:[#allocation9 + $0x468] sm:$0xff] %v1761_v51  ;;  %v2210_v62 = vpop.f32.mrb[71].mxu1 }
 0x1f8   :  { %2524 = vst [vmem:[#allocation9 + $0x478] sm:$0xff] %v2210_v62  ;;  %v1765_v12 = vpop.f32.mrb[72].mxu0  ;;  %p2904_p8 = pnand %p2903_p7, %p2897_p4 }
 0x1f9   :  { %2525 = vst [vmem:[#allocation9 + $0x480] sm:$0xff] %v1765_v12  ;;  %v1767_v50 = vpop.f32.mrb[73].mxu0 }
 0x1fa   :  { %v2214_v29 = vpop.f32.mrb[72].mxu1  ;;  %2526 = vst [vmem:[#allocation9 + $0x488] sm:$0xff] %v1767_v50 }
 0x1fb   :  { %2527 = vst [vmem:[#allocation9 + $0x490] sm:$0xff] %v2214_v29  ;;  %v2216_v13 = vpop.f32.mrb[73].mxu1 }
 0x1fc   :  { %2528 = vst [vmem:[#allocation9 + $0x498] sm:$0xff] %v2216_v13  ;;  %v1771_v58 = vpop.f32.mrb[74].mxu0 }
 0x1fd   :  { %2529 = vst [vmem:[#allocation9 + $0x4a0] sm:$0xff] %v1771_v58  ;;  %v1773_v14 = vpop.f32.mrb[75].mxu0 }
 0x1fe   :  { %v2220_v3 = vpop.f32.mrb[74].mxu1  ;;  %2530 = vst [vmem:[#allocation9 + $0x4a8] sm:$0xff] %v1773_v14 }
 0x1ff   :  { %2531 = vst [vmem:[#allocation9 + $0x4b0] sm:$0xff] %v2220_v3  ;;  %v2222_v5 = vpop.f32.mrb[75].mxu1 }
 0x200   :  { %2532 = vst [vmem:[#allocation9 + $0x4b8] sm:$0xff] %v2222_v5  ;;  %v1777_v27 = vpop.f32.mrb[76].mxu0 }
 0x201   :  { %2533 = vst [vmem:[#allocation9 + $0x4c0] sm:$0xff] %v1777_v27  ;;  %v1779_v57 = vpop.f32.mrb[77].mxu0 }
 0x202   :  { %v2226_v54 = vpop.f32.mrb[76].mxu1  ;;  %2534 = vst [vmem:[#allocation9 + $0x4c8] sm:$0xff] %v1779_v57 }
 0x203   :  { %2535 = vst [vmem:[#allocation9 + $0x4d0] sm:$0xff] %v2226_v54  ;;  %v2228_v23 = vpop.f32.mrb[77].mxu1 }
 0x204   :  { %2536 = vst [vmem:[#allocation9 + $0x4d8] sm:$0xff] %v2228_v23  ;;  %v1783_v19 = vpop.f32.mrb[78].mxu0 }
 0x205   :  { %2537 = vst [vmem:[#allocation9 + $0x4e0] sm:$0xff] %v1783_v19  ;;  %v1785_v9 = vpop.f32.mrb[79].mxu0 }
 0x206   :  { %v2232_v25 = vpop.f32.mrb[78].mxu1  ;;  %2538 = vst [vmem:[#allocation9 + $0x4e8] sm:$0xff] %v1785_v9 }
 0x207   :  { %2539 = vst [vmem:[#allocation9 + $0x4f0] sm:$0xff] %v2232_v25  ;;  %v2234_v44 = vpop.f32.mrb[79].mxu1 }
 0x208   :  { %2540 = vst [vmem:[#allocation9 + $0x4f8] sm:$0xff] %v2234_v44  ;;  %v1789_v43 = vpop.f32.mrb[80].mxu0 }
 0x209   :  { %2541 = vst [vmem:[#allocation9 + $0x500] sm:$0xff] %v1789_v43  ;;  %v1791_v59 = vpop.f32.mrb[81].mxu0 }
 0x20a   :  { %v2238_v52 = vpop.f32.mrb[80].mxu1  ;;  %2542 = vst [vmem:[#allocation9 + $0x508] sm:$0xff] %v1791_v59 }
 0x20b   :  { %2543 = vst [vmem:[#allocation9 + $0x510] sm:$0xff] %v2238_v52  ;;  %v2240_v45 = vpop.f32.mrb[81].mxu1 }
 0x20c   :  { %2544 = vst [vmem:[#allocation9 + $0x518] sm:$0xff] %v2240_v45  ;;  %v1795_v16 = vpop.f32.mrb[82].mxu0 }
 0x20d   :  { %2545 = vst [vmem:[#allocation9 + $0x520] sm:$0xff] %v1795_v16  ;;  %v1797_v35 = vpop.f32.mrb[83].mxu0 }
 0x20e   :  { %v2244_v32 = vpop.f32.mrb[82].mxu1  ;;  %2546 = vst [vmem:[#allocation9 + $0x528] sm:$0xff] %v1797_v35 }
 0x20f   :  { %2547 = vst [vmem:[#allocation9 + $0x530] sm:$0xff] %v2244_v32  ;;  %v2246_v2 = vpop.f32.mrb[83].mxu1 }
 0x210   :  { %2548 = vst [vmem:[#allocation9 + $0x538] sm:$0xff] %v2246_v2  ;;  %v1801_v11 = vpop.f32.mrb[84].mxu0 }
 0x211   :  { %2549 = vst [vmem:[#allocation9 + $0x540] sm:$0xff] %v1801_v11  ;;  %v1803_v48 = vpop.f32.mrb[85].mxu0 }
 0x212   :  { %v2250_v37 = vpop.f32.mrb[84].mxu1  ;;  %2550 = vst [vmem:[#allocation9 + $0x548] sm:$0xff] %v1803_v48 }
 0x213   :  { %2551 = vst [vmem:[#allocation9 + $0x550] sm:$0xff] %v2250_v37  ;;  %v2252_v33 = vpop.f32.mrb[85].mxu1 }
 0x214   :  { %2552 = vst [vmem:[#allocation9 + $0x558] sm:$0xff] %v2252_v33  ;;  %v1807_v42 = vpop.f32.mrb[86].mxu0 }
 0x215   :  { %2553 = vst [vmem:[#allocation9 + $0x560] sm:$0xff] %v1807_v42  ;;  %v1809_v10 = vpop.f32.mrb[87].mxu0 }
 0x216   :  { %v2256_v4 = vpop.f32.mrb[86].mxu1  ;;  %2554 = vst [vmem:[#allocation9 + $0x568] sm:$0xff] %v1809_v10 }
 0x217   :  { %2555 = vst [vmem:[#allocation9 + $0x570] sm:$0xff] %v2256_v4  ;;  %v2258_v60 = vpop.f32.mrb[87].mxu1 }
 0x218   :  { %2556 = vst [vmem:[#allocation9 + $0x578] sm:$0xff] %v2258_v60  ;;  %v1813_v18 = vpop.f32.mrb[88].mxu0 }
 0x219   :  { %2557 = vst [vmem:[#allocation9 + $0x580] sm:$0xff] %v1813_v18  ;;  %v1815_v38 = vpop.f32.mrb[89].mxu0 }
 0x21a   :  { %v2262_v49 = vpop.f32.mrb[88].mxu1  ;;  %2558 = vst [vmem:[#allocation9 + $0x588] sm:$0xff] %v1815_v38 }
 0x21b   :  { %2559 = vst [vmem:[#allocation9 + $0x590] sm:$0xff] %v2262_v49  ;;  %v2264_v1 = vpop.f32.mrb[89].mxu1 }
 0x21c   :  { %2560 = vst [vmem:[#allocation9 + $0x598] sm:$0xff] %v2264_v1  ;;  %v1819_v21 = vpop.f32.mrb[90].mxu0 }
 0x21d   :  { %2561 = vst [vmem:[#allocation9 + $0x5a0] sm:$0xff] %v1819_v21  ;;  %v1821_v41 = vpop.f32.mrb[91].mxu0 }
 0x21e   :  { %v2268_v55 = vpop.f32.mrb[90].mxu1  ;;  %2562 = vst [vmem:[#allocation9 + $0x5a8] sm:$0xff] %v1821_v41 }
 0x21f   :  { %2563 = vst [vmem:[#allocation9 + $0x5b0] sm:$0xff] %v2268_v55  ;;  %v2270_v15 = vpop.f32.mrb[91].mxu1 }
 0x220   :  { %2564 = vst [vmem:[#allocation9 + $0x5b8] sm:$0xff] %v2270_v15  ;;  %v1825_v46 = vpop.f32.mrb[92].mxu0 }
 0x221   :  { %2565 = vst [vmem:[#allocation9 + $0x5c0] sm:$0xff] %v1825_v46  ;;  %v1827_v20 = vpop.f32.mrb[93].mxu0 }
 0x222   :  { %v2274_v56 = vpop.f32.mrb[92].mxu1  ;;  %2566 = vst [vmem:[#allocation9 + $0x5c8] sm:$0xff] %v1827_v20 }
 0x223   :  { %2567 = vst [vmem:[#allocation9 + $0x5d0] sm:$0xff] %v2274_v56  ;;  %v2276_v0 = vpop.f32.mrb[93].mxu1 }
 0x224   :  { %2568 = vst [vmem:[#allocation9 + $0x5d8] sm:$0xff] %v2276_v0  ;;  %v1831_v22 = vpop.f32.mrb[94].mxu0 }
 0x225   :  { %2569 = vst [vmem:[#allocation9 + $0x5e0] sm:$0xff] %v1831_v22  ;;  %v1833_v63 = vpop.f32.mrb[95].mxu0 }
 0x226   :  { %v2280_v31 = vpop.f32.mrb[94].mxu1  ;;  %2570 = vst [vmem:[#allocation9 + $0x5e8] sm:$0xff] %v1833_v63 }
 0x227   :  { %2571 = vst [vmem:[#allocation9 + $0x5f0] sm:$0xff] %v2280_v31  ;;  %v2282_v53 = vpop.f32.mrb[95].mxu1 }
 0x228   :  { %2572 = vst [vmem:[#allocation9 + $0x5f8] sm:$0xff] %v2282_v53  ;;  %v1837_v61 = vpop.f32.mrb[96].mxu0 }
 0x229   :  { %2573 = vst [vmem:[#allocation9 + $0x600] sm:$0xff] %v1837_v61  ;;  %v1839_v30 = vpop.f32.mrb[97].mxu0 }
 0x22a   :  { %v2286_v7 = vpop.f32.mrb[96].mxu1  ;;  %2574 = vst [vmem:[#allocation9 + $0x608] sm:$0xff] %v1839_v30 }
 0x22b   :  { %2575 = vst [vmem:[#allocation9 + $0x610] sm:$0xff] %v2286_v7  ;;  %v2288_v34 = vpop.f32.mrb[97].mxu1 }
 0x22c   :  { %2576 = vst [vmem:[#allocation9 + $0x618] sm:$0xff] %v2288_v34  ;;  %v1843_v39 = vpop.f32.mrb[98].mxu0 }
 0x22d   :  { %2577 = vst [vmem:[#allocation9 + $0x620] sm:$0xff] %v1843_v39  ;;  %v1845_v26 = vpop.f32.mrb[99].mxu0 }
 0x22e   :  { %v2292_v8 = vpop.f32.mrb[98].mxu1  ;;  %2578 = vst [vmem:[#allocation9 + $0x628] sm:$0xff] %v1845_v26 }
 0x22f   :  { %2579 = vst [vmem:[#allocation9 + $0x630] sm:$0xff] %v2292_v8  ;;  %v2294_v6 = vpop.f32.mrb[99].mxu1 }
 0x230   :  { %2580 = vst [vmem:[#allocation9 + $0x638] sm:$0xff] %v2294_v6  ;;  %v1849_v28 = vpop.f32.mrb[100].mxu0 }
 0x231   :  { %2581 = vst [vmem:[#allocation9 + $0x640] sm:$0xff] %v1849_v28  ;;  %v1851_v40 = vpop.f32.mrb[101].mxu0 }
 0x232   :  { %v2298_v47 = vpop.f32.mrb[100].mxu1  ;;  %2582 = vst [vmem:[#allocation9 + $0x648] sm:$0xff] %v1851_v40 }
 0x233   :  { %2583 = vst [vmem:[#allocation9 + $0x650] sm:$0xff] %v2298_v47  ;;  %v2300_v36 = vpop.f32.mrb[101].mxu1 }
 0x234   :  { %2584 = vst [vmem:[#allocation9 + $0x658] sm:$0xff] %v2300_v36  ;;  %v1855_v17 = vpop.f32.mrb[102].mxu0 }
 0x235   :  { %2585 = vst [vmem:[#allocation9 + $0x660] sm:$0xff] %v1855_v17  ;;  %v1857_v51 = vpop.f32.mrb[103].mxu0 }
 0x236   :  { %v2304_v24 = vpop.f32.mrb[102].mxu1  ;;  %2586 = vst [vmem:[#allocation9 + $0x668] sm:$0xff] %v1857_v51 }
 0x237   :  { %2587 = vst [vmem:[#allocation9 + $0x670] sm:$0xff] %v2304_v24  ;;  %v2306_v62 = vpop.f32.mrb[103].mxu1 }
 0x238   :  { %2588 = vst [vmem:[#allocation9 + $0x678] sm:$0xff] %v2306_v62  ;;  %v1861_v12 = vpop.f32.mrb[104].mxu0 }
 0x239   :  { %2589 = vst [vmem:[#allocation9 + $0x680] sm:$0xff] %v1861_v12  ;;  %v1863_v50 = vpop.f32.mrb[105].mxu0 }
 0x23a   :  { %v2310_v29 = vpop.f32.mrb[104].mxu1  ;;  %2590 = vst [vmem:[#allocation9 + $0x688] sm:$0xff] %v1863_v50 }
 0x23b   :  { %2591 = vst [vmem:[#allocation9 + $0x690] sm:$0xff] %v2310_v29  ;;  %v2312_v13 = vpop.f32.mrb[105].mxu1 }
 0x23c   :  { %2592 = vst [vmem:[#allocation9 + $0x698] sm:$0xff] %v2312_v13  ;;  %v1867_v58 = vpop.f32.mrb[106].mxu0 }
 0x23d   :  { %2593 = vst [vmem:[#allocation9 + $0x6a0] sm:$0xff] %v1867_v58  ;;  %v1869_v14 = vpop.f32.mrb[107].mxu0 }
 0x23e   :  { %v2316_v3 = vpop.f32.mrb[106].mxu1  ;;  %2594 = vst [vmem:[#allocation9 + $0x6a8] sm:$0xff] %v1869_v14 }
 0x23f   :  { %2595 = vst [vmem:[#allocation9 + $0x6b0] sm:$0xff] %v2316_v3  ;;  %v2318_v5 = vpop.f32.mrb[107].mxu1 }
 0x240   :  { %2596 = vst [vmem:[#allocation9 + $0x6b8] sm:$0xff] %v2318_v5  ;;  %v1873_v27 = vpop.f32.mrb[108].mxu0 }
 0x241   :  { %2597 = vst [vmem:[#allocation9 + $0x6c0] sm:$0xff] %v1873_v27  ;;  %v1875_v57 = vpop.f32.mrb[109].mxu0 }
 0x242   :  { %v2322_v54 = vpop.f32.mrb[108].mxu1  ;;  %2598 = vst [vmem:[#allocation9 + $0x6c8] sm:$0xff] %v1875_v57 }
 0x243   :  { %2599 = vst [vmem:[#allocation9 + $0x6d0] sm:$0xff] %v2322_v54  ;;  %v2324_v23 = vpop.f32.mrb[109].mxu1 }
 0x244   :  { %2600 = vst [vmem:[#allocation9 + $0x6d8] sm:$0xff] %v2324_v23  ;;  %v1879_v19 = vpop.f32.mrb[110].mxu0 }
 0x245   :  { %2601 = vst [vmem:[#allocation9 + $0x6e0] sm:$0xff] %v1879_v19  ;;  %v1881_v9 = vpop.f32.mrb[111].mxu0 }
 0x246   :  { %v2328_v25 = vpop.f32.mrb[110].mxu1  ;;  %2602 = vst [vmem:[#allocation9 + $0x6e8] sm:$0xff] %v1881_v9 }
 0x247   :  { %2603 = vst [vmem:[#allocation9 + $0x6f0] sm:$0xff] %v2328_v25  ;;  %v2330_v44 = vpop.f32.mrb[111].mxu1 }
 0x248   :  { %2604 = vst [vmem:[#allocation9 + $0x6f8] sm:$0xff] %v2330_v44  ;;  %v1885_v43 = vpop.f32.mrb[112].mxu0 }
 0x249   :  { %2605 = vst [vmem:[#allocation9 + $0x700] sm:$0xff] %v1885_v43  ;;  %v1887_v59 = vpop.f32.mrb[113].mxu0 }
 0x24a   :  { %v2334_v52 = vpop.f32.mrb[112].mxu1  ;;  %2606 = vst [vmem:[#allocation9 + $0x708] sm:$0xff] %v1887_v59 }
 0x24b   :  { %2607 = vst [vmem:[#allocation9 + $0x710] sm:$0xff] %v2334_v52  ;;  %v2336_v45 = vpop.f32.mrb[113].mxu1 }
 0x24c   :  { %2608 = vst [vmem:[#allocation9 + $0x718] sm:$0xff] %v2336_v45  ;;  %v1891_v16 = vpop.f32.mrb[114].mxu0 }
 0x24d   :  { %2609 = vst [vmem:[#allocation9 + $0x720] sm:$0xff] %v1891_v16  ;;  %v1893_v35 = vpop.f32.mrb[115].mxu0 }
 0x24e   :  { %v2340_v32 = vpop.f32.mrb[114].mxu1  ;;  %2610 = vst [vmem:[#allocation9 + $0x728] sm:$0xff] %v1893_v35 }
 0x24f   :  { %2611 = vst [vmem:[#allocation9 + $0x730] sm:$0xff] %v2340_v32  ;;  %v2342_v2 = vpop.f32.mrb[115].mxu1 }
 0x250   :  { %2612 = vst [vmem:[#allocation9 + $0x738] sm:$0xff] %v2342_v2  ;;  %v1897_v11 = vpop.f32.mrb[116].mxu0 }
 0x251   :  { %2613 = vst [vmem:[#allocation9 + $0x740] sm:$0xff] %v1897_v11  ;;  %v1899_v48 = vpop.f32.mrb[117].mxu0 }
 0x252   :  { %v2346_v37 = vpop.f32.mrb[116].mxu1  ;;  %2614 = vst [vmem:[#allocation9 + $0x748] sm:$0xff] %v1899_v48 }
 0x253   :  { %2615 = vst [vmem:[#allocation9 + $0x750] sm:$0xff] %v2346_v37  ;;  %v2348_v33 = vpop.f32.mrb[117].mxu1 }
 0x254   :  { %2616 = vst [vmem:[#allocation9 + $0x758] sm:$0xff] %v2348_v33  ;;  %v1903_v42 = vpop.f32.mrb[118].mxu0 }
 0x255   :  { %2617 = vst [vmem:[#allocation9 + $0x760] sm:$0xff] %v1903_v42  ;;  %v1905_v10 = vpop.f32.mrb[119].mxu0 }
 0x256   :  { %v2352_v4 = vpop.f32.mrb[118].mxu1  ;;  %2618 = vst [vmem:[#allocation9 + $0x768] sm:$0xff] %v1905_v10 }
 0x257   :  { %2619 = vst [vmem:[#allocation9 + $0x770] sm:$0xff] %v2352_v4  ;;  %v2354_v60 = vpop.f32.mrb[119].mxu1 }
 0x258   :  { %2620 = vst [vmem:[#allocation9 + $0x778] sm:$0xff] %v2354_v60  ;;  %v1909_v18 = vpop.f32.mrb[120].mxu0 }
 0x259   :  { %2621 = vst [vmem:[#allocation9 + $0x780] sm:$0xff] %v1909_v18  ;;  %v1911_v38 = vpop.f32.mrb[121].mxu0 }
 0x25a   :  { %v2358_v49 = vpop.f32.mrb[120].mxu1  ;;  %2622 = vst [vmem:[#allocation9 + $0x788] sm:$0xff] %v1911_v38 }
 0x25b   :  { %2623 = vst [vmem:[#allocation9 + $0x790] sm:$0xff] %v2358_v49  ;;  %v2360_v1 = vpop.f32.mrb[121].mxu1 }
 0x25c   :  { %2624 = vst [vmem:[#allocation9 + $0x798] sm:$0xff] %v2360_v1  ;;  %v1915_v21 = vpop.f32.mrb[122].mxu0 }
 0x25d   :  { %2625 = vst [vmem:[#allocation9 + $0x7a0] sm:$0xff] %v1915_v21  ;;  %v1917_v41 = vpop.f32.mrb[123].mxu0 }
 0x25e   :  { %v2364_v55 = vpop.f32.mrb[122].mxu1  ;;  %2626 = vst [vmem:[#allocation9 + $0x7a8] sm:$0xff] %v1917_v41 }
 0x25f   :  { %2627 = vst [vmem:[#allocation9 + $0x7b0] sm:$0xff] %v2364_v55  ;;  %v2366_v15 = vpop.f32.mrb[123].mxu1 }
 0x260   :  { %2628 = vst [vmem:[#allocation9 + $0x7b8] sm:$0xff] %v2366_v15  ;;  %v1921_v46 = vpop.f32.mrb[124].mxu0 }
 0x261   :  { %2629 = vst [vmem:[#allocation9 + $0x7c0] sm:$0xff] %v1921_v46  ;;  %v1923_v20 = vpop.f32.mrb[125].mxu0 }
 0x262   :  { %v2370_v56 = vpop.f32.mrb[124].mxu1  ;;  %2630 = vst [vmem:[#allocation9 + $0x7c8] sm:$0xff] %v1923_v20 }
 0x263   :  { %2631 = vst [vmem:[#allocation9 + $0x7d0] sm:$0xff] %v2370_v56  ;;  %v2372_v0 = vpop.f32.mrb[125].mxu1 }
 0x264   :  { %2632 = vst [vmem:[#allocation9 + $0x7d8] sm:$0xff] %v2372_v0  ;;  %v1927_v22 = vpop.f32.mrb[126].mxu0 }
 0x265   :  { %2633 = vst [vmem:[#allocation9 + $0x7e0] sm:$0xff] %v1927_v22  ;;  %v1929_v63 = vpop.f32.mrb[127].mxu0 }
 0x266   :  { %v2376_v31 = vpop.f32.mrb[126].mxu1  ;;  %2634 = vst [vmem:[#allocation9 + $0x7e8] sm:$0xff] %v1929_v63 }
 0x267   :  { %2635 = vst [vmem:[#allocation9 + $0x7f0] sm:$0xff] %v2376_v31  ;;  %v2378_v53 = vpop.f32.mrb[127].mxu1 }
 0x268   :  { %2636 = vst [vmem:[#allocation9 + $0x7f8] sm:$0xff] %v2378_v53 }
 0x269   :  { %2907 = shalt.err (!%p2904_p8)
}
 0x26a   :  { %s2908_s17 = scalar_lea.hbm %s4562_s6, 32768 }
 0x26b   :  { %p2909_p9 = scmp.ne.s32.totalorder %s4562_s6, %s2908_s17  ;;  %p2912_p10 = scmp.lt.u32.totalorder %s2908_s17, %s4562_s6 }
 0x26d   :  { %p2914_p11 = pnand %p2912_p10, %p2909_p9 }
 0x26f   :  { %2917 = shalt.err (!%p2914_p11)
}
 0x270   :  { %2648 = dma.vmem_to_hbm [thread:$0]  %s2643_s4, 32768, %s4562_s6, [#allocation5], %s2927_s11, %s2927_s11, %s2928_s12  }
 0x271   :  { %2922 = dma.done.wait [#allocation5], 32768  }
 0x272   :  { %2923 = vsyncadd [#allocation5], 4294934528 }
 0x273   :  { %2924 = dma.done.wait [#allocation11], 16384  }
 0x274   :  { %2925 = vsyncadd [#allocation11], 4294950912 }
 0x275   :  { %2667 = vsyncpa [#allocation4], 1 }
 0x276   :  { %2668 = vsyncpa [#allocation7], 1 }
 0x277   :  { %2669 = vsyncpa [#allocation5], 1 }
 0x278   :  { %2670 = vsyncpa [#allocation11], 1 }

</bundles_post_ra>
